<compile_context>
chip_gen: v7x
topology: tpu7x:2x2x1
jax: 0.10.0
libtpu: 0.0.40
codegen_flags: <defaults>
</compile_context>

<pallas_src>
import math
from functools import partial

import jax
import jax.numpy as jnp
from jax.experimental import pallas as pl
from jax.experimental.pallas import tpu as pltpu


def _layernorm(z, g, b, eps):
    mu = jnp.mean(z, axis=-1, keepdims=True)
    c = z - mu
    var = jnp.mean(c * c, axis=-1, keepdims=True)
    return c * jax.lax.rsqrt(var + eps) * g + b


def _fused_forward_kernel(
        x_ref, emb_w_ref, emb_b_ref, pe_ref,
        wqkv_ref, bqkv_ref, wout_ref, bout_ref, g1_ref, bln1_ref,
        wff1_ref, bff1_ref, wff2_ref, bff2_ref, g2_ref, bln2_ref,
        d1w_ref, d1b_ref, d2w_ref, d2b_ref,
        o_ref, h_sc,
        *, B, S, nhead, eps, scale):
    l = pl.program_id(0)

    # ---- prologue (layer 0): fused embed = (x @ W + b) * sqrt(emb) + pos-enc ----
    @pl.when(l == 0)
    def _():
        y = jnp.dot(x_ref[...].astype(jnp.bfloat16), emb_w_ref[...],
                    preferred_element_type=jnp.float32)
        h_sc[...] = (y + emb_b_ref[...]) * scale + pe_ref[...]

    D = h_sc.shape[-1]
    Dh = D // nhead
    inv_sqrt_dh = 1.0 / math.sqrt(Dh)

    h = h_sc[...]                                       # (B*S, D) f32
    hb = h.astype(jnp.bfloat16)

    # --- multi-head self-attention (packed qkv projection) ---
    qkv = jnp.dot(hb, wqkv_ref[...], preferred_element_type=jnp.float32) + bqkv_ref[...]
    q = qkv[:, :D]
    k = qkv[:, D:2 * D]
    v = qkv[:, 2 * D:]

    batch_rows = []
    for b in range(B):
        r0 = b * S
        head_outs = []
        for hd in range(nhead):
            c0 = hd * Dh
            qh = q[r0:r0 + S, c0:c0 + Dh]               # (S, Dh) lane-aligned slice
            kh = k[r0:r0 + S, c0:c0 + Dh]
            vh = v[r0:r0 + S, c0:c0 + Dh]
            s = jax.lax.dot_general(qh, kh, (((1,), (1,)), ((), ())),
                                    preferred_element_type=jnp.float32) * inv_sqrt_dh
            m = jnp.max(s, axis=-1, keepdims=True)
            p = jnp.exp(s - m)
            p = p * pl.reciprocal(jnp.sum(p, axis=-1, keepdims=True), approx=True)
            head_outs.append(jnp.dot(p, vh, preferred_element_type=jnp.float32))
        batch_rows.append(jnp.concatenate(head_outs, axis=1))   # (S, D)
    attn = jnp.concatenate(batch_rows, axis=0)                  # (B*S, D)

    a = jnp.dot(attn.astype(jnp.bfloat16), wout_ref[...],
                preferred_element_type=jnp.float32) + bout_ref[...]
    h = _layernorm(h + a, g1_ref[...], bln1_ref[...], eps)

    # --- feed-forward ---
    f = jnp.dot(h.astype(jnp.bfloat16), wff1_ref[...],
                preferred_element_type=jnp.float32) + bff1_ref[...]
    f = jnp.maximum(f, 0.0)
    f = jnp.dot(f.astype(jnp.bfloat16), wff2_ref[...],
                preferred_element_type=jnp.float32) + bff2_ref[...]
    h = _layernorm(h + f, g2_ref[...], bln2_ref[...], eps)

    h_sc[...] = h

    # ---- epilogue (last layer): decoder head + sum over sequence ----
    @pl.when(l == pl.num_programs(0) - 1)
    def _():
        d1 = jnp.dot(h.astype(jnp.bfloat16), d1w_ref[...],
                     preferred_element_type=jnp.float32) + d1b_ref[...]
        d1 = jnp.maximum(d1, 0.0)                                   # (B*S, 16)
        contrib = jnp.sum(d1 * d2w_ref[...], axis=-1, keepdims=True)  # (B*S, 1)
        parts = [jnp.sum(contrib[b * S:(b + 1) * S, :], axis=0, keepdims=True)
                 for b in range(B)]                                 # B x (1, 1)
        o_ref[...] = jnp.concatenate(parts, axis=0) + float(S) * d2b_ref[...]


def _fixed_spec(shape):
    dims = tuple(int(d) for d in shape)
    zeros = (0,) * len(dims)
    return pl.BlockSpec(dims, lambda l: zeros)


def _stacked_spec(shape):
    # Per-layer block of a (num_layers, ...) stacked parameter; layer dim squeezed.
    trailing = tuple(int(d) for d in shape[1:])
    zeros = (0,) * len(trailing)
    return pl.BlockSpec((None,) + trailing, lambda l: (l,) + zeros)


def forward(src, pe_tiled, params, nhead):
    B, S, F = src.shape
    D = params["emb_w"].shape[1]
    stack = params["stack"]
    L = stack["w_qkv"].shape[0]

    x = src.reshape(B * S, F)

    order = ["w_qkv", "b_qkv", "w_out", "b_out", "ln1_g", "ln1_b",
             "w_ff1", "b_ff1", "w_ff2", "b_ff2", "ln2_g", "ln2_b"]

    in_specs = [_fixed_spec(x.shape),
                _fixed_spec(params["emb_w"].shape),
                _fixed_spec(params["emb_b"].shape),
                _fixed_spec(pe_tiled.shape)]
    in_specs += [_stacked_spec(stack[name].shape) for name in order]
    in_specs += [_fixed_spec(params["dec1_w"].shape),
                 _fixed_spec(params["dec1_b"].shape),
                 _fixed_spec(params["dec2_w"].shape),
                 _fixed_spec(params["dec2_b"].shape)]

    kernel = partial(_fused_forward_kernel, B=B, S=S, nhead=nhead, eps=1e-5,
                     scale=math.sqrt(D))

    return pl.pallas_call(
        kernel,
        grid=(L,),
        out_shape=jax.ShapeDtypeStruct((B, 1), jnp.float32),
        in_specs=in_specs,
        out_specs=pl.BlockSpec((B, 1), lambda l: (0, 0)),
        scratch_shapes=[pltpu.VMEM((B * S, D), jnp.float32)],
        compiler_params=pltpu.CompilerParams(
            dimension_semantics=("arbitrary",),
            vmem_limit_bytes=48 * 1024 * 1024),
    )(x, params["emb_w"], params["emb_b"], pe_tiled,
      *[stack[name] for name in order],
      params["dec1_w"], params["dec1_b"],
      params["dec2_w"], params["dec2_b"])


# ----------------------------- host-side setup -----------------------------

def positional_encoding(seq_len, emb_dim):
    pos = jnp.arange(seq_len, dtype=jnp.float32)[:, None]
    _2i = jnp.arange(0, emb_dim, 2, dtype=jnp.float32)
    angle = pos / jnp.power(10000.0, _2i / emb_dim)
    pe = jnp.zeros((seq_len, emb_dim), jnp.float32)
    pe = pe.at[:, 0::2].set(jnp.sin(angle))
    pe = pe.at[:, 1::2].set(jnp.cos(angle))
    return pe


def init_params(key, feature_size, emb_dim, num_layers, nhead, dff=2048, dec_hidden=16):
    def uniform(k, shape, bound):
        return jax.random.uniform(k, shape, jnp.float32, -bound, bound)

    keys = jax.random.split(key, 2 + num_layers)
    ke = jax.random.split(keys[0], 2)
    emb_bound = 1.0 / math.sqrt(feature_size)
    params = {
        "emb_w": uniform(ke[0], (feature_size, emb_dim), emb_bound).astype(jnp.bfloat16),
        "emb_b": uniform(ke[1], (1, emb_dim), emb_bound),
    }
    b_in = 1.0 / math.sqrt(emb_dim)
    b_ff = 1.0 / math.sqrt(dff)
    layers = []
    for li in range(num_layers):
        lk = jax.random.split(keys[2 + li], 8)
        layers.append({
            "w_qkv": uniform(lk[0], (emb_dim, 3 * emb_dim), b_in),
            "b_qkv": uniform(lk[1], (1, 3 * emb_dim), b_in),
            "w_out": uniform(lk[2], (emb_dim, emb_dim), b_in),
            "b_out": uniform(lk[3], (1, emb_dim), b_in),
            "ln1_g": jnp.ones((1, emb_dim), jnp.float32),
            "ln1_b": jnp.zeros((1, emb_dim), jnp.float32),
            "w_ff1": uniform(lk[4], (emb_dim, dff), b_in),
            "b_ff1": uniform(lk[5], (1, dff), b_in),
            "w_ff2": uniform(lk[6], (dff, emb_dim), b_ff),
            "b_ff2": uniform(lk[7], (1, emb_dim), b_ff),
            "ln2_g": jnp.ones((1, emb_dim), jnp.float32),
            "ln2_b": jnp.zeros((1, emb_dim), jnp.float32),
        })
    # Stack per-layer params along a leading layer axis; MXU weights streamed in bf16.
    bf16_names = {"w_qkv", "w_out", "w_ff1", "w_ff2"}
    stack = {}
    for name in layers[0]:
        arr = jnp.stack([lp[name] for lp in layers], axis=0)
        if name in bf16_names:
            arr = arr.astype(jnp.bfloat16)
        stack[name] = arr
    params["stack"] = stack

    kd = jax.random.split(keys[1], 2)
    # decoder init_weights(): uniform(-0.1, 0.1) weights, zero biases
    params["dec1_w"] = uniform(kd[0], (emb_dim, dec_hidden), 0.1).astype(jnp.bfloat16)
    params["dec1_b"] = jnp.zeros((1, dec_hidden), jnp.float32)
    params["dec2_w"] = uniform(kd[1], (1, dec_hidden), 0.1)   # row vector (VPU weighted sum)
    params["dec2_b"] = jnp.zeros((1, 1), jnp.float32)
    return params


if __name__ == "__main__":
    B, S = 2, 8
    feature_size, emb_dim, num_layers, nhead = 116, 512, 6, 4

    key = jax.random.PRNGKey(0)
    pkey, xkey = jax.random.split(key)
    params = init_params(pkey, feature_size, emb_dim, num_layers, nhead)
    pe_tiled = jnp.tile(positional_encoding(S, emb_dim), (B, 1))   # hoisted, (B*S, D)
    src = jax.random.normal(xkey, (B, S, feature_size), jnp.float32)

    fwd = jax.jit(forward, static_argnums=(3,))
    out = jax.block_until_ready(fwd(src, pe_tiled, params, nhead))
    assert out.shape == (B, 1) and out.dtype == jnp.float32
    print("KERNEL_OK")
</pallas_src>

<mosaic_0001>
module attributes {stable_mosaic.version = 11 : i64} {
  func.func @_fused_forward_kernel(%arg0: i32, %arg1: memref<16x116xf32, #tpu.memory_space<vmem>>, %arg2: memref<116x512xbf16, #tpu.memory_space<vmem>>, %arg3: memref<1x512xf32, #tpu.memory_space<vmem>>, %arg4: memref<16x512xf32, #tpu.memory_space<vmem>>, %arg5: memref<1x512x1536xbf16, #tpu.memory_space<vmem>>, %arg6: memref<1x1x1536xf32, #tpu.memory_space<vmem>>, %arg7: memref<1x512x512xbf16, #tpu.memory_space<vmem>>, %arg8: memref<1x1x512xf32, #tpu.memory_space<vmem>>, %arg9: memref<1x1x512xf32, #tpu.memory_space<vmem>>, %arg10: memref<1x1x512xf32, #tpu.memory_space<vmem>>, %arg11: memref<1x512x2048xbf16, #tpu.memory_space<vmem>>, %arg12: memref<1x1x2048xf32, #tpu.memory_space<vmem>>, %arg13: memref<1x2048x512xbf16, #tpu.memory_space<vmem>>, %arg14: memref<1x1x512xf32, #tpu.memory_space<vmem>>, %arg15: memref<1x1x512xf32, #tpu.memory_space<vmem>>, %arg16: memref<1x1x512xf32, #tpu.memory_space<vmem>>, %arg17: memref<512x16xbf16, #tpu.memory_space<vmem>>, %arg18: memref<1x16xf32, #tpu.memory_space<vmem>>, %arg19: memref<1x16xf32, #tpu.memory_space<vmem>>, %arg20: memref<1x1xf32, #tpu.memory_space<vmem>>, %arg21: memref<2x1xf32, #tpu.memory_space<vmem>>, %arg22: memref<16x512xf32, #tpu.memory_space<vmem>>) attributes {dimension_semantics = [#tpu.dimension_semantics<arbitrary>], iteration_bounds = array<i64: 6>, scalar_prefetch = 0 : i64, scratch_operands = 1 : i64, tpu.core_type = #tpu.core_type<tc>, window_params = [{pipeline_mode = #tpu.pipeline_mode<synchronous>, transform_indices = @transform_0, window_bounds = array<i64: 16, 116>}, {pipeline_mode = #tpu.pipeline_mode<synchronous>, transform_indices = @transform_1, window_bounds = array<i64: 116, 512>}, {pipeline_mode = #tpu.pipeline_mode<synchronous>, transform_indices = @transform_2, window_bounds = array<i64: 1, 512>}, {pipeline_mode = #tpu.pipeline_mode<synchronous>, transform_indices = @transform_3, window_bounds = array<i64: 16, 512>}, {transform_indices = @transform_4, window_bounds = array<i64: 1, 512, 1536>}, {transform_indices = @transform_5, window_bounds = array<i64: 1, 1, 1536>}, {transform_indices = @transform_6, window_bounds = array<i64: 1, 512, 512>}, {transform_indices = @transform_7, window_bounds = array<i64: 1, 1, 512>}, {transform_indices = @transform_8, window_bounds = array<i64: 1, 1, 512>}, {transform_indices = @transform_9, window_bounds = array<i64: 1, 1, 512>}, {transform_indices = @transform_10, window_bounds = array<i64: 1, 512, 2048>}, {transform_indices = @transform_11, window_bounds = array<i64: 1, 1, 2048>}, {transform_indices = @transform_12, window_bounds = array<i64: 1, 2048, 512>}, {transform_indices = @transform_13, window_bounds = array<i64: 1, 1, 512>}, {transform_indices = @transform_14, window_bounds = array<i64: 1, 1, 512>}, {transform_indices = @transform_15, window_bounds = array<i64: 1, 1, 512>}, {pipeline_mode = #tpu.pipeline_mode<synchronous>, transform_indices = @transform_16, window_bounds = array<i64: 512, 16>}, {pipeline_mode = #tpu.pipeline_mode<synchronous>, transform_indices = @transform_17, window_bounds = array<i64: 1, 16>}, {pipeline_mode = #tpu.pipeline_mode<synchronous>, transform_indices = @transform_18, window_bounds = array<i64: 1, 16>}, {pipeline_mode = #tpu.pipeline_mode<synchronous>, transform_indices = @transform_19, window_bounds = array<i64: 1, 1>}, {pipeline_mode = #tpu.pipeline_mode<synchronous>, transform_indices = @transform_20, window_bounds = array<i64: 2, 1>}]} {
    %c0_i32 = arith.constant 0 : i32
    %0 = arith.cmpi eq, %arg0, %c0_i32 : i32
    %1 = arith.extui %0 : i1 to i32
    %c0_i32_0 = arith.constant 0 : i32
    %2 = arith.cmpi ne, %1, %c0_i32_0 : i32
    scf.if %2 {
      %c0_95 = arith.constant 0 : index
      %c0_96 = arith.constant 0 : index
      %234 = vector.load %arg1[%c0_95, %c0_96] : memref<16x116xf32, #tpu.memory_space<vmem>>, vector<16x116xf32>
      %235 = arith.truncf %234 : vector<16x116xf32> to vector<16x116xbf16>
      %c0_97 = arith.constant 0 : index
      %c0_98 = arith.constant 0 : index
      %236 = vector.load %arg2[%c0_97, %c0_98] : memref<116x512xbf16, #tpu.memory_space<vmem>>, vector<116x512xbf16>
      %cst_99 = arith.constant dense<0.000000e+00> : vector<16x512xf32>
      %237 = tpu.matmul %235, %236, %cst_99 {dimension_numbers = #tpu.dot_dimension_numbers<[1], [0], [0], [1], [0, 0, 1, 1], [], []>} : vector<16x116xbf16>, vector<116x512xbf16>, vector<16x512xf32> -> vector<16x512xf32>
      %c0_100 = arith.constant 0 : index
      %c0_101 = arith.constant 0 : index
      %238 = vector.load %arg3[%c0_100, %c0_101] : memref<1x512xf32, #tpu.memory_space<vmem>>, vector<1x512xf32>
      %239 = vector.broadcast %238 : vector<1x512xf32> to vector<16x512xf32>
      %240 = arith.addf %237, %239 : vector<16x512xf32>
      %cst_102 = arith.constant 22.6274166 : f32
      %241 = vector.broadcast %cst_102 : f32 to vector<16x512xf32>
      %242 = arith.mulf %240, %241 : vector<16x512xf32>
      %c0_103 = arith.constant 0 : index
      %c0_104 = arith.constant 0 : index
      %243 = vector.load %arg4[%c0_103, %c0_104] : memref<16x512xf32, #tpu.memory_space<vmem>>, vector<16x512xf32>
      %244 = arith.addf %242, %243 : vector<16x512xf32>
      %c0_105 = arith.constant 0 : index
      %c0_106 = arith.constant 0 : index
      %245 = vector.load %arg22[%c0_105, %c0_106] : memref<16x512xf32, #tpu.memory_space<vmem>>, vector<16x512xf32>
      tpu.vector_store %arg22[%c0_105, %c0_106], %244 {strides = array<i32>} : memref<16x512xf32, #tpu.memory_space<vmem>>, vector<16x512xf32>,
    } else {
    }
    %c0 = arith.constant 0 : index
    %c0_1 = arith.constant 0 : index
    %3 = vector.load %arg22[%c0, %c0_1] : memref<16x512xf32, #tpu.memory_space<vmem>>, vector<16x512xf32>
    %4 = arith.truncf %3 : vector<16x512xf32> to vector<16x512xbf16>
    %c0_2 = arith.constant 0 : index
    %c0_3 = arith.constant 0 : index
    %c0_4 = arith.constant 0 : index
    %5 = vector.load %arg5[%c0_2, %c0_3, %c0_4] : memref<1x512x1536xbf16, #tpu.memory_space<vmem>>, vector<1x512x1536xbf16>
    %6 = vector.shape_cast %5 : vector<1x512x1536xbf16> to vector<512x1536xbf16>
    %cst = arith.constant dense<0.000000e+00> : vector<16x1536xf32>
    %7 = tpu.matmul %4, %6, %cst {dimension_numbers = #tpu.dot_dimension_numbers<[1], [0], [0], [1], [0, 0, 1, 1], [], []>} : vector<16x512xbf16>, vector<512x1536xbf16>, vector<16x1536xf32> -> vector<16x1536xf32>
    %c0_5 = arith.constant 0 : index
    %c0_6 = arith.constant 0 : index
    %c0_7 = arith.constant 0 : index
    %8 = vector.load %arg6[%c0_5, %c0_6, %c0_7] : memref<1x1x1536xf32, #tpu.memory_space<vmem>>, vector<1x1x1536xf32>
    %9 = vector.shape_cast %8 : vector<1x1x1536xf32> to vector<1x1536xf32>
    %10 = vector.broadcast %9 : vector<1x1536xf32> to vector<16x1536xf32>
    %11 = arith.addf %7, %10 : vector<16x1536xf32>
    %12 = vector.extract_strided_slice %11 {offsets = [0, 0], sizes = [16, 512], strides = [1, 1]} : vector<16x1536xf32> to vector<16x512xf32>
    %13 = vector.extract_strided_slice %11 {offsets = [0, 512], sizes = [16, 512], strides = [1, 1]} : vector<16x1536xf32> to vector<16x512xf32>
    %14 = vector.extract_strided_slice %11 {offsets = [0, 1024], sizes = [16, 512], strides = [1, 1]} : vector<16x1536xf32> to vector<16x512xf32>
    %15 = vector.extract_strided_slice %12 {offsets = [0, 0], sizes = [8, 128], strides = [1, 1]} : vector<16x512xf32> to vector<8x128xf32>
    %16 = vector.extract_strided_slice %13 {offsets = [0, 0], sizes = [8, 128], strides = [1, 1]} : vector<16x512xf32> to vector<8x128xf32>
    %17 = vector.extract_strided_slice %14 {offsets = [0, 0], sizes = [8, 128], strides = [1, 1]} : vector<16x512xf32> to vector<8x128xf32>
    %cst_8 = arith.constant dense<0.000000e+00> : vector<8x8xf32>
    %18 = tpu.matmul %15, %16, %cst_8 {dimension_numbers = #tpu.dot_dimension_numbers<[1], [1], [0], [0], [0, 0, 1, 0], [], []>} : vector<8x128xf32>, vector<8x128xf32>, vector<8x8xf32> -> vector<8x8xf32>
    %cst_9 = arith.constant 0.0883883461 : f32
    %19 = vector.broadcast %cst_9 : f32 to vector<8x8xf32>
    %20 = arith.mulf %18, %19 : vector<8x8xf32>
    %cst_10 = arith.constant dense<0xFF800000> : vector<8xf32>
    %21 = vector.multi_reduction <maximumf>, %20, %cst_10 [1] : vector<8x8xf32> to vector<8xf32>
    %22 = vector.shape_cast %21 : vector<8xf32> to vector<8x1xf32>
    %23 = vector.broadcast %22 : vector<8x1xf32> to vector<8x8xf32>
    %24 = arith.subf %20, %23 : vector<8x8xf32>
    %25 = math.exp %24 : vector<8x8xf32>
    %cst_11 = arith.constant dense<0.000000e+00> : vector<8xf32>
    %26 = vector.multi_reduction <add>, %25, %cst_11 [1] : vector<8x8xf32> to vector<8xf32>
    %27 = vector.shape_cast %26 : vector<8xf32> to vector<8x1xf32>
    %28 = tpu.reciprocal %27 {approx = true} : vector<8x1xf32> -> vector<8x1xf32>
    %29 = vector.broadcast %28 : vector<8x1xf32> to vector<8x8xf32>
    %30 = arith.mulf %25, %29 : vector<8x8xf32>
    %cst_12 = arith.constant dense<0.000000e+00> : vector<8x128xf32>
    %31 = tpu.matmul %30, %17, %cst_12 {dimension_numbers = #tpu.dot_dimension_numbers<[1], [0], [0], [1], [0, 0, 1, 1], [], []>} : vector<8x8xf32>, vector<8x128xf32>, vector<8x128xf32> -> vector<8x128xf32>
    %32 = vector.extract_strided_slice %12 {offsets = [0, 128], sizes = [8, 128], strides = [1, 1]} : vector<16x512xf32> to vector<8x128xf32>
    %33 = vector.extract_strided_slice %13 {offsets = [0, 128], sizes = [8, 128], strides = [1, 1]} : vector<16x512xf32> to vector<8x128xf32>
    %34 = vector.extract_strided_slice %14 {offsets = [0, 128], sizes = [8, 128], strides = [1, 1]} : vector<16x512xf32> to vector<8x128xf32>
    %cst_13 = arith.constant dense<0.000000e+00> : vector<8x8xf32>
    %35 = tpu.matmul %32, %33, %cst_13 {dimension_numbers = #tpu.dot_dimension_numbers<[1], [1], [0], [0], [0, 0, 1, 0], [], []>} : vector<8x128xf32>, vector<8x128xf32>, vector<8x8xf32> -> vector<8x8xf32>
    %cst_14 = arith.constant 0.0883883461 : f32
    %36 = vector.broadcast %cst_14 : f32 to vector<8x8xf32>
    %37 = arith.mulf %35, %36 : vector<8x8xf32>
    %cst_15 = arith.constant dense<0xFF800000> : vector<8xf32>
    %38 = vector.multi_reduction <maximumf>, %37, %cst_15 [1] : vector<8x8xf32> to vector<8xf32>
    %39 = vector.shape_cast %38 : vector<8xf32> to vector<8x1xf32>
    %40 = vector.broadcast %39 : vector<8x1xf32> to vector<8x8xf32>
    %41 = arith.subf %37, %40 : vector<8x8xf32>
    %42 = math.exp %41 : vector<8x8xf32>
    %cst_16 = arith.constant dense<0.000000e+00> : vector<8xf32>
    %43 = vector.multi_reduction <add>, %42, %cst_16 [1] : vector<8x8xf32> to vector<8xf32>
    %44 = vector.shape_cast %43 : vector<8xf32> to vector<8x1xf32>
    %45 = tpu.reciprocal %44 {approx = true} : vector<8x1xf32> -> vector<8x1xf32>
    %46 = vector.broadcast %45 : vector<8x1xf32> to vector<8x8xf32>
    %47 = arith.mulf %42, %46 : vector<8x8xf32>
    %cst_17 = arith.constant dense<0.000000e+00> : vector<8x128xf32>
    %48 = tpu.matmul %47, %34, %cst_17 {dimension_numbers = #tpu.dot_dimension_numbers<[1], [0], [0], [1], [0, 0, 1, 1], [], []>} : vector<8x8xf32>, vector<8x128xf32>, vector<8x128xf32> -> vector<8x128xf32>
    %49 = vector.extract_strided_slice %12 {offsets = [0, 256], sizes = [8, 128], strides = [1, 1]} : vector<16x512xf32> to vector<8x128xf32>
    %50 = vector.extract_strided_slice %13 {offsets = [0, 256], sizes = [8, 128], strides = [1, 1]} : vector<16x512xf32> to vector<8x128xf32>
    %51 = vector.extract_strided_slice %14 {offsets = [0, 256], sizes = [8, 128], strides = [1, 1]} : vector<16x512xf32> to vector<8x128xf32>
    %cst_18 = arith.constant dense<0.000000e+00> : vector<8x8xf32>
    %52 = tpu.matmul %49, %50, %cst_18 {dimension_numbers = #tpu.dot_dimension_numbers<[1], [1], [0], [0], [0, 0, 1, 0], [], []>} : vector<8x128xf32>, vector<8x128xf32>, vector<8x8xf32> -> vector<8x8xf32>
    %cst_19 = arith.constant 0.0883883461 : f32
    %53 = vector.broadcast %cst_19 : f32 to vector<8x8xf32>
    %54 = arith.mulf %52, %53 : vector<8x8xf32>
    %cst_20 = arith.constant dense<0xFF800000> : vector<8xf32>
    %55 = vector.multi_reduction <maximumf>, %54, %cst_20 [1] : vector<8x8xf32> to vector<8xf32>
    %56 = vector.shape_cast %55 : vector<8xf32> to vector<8x1xf32>
    %57 = vector.broadcast %56 : vector<8x1xf32> to vector<8x8xf32>
    %58 = arith.subf %54, %57 : vector<8x8xf32>
    %59 = math.exp %58 : vector<8x8xf32>
    %cst_21 = arith.constant dense<0.000000e+00> : vector<8xf32>
    %60 = vector.multi_reduction <add>, %59, %cst_21 [1] : vector<8x8xf32> to vector<8xf32>
    %61 = vector.shape_cast %60 : vector<8xf32> to vector<8x1xf32>
    %62 = tpu.reciprocal %61 {approx = true} : vector<8x1xf32> -> vector<8x1xf32>
    %63 = vector.broadcast %62 : vector<8x1xf32> to vector<8x8xf32>
    %64 = arith.mulf %59, %63 : vector<8x8xf32>
    %cst_22 = arith.constant dense<0.000000e+00> : vector<8x128xf32>
    %65 = tpu.matmul %64, %51, %cst_22 {dimension_numbers = #tpu.dot_dimension_numbers<[1], [0], [0], [1], [0, 0, 1, 1], [], []>} : vector<8x8xf32>, vector<8x128xf32>, vector<8x128xf32> -> vector<8x128xf32>
    %66 = vector.extract_strided_slice %12 {offsets = [0, 384], sizes = [8, 128], strides = [1, 1]} : vector<16x512xf32> to vector<8x128xf32>
    %67 = vector.extract_strided_slice %13 {offsets = [0, 384], sizes = [8, 128], strides = [1, 1]} : vector<16x512xf32> to vector<8x128xf32>
    %68 = vector.extract_strided_slice %14 {offsets = [0, 384], sizes = [8, 128], strides = [1, 1]} : vector<16x512xf32> to vector<8x128xf32>
    %cst_23 = arith.constant dense<0.000000e+00> : vector<8x8xf32>
    %69 = tpu.matmul %66, %67, %cst_23 {dimension_numbers = #tpu.dot_dimension_numbers<[1], [1], [0], [0], [0, 0, 1, 0], [], []>} : vector<8x128xf32>, vector<8x128xf32>, vector<8x8xf32> -> vector<8x8xf32>
    %cst_24 = arith.constant 0.0883883461 : f32
    %70 = vector.broadcast %cst_24 : f32 to vector<8x8xf32>
    %71 = arith.mulf %69, %70 : vector<8x8xf32>
    %cst_25 = arith.constant dense<0xFF800000> : vector<8xf32>
    %72 = vector.multi_reduction <maximumf>, %71, %cst_25 [1] : vector<8x8xf32> to vector<8xf32>
    %73 = vector.shape_cast %72 : vector<8xf32> to vector<8x1xf32>
    %74 = vector.broadcast %73 : vector<8x1xf32> to vector<8x8xf32>
    %75 = arith.subf %71, %74 : vector<8x8xf32>
    %76 = math.exp %75 : vector<8x8xf32>
    %cst_26 = arith.constant dense<0.000000e+00> : vector<8xf32>
    %77 = vector.multi_reduction <add>, %76, %cst_26 [1] : vector<8x8xf32> to vector<8xf32>
    %78 = vector.shape_cast %77 : vector<8xf32> to vector<8x1xf32>
    %79 = tpu.reciprocal %78 {approx = true} : vector<8x1xf32> -> vector<8x1xf32>
    %80 = vector.broadcast %79 : vector<8x1xf32> to vector<8x8xf32>
    %81 = arith.mulf %76, %80 : vector<8x8xf32>
    %cst_27 = arith.constant dense<0.000000e+00> : vector<8x128xf32>
    %82 = tpu.matmul %81, %68, %cst_27 {dimension_numbers = #tpu.dot_dimension_numbers<[1], [0], [0], [1], [0, 0, 1, 1], [], []>} : vector<8x8xf32>, vector<8x128xf32>, vector<8x128xf32> -> vector<8x128xf32>
    %83 = tpu.concatenate %31, %48, %65, %82 in 1 : vector<8x128xf32>, vector<8x128xf32>, vector<8x128xf32>, vector<8x128xf32> -> vector<8x512xf32>
    %84 = vector.extract_strided_slice %12 {offsets = [8, 0], sizes = [8, 128], strides = [1, 1]} : vector<16x512xf32> to vector<8x128xf32>
    %85 = vector.extract_strided_slice %13 {offsets = [8, 0], sizes = [8, 128], strides = [1, 1]} : vector<16x512xf32> to vector<8x128xf32>
    %86 = vector.extract_strided_slice %14 {offsets = [8, 0], sizes = [8, 128], strides = [1, 1]} : vector<16x512xf32> to vector<8x128xf32>
    %cst_28 = arith.constant dense<0.000000e+00> : vector<8x8xf32>
    %87 = tpu.matmul %84, %85, %cst_28 {dimension_numbers = #tpu.dot_dimension_numbers<[1], [1], [0], [0], [0, 0, 1, 0], [], []>} : vector<8x128xf32>, vector<8x128xf32>, vector<8x8xf32> -> vector<8x8xf32>
    %cst_29 = arith.constant 0.0883883461 : f32
    %88 = vector.broadcast %cst_29 : f32 to vector<8x8xf32>
    %89 = arith.mulf %87, %88 : vector<8x8xf32>
    %cst_30 = arith.constant dense<0xFF800000> : vector<8xf32>
    %90 = vector.multi_reduction <maximumf>, %89, %cst_30 [1] : vector<8x8xf32> to vector<8xf32>
    %91 = vector.shape_cast %90 : vector<8xf32> to vector<8x1xf32>
    %92 = vector.broadcast %91 : vector<8x1xf32> to vector<8x8xf32>
    %93 = arith.subf %89, %92 : vector<8x8xf32>
    %94 = math.exp %93 : vector<8x8xf32>
    %cst_31 = arith.constant dense<0.000000e+00> : vector<8xf32>
    %95 = vector.multi_reduction <add>, %94, %cst_31 [1] : vector<8x8xf32> to vector<8xf32>
    %96 = vector.shape_cast %95 : vector<8xf32> to vector<8x1xf32>
    %97 = tpu.reciprocal %96 {approx = true} : vector<8x1xf32> -> vector<8x1xf32>
    %98 = vector.broadcast %97 : vector<8x1xf32> to vector<8x8xf32>
    %99 = arith.mulf %94, %98 : vector<8x8xf32>
    %cst_32 = arith.constant dense<0.000000e+00> : vector<8x128xf32>
    %100 = tpu.matmul %99, %86, %cst_32 {dimension_numbers = #tpu.dot_dimension_numbers<[1], [0], [0], [1], [0, 0, 1, 1], [], []>} : vector<8x8xf32>, vector<8x128xf32>, vector<8x128xf32> -> vector<8x128xf32>
    %101 = vector.extract_strided_slice %12 {offsets = [8, 128], sizes = [8, 128], strides = [1, 1]} : vector<16x512xf32> to vector<8x128xf32>
    %102 = vector.extract_strided_slice %13 {offsets = [8, 128], sizes = [8, 128], strides = [1, 1]} : vector<16x512xf32> to vector<8x128xf32>
    %103 = vector.extract_strided_slice %14 {offsets = [8, 128], sizes = [8, 128], strides = [1, 1]} : vector<16x512xf32> to vector<8x128xf32>
    %cst_33 = arith.constant dense<0.000000e+00> : vector<8x8xf32>
    %104 = tpu.matmul %101, %102, %cst_33 {dimension_numbers = #tpu.dot_dimension_numbers<[1], [1], [0], [0], [0, 0, 1, 0], [], []>} : vector<8x128xf32>, vector<8x128xf32>, vector<8x8xf32> -> vector<8x8xf32>
    %cst_34 = arith.constant 0.0883883461 : f32
    %105 = vector.broadcast %cst_34 : f32 to vector<8x8xf32>
    %106 = arith.mulf %104, %105 : vector<8x8xf32>
    %cst_35 = arith.constant dense<0xFF800000> : vector<8xf32>
    %107 = vector.multi_reduction <maximumf>, %106, %cst_35 [1] : vector<8x8xf32> to vector<8xf32>
    %108 = vector.shape_cast %107 : vector<8xf32> to vector<8x1xf32>
    %109 = vector.broadcast %108 : vector<8x1xf32> to vector<8x8xf32>
    %110 = arith.subf %106, %109 : vector<8x8xf32>
    %111 = math.exp %110 : vector<8x8xf32>
    %cst_36 = arith.constant dense<0.000000e+00> : vector<8xf32>
    %112 = vector.multi_reduction <add>, %111, %cst_36 [1] : vector<8x8xf32> to vector<8xf32>
    %113 = vector.shape_cast %112 : vector<8xf32> to vector<8x1xf32>
    %114 = tpu.reciprocal %113 {approx = true} : vector<8x1xf32> -> vector<8x1xf32>
    %115 = vector.broadcast %114 : vector<8x1xf32> to vector<8x8xf32>
    %116 = arith.mulf %111, %115 : vector<8x8xf32>
    %cst_37 = arith.constant dense<0.000000e+00> : vector<8x128xf32>
    %117 = tpu.matmul %116, %103, %cst_37 {dimension_numbers = #tpu.dot_dimension_numbers<[1], [0], [0], [1], [0, 0, 1, 1], [], []>} : vector<8x8xf32>, vector<8x128xf32>, vector<8x128xf32> -> vector<8x128xf32>
    %118 = vector.extract_strided_slice %12 {offsets = [8, 256], sizes = [8, 128], strides = [1, 1]} : vector<16x512xf32> to vector<8x128xf32>
    %119 = vector.extract_strided_slice %13 {offsets = [8, 256], sizes = [8, 128], strides = [1, 1]} : vector<16x512xf32> to vector<8x128xf32>
    %120 = vector.extract_strided_slice %14 {offsets = [8, 256], sizes = [8, 128], strides = [1, 1]} : vector<16x512xf32> to vector<8x128xf32>
    %cst_38 = arith.constant dense<0.000000e+00> : vector<8x8xf32>
    %121 = tpu.matmul %118, %119, %cst_38 {dimension_numbers = #tpu.dot_dimension_numbers<[1], [1], [0], [0], [0, 0, 1, 0], [], []>} : vector<8x128xf32>, vector<8x128xf32>, vector<8x8xf32> -> vector<8x8xf32>
    %cst_39 = arith.constant 0.0883883461 : f32
    %122 = vector.broadcast %cst_39 : f32 to vector<8x8xf32>
    %123 = arith.mulf %121, %122 : vector<8x8xf32>
    %cst_40 = arith.constant dense<0xFF800000> : vector<8xf32>
    %124 = vector.multi_reduction <maximumf>, %123, %cst_40 [1] : vector<8x8xf32> to vector<8xf32>
    %125 = vector.shape_cast %124 : vector<8xf32> to vector<8x1xf32>
    %126 = vector.broadcast %125 : vector<8x1xf32> to vector<8x8xf32>
    %127 = arith.subf %123, %126 : vector<8x8xf32>
    %128 = math.exp %127 : vector<8x8xf32>
    %cst_41 = arith.constant dense<0.000000e+00> : vector<8xf32>
    %129 = vector.multi_reduction <add>, %128, %cst_41 [1] : vector<8x8xf32> to vector<8xf32>
    %130 = vector.shape_cast %129 : vector<8xf32> to vector<8x1xf32>
    %131 = tpu.reciprocal %130 {approx = true} : vector<8x1xf32> -> vector<8x1xf32>
    %132 = vector.broadcast %131 : vector<8x1xf32> to vector<8x8xf32>
    %133 = arith.mulf %128, %132 : vector<8x8xf32>
    %cst_42 = arith.constant dense<0.000000e+00> : vector<8x128xf32>
    %134 = tpu.matmul %133, %120, %cst_42 {dimension_numbers = #tpu.dot_dimension_numbers<[1], [0], [0], [1], [0, 0, 1, 1], [], []>} : vector<8x8xf32>, vector<8x128xf32>, vector<8x128xf32> -> vector<8x128xf32>
    %135 = vector.extract_strided_slice %12 {offsets = [8, 384], sizes = [8, 128], strides = [1, 1]} : vector<16x512xf32> to vector<8x128xf32>
    %136 = vector.extract_strided_slice %13 {offsets = [8, 384], sizes = [8, 128], strides = [1, 1]} : vector<16x512xf32> to vector<8x128xf32>
    %137 = vector.extract_strided_slice %14 {offsets = [8, 384], sizes = [8, 128], strides = [1, 1]} : vector<16x512xf32> to vector<8x128xf32>
    %cst_43 = arith.constant dense<0.000000e+00> : vector<8x8xf32>
    %138 = tpu.matmul %135, %136, %cst_43 {dimension_numbers = #tpu.dot_dimension_numbers<[1], [1], [0], [0], [0, 0, 1, 0], [], []>} : vector<8x128xf32>, vector<8x128xf32>, vector<8x8xf32> -> vector<8x8xf32>
    %cst_44 = arith.constant 0.0883883461 : f32
    %139 = vector.broadcast %cst_44 : f32 to vector<8x8xf32>
    %140 = arith.mulf %138, %139 : vector<8x8xf32>
    %cst_45 = arith.constant dense<0xFF800000> : vector<8xf32>
    %141 = vector.multi_reduction <maximumf>, %140, %cst_45 [1] : vector<8x8xf32> to vector<8xf32>
    %142 = vector.shape_cast %141 : vector<8xf32> to vector<8x1xf32>
    %143 = vector.broadcast %142 : vector<8x1xf32> to vector<8x8xf32>
    %144 = arith.subf %140, %143 : vector<8x8xf32>
    %145 = math.exp %144 : vector<8x8xf32>
    %cst_46 = arith.constant dense<0.000000e+00> : vector<8xf32>
    %146 = vector.multi_reduction <add>, %145, %cst_46 [1] : vector<8x8xf32> to vector<8xf32>
    %147 = vector.shape_cast %146 : vector<8xf32> to vector<8x1xf32>
    %148 = tpu.reciprocal %147 {approx = true} : vector<8x1xf32> -> vector<8x1xf32>
    %149 = vector.broadcast %148 : vector<8x1xf32> to vector<8x8xf32>
    %150 = arith.mulf %145, %149 : vector<8x8xf32>
    %cst_47 = arith.constant dense<0.000000e+00> : vector<8x128xf32>
    %151 = tpu.matmul %150, %137, %cst_47 {dimension_numbers = #tpu.dot_dimension_numbers<[1], [0], [0], [1], [0, 0, 1, 1], [], []>} : vector<8x8xf32>, vector<8x128xf32>, vector<8x128xf32> -> vector<8x128xf32>
    %152 = tpu.concatenate %100, %117, %134, %151 in 1 : vector<8x128xf32>, vector<8x128xf32>, vector<8x128xf32>, vector<8x128xf32> -> vector<8x512xf32>
    %153 = tpu.concatenate %83, %152 in 0 : vector<8x512xf32>, vector<8x512xf32> -> vector<16x512xf32>
    %154 = arith.truncf %153 : vector<16x512xf32> to vector<16x512xbf16>
    %c0_48 = arith.constant 0 : index
    %c0_49 = arith.constant 0 : index
    %c0_50 = arith.constant 0 : index
    %155 = vector.load %arg7[%c0_48, %c0_49, %c0_50] : memref<1x512x512xbf16, #tpu.memory_space<vmem>>, vector<1x512x512xbf16>
    %156 = vector.shape_cast %155 : vector<1x512x512xbf16> to vector<512x512xbf16>
    %cst_51 = arith.constant dense<0.000000e+00> : vector<16x512xf32>
    %157 = tpu.matmul %154, %156, %cst_51 {dimension_numbers = #tpu.dot_dimension_numbers<[1], [0], [0], [1], [0, 0, 1, 1], [], []>} : vector<16x512xbf16>, vector<512x512xbf16>, vector<16x512xf32> -> vector<16x512xf32>
    %c0_52 = arith.constant 0 : index
    %c0_53 = arith.constant 0 : index
    %c0_54 = arith.constant 0 : index
    %158 = vector.load %arg8[%c0_52, %c0_53, %c0_54] : memref<1x1x512xf32, #tpu.memory_space<vmem>>, vector<1x1x512xf32>
    %159 = vector.shape_cast %158 : vector<1x1x512xf32> to vector<1x512xf32>
    %160 = vector.broadcast %159 : vector<1x512xf32> to vector<16x512xf32>
    %161 = arith.addf %157, %160 : vector<16x512xf32>
    %162 = arith.addf %3, %161 : vector<16x512xf32>
    %c0_55 = arith.constant 0 : index
    %c0_56 = arith.constant 0 : index
    %c0_57 = arith.constant 0 : index
    %163 = vector.load %arg9[%c0_55, %c0_56, %c0_57] : memref<1x1x512xf32, #tpu.memory_space<vmem>>, vector<1x1x512xf32>
    %164 = vector.shape_cast %163 : vector<1x1x512xf32> to vector<1x512xf32>
    %c0_58 = arith.constant 0 : index
    %c0_59 = arith.constant 0 : index
    %c0_60 = arith.constant 0 : index
    %165 = vector.load %arg10[%c0_58, %c0_59, %c0_60] : memref<1x1x512xf32, #tpu.memory_space<vmem>>, vector<1x1x512xf32>
    %166 = vector.shape_cast %165 : vector<1x1x512xf32> to vector<1x512xf32>
    %cst_61 = arith.constant dense<0.000000e+00> : vector<16xf32>
    %167 = vector.multi_reduction <add>, %162, %cst_61 [1] : vector<16x512xf32> to vector<16xf32>
    %168 = vector.shape_cast %167 : vector<16xf32> to vector<16x1xf32>
    %cst_62 = arith.constant 5.120000e+02 : f32
    %169 = vector.broadcast %cst_62 : f32 to vector<16x1xf32>
    %170 = arith.divf %168, %169 : vector<16x1xf32>
    %171 = vector.broadcast %170 : vector<16x1xf32> to vector<16x512xf32>
    %172 = arith.subf %162, %171 : vector<16x512xf32>
    %173 = arith.mulf %172, %172 : vector<16x512xf32>
    %cst_63 = arith.constant dense<0.000000e+00> : vector<16xf32>
    %174 = vector.multi_reduction <add>, %173, %cst_63 [1] : vector<16x512xf32> to vector<16xf32>
    %175 = vector.shape_cast %174 : vector<16xf32> to vector<16x1xf32>
    %cst_64 = arith.constant 5.120000e+02 : f32
    %176 = vector.broadcast %cst_64 : f32 to vector<16x1xf32>
    %177 = arith.divf %175, %176 : vector<16x1xf32>
    %cst_65 = arith.constant 9.99999974E-6 : f32
    %178 = vector.broadcast %cst_65 : f32 to vector<16x1xf32>
    %179 = arith.addf %177, %178 : vector<16x1xf32>
    %180 = math.rsqrt %179 : vector<16x1xf32>
    %181 = vector.broadcast %180 : vector<16x1xf32> to vector<16x512xf32>
    %182 = arith.mulf %172, %181 : vector<16x512xf32>
    %183 = vector.broadcast %164 : vector<1x512xf32> to vector<16x512xf32>
    %184 = arith.mulf %182, %183 : vector<16x512xf32>
    %185 = vector.broadcast %166 : vector<1x512xf32> to vector<16x512xf32>
    %186 = arith.addf %184, %185 : vector<16x512xf32>
    %187 = arith.truncf %186 : vector<16x512xf32> to vector<16x512xbf16>
    %c0_66 = arith.constant 0 : index
    %c0_67 = arith.constant 0 : index
    %c0_68 = arith.constant 0 : index
    %188 = vector.load %arg11[%c0_66, %c0_67, %c0_68] : memref<1x512x2048xbf16, #tpu.memory_space<vmem>>, vector<1x512x2048xbf16>
    %189 = vector.shape_cast %188 : vector<1x512x2048xbf16> to vector<512x2048xbf16>
    %cst_69 = arith.constant dense<0.000000e+00> : vector<16x2048xf32>
    %190 = tpu.matmul %187, %189, %cst_69 {dimension_numbers = #tpu.dot_dimension_numbers<[1], [0], [0], [1], [0, 0, 1, 1], [], []>} : vector<16x512xbf16>, vector<512x2048xbf16>, vector<16x2048xf32> -> vector<16x2048xf32>
    %c0_70 = arith.constant 0 : index
    %c0_71 = arith.constant 0 : index
    %c0_72 = arith.constant 0 : index
    %191 = vector.load %arg12[%c0_70, %c0_71, %c0_72] : memref<1x1x2048xf32, #tpu.memory_space<vmem>>, vector<1x1x2048xf32>
    %192 = vector.shape_cast %191 : vector<1x1x2048xf32> to vector<1x2048xf32>
    %193 = vector.broadcast %192 : vector<1x2048xf32> to vector<16x2048xf32>
    %194 = arith.addf %190, %193 : vector<16x2048xf32>
    %cst_73 = arith.constant 0.000000e+00 : f32
    %195 = vector.broadcast %cst_73 : f32 to vector<16x2048xf32>
    %196 = arith.maximumf %194, %195 : vector<16x2048xf32>
    %197 = arith.truncf %196 : vector<16x2048xf32> to vector<16x2048xbf16>
    %c0_74 = arith.constant 0 : index
    %c0_75 = arith.constant 0 : index
    %c0_76 = arith.constant 0 : index
    %198 = vector.load %arg13[%c0_74, %c0_75, %c0_76] : memref<1x2048x512xbf16, #tpu.memory_space<vmem>>, vector<1x2048x512xbf16>
    %199 = vector.shape_cast %198 : vector<1x2048x512xbf16> to vector<2048x512xbf16>
    %cst_77 = arith.constant dense<0.000000e+00> : vector<16x512xf32>
    %200 = tpu.matmul %197, %199, %cst_77 {dimension_numbers = #tpu.dot_dimension_numbers<[1], [0], [0], [1], [0, 0, 1, 1], [], []>} : vector<16x2048xbf16>, vector<2048x512xbf16>, vector<16x512xf32> -> vector<16x512xf32>
    %c0_78 = arith.constant 0 : index
    %c0_79 = arith.constant 0 : index
    %c0_80 = arith.constant 0 : index
    %201 = vector.load %arg14[%c0_78, %c0_79, %c0_80] : memref<1x1x512xf32, #tpu.memory_space<vmem>>, vector<1x1x512xf32>
    %202 = vector.shape_cast %201 : vector<1x1x512xf32> to vector<1x512xf32>
    %203 = vector.broadcast %202 : vector<1x512xf32> to vector<16x512xf32>
    %204 = arith.addf %200, %203 : vector<16x512xf32>
    %205 = arith.addf %186, %204 : vector<16x512xf32>
    %c0_81 = arith.constant 0 : index
    %c0_82 = arith.constant 0 : index
    %c0_83 = arith.constant 0 : index
    %206 = vector.load %arg15[%c0_81, %c0_82, %c0_83] : memref<1x1x512xf32, #tpu.memory_space<vmem>>, vector<1x1x512xf32>
    %207 = vector.shape_cast %206 : vector<1x1x512xf32> to vector<1x512xf32>
    %c0_84 = arith.constant 0 : index
    %c0_85 = arith.constant 0 : index
    %c0_86 = arith.constant 0 : index
    %208 = vector.load %arg16[%c0_84, %c0_85, %c0_86] : memref<1x1x512xf32, #tpu.memory_space<vmem>>, vector<1x1x512xf32>
    %209 = vector.shape_cast %208 : vector<1x1x512xf32> to vector<1x512xf32>
    %cst_87 = arith.constant dense<0.000000e+00> : vector<16xf32>
    %210 = vector.multi_reduction <add>, %205, %cst_87 [1] : vector<16x512xf32> to vector<16xf32>
    %211 = vector.shape_cast %210 : vector<16xf32> to vector<16x1xf32>
    %cst_88 = arith.constant 5.120000e+02 : f32
    %212 = vector.broadcast %cst_88 : f32 to vector<16x1xf32>
    %213 = arith.divf %211, %212 : vector<16x1xf32>
    %214 = vector.broadcast %213 : vector<16x1xf32> to vector<16x512xf32>
    %215 = arith.subf %205, %214 : vector<16x512xf32>
    %216 = arith.mulf %215, %215 : vector<16x512xf32>
    %cst_89 = arith.constant dense<0.000000e+00> : vector<16xf32>
    %217 = vector.multi_reduction <add>, %216, %cst_89 [1] : vector<16x512xf32> to vector<16xf32>
    %218 = vector.shape_cast %217 : vector<16xf32> to vector<16x1xf32>
    %cst_90 = arith.constant 5.120000e+02 : f32
    %219 = vector.broadcast %cst_90 : f32 to vector<16x1xf32>
    %220 = arith.divf %218, %219 : vector<16x1xf32>
    %cst_91 = arith.constant 9.99999974E-6 : f32
    %221 = vector.broadcast %cst_91 : f32 to vector<16x1xf32>
    %222 = arith.addf %220, %221 : vector<16x1xf32>
    %223 = math.rsqrt %222 : vector<16x1xf32>
    %224 = vector.broadcast %223 : vector<16x1xf32> to vector<16x512xf32>
    %225 = arith.mulf %215, %224 : vector<16x512xf32>
    %226 = vector.broadcast %207 : vector<1x512xf32> to vector<16x512xf32>
    %227 = arith.mulf %225, %226 : vector<16x512xf32>
    %228 = vector.broadcast %209 : vector<1x512xf32> to vector<16x512xf32>
    %229 = arith.addf %227, %228 : vector<16x512xf32>
    %c0_92 = arith.constant 0 : index
    %c0_93 = arith.constant 0 : index
    %230 = vector.load %arg22[%c0_92, %c0_93] : memref<16x512xf32, #tpu.memory_space<vmem>>, vector<16x512xf32>
    tpu.vector_store %arg22[%c0_92, %c0_93], %229 {strides = array<i32>} : memref<16x512xf32, #tpu.memory_space<vmem>>, vector<16x512xf32>,
    %c5_i32 = arith.constant 5 : i32
    %231 = arith.cmpi eq, %arg0, %c5_i32 : i32
    %232 = arith.extui %231 : i1 to i32
    %c0_i32_94 = arith.constant 0 : i32
    %233 = arith.cmpi ne, %232, %c0_i32_94 : i32
    scf.if %233 {
      %234 = arith.truncf %229 : vector<16x512xf32> to vector<16x512xbf16>
      %c0_95 = arith.constant 0 : index
      %c0_96 = arith.constant 0 : index
      %235 = vector.load %arg17[%c0_95, %c0_96] : memref<512x16xbf16, #tpu.memory_space<vmem>>, vector<512x16xbf16>
      %cst_97 = arith.constant dense<0.000000e+00> : vector<16x16xf32>
      %236 = tpu.matmul %234, %235, %cst_97 {dimension_numbers = #tpu.dot_dimension_numbers<[1], [0], [0], [1], [0, 0, 1, 1], [], []>} : vector<16x512xbf16>, vector<512x16xbf16>, vector<16x16xf32> -> vector<16x16xf32>
      %c0_98 = arith.constant 0 : index
      %c0_99 = arith.constant 0 : index
      %237 = vector.load %arg18[%c0_98, %c0_99] : memref<1x16xf32, #tpu.memory_space<vmem>>, vector<1x16xf32>
      %238 = vector.broadcast %237 : vector<1x16xf32> to vector<16x16xf32>
      %239 = arith.addf %236, %238 : vector<16x16xf32>
      %cst_100 = arith.constant 0.000000e+00 : f32
      %240 = vector.broadcast %cst_100 : f32 to vector<16x16xf32>
      %241 = arith.maximumf %239, %240 : vector<16x16xf32>
      %c0_101 = arith.constant 0 : index
      %c0_102 = arith.constant 0 : index
      %242 = vector.load %arg19[%c0_101, %c0_102] : memref<1x16xf32, #tpu.memory_space<vmem>>, vector<1x16xf32>
      %243 = vector.broadcast %242 : vector<1x16xf32> to vector<16x16xf32>
      %244 = arith.mulf %241, %243 : vector<16x16xf32>
      %cst_103 = arith.constant dense<0.000000e+00> : vector<16xf32>
      %245 = vector.multi_reduction <add>, %244, %cst_103 [1] : vector<16x16xf32> to vector<16xf32>
      %246 = vector.shape_cast %245 : vector<16xf32> to vector<16x1xf32>
      %247 = vector.extract_strided_slice %246 {offsets = [0, 0], sizes = [8, 1], strides = [1, 1]} : vector<16x1xf32> to vector<8x1xf32>
      %cst_104 = arith.constant dense<0.000000e+00> : vector<1xf32>
      %248 = vector.multi_reduction <add>, %247, %cst_104 [0] : vector<8x1xf32> to vector<1xf32>
      %249 = vector.shape_cast %248 : vector<1xf32> to vector<1x1xf32>
      %250 = vector.extract_strided_slice %246 {offsets = [8, 0], sizes = [8, 1], strides = [1, 1]} : vector<16x1xf32> to vector<8x1xf32>
      %cst_105 = arith.constant dense<0.000000e+00> : vector<1xf32>
      %251 = vector.multi_reduction <add>, %250, %cst_105 [0] : vector<8x1xf32> to vector<1xf32>
      %252 = vector.shape_cast %251 : vector<1xf32> to vector<1x1xf32>
      %253 = tpu.concatenate %249, %252 in 0 : vector<1x1xf32>, vector<1x1xf32> -> vector<2x1xf32>
      %c0_106 = arith.constant 0 : index
      %c0_107 = arith.constant 0 : index
      %254 = vector.load %arg20[%c0_106, %c0_107] : memref<1x1xf32, #tpu.memory_space<vmem>>, vector<1x1xf32>
      %cst_108 = arith.constant 8.000000e+00 : f32
      %255 = vector.broadcast %cst_108 : f32 to vector<1x1xf32>
      %256 = arith.mulf %255, %254 : vector<1x1xf32>
      %257 = vector.broadcast %256 : vector<1x1xf32> to vector<2x1xf32>
      %258 = arith.addf %253, %257 : vector<2x1xf32>
      %c0_109 = arith.constant 0 : index
      %c0_110 = arith.constant 0 : index
      %259 = vector.load %arg21[%c0_109, %c0_110] : memref<2x1xf32, #tpu.memory_space<vmem>>, vector<2x1xf32>
      tpu.vector_store %arg21[%c0_109, %c0_110], %258 {strides = array<i32>} : memref<2x1xf32, #tpu.memory_space<vmem>>, vector<2x1xf32>,
    } else {
    }
    return
  }
  func.func @transform_0(%arg0: i32) -> (i32, i32) {
    %c0_i32 = arith.constant 0 : i32
    %c0_i32_0 = arith.constant 0 : i32
    %c0_i32_1 = arith.constant 0 : i32
    return %c0_i32, %c0_i32_0 : i32, i32
  }
  func.func @transform_1(%arg0: i32) -> (i32, i32) {
    %c0_i32 = arith.constant 0 : i32
    %c0_i32_0 = arith.constant 0 : i32
    %c0_i32_1 = arith.constant 0 : i32
    return %c0_i32, %c0_i32_0 : i32, i32
  }
  func.func @transform_2(%arg0: i32) -> (i32, i32) {
    %c0_i32 = arith.constant 0 : i32
    %c0_i32_0 = arith.constant 0 : i32
    %c0_i32_1 = arith.constant 0 : i32
    return %c0_i32, %c0_i32_0 : i32, i32
  }
  func.func @transform_3(%arg0: i32) -> (i32, i32) {
    %c0_i32 = arith.constant 0 : i32
    %c0_i32_0 = arith.constant 0 : i32
    %c0_i32_1 = arith.constant 0 : i32
    return %c0_i32, %c0_i32_0 : i32, i32
  }
  func.func @transform_4(%arg0: i32) -> (i32, i32, i32) {
    %c0_i32 = arith.constant 0 : i32
    %c0_i32_0 = arith.constant 0 : i32
    %c0_i32_1 = arith.constant 0 : i32
    return %arg0, %c0_i32, %c0_i32_0 : i32, i32, i32
  }
  func.func @transform_5(%arg0: i32) -> (i32, i32, i32) {
    %c0_i32 = arith.constant 0 : i32
    %c0_i32_0 = arith.constant 0 : i32
    %c0_i32_1 = arith.constant 0 : i32
    return %arg0, %c0_i32, %c0_i32_0 : i32, i32, i32
  }
  func.func @transform_6(%arg0: i32) -> (i32, i32, i32) {
    %c0_i32 = arith.constant 0 : i32
    %c0_i32_0 = arith.constant 0 : i32
    %c0_i32_1 = arith.constant 0 : i32
    return %arg0, %c0_i32, %c0_i32_0 : i32, i32, i32
  }
  func.func @transform_7(%arg0: i32) -> (i32, i32, i32) {
    %c0_i32 = arith.constant 0 : i32
    %c0_i32_0 = arith.constant 0 : i32
    %c0_i32_1 = arith.constant 0 : i32
    return %arg0, %c0_i32, %c0_i32_0 : i32, i32, i32
  }
  func.func @transform_8(%arg0: i32) -> (i32, i32, i32) {
    %c0_i32 = arith.constant 0 : i32
    %c0_i32_0 = arith.constant 0 : i32
    %c0_i32_1 = arith.constant 0 : i32
    return %arg0, %c0_i32, %c0_i32_0 : i32, i32, i32
  }
  func.func @transform_9(%arg0: i32) -> (i32, i32, i32) {
    %c0_i32 = arith.constant 0 : i32
    %c0_i32_0 = arith.constant 0 : i32
    %c0_i32_1 = arith.constant 0 : i32
    return %arg0, %c0_i32, %c0_i32_0 : i32, i32, i32
  }
  func.func @transform_10(%arg0: i32) -> (i32, i32, i32) {
    %c0_i32 = arith.constant 0 : i32
    %c0_i32_0 = arith.constant 0 : i32
    %c0_i32_1 = arith.constant 0 : i32
    return %arg0, %c0_i32, %c0_i32_0 : i32, i32, i32
  }
  func.func @transform_11(%arg0: i32) -> (i32, i32, i32) {
    %c0_i32 = arith.constant 0 : i32
    %c0_i32_0 = arith.constant 0 : i32
    %c0_i32_1 = arith.constant 0 : i32
    return %arg0, %c0_i32, %c0_i32_0 : i32, i32, i32
  }
  func.func @transform_12(%arg0: i32) -> (i32, i32, i32) {
    %c0_i32 = arith.constant 0 : i32
    %c0_i32_0 = arith.constant 0 : i32
    %c0_i32_1 = arith.constant 0 : i32
    return %arg0, %c0_i32, %c0_i32_0 : i32, i32, i32
  }
  func.func @transform_13(%arg0: i32) -> (i32, i32, i32) {
    %c0_i32 = arith.constant 0 : i32
    %c0_i32_0 = arith.constant 0 : i32
    %c0_i32_1 = arith.constant 0 : i32
    return %arg0, %c0_i32, %c0_i32_0 : i32, i32, i32
  }
  func.func @transform_14(%arg0: i32) -> (i32, i32, i32) {
    %c0_i32 = arith.constant 0 : i32
    %c0_i32_0 = arith.constant 0 : i32
    %c0_i32_1 = arith.constant 0 : i32
    return %arg0, %c0_i32, %c0_i32_0 : i32, i32, i32
  }
  func.func @transform_15(%arg0: i32) -> (i32, i32, i32) {
    %c0_i32 = arith.constant 0 : i32
    %c0_i32_0 = arith.constant 0 : i32
    %c0_i32_1 = arith.constant 0 : i32
    return %arg0, %c0_i32, %c0_i32_0 : i32, i32, i32
  }
  func.func @transform_16(%arg0: i32) -> (i32, i32) {
    %c0_i32 = arith.constant 0 : i32
    %c0_i32_0 = arith.constant 0 : i32
    %c0_i32_1 = arith.constant 0 : i32
    return %c0_i32, %c0_i32_0 : i32, i32
  }
  func.func @transform_17(%arg0: i32) -> (i32, i32) {
    %c0_i32 = arith.constant 0 : i32
    %c0_i32_0 = arith.constant 0 : i32
    %c0_i32_1 = arith.constant 0 : i32
    return %c0_i32, %c0_i32_0 : i32, i32
  }
  func.func @transform_18(%arg0: i32) -> (i32, i32) {
    %c0_i32 = arith.constant 0 : i32
    %c0_i32_0 = arith.constant 0 : i32
    %c0_i32_1 = arith.constant 0 : i32
    return %c0_i32, %c0_i32_0 : i32, i32
  }
  func.func @transform_19(%arg0: i32) -> (i32, i32) {
    %c0_i32 = arith.constant 0 : i32
    %c0_i32_0 = arith.constant 0 : i32
    %c0_i32_1 = arith.constant 0 : i32
    return %c0_i32, %c0_i32_0 : i32, i32
  }
  func.func @transform_20(%arg0: i32) -> (i32, i32) {
    %c0_i32 = arith.constant 0 : i32
    %c0_i32_0 = arith.constant 0 : i32
    %c0_i32_1 = arith.constant 0 : i32
    return %c0_i32, %c0_i32_0 : i32, i32
  }
}

</mosaic_0001>

<bundles_post_ra>
// kernel: forward.1
= control target key start
LH: loop header
LB: loop body
LE: loop exit
PB: predicated region body
PF: predicated region fallthrough
CT: control target
= control target key end

     0   :  { %s22566_s0 = inlined_call_operand.hbm [shape: f32[16,116], index: 0, kind: input, shape index: {}]   ;;  %s22567_s1 = inlined_call_operand.hbm [shape: bf16[116,512], index: 1, kind: input, shape index: {}]   ;;  %s22568_s2 = inlined_call_operand.hbm [shape: f32[1,512], index: 2, kind: input, shape index: {}]   ;;  %s22569_s3 = inlined_call_operand.hbm [shape: f32[16,512], index: 3, kind: input, shape index: {}]   ;;  %s22570_s4 = inlined_call_operand.hbm [shape: bf16[6,512,1536], index: 4, kind: input, shape index: {}]   ;;  %s22571_s5 = inlined_call_operand.hbm [shape: f32[6,1,1536], index: 5, kind: input, shape index: {}]   ;;  %s22572_s6 = inlined_call_operand.hbm [shape: bf16[6,512,512], index: 6, kind: input, shape index: {}]   ;;  %s22573_s7 = inlined_call_operand.hbm [shape: f32[6,1,512], index: 7, kind: input, shape index: {}]   ;;  %s22574_s8 = inlined_call_operand.hbm [shape: f32[6,1,512], index: 8, kind: input, shape index: {}]   ;;  %s22575_s9 = inlined_call_operand.hbm [shape: f32[6,1,512], index: 9, kind: input, shape index: {}]   ;;  %s22576_s10 = inlined_call_operand.hbm [shape: bf16[6,512,2048], index: 10, kind: input, shape index: {}]   ;;  %s22577_s11 = inlined_call_operand.hbm [shape: f32[6,1,2048], index: 11, kind: input, shape index: {}]   ;;  %s22578_s12 = inlined_call_operand.hbm [shape: bf16[6,2048,512], index: 12, kind: input, shape index: {}]   ;;  %s22579_s13 = inlined_call_operand.hbm [shape: f32[6,1,512], index: 13, kind: input, shape index: {}]   ;;  %s22580_s14 = inlined_call_operand.hbm [shape: f32[6,1,512], index: 14, kind: input, shape index: {}]   ;;  %s22581_s15 = inlined_call_operand.hbm [shape: f32[6,1,512], index: 15, kind: input, shape index: {}]   ;;  %s22582_s16 = inlined_call_operand.vmem [shape: bf16[512,16], index: 16, kind: input, shape index: {}]   ;;  %s22583_s17 = inlined_call_operand.hbm [shape: f32[1,16], index: 17, kind: input, shape index: {}]   ;;  %s22584_s18 = inlined_call_operand.hbm [shape: f32[1,16], index: 18, kind: input, shape index: {}]   ;;  %s22585_s19 = inlined_call_operand.<no memory space> [shape: f32[1,1], index: 19, kind: input, shape index: {}]   ;;  %s22586_s20 = inlined_call_operand.vmem [shape: f32[2,1], index: 20, kind: output, shape index: {}]  }
   0x1   :  { %22629 = sst [smem:[#allocation38_spill]] %s22566_s0  ;;  %v25_v0 = vstv %s22585_s19 }
   0x2   :  { %22630 = sst [smem:[#allocation39_spill]] %s22567_s1  ;;  %26 = vst [vmem:[#allocation3] sm:$0x1] %v25_v0 }
   0x3   :  { %22631 = sst [smem:[#allocation40_spill]] %s22568_s2 }
   0x4   :  { %22632 = sst [smem:[#allocation41_spill]] %s22569_s3 }
   0x5   :  { %22633 = sst [smem:[#allocation42_spill]] %s22570_s4 }
   0x6   :  { %22634 = sst [smem:[#allocation43_spill]] %s22571_s5 }
   0x7   :  { %22635 = sst [smem:[#allocation44_spill]] %s22572_s6 }
   0x8   :  { %22636 = sst [smem:[#allocation45_spill]] %s22573_s7 }
   0x9   :  { %22637 = sst [smem:[#allocation46_spill]] %s22574_s8 }
   0xa   :  { %22638 = sst [smem:[#allocation47_spill]] %s22581_s15 }
   0xb   :  { %22639 = sst [smem:[#allocation48_spill]] %s22582_s16 }
   0xc   :  { %22640 = sst [smem:[#allocation49_spill]] %s22584_s18 }
   0xd   :  { %22641 = sst [smem:[#allocation50_spill]] %s22586_s20 }
   0xe   :  { %27 = vsyncpa [#allocation5], 0 }
   0xf   :  { %28 = vsyncpa [#allocation7], 0 }
  0x10   :  { %29 = vsyncpa [#allocation10], 0  ;;  %s19785_s23 = smov 0   ;;  %s19787_s24 = smov 0  }
  0x11   :  { %s19789_s2 = smov 0   ;;  %s19791_s25 = smov 0  }
  0x12 LB: > { %22642 = sst [smem:[#allocation31_spill]] %s19636_s24  ;;  %s19804_s19 = sadd.s32 4294967295, %s19644_s25   ;;  %s19644_s25 = sphi %s19791_s25, %s22705_s25   ;;  %s19640_s2 = sphi %s19789_s2, %s22708_s2   ;;  %s19636_s24 = sphi %s19787_s24, %s22707_s24   ;;  %s19632_s23 = sphi %s19785_s23, %s22706_s23  }
  0x13   : > { %22643 = sst [smem:[#allocation32_spill]] %s19640_s2  ;;  %p139_p0 = scmp.ne.s32.totalorder %s19636_s24, %s19632_s23 }
  0x14   : > { %22644 = sst [smem:[#allocation33_spill]] %s19804_s19  ;;  %p22597_p1 = scmp.eq.s32.totalorder %s19804_s19, 0 }
  0x15   : > { %p15193_p2 = scmp.ge.s32.totalorder %s19644_s25, 1  ;;  %p541_p3 = scmp.lt.s32.totalorder %s19644_s25, 7 }
  0x16   : > { %p19813_p5 = por %p22597_p1, %p139_p0  ;;  %s19646_s27 = smov [#allocation4]  }
  0x17   : > { %p19817_p6 = pnand %p15193_p2, %p541_p3  ;;  %s553_s28 = sshll.u32 %s19646_s27, 4  ;;  %s554_s28 = int_to_ptr.vmem [resolvable:$true] %s553_s28 }
  0x18   : > { %s22645_s3 = scalar_select %p19813_p5, 1, 0 }
  0x19   : > { %s22647_s26 = scalar_select %p19817_p6, 1, 0 }
  0x1a   : > { %22646 = sst [smem:[#allocation34_spill]] %s22645_s3  ;;  %p17280_p7 = pneg %p19817_p6 }
  0x1b   : > { %22648 = sst [smem:[#allocation35_spill]] %s22647_s26  ;;  %s19830_s29 = sadd.s32 1, %s19644_s25  }
  0x1c   : > { %p19825_p8 = pnand %p17280_p7, %p22597_p1  ;;  %22650 = sst [smem:[#allocation36_spill]] %s19830_s29 }
  0x1d   : > { %s126_s30 = sadd.s32 1, %s19640_s2  ;;  %s123_s0 = ssub.s32 %s19644_s25, %s19830_s29 }
  0x1e   : > { %s22649_s4 = scalar_select %p19825_p8, 1, 0 }
  0x1f   : > { %s22651_s22 = sld [smem:[#allocation38_spill]]  ;;  %p19843_p10 = pneg %p19825_p8 }
  0x21   : > { %s22652_s16 = scalar_select %p19843_p10, 1, 0 }
  0x25   : > { %s19062_s23 = scalar_lea.hbm %s22651_s22, 256 }
  0x26   : > { %p19063_p9 = scmp.ne.s32.totalorder %s22651_s22, %s19062_s23  ;;  %p19069_p13 = scmp.lt.u32.totalorder %s19062_s23, %s22651_s22 }
  0x28   : > { %p19065_p11 = pnand %p19843_p10, %p19063_p9 }
  0x2a   : > { %p19066_p12 = pneg %p19065_p11 }
  0x2c   : > { %p19071_p0 = pnand %p19069_p13, %p19066_p12 }
  0x2e   : > { %19074 = shalt.err (!%p19071_p0)
}
  0x2f   : > { %s19075_s21 = scalar_lea.vmem %s554_s28, 256  ;;  %p19083_p4 = scmp.lt.s32.totalorder %s554_s28, %s554_s28 }
  0x30   : > { %p19076_p2 = scmp.ne.s32.totalorder %s554_s28, %s19075_s21  ;;  %p19084_p1 = scmp.lt.s32.totalorder %s19075_s21, %s19075_s21 }
  0x32   : > { %p19078_p3 = pnand %p19076_p2, %p19843_p10  ;;  %p19085_p5 = por %p19084_p1, %p19083_p4 }
  0x34   : > { %p19079_p7 = pneg %p19078_p3 }
  0x36   : > { %p19086_p6 = pnand %p19085_p5, %p19079_p7 }
  0x38   : > { %19089 = shalt.err (!%p19086_p6)
}
  0x39   : > { %s19647_s20 = smov 128   ;;  %s19648_s19 = smov 8  }
  0x3a   : > { %17283 = dma.hbm_to_vmem [thread:$0]  (!%p19825_p8), %s22651_s22, 256, %s554_s28, [#allocation5], %s19647_s20, %s19647_s20, %s19648_s19  }
  0x3b   : > { %p124_p9 = scmp.eq.s32.totalorder %s123_s0, 0  ;;  %p133_p1 = scmp.ne.s32.totalorder %s19640_s2, %s19636_s24 }
  0x3c   : > { %p134_p4 = scmp.eq.s32.totalorder %s19644_s25, 0  ;;  %p17342_p5 = scmp.lt.s32.totalorder %s19644_s25, 6 }
  0x3d   : > { %s19864_s23 = scalar_select %p124_p9, %s19640_s2, %s126_s30  }
  0x3e   : > { %p135_p6 = por %p134_p4, %p133_p1  ;;  %s632_s27 = sand.u32 1, %s19644_s25  }
  0x3f   : > { %22653 = sst [smem:[#allocation37_spill]] %s19864_s23  ;;  %s19868_s21 = sand.u32 1, %s19640_s2  }
  0x40   : > { %s17226_s29 = smul.u32 3072, %s19868_s21  ;;  %p19871_p11 = pnand %p17342_p5, %p135_p6 }
  0x41   : > { %s17227_s15 = smul.u32 49152, %s19644_s25  ;;  %s22655_s0 = sld [smem:[#allocation42_spill]] }
  0x42   : > { %s22654_s26 = scalar_select %p19871_p11, 1, 0 }
  0x43   : > { %s636_s30 = scalar_lea.vmem [#allocation11], %s17226_s29  ;;  %s19883_s1 = scalar_lea.sflag [#allocation5], %s632_s27 }
  0x44   : > { %s643_s19 = sshll.u32 %s636_s30, 4  ;;  %p19889_p13 = pneg %p19871_p11  ;;  %s19881_s19 = int_to_ptr.vmem [resolvable:$true] %s643_s19 }
  0x46   : > { %s22656_s23 = scalar_select %p19889_p13, 1, 0 }
  0x47   : > { %s19879_s20 = scalar_lea.hbm %s22655_s0, %s17227_s15  ;;  %s19095_s29 = scalar_lea.hbm %s22655_s0, 294912 }
  0x48   : > { %s19090_s22 = scalar_lea.hbm %s19879_s20, 49152  ;;  %p19096_p3 = scmp.lt.u32.totalorder %s19879_s20, %s22655_s0 }
  0x49   : > { %p19091_p12 = scmp.ne.s32.totalorder %s19879_s20, %s19090_s22  ;;  %p19097_p7 = scmp.lt.u32.totalorder %s19095_s29, %s19090_s22 }
  0x4a   : > { %p19099_p1 = scmp.lt.u32.totalorder %s19090_s22, %s19879_s20 }
  0x4b   : > { %p19093_p0 = pnand %p19889_p13, %p19091_p12  ;;  %p19098_p9 = por %p19097_p7, %p19096_p3 }
  0x4d   : > { %p19094_p2 = pneg %p19093_p0  ;;  %p19100_p4 = por %p19099_p1, %p19098_p9 }
  0x4f   : > { %p19101_p5 = pnand %p19100_p4, %p19094_p2 }
  0x51   : > { %19104 = shalt.err (!%p19101_p5)
}
  0x52   : > { %s19105_s27 = scalar_lea.vmem %s19881_s19, 49152  ;;  %s19649_s15 = smov [#allocation11]  }
  0x53   : > { %p19106_p6 = scmp.ne.s32.totalorder %s19881_s19, %s19105_s27  ;;  %s19110_s3 = sshll.u32 %s19649_s15, 4  ;;  %s19111_s3 = int_to_ptr.vmem [resolvable:$false] %s19110_s3 }
  0x54   : > { %s19112_s28 = scalar_lea.vmem %s19111_s3, 98304  ;;  %p19113_p8 = scmp.lt.s32.totalorder %s19881_s19, %s19111_s3 }
  0x55   : > { %p19108_p12 = pnand %p19106_p6, %p19889_p13  ;;  %p19114_p10 = scmp.lt.s32.totalorder %s19112_s28, %s19105_s27 }
  0x57   : > { %p19109_p0 = pneg %p19108_p12  ;;  %p19115_p3 = por %p19114_p10, %p19113_p8 }
  0x59   : > { %p19116_p7 = pnand %p19115_p3, %p19109_p0 }
  0x5b   : > { %19119 = shalt.err (!%p19116_p7)
}
  0x5c   : > { %s19650_s22 = smov 768   ;;  %s19651_s29 = smov 48  }
  0x5d   : > { %17302 = dma.hbm_to_vmem [thread:$0]  (!%p19871_p11), %s19879_s20, 49152, %s19881_s19, %s19883_s1, %s19650_s22, %s19650_s22, %s19651_s29  }
  0x5e   : > { %s17228_s30 = smul.u32 12, %s19868_s21  ;;  %s15203_s0 = sshll.u32 %s19868_s21, 10 }
  0x5f   : > { %s17229_s15 = smul.u32 192, %s19644_s25  ;;  %s22657_s5 = sld [smem:[#allocation43_spill]] }
  0x60   : > { %s657_s2 = scalar_lea.vmem [#allocation12], %s17228_s30 }
  0x61   : > { %s665_s24 = sshll.u32 %s657_s2, 4  ;;  %s666_s24 = int_to_ptr.vmem [resolvable:$true] %s665_s24 }
  0x65   : > { %s19919_s28 = scalar_lea.hbm %s22657_s5, %s17229_s15  ;;  %s19125_s22 = scalar_lea.hbm %s22657_s5, 1152 }
  0x66   : > { %s19120_s18 = scalar_lea.hbm %s19919_s28, 192  ;;  %p19126_p9 = scmp.lt.u32.totalorder %s19919_s28, %s22657_s5 }
  0x67   : > { %p19121_p8 = scmp.ne.s32.totalorder %s19919_s28, %s19120_s18  ;;  %p19127_p1 = scmp.lt.u32.totalorder %s19125_s22, %s19120_s18 }
  0x68   : > { %p19129_p5 = scmp.lt.u32.totalorder %s19120_s18, %s19919_s28 }
  0x69   : > { %p19123_p10 = pnand %p19121_p8, %p19889_p13  ;;  %p19128_p4 = por %p19127_p1, %p19126_p9 }
  0x6b   : > { %p19124_p2 = pneg %p19123_p10  ;;  %p19130_p6 = por %p19129_p5, %p19128_p4 }
  0x6d   : > { %p19131_p12 = pnand %p19130_p6, %p19124_p2 }
  0x6f   : > { %19134 = shalt.err (!%p19131_p12)
}
  0x70   : > { %s19135_s2 = scalar_lea.vmem %s666_s24, 192  ;;  %s19652_s30 = smov [#allocation12]  }
  0x71   : > { %p19136_p0 = scmp.ne.s32.totalorder %s666_s24, %s19135_s2  ;;  %s19140_s15 = sshll.u32 %s19652_s30, 4  ;;  %s19141_s15 = int_to_ptr.vmem [resolvable:$false] %s19140_s15 }
  0x72   : > { %s19142_s27 = scalar_lea.vmem %s19141_s15, 384  ;;  %p19143_p8 = scmp.lt.s32.totalorder %s666_s24, %s19141_s15 }
  0x73   : > { %p19138_p3 = pnand %p19136_p0, %p19889_p13  ;;  %p19144_p10 = scmp.lt.s32.totalorder %s19142_s27, %s19135_s2 }
  0x75   : > { %p19139_p7 = pneg %p19138_p3  ;;  %p19145_p11 = por %p19144_p10, %p19143_p8 }
  0x77   : > { %p19146_p1 = pnand %p19145_p11, %p19139_p7 }
  0x79   : > { %19149 = shalt.err (!%p19146_p1)
}
  0x7a   : > { %p22658_p9 = scmp.ne.s32.totalorder %s22654_s26, 0  ;;  %s16868_s18 = sshll.u32 %s19644_s25, 14 }
  0x7b   : > { %s676_s20 = scalar_lea.vmem [#allocation13], %s15203_s0  ;;  %s22659_s6 = sld [smem:[#allocation44_spill]] }
  0x7c   : > { %17305 = dma.hbm_to_vmem [thread:$0]  (!%p22658_p9), %s19919_s28, 192, %s666_s24, %s19883_s1  }
  0x7d   : > { %s683_s19 = sshll.u32 %s676_s20, 4  ;;  %s19947_s19 = int_to_ptr.vmem [resolvable:$true] %s683_s19 }
  0x81   : > { %s19945_s3 = scalar_lea.hbm %s22659_s6, %s16868_s18  ;;  %s19155_s0 = scalar_lea.hbm %s22659_s6, 98304 }
  0x82   : > { %s19150_s2 = scalar_lea.hbm %s19945_s3, 16384  ;;  %p19156_p5 = scmp.lt.u32.totalorder %s19945_s3, %s22659_s6 }
  0x83   : > { %p19151_p11 = scmp.ne.s32.totalorder %s19945_s3, %s19150_s2  ;;  %p19157_p6 = scmp.lt.u32.totalorder %s19155_s0, %s19150_s2 }
  0x84   : > { %p19159_p0 = scmp.lt.u32.totalorder %s19150_s2, %s19945_s3 }
  0x85   : > { %p19153_p2 = pnand %p19151_p11, %p19889_p13  ;;  %p19158_p12 = por %p19157_p6, %p19156_p5 }
  0x87   : > { %p19154_p4 = pneg %p19153_p2  ;;  %p19160_p3 = por %p19159_p0, %p19158_p12 }
  0x89   : > { %p19161_p7 = pnand %p19160_p3, %p19154_p4 }
  0x8b   : > { %19164 = shalt.err (!%p19161_p7)
}
  0x8c   : > { %s19165_s27 = scalar_lea.vmem %s19947_s19, 16384  ;;  %s19653_s18 = smov [#allocation13]  }
  0x8d   : > { %p19166_p8 = scmp.ne.s32.totalorder %s19947_s19, %s19165_s27  ;;  %s19170_s20 = sshll.u32 %s19653_s18, 4  ;;  %s19171_s20 = int_to_ptr.vmem [resolvable:$false] %s19170_s20 }
  0x8e   : > { %s19172_s22 = scalar_lea.vmem %s19171_s20, 32768  ;;  %p19173_p11 = scmp.lt.s32.totalorder %s19947_s19, %s19171_s20 }
  0x8f   : > { %p19168_p10 = pnand %p19166_p8, %p19889_p13  ;;  %p19174_p2 = scmp.lt.s32.totalorder %s19172_s22, %s19165_s27 }
  0x91   : > { %p19169_p1 = pneg %p19168_p10  ;;  %p19175_p5 = por %p19174_p2, %p19173_p11 }
  0x93   : > { %p19176_p6 = pnand %p19175_p5, %p19169_p1 }
  0x95   : > { %19179 = shalt.err (!%p19176_p6)
}
  0x96   : > { %s22615_s29 = smov 256   ;;  %s22617_s2 = smov 16  }
  0x97   : > { %17308 = dma.hbm_to_vmem [thread:$0]  (!%p22658_p9), %s19945_s3, 16384, %s19947_s19, %s19883_s1, %s22615_s29, %s22615_s29, %s22617_s2  }
  0x98   : > { %s19975_s24 = sshll.u32 %s19868_s21, 2  ;;  %s19978_s28 = sshll.u32 %s19644_s25, 6 }
  0x99   : > { %s22660_s7 = sld [smem:[#allocation45_spill]]  ;;  %s697_s27 = scalar_lea.vmem [#allocation14], %s19975_s24 }
  0x9a   : > { %s705_s18 = sshll.u32 %s697_s27, 4  ;;  %s22661_s8 = sld [smem:[#allocation46_spill]]  ;;  %s706_s18 = int_to_ptr.vmem [resolvable:$true] %s705_s18 }
  0x9f   : > { %s19984_s15 = scalar_lea.hbm %s22660_s7, %s19978_s28  ;;  %s19185_s29 = scalar_lea.hbm %s22660_s7, 384 }
  0xa0   : > { %s19991_s20 = scalar_lea.hbm %s22661_s8, %s19978_s28  ;;  %s19180_s22 = scalar_lea.hbm %s19984_s15, 64 }
  0xa1   : > { %p19181_p4 = scmp.ne.s32.totalorder %s19984_s15, %s19180_s22  ;;  %p19186_p3 = scmp.lt.u32.totalorder %s19984_s15, %s22660_s7 }
  0xa2   : > { %p19187_p7 = scmp.lt.u32.totalorder %s19185_s29, %s19180_s22  ;;  %p19189_p10 = scmp.lt.u32.totalorder %s19180_s22, %s19984_s15 }
  0xa3   : > { %p19183_p12 = pnand %p19181_p4, %p19889_p13 }
  0xa4   : > { %p19188_p8 = por %p19187_p7, %p19186_p3 }
  0xa5   : > { %p19184_p0 = pneg %p19183_p12 }
  0xa6   : > { %p19190_p1 = por %p19189_p10, %p19188_p8 }
  0xa8   : > { %p19191_p11 = pnand %p19190_p1, %p19184_p0 }
  0xaa   : > { %19194 = shalt.err (!%p19191_p11)
}
  0xab   : > { %s19195_s27 = scalar_lea.vmem %s706_s18, 64  ;;  %s19656_s19 = smov [#allocation14]  }
  0xac   : > { %p19196_p2 = scmp.ne.s32.totalorder %s706_s18, %s19195_s27  ;;  %s19200_s3 = sshll.u32 %s19656_s19, 4  ;;  %s19201_s3 = int_to_ptr.vmem [resolvable:$false] %s19200_s3 }
  0xad   : > { %s19202_s0 = scalar_lea.vmem %s19201_s3, 128  ;;  %p19203_p4 = scmp.lt.s32.totalorder %s706_s18, %s19201_s3 }
  0xae   : > { %p19198_p5 = pnand %p19196_p2, %p19889_p13  ;;  %p19204_p12 = scmp.lt.s32.totalorder %s19202_s0, %s19195_s27 }
  0xb0   : > { %p19199_p6 = pneg %p19198_p5  ;;  %p19205_p9 = por %p19204_p12, %p19203_p4 }
  0xb2   : > { %p19206_p3 = pnand %p19205_p9, %p19199_p6 }
  0xb4   : > { %19209 = shalt.err (!%p19206_p3)
}
  0xb5   : > { %p22662_p7 = scmp.ne.s32.totalorder %s22654_s26, 0  ;;  %s716_s5 = scalar_lea.vmem [#allocation15], %s19975_s24 }
  0xb6   : > { %s724_s29 = sshll.u32 %s716_s5, 4  ;;  %s20016_s30 = scalar_lea.hbm %s22575_s9, %s19978_s28  ;;  %s725_s29 = int_to_ptr.vmem [resolvable:$true] %s724_s29 }
  0xb7   : > { %17311 = dma.hbm_to_vmem [thread:$0]  (!%p22662_p7), %s19984_s15, 64, %s706_s18, %s19883_s1  }
  0xb8   : > { %s19210_s27 = scalar_lea.hbm %s19991_s20, 64  ;;  %s19215_s0 = scalar_lea.hbm %s22661_s8, 384 }
  0xb9   : > { %p19211_p9 = scmp.ne.s32.totalorder %s19991_s20, %s19210_s27  ;;  %p19216_p10 = scmp.lt.u32.totalorder %s19991_s20, %s22661_s8 }
  0xba   : > { %p19217_p1 = scmp.lt.u32.totalorder %s19215_s0, %s19210_s27  ;;  %p19219_p2 = scmp.lt.u32.totalorder %s19210_s27, %s19991_s20 }
  0xbb   : > { %p19213_p0 = pnand %p19211_p9, %p19889_p13 }
  0xbc   : > { %p19218_p11 = por %p19217_p1, %p19216_p10 }
  0xbd   : > { %p19214_p8 = pneg %p19213_p0 }
  0xbe   : > { %p19220_p5 = por %p19219_p2, %p19218_p11 }
  0xc0   : > { %p19221_p6 = pnand %p19220_p5, %p19214_p8 }
  0xc2   : > { %19224 = shalt.err (!%p19221_p6)
}
  0xc3   : > { %s19225_s15 = scalar_lea.vmem %s725_s29, 64  ;;  %s19657_s18 = smov [#allocation15]  }
  0xc4   : > { %p19226_p4 = scmp.ne.s32.totalorder %s725_s29, %s19225_s15  ;;  %s19230_s5 = sshll.u32 %s19657_s18, 4  ;;  %s19231_s5 = int_to_ptr.vmem [resolvable:$false] %s19230_s5 }
  0xc5   : > { %s19232_s2 = scalar_lea.vmem %s19231_s5, 128  ;;  %p19233_p9 = scmp.lt.s32.totalorder %s725_s29, %s19231_s5 }
  0xc6   : > { %p19228_p12 = pnand %p19226_p4, %p19889_p13  ;;  %p19234_p0 = scmp.lt.s32.totalorder %s19232_s2, %s19225_s15 }
  0xc8   : > { %p19229_p3 = pneg %p19228_p12  ;;  %p19235_p7 = por %p19234_p0, %p19233_p9 }
  0xca   : > { %p19236_p1 = pnand %p19235_p7, %p19229_p3 }
  0xcc   : > { %19239 = shalt.err (!%p19236_p1)
}
  0xcd   : > { %p22663_p10 = scmp.ne.s32.totalorder %s22654_s26, 0  ;;  %s735_s6 = scalar_lea.vmem [#allocation16], %s19975_s24 }
  0xce   : > { %s743_s7 = sshll.u32 %s735_s6, 4  ;;  %s22620_s22 = sshll.u32 %s19868_s21, 12  ;;  %s744_s7 = int_to_ptr.vmem [resolvable:$true] %s743_s7 }
  0xcf   : > { %17314 = dma.hbm_to_vmem [thread:$0]  (!%p22663_p10), %s19991_s20, 64, %s725_s29, %s19883_s1  }
  0xd0   : > { %s19240_s27 = scalar_lea.hbm %s20016_s30, 64  ;;  %s19245_s0 = scalar_lea.hbm %s22575_s9, 384 }
  0xd1   : > { %p19241_p8 = scmp.ne.s32.totalorder %s20016_s30, %s19240_s27  ;;  %p19246_p2 = scmp.lt.u32.totalorder %s20016_s30, %s22575_s9 }
  0xd2   : > { %p19247_p5 = scmp.lt.u32.totalorder %s19245_s0, %s19240_s27  ;;  %p19249_p4 = scmp.lt.u32.totalorder %s19240_s27, %s20016_s30 }
  0xd3   : > { %p19243_p7 = pnand %p19241_p8, %p19889_p13 }
  0xd4   : > { %p19248_p6 = por %p19247_p5, %p19246_p2 }
  0xd5   : > { %p19244_p11 = pneg %p19243_p7 }
  0xd6   : > { %p19250_p12 = por %p19249_p4, %p19248_p6 }
  0xd8   : > { %p19251_p3 = pnand %p19250_p12, %p19244_p11 }
  0xda   : > { %19254 = shalt.err (!%p19251_p3)
}
  0xdb   : > { %s19255_s20 = scalar_lea.vmem %s744_s7, 64  ;;  %s19658_s29 = smov [#allocation16]  }
  0xdc   : > { %p19256_p9 = scmp.ne.s32.totalorder %s744_s7, %s19255_s20  ;;  %s19260_s5 = sshll.u32 %s19658_s29, 4  ;;  %s19261_s5 = int_to_ptr.vmem [resolvable:$false] %s19260_s5 }
  0xdd   : > { %s19262_s2 = scalar_lea.vmem %s19261_s5, 128  ;;  %p19263_p8 = scmp.lt.s32.totalorder %s744_s7, %s19261_s5 }
  0xde   : > { %p19258_p0 = pnand %p19256_p9, %p19889_p13  ;;  %p19264_p7 = scmp.lt.s32.totalorder %s19262_s2, %s19255_s20 }
  0xe0   : > { %p19259_p1 = pneg %p19258_p0  ;;  %p19265_p10 = por %p19264_p7, %p19263_p8 }
  0xe2   : > { %p19266_p2 = pnand %p19265_p10, %p19259_p1 }
  0xe4   : > { %19269 = shalt.err (!%p19266_p2)
}
  0xe5   : > { %p22664_p5 = scmp.ne.s32.totalorder %s22654_s26, 0  ;;  %s16872_s6 = sshll.u32 %s19644_s25, 16 }
  0xe6   : > { %s754_s27 = scalar_lea.vmem [#allocation17], %s22620_s22  ;;  %s20064_s15 = scalar_lea.hbm %s22576_s10, %s16872_s6 }
  0xe7   : > { %17317 = dma.hbm_to_vmem [thread:$0]  (!%p22664_p5), %s20016_s30, 64, %s744_s7, %s19883_s1  }
  0xe8   : > { %s761_s19 = sshll.u32 %s754_s27, 4  ;;  %s19270_s18 = scalar_lea.hbm %s20064_s15, 65536  ;;  %s20066_s19 = int_to_ptr.vmem [resolvable:$true] %s761_s19 }
  0xe9   : > { %p19271_p10 = scmp.ne.s32.totalorder %s20064_s15, %s19270_s18  ;;  %s19275_s20 = scalar_lea.hbm %s22576_s10, 393216 }
  0xea   : > { %p19276_p4 = scmp.lt.u32.totalorder %s20064_s15, %s22576_s10  ;;  %p19277_p12 = scmp.lt.u32.totalorder %s19275_s20, %s19270_s18 }
  0xeb   : > { %p19273_p11 = pnand %p19271_p10, %p19889_p13  ;;  %p19279_p9 = scmp.lt.u32.totalorder %s19270_s18, %s20064_s15 }
  0xec   : > { %p19278_p3 = por %p19277_p12, %p19276_p4 }
  0xed   : > { %p19274_p6 = pneg %p19273_p11 }
  0xee   : > { %p19280_p0 = por %p19279_p9, %p19278_p3 }
  0xf0   : > { %p19281_p1 = pnand %p19280_p0, %p19274_p6 }
  0xf2   : > { %19284 = shalt.err (!%p19281_p1)
}
  0xf3   : > { %s19285_s2 = scalar_lea.vmem %s20066_s19, 65536  ;;  %s19659_s27 = smov [#allocation17]  }
  0xf4   : > { %p19286_p8 = scmp.ne.s32.totalorder %s20066_s19, %s19285_s2  ;;  %s19290_s3 = sshll.u32 %s19659_s27, 4  ;;  %s19291_s3 = int_to_ptr.vmem [resolvable:$false] %s19290_s3 }
  0xf5   : > { %s19292_s0 = scalar_lea.vmem %s19291_s3, 131072  ;;  %p19293_p10 = scmp.lt.s32.totalorder %s20066_s19, %s19291_s3 }
  0xf6   : > { %p19288_p7 = pnand %p19286_p8, %p19889_p13  ;;  %p19294_p11 = scmp.lt.s32.totalorder %s19292_s0, %s19285_s2 }
  0xf8   : > { %p19289_p2 = pneg %p19288_p7  ;;  %p19295_p4 = por %p19294_p11, %p19293_p10 }
  0xfa   : > { %p19296_p12 = pnand %p19295_p4, %p19289_p2 }
  0xfc   : > { %19299 = shalt.err (!%p19296_p12)
}
  0xfd   : > { %s19660_s18 = smov 1024   ;;  %s19661_s30 = smov 64  }
  0xfe   : > { %17320 = dma.hbm_to_vmem [thread:$0]  (!%p22664_p5), %s20064_s15, 65536, %s20066_s19, %s19883_s1, %s19660_s18, %s19660_s18, %s19661_s30  }
  0xff   : > { %s15218_s7 = sshll.u32 %s19868_s21, 4  ;;  %s16873_s20 = sshll.u32 %s19644_s25, 8 }
 0x100   : > { %s20095_s2 = scalar_lea.hbm %s22577_s11, %s16873_s20  ;;  %s775_s27 = scalar_lea.vmem [#allocation18], %s15218_s7 }
 0x101   : > { %s783_s3 = sshll.u32 %s775_s27, 4  ;;  %s20102_s8 = scalar_lea.hbm %s22578_s12, %s16872_s6  ;;  %s784_s3 = int_to_ptr.vmem [resolvable:$true] %s783_s3 }
 0x102   : > { %s19300_s19 = scalar_lea.hbm %s20095_s2, 256  ;;  %s19305_s30 = scalar_lea.hbm %s22577_s11, 1536 }
 0x103   : > { %p19301_p6 = scmp.ne.s32.totalorder %s20095_s2, %s19300_s19  ;;  %p19306_p0 = scmp.lt.u32.totalorder %s20095_s2, %s22577_s11 }
 0x104   : > { %p19307_p1 = scmp.lt.u32.totalorder %s19305_s30, %s19300_s19  ;;  %p19309_p7 = scmp.lt.u32.totalorder %s19300_s19, %s20095_s2 }
 0x105   : > { %p19303_p3 = pnand %p19301_p6, %p19889_p13 }
 0x106   : > { %p19308_p8 = por %p19307_p1, %p19306_p0 }
 0x107   : > { %p19304_p9 = pneg %p19303_p3 }
 0x108   : > { %p19310_p2 = por %p19309_p7, %p19308_p8 }
 0x10a   : > { %p19311_p10 = pnand %p19310_p2, %p19304_p9 }
 0x10c   : > { %19314 = shalt.err (!%p19311_p10)
}
 0x10d   : > { %s19315_s25 = scalar_lea.vmem %s784_s3, 256  ;;  %s19662_s22 = smov [#allocation18]  }
 0x10e   : > { %p19316_p11 = scmp.ne.s32.totalorder %s784_s3, %s19315_s25  ;;  %s19320_s6 = sshll.u32 %s19662_s22, 4  ;;  %s19321_s6 = int_to_ptr.vmem [resolvable:$false] %s19320_s6 }
 0x10f   : > { %s19322_s7 = scalar_lea.vmem %s19321_s6, 512  ;;  %p19323_p6 = scmp.lt.s32.totalorder %s784_s3, %s19321_s6 }
 0x110   : > { %p19318_p4 = pnand %p19316_p11, %p19889_p13  ;;  %p19324_p3 = scmp.lt.s32.totalorder %s19322_s7, %s19315_s25 }
 0x112   : > { %p19319_p12 = pneg %p19318_p4  ;;  %p19325_p5 = por %p19324_p3, %p19323_p6 }
 0x114   : > { %p19326_p0 = pnand %p19325_p5, %p19319_p12 }
 0x116   : > { %19329 = shalt.err (!%p19326_p0)
}
 0x117   : > { %p22665_p1 = scmp.ne.s32.totalorder %s22654_s26, 0  ;;  %s22666_s5 = sshll.u32 %s19868_s21, 12 }
 0x118   : > { %s794_s27 = scalar_lea.vmem [#allocation19], %s22666_s5  ;;  %s19663_s19 = smov [#allocation6]  }
 0x119   : > { %17323 = dma.hbm_to_vmem [thread:$0]  (!%p22665_p1), %s20095_s2, 256, %s784_s3, %s19883_s1  }
 0x11a   : > { %s801_s0 = sshll.u32 %s794_s27, 4  ;;  %s20126_s15 = sshll.u32 %s19663_s19, 4  ;;  %s20124_s0 = int_to_ptr.vmem [resolvable:$true] %s801_s0  ;;  %s567_s15 = int_to_ptr.vmem [resolvable:$true] %s20126_s15 }
 0x11b   : > { %s19330_s18 = scalar_lea.hbm %s20102_s8, 65536  ;;  %s19335_s29 = scalar_lea.hbm %s22578_s12, 393216 }
 0x11c   : > { %p19331_p5 = scmp.ne.s32.totalorder %s20102_s8, %s19330_s18  ;;  %p19336_p7 = scmp.lt.u32.totalorder %s20102_s8, %s22578_s12 }
 0x11d   : > { %p19337_p2 = scmp.lt.u32.totalorder %s19335_s29, %s19330_s18  ;;  %p19339_p11 = scmp.lt.u32.totalorder %s19330_s18, %s20102_s8 }
 0x11e   : > { %p19333_p9 = pnand %p19331_p5, %p19889_p13 }
 0x11f   : > { %p19338_p10 = por %p19337_p2, %p19336_p7 }
 0x120   : > { %p19334_p8 = pneg %p19333_p9 }
 0x121   : > { %p19340_p4 = por %p19339_p11, %p19338_p10 }
 0x123   : > { %p19341_p12 = pnand %p19340_p4, %p19334_p8 }
 0x125   : > { %19344 = shalt.err (!%p19341_p12)
}
 0x126   : > { %s19345_s21 = scalar_lea.vmem %s20124_s0, 65536  ;;  %s19664_s2 = smov [#allocation19]  }
 0x127   : > { %p19346_p6 = scmp.ne.s32.totalorder %s20124_s0, %s19345_s21  ;;  %s19350_s3 = sshll.u32 %s19664_s2, 4  ;;  %s19351_s3 = int_to_ptr.vmem [resolvable:$false] %s19350_s3 }
 0x128   : > { %s19352_s6 = scalar_lea.vmem %s19351_s3, 131072  ;;  %p19353_p5 = scmp.lt.s32.totalorder %s20124_s0, %s19351_s3 }
 0x129   : > { %p19348_p3 = pnand %p19346_p6, %p19889_p13  ;;  %p19354_p9 = scmp.lt.s32.totalorder %s19352_s6, %s19345_s21 }
 0x12b   : > { %p19349_p0 = pneg %p19348_p3  ;;  %p19355_p7 = por %p19354_p9, %p19353_p5 }
 0x12d   : > { %p19356_p2 = pnand %p19355_p7, %p19349_p0 }
 0x12f   : > { %19359 = shalt.err (!%p19356_p2)
}
 0x130   : > { %s22667_s7 = smov 16   ;;  %s22668_s5 = smov 256  }
 0x131   : > { %17326 = dma.hbm_to_vmem [thread:$0]  (!%p22665_p1), %s20102_s8, 65536, %s20124_s0, %s19883_s1, %s22668_s5, %s22668_s5, %s22667_s7  }
 0x132   : > { %s22669_s18 = sld [smem:[#allocation39_spill]]  ;;  %p22670_p10 = scmp.ne.s32.totalorder %s22652_s16, 0 }
 0x138   : > { %s19360_s30 = scalar_lea.hbm %s22669_s18, 3840 }
 0x139   : > { %p19361_p8 = scmp.ne.s32.totalorder %s22669_s18, %s19360_s30  ;;  %p19367_p12 = scmp.lt.u32.totalorder %s19360_s30, %s22669_s18 }
 0x13b   : > { %p19363_p11 = pnand %p19361_p8, %p22670_p10 }
 0x13d   : > { %p19364_p4 = pneg %p19363_p11 }
 0x13f   : > { %p19369_p6 = pnand %p19367_p12, %p19364_p4 }
 0x141   : > { %19372 = shalt.err (!%p19369_p6)
}
 0x142   : > { %s19373_s21 = scalar_lea.vmem %s567_s15, 3840  ;;  %p19381_p9 = scmp.lt.s32.totalorder %s567_s15, %s567_s15 }
 0x143   : > { %p19374_p3 = scmp.ne.s32.totalorder %s567_s15, %s19373_s21  ;;  %p19382_p7 = scmp.lt.s32.totalorder %s19373_s21, %s19373_s21 }
 0x145   : > { %p19376_p0 = pnand %p19374_p3, %p22670_p10  ;;  %p19383_p2 = por %p19382_p7, %p19381_p9 }
 0x147   : > { %p19377_p5 = pneg %p19376_p0 }
 0x149   : > { %p19384_p1 = pnand %p19383_p2, %p19377_p5 }
 0x14b   : > { %19387 = shalt.err (!%p19384_p1)
}
 0x14c   : > { %p22671_p8 = scmp.ne.s32.totalorder %s22649_s4, 0  ;;  %s20179_s6 = scalar_lea.hbm %s22579_s13, %s19978_s28 }
 0x14d   : > { %s815_s27 = scalar_lea.vmem [#allocation20], %s19975_s24  ;;  %s19388_s30 = scalar_lea.hbm %s20179_s6, 64 }
 0x14e   : > { %17286 = dma.hbm_to_vmem [thread:$0]  (!%p22671_p8), %s22669_s18, 3840, %s567_s15, [#allocation7], %s22668_s5, %s22668_s5, %s22667_s7  }
 0x14f   : > { %s823_s19 = sshll.u32 %s815_s27, 4  ;;  %p19389_p1 = scmp.ne.s32.totalorder %s20179_s6, %s19388_s30  ;;  %s824_s19 = int_to_ptr.vmem [resolvable:$true] %s823_s19 }
 0x150   : > { %s19393_s15 = scalar_lea.hbm %s22579_s13, 384  ;;  %p19394_p12 = scmp.lt.u32.totalorder %s20179_s6, %s22579_s13 }
 0x151   : > { %p19391_p11 = pnand %p19389_p1, %p19889_p13  ;;  %p19395_p6 = scmp.lt.u32.totalorder %s19393_s15, %s19388_s30 }
 0x152   : > { %p19397_p0 = scmp.lt.u32.totalorder %s19388_s30, %s20179_s6 }
 0x153   : > { %p19392_p4 = pneg %p19391_p11  ;;  %p19396_p3 = por %p19395_p6, %p19394_p12 }
 0x155   : > { %p19398_p5 = por %p19397_p0, %p19396_p3 }
 0x157   : > { %p19399_p9 = pnand %p19398_p5, %p19392_p4 }
 0x159   : > { %19402 = shalt.err (!%p19399_p9)
}
 0x15a   : > { %s19403_s25 = scalar_lea.vmem %s824_s19, 64  ;;  %s19665_s22 = smov [#allocation20]  }
 0x15b   : > { %p19404_p7 = scmp.ne.s32.totalorder %s824_s19, %s19403_s25  ;;  %s19408_s21 = sshll.u32 %s19665_s22, 4  ;;  %s19409_s21 = int_to_ptr.vmem [resolvable:$false] %s19408_s21 }
 0x15c   : > { %s19410_s8 = scalar_lea.vmem %s19409_s21, 128  ;;  %p19411_p11 = scmp.lt.s32.totalorder %s824_s19, %s19409_s21 }
 0x15d   : > { %p19406_p2 = pnand %p19404_p7, %p19889_p13  ;;  %p19412_p8 = scmp.lt.s32.totalorder %s19410_s8, %s19403_s25 }
 0x15f   : > { %p19407_p1 = pneg %p19406_p2  ;;  %p19413_p10 = por %p19412_p8, %p19411_p11 }
 0x161   : > { %p19414_p6 = pnand %p19413_p10, %p19407_p1 }
 0x163   : > { %19417 = shalt.err (!%p19414_p6)
}
 0x164   : > { %p22672_p12 = scmp.ne.s32.totalorder %s22654_s26, 0  ;;  %s19666_s0 = smov [#allocation8]  }
 0x165   : > { %s580_s2 = sshll.u32 %s19666_s0, 4  ;;  %s19667_s3 = smov [#allocation9]   ;;  %s581_s2 = int_to_ptr.vmem [resolvable:$true] %s580_s2 }
 0x166   : > { %17329 = dma.hbm_to_vmem [thread:$0]  (!%p22672_p12), %s20179_s6, 64, %s824_s19, %s19883_s1  }
 0x167   : > { %s590_s27 = sshll.u32 %s19667_s3, 4  ;;  %s22673_s29 = sld [smem:[#allocation40_spill]]  ;;  %s591_s27 = int_to_ptr.vmem [resolvable:$true] %s590_s27 }
 0x168   : > { %p22674_p8 = scmp.ne.s32.totalorder %s22652_s16, 0 }
 0x16d   : > { %s19418_s15 = scalar_lea.hbm %s22673_s29, 64 }
 0x16e   : > { %p19419_p10 = scmp.ne.s32.totalorder %s22673_s29, %s19418_s15  ;;  %p19425_p0 = scmp.lt.u32.totalorder %s19418_s15, %s22673_s29 }
 0x170   : > { %p19421_p4 = pnand %p19419_p10, %p22674_p8 }
 0x172   : > { %p19422_p3 = pneg %p19421_p4 }
 0x174   : > { %p19427_p5 = pnand %p19425_p0, %p19422_p3 }
 0x176   : > { %19430 = shalt.err (!%p19427_p5)
}
 0x177   : > { %s19431_s6 = scalar_lea.vmem %s581_s2, 64  ;;  %p19439_p1 = scmp.lt.s32.totalorder %s581_s2, %s581_s2 }
 0x178   : > { %p19432_p9 = scmp.ne.s32.totalorder %s581_s2, %s19431_s6  ;;  %p19440_p11 = scmp.lt.s32.totalorder %s19431_s6, %s19431_s6 }
 0x17a   : > { %p19434_p7 = pnand %p19432_p9, %p22674_p8  ;;  %p19441_p6 = por %p19440_p11, %p19439_p1 }
 0x17c   : > { %p19435_p2 = pneg %p19434_p7 }
 0x17e   : > { %p19442_p12 = pnand %p19441_p6, %p19435_p2 }
 0x180   : > { %19445 = shalt.err (!%p19442_p12)
}
 0x181   : > { %p22675_p10 = scmp.ne.s32.totalorder %s22649_s4, 0  ;;  %s22676_s3 = sld [smem:[#allocation41_spill]] }
 0x183   : > { %17289 = dma.hbm_to_vmem [thread:$0]  (!%p22675_p10), %s22673_s29, 64, %s581_s2, [#allocation7]  }
 0x187   : > { %s19446_s30 = scalar_lea.hbm %s22676_s3, 1024 }
 0x188   : > { %p19447_p4 = scmp.ne.s32.totalorder %s22676_s3, %s19446_s30  ;;  %p19453_p12 = scmp.lt.u32.totalorder %s19446_s30, %s22676_s3 }
 0x18a   : > { %p19449_p3 = pnand %p19447_p4, %p22674_p8 }
 0x18c   : > { %p19450_p0 = pneg %p19449_p3 }
 0x18e   : > { %p19455_p5 = pnand %p19453_p12, %p19450_p0 }
 0x190   : > { %19458 = shalt.err (!%p19455_p5)
}
 0x191   : > { %s19459_s25 = scalar_lea.vmem %s591_s27, 1024  ;;  %p19467_p1 = scmp.lt.s32.totalorder %s591_s27, %s591_s27 }
 0x192   : > { %p19460_p9 = scmp.ne.s32.totalorder %s591_s27, %s19459_s25  ;;  %p19468_p11 = scmp.lt.s32.totalorder %s19459_s25, %s19459_s25 }
 0x194   : > { %p19462_p7 = pnand %p19460_p9, %p22674_p8  ;;  %p19469_p6 = por %p19468_p11, %p19467_p1 }
 0x196   : > { %p19463_p2 = pneg %p19462_p7 }
 0x198   : > { %p19470_p13 = pnand %p19469_p6, %p19463_p2 }
 0x19a   : > { %19473 = shalt.err (!%p19470_p13)
}
 0x19b   : > { %s19668_s2 = smov 512   ;;  %s19669_s22 = smov 32  }
 0x19c   : > { %17292 = dma.hbm_to_vmem [thread:$0]  (!%p22675_p10), %s22676_s3, 1024, %s591_s27, [#allocation10], %s19668_s2, %s19668_s2, %s19669_s22  }
 0x19d   : > { %s20240_s0 = scalar_lea.hbm %s22580_s14, %s19978_s28  ;;  %s834_s30 = scalar_lea.vmem [#allocation21], %s19975_s24 }
 0x19e   : > { %s842_s20 = sshll.u32 %s834_s30, 4  ;;  %s19474_s15 = scalar_lea.hbm %s20240_s0, 64  ;;  %s843_s20 = int_to_ptr.vmem [resolvable:$true] %s842_s20 }
 0x19f   : > { %p19475_p13 = scmp.ne.s32.totalorder %s20240_s0, %s19474_s15  ;;  %p22677_p4 = scmp.ne.s32.totalorder %s22656_s23, 0 }
 0x1a0   : > { %s19479_s27 = scalar_lea.hbm %s22580_s14, 384  ;;  %p19480_p12 = scmp.lt.u32.totalorder %s20240_s0, %s22580_s14 }
 0x1a1   : > { %p19477_p3 = pnand %p19475_p13, %p22677_p4  ;;  %p19481_p5 = scmp.lt.u32.totalorder %s19479_s27, %s19474_s15 }
 0x1a2   : > { %p19483_p7 = scmp.lt.u32.totalorder %s19474_s15, %s20240_s0 }
 0x1a3   : > { %p19478_p0 = pneg %p19477_p3  ;;  %p19482_p9 = por %p19481_p5, %p19480_p12 }
 0x1a5   : > { %p19484_p2 = por %p19483_p7, %p19482_p9 }
 0x1a7   : > { %p19485_p1 = pnand %p19484_p2, %p19478_p0 }
 0x1a9   : > { %19488 = shalt.err (!%p19485_p1)
}
 0x1aa   : > { %s19489_s22 = scalar_lea.vmem %s843_s20, 64  ;;  %s19670_s6 = smov [#allocation21]  }
 0x1ab   : > { %p19490_p11 = scmp.ne.s32.totalorder %s843_s20, %s19489_s22  ;;  %s19494_s19 = sshll.u32 %s19670_s6, 4  ;;  %s19495_s19 = int_to_ptr.vmem [resolvable:$false] %s19494_s19 }
 0x1ac   : > { %s19496_s21 = scalar_lea.vmem %s19495_s19, 128  ;;  %p19497_p3 = scmp.lt.s32.totalorder %s843_s20, %s19495_s19 }
 0x1ad   : > { %p19492_p6 = pnand %p19490_p11, %p22677_p4  ;;  %p19498_p10 = scmp.lt.s32.totalorder %s19496_s21, %s19489_s22 }
 0x1af   : > { %p19493_p13 = pneg %p19492_p6  ;;  %p19499_p8 = por %p19498_p10, %p19497_p3 }
 0x1b1   : > { %p19500_p5 = pnand %p19499_p8, %p19493_p13 }
 0x1b3   : > { %19503 = shalt.err (!%p19500_p5)
}
 0x1b4   : > { %p22678_p12 = scmp.ne.s32.totalorder %s22654_s26, 0  ;;  %s19671_s8 = smov [#allocation23]  }
 0x1b5   : > { %s607_s30 = sshll.u32 %s19671_s8, 4  ;;  %s19672_s15 = smov [#allocation24]   ;;  %s608_s30 = int_to_ptr.vmem [resolvable:$true] %s607_s30 }
 0x1b6   : > { %17332 = dma.hbm_to_vmem [thread:$0]  (!%p22678_p12), %s20240_s0, 64, %s843_s20, %s19883_s1  }
 0x1b7   : > { %s618_s7 = sshll.u32 %s19672_s15, 4  ;;  %s19504_s25 = scalar_lea.hbm %s22583_s17, 16  ;;  %s619_s7 = int_to_ptr.vmem [resolvable:$true] %s618_s7 }
 0x1b8   : > { %p19505_p8 = scmp.ne.s32.totalorder %s22583_s17, %s19504_s25  ;;  %p22679_p10 = scmp.ne.s32.totalorder %s22652_s16, 0 }
 0x1b9   : > { %p19511_p7 = scmp.lt.u32.totalorder %s19504_s25, %s22583_s17 }
 0x1ba   : > { %p19507_p0 = pnand %p19505_p8, %p22679_p10 }
 0x1bc   : > { %p19508_p9 = pneg %p19507_p0 }
 0x1be   : > { %p19513_p2 = pnand %p19511_p7, %p19508_p9 }
 0x1c0   : > { %19516 = shalt.err (!%p19513_p2)
}
 0x1c1   : > { %s19517_s0 = scalar_lea.vmem %s608_s30, 16  ;;  %s19524_s20 = scalar_lea.vmem %s608_s30, 32 }
 0x1c2   : > { %p19518_p1 = scmp.ne.s32.totalorder %s608_s30, %s19517_s0  ;;  %p19525_p13 = scmp.lt.s32.totalorder %s608_s30, %s608_s30 }
 0x1c3   : > { %p19526_p3 = scmp.lt.s32.totalorder %s19524_s20, %s19517_s0 }
 0x1c4   : > { %p19520_p11 = pnand %p19518_p1, %p22679_p10 }
 0x1c5   : > { %p19527_p5 = por %p19526_p3, %p19525_p13 }
 0x1c6   : > { %p19521_p6 = pneg %p19520_p11 }
 0x1c8   : > { %p19528_p12 = pnand %p19527_p5, %p19521_p6 }
 0x1ca   : > { %19531 = shalt.err (!%p19528_p12)
}
 0x1cb   : > { %p22680_p8 = scmp.ne.s32.totalorder %s22649_s4, 0  ;;  %s22681_s27 = sld [smem:[#allocation49_spill]] }
 0x1cd   : > { %17295 = dma.hbm_to_vmem [thread:$0]  (!%p22680_p8), %s22583_s17, 16, %s608_s30, [#allocation7]  }
 0x1d1   : > { %s19532_s25 = scalar_lea.hbm %s22681_s27, 16 }
 0x1d2   : > { %p19533_p0 = scmp.ne.s32.totalorder %s22681_s27, %s19532_s25  ;;  %p19539_p12 = scmp.lt.u32.totalorder %s19532_s25, %s22681_s27 }
 0x1d4   : > { %p19535_p9 = pnand %p19533_p0, %p22679_p10 }
 0x1d6   : > { %p19536_p7 = pneg %p19535_p9 }
 0x1d8   : > { %p19541_p2 = pnand %p19539_p12, %p19536_p7 }
 0x1da   : > { %19544 = shalt.err (!%p19541_p2)
}
 0x1db   : > { %s19545_s0 = scalar_lea.vmem %s619_s7, 16  ;;  %s19552_s30 = scalar_lea.vmem %s619_s7, 32 }
 0x1dc   : > { %p19546_p1 = scmp.ne.s32.totalorder %s619_s7, %s19545_s0  ;;  %p19553_p13 = scmp.lt.s32.totalorder %s619_s7, %s619_s7 }
 0x1dd   : > { %p19554_p3 = scmp.lt.s32.totalorder %s19552_s30, %s19545_s0 }
 0x1de   : > { %p19548_p11 = pnand %p19546_p1, %p22679_p10 }
 0x1df   : > { %p19555_p5 = por %p19554_p3, %p19553_p13 }
 0x1e0   : > { %p19549_p6 = pneg %p19548_p11 }
 0x1e2   : > { %p19556_p4 = pnand %p19555_p5, %p19549_p6 }
 0x1e4   : > { %19559 = shalt.err (!%p19556_p4)
}
 0x1e5   : > { %17298 = dma.hbm_to_vmem [thread:$0]  (!%p22680_p8), %s22681_s27, 16, %s619_s7, [#allocation10]  }
 0x1e6   : > { %s22682_s16 = sld [smem:[#allocation47_spill]]  ;;  %s853_s25 = scalar_lea.vmem [#allocation22], %s19975_s24 }
 0x1e7   : > { %s861_s2 = sshll.u32 %s853_s25, 4  ;;  %p22683_p10 = scmp.ne.s32.totalorder %s22656_s23, 0  ;;  %s862_s2 = int_to_ptr.vmem [resolvable:$true] %s861_s2 }
 0x1ec   : > { %s20301_s5 = scalar_lea.hbm %s22682_s16, %s19978_s28  ;;  %s19565_s7 = scalar_lea.hbm %s22682_s16, 384 }
 0x1ed   : > { %s19560_s4 = scalar_lea.hbm %s20301_s5, 64  ;;  %p19566_p8 = scmp.lt.u32.totalorder %s20301_s5, %s22682_s16 }
 0x1ee   : > { %p19561_p4 = scmp.ne.s32.totalorder %s20301_s5, %s19560_s4  ;;  %p19567_p7 = scmp.lt.u32.totalorder %s19565_s7, %s19560_s4 }
 0x1ef   : > { %p19569_p2 = scmp.lt.u32.totalorder %s19560_s4, %s20301_s5 }
 0x1f0   : > { %p19563_p0 = pnand %p19561_p4, %p22683_p10  ;;  %p19568_p12 = por %p19567_p7, %p19566_p8 }
 0x1f2   : > { %p19564_p9 = pneg %p19563_p0  ;;  %p19570_p1 = por %p19569_p2, %p19568_p12 }
 0x1f4   : > { %p19571_p11 = pnand %p19570_p1, %p19564_p9 }
 0x1f6   : > { %19574 = shalt.err (!%p19571_p11)
}
 0x1f7   : > { %s19575_s24 = scalar_lea.vmem %s862_s2, 64  ;;  %s19673_s28 = smov [#allocation22]  }
 0x1f8   : > { %p19576_p6 = scmp.ne.s32.totalorder %s862_s2, %s19575_s24  ;;  %s19580_s30 = sshll.u32 %s19673_s28, 4  ;;  %s19581_s30 = int_to_ptr.vmem [resolvable:$false] %s19580_s30 }
 0x1f9   : > { %s19582_s20 = scalar_lea.vmem %s19581_s30, 128  ;;  %p19583_p5 = scmp.lt.s32.totalorder %s862_s2, %s19581_s30 }
 0x1fa   : > { %p19578_p13 = pnand %p19576_p6, %p22683_p10  ;;  %p19584_p4 = scmp.lt.s32.totalorder %s19582_s20, %s19575_s24 }
 0x1fc   : > { %p19579_p3 = pneg %p19578_p13  ;;  %p19585_p0 = por %p19584_p4, %p19583_p5 }
 0x1fe   : > { %p19586_p7 = pnand %p19585_p0, %p19579_p3 }
 0x200   : > { %19589 = shalt.err (!%p19586_p7)
}
 0x201   : > { %p22684_p8 = scmp.ne.s32.totalorder %s22654_s26, 0  ;;  %s22685_s21 = sld [smem:[#allocation35_spill]] }
 0x203   : > { %17335 = dma.hbm_to_vmem [thread:$0]  (!%p22684_p8), %s20301_s5, 64, %s862_s2, %s19883_s1  }
 0x207   : > { %p22686_p9 = scmp.ne.s32.totalorder %s22685_s21, 0 }
 0x208   : > { %s22687_s23 = sld [smem:[#allocation33_spill]] (!%p22686_p9) }
 0x209   : > { %870 = sbr.rel (%p22686_p9) target bundleno = 4580 (0x11e4), region = 100 }
 0x20e   : > { %p22688_p10 = scmp.eq.s32.totalorder (!%p22686_p9), %s22687_s23, 0 }
 0x210   : > { %19607 = dma.done.wait (%p22688_p10), [#allocation5], 256   ;;  %p22689_p12 = pmov %p22688_p10 }
 0x211   : > { %p22690_p2 = pmov %p22688_p10 }
 0x212   : > { %19609 = vsyncadd (%p22689_p12), [#allocation5], 4294967040 }
 0x213   : > { %19611 = dma.done.wait (%p22690_p2), [#allocation7], 3904   ;;  %p22691_p1 = pmov %p22690_p2 }
 0x215   : > { %19613 = vsyncadd (%p22691_p1), [#allocation7], 4294963392  ;;  %p22692_p11 = pmov %p22691_p1 }
 0x216   : > { %p22693_p6 = pmov %p22691_p1 }
 0x217   : > { %19615 = dma.done.wait (%p22692_p11), [#allocation10], 1024  }
 0x218   : > { %19617 = vsyncadd (%p22693_p6), [#allocation10], 4294966272  ;;  %s22694_s26 = sld [smem:[#allocation31_spill]]  ;;  %s22695_s1 = sld [smem:[#allocation34_spill]] }
 0x219   : > { %s888_s8 = sand.u32 1, %s22687_s23  }
 0x21a   : > { %s889_s25 = scalar_lea.sflag [#allocation5], %s888_s8 }
 0x21e   : > { %s890_s15 = sand.u32 1, %s22694_s26   ;;  %p22696_p13 = scmp.ne.s32.totalorder %s22695_s1, 0 }
 0x21f   : > { %s17230_s5 = smul.u32 3072, %s890_s15 }
 0x221   : > { %s20338_s2 = scalar_lea.vmem [#allocation11], %s17230_s5 }
 0x222   : > { %19619 = dma.done.wait (%p22696_p13), %s889_s25, 197440  }
 0x223   : > { %19621 = vsyncadd (%p22696_p13), %s889_s25, 4294769856  ;;  %s17231_s4 = smul.u32 12, %s890_s15  ;;  %s15238_s22 = sshll.u32 %s890_s15, 10 }
 0x224   : > { %s20344_s6 = sshll.u32 %s890_s15, 2  ;;  %s15242_s7 = sshll.u32 %s890_s15, 12 }
 0x225   : > { %s15243_s19 = sshll.u32 %s890_s15, 4  ;;  %s20346_s0 = scalar_lea.vmem [#allocation12], %s17231_s4 }
 0x226   : > { %s20348_s24 = scalar_lea.vmem [#allocation13], %s15238_s22  ;;  %s919_s28 = scalar_lea.vmem [#allocation14], %s20344_s6 }
 0x227   : > { %s928_s30 = scalar_lea.vmem [#allocation15], %s20344_s6  ;;  %s937_s20 = scalar_lea.vmem [#allocation16], %s20344_s6 }
 0x228   : > { %s20353_s21 = scalar_lea.vmem [#allocation17], %s15242_s7  ;;  %s20355_s26 = scalar_lea.vmem [#allocation18], %s15243_s19 }
 0x229   : > { %s20357_s1 = scalar_lea.vmem [#allocation19], %s15242_s7  ;;  %s973_s8 = scalar_lea.vmem [#allocation20], %s20344_s6 }
 0x22a   : > { %s982_s5 = scalar_lea.vmem [#allocation21], %s20344_s6  ;;  %s991_s25 = scalar_lea.vmem [#allocation22], %s20344_s6 }
 0x22b   : > { %p22697_p3 = pmov %p22691_p1 }
 0x22c   : > { %p22698_p5 = pmov %p22691_p1 }
 0x22d   : > { %19623 = dma.done.wait (%p22697_p3), [#allocation7], 16  }
 0x22e   : > { %19625 = vsyncadd (%p22698_p5), [#allocation7], 4294967280  ;;  %p22699_p4 = pmov %p22691_p1 }
 0x22f   : > { %p22700_p0 = pmov %p22691_p1 }
 0x230   : > { %19627 = dma.done.wait (%p22699_p4), [#allocation10], 16  }
 0x231   : > { %19629 = vsyncadd (%p22700_p0), [#allocation10], 4294967280  ;;  %p22701_p7 = scmp.ne.s32.totalorder %s22687_s23, 0 }
 0x232   : > { %v17400_v1 = vld [vmem:[#allocation6 + $0x4] ss:$16 sps:$4 sm:$0xff] (!%p22701_p7)   ;;  %v17402_v2 = vld [vmem:[#allocation6 + $0xc] ss:$16 sps:$4 sm:$0xff] (!%p22701_p7)   ;;  %v19674_v3 = vmov (!%p22701_p7), 0   ;;  %vm1320_vm0 = vcmask (!%p22701_p7), 1041408   ;;  %v1146_v41 = vlaneseq (!%p22701_p7) }
 0x233   : > { %1110 = sbr.rel (%p22701_p7) target bundleno = 818 (0x332), region = 176  ;;  %1365 = vmatprep.mubr.bf16.mxu0 (!%p22701_p7), %v19674_v3  ;;  %1408 = vmatprep.mubr.bf16.mxu1 (!%p22701_p7), %v19674_v3  ;;  %v17404_v4 = vld [vmem:[#allocation6] ss:$16 sps:$4 sm:$0xff] (!%p22701_p7)   ;;  %v17405_v5 = vld [vmem:[#allocation6 + $0x8] ss:$16 sps:$4 sm:$0xff] (!%p22701_p7)   ;;  %vm1316_vm1 = vcmask (!%p22701_p7), 949248  }
 0x234   : > { %1333 = vmatprep.subr.bf16.mxu0 (!%p22701_p7), %v17400_v1  ;;  %1376 = vmatprep.subr.bf16.mxu1 (!%p22701_p7), %v17402_v2  ;;  %v17406_v6 = vld [vmem:[#allocation6 + $0x24] ss:$16 sps:$4 sm:$0xff] (!%p22701_p7)   ;;  %v17408_v7 = vld [vmem:[#allocation6 + $0x2c] ss:$16 sps:$4 sm:$0xff] (!%p22701_p7)   ;;  %v17410_v8 = vld [vmem:[#allocation6 + $0x20] ss:$16 sps:$4 sm:$0xff] (!%p22701_p7)  }
 0x235   : > { %1334 = vmatpush1.bf16.msra.mxu0 (!%p22701_p7), %v17404_v4  ;;  %1377 = vmatpush1.bf16.msra.mxu1 (!%p22701_p7), %v17405_v5  ;;  %v17411_v9 = vld [vmem:[#allocation6 + $0x28] ss:$16 sps:$4 sm:$0xff] (!%p22701_p7)   ;;  %v17412_v10 = vld [vmem:[#allocation6 + $0x44] ss:$16 sps:$4 sm:$0xff] (!%p22701_p7)   ;;  %v17414_v11 = vld [vmem:[#allocation6 + $0x4c] ss:$16 sps:$4 sm:$0xff] (!%p22701_p7)  }
 0x236   : > { %1335 = vmatprep.subr.bf16.mxu0 (!%p22701_p7), %v17406_v6  ;;  %1378 = vmatprep.subr.bf16.mxu1 (!%p22701_p7), %v17408_v7  ;;  %v17416_v12 = vld [vmem:[#allocation6 + $0x40] ss:$16 sps:$4 sm:$0xff] (!%p22701_p7)   ;;  %v17417_v13 = vld [vmem:[#allocation6 + $0x48] ss:$16 sps:$4 sm:$0xff] (!%p22701_p7)   ;;  %v17418_v14 = vld [vmem:[#allocation6 + $0x64] ss:$16 sps:$4 sm:$0xff] (!%p22701_p7)  }
 0x237   : > { %v17420_v15 = vld [vmem:[#allocation6 + $0x6c] ss:$16 sps:$4 sm:$0xff] (!%p22701_p7)   ;;  %v17422_v16 = vld [vmem:[#allocation6 + $0x60] ss:$16 sps:$4 sm:$0xff] (!%p22701_p7)   ;;  %v17423_v17 = vld [vmem:[#allocation6 + $0x68] ss:$16 sps:$4 sm:$0xff] (!%p22701_p7)  }
 0x238   : > { %v17424_v18 = vld [vmem:[#allocation6 + $0x84] ss:$16 sps:$4 sm:$0xff] (!%p22701_p7)   ;;  %v17426_v19 = vld [vmem:[#allocation6 + $0x8c] ss:$16 sps:$4 sm:$0xff] (!%p22701_p7)   ;;  %v17428_v20 = vld [vmem:[#allocation6 + $0x80] ss:$16 sps:$4 sm:$0xff] (!%p22701_p7)  }
 0x239   : > { %1336 = vmatpush1.bf16.msra.mxu0 (!%p22701_p7), %v17410_v8  ;;  %1379 = vmatpush1.bf16.msra.mxu1 (!%p22701_p7), %v17411_v9  ;;  %v17429_v21 = vld [vmem:[#allocation6 + $0x88] ss:$16 sps:$4 sm:$0xff] (!%p22701_p7)   ;;  %v17430_v22 = vld [vmem:[#allocation6 + $0xa4] ss:$16 sps:$4 sm:$0xff] (!%p22701_p7)   ;;  %v17432_v23 = vld [vmem:[#allocation6 + $0xac] ss:$16 sps:$4 sm:$0xff] (!%p22701_p7)  }
 0x23a   : > { %1337 = vmatprep.subr.bf16.mxu0 %v17412_v10  ;;  %1380 = vmatprep.subr.bf16.mxu1 %v17414_v11  ;;  %v17434_v24 = vld [vmem:[#allocation6 + $0xa0] ss:$16 sps:$4 sm:$0xff]   ;;  %v17435_v25 = vld [vmem:[#allocation6 + $0xa8] ss:$16 sps:$4 sm:$0xff]   ;;  %v17436_v26 = vld [vmem:[#allocation6 + $0xc4] ss:$16 sps:$4 sm:$0xff]  }
 0x23b   : > { %v17438_v27 = vld [vmem:[#allocation6 + $0xcc] ss:$16 sps:$4 sm:$0xff]   ;;  %v1142_v28 = vld [vmem:[#allocation6 + $0xe0] sm:$0x33]  ;;  %v17441_v31 = vld [vmem:[#allocation6 + $0xc8] ss:$16 sps:$4 sm:$0xff]  }
 0x23c   : > { %v1143_v29 = vld [vmem:[#allocation6 + $0xe8] sm:$0x33]  ;;  %v17440_v30 = vld [vmem:[#allocation6 + $0xc0] ss:$16 sps:$4 sm:$0xff]   ;;  %v15280_v32 = vcombine.high %v1142_v28, %v1142_v28  ;;  %v15279_v34 = vcombine.low %v1142_v28, %v1142_v28  ;;  %v1112_v37 = vld [vmem:[#allocation4 + $0x8] sm:$0xff]  ;;  %v1147_v42 = vshrl.u32 %v1146_v41, 7 }
 0x23d   : > { %1338 = vmatpush1.bf16.msra.mxu0 %v17416_v12  ;;  %1381 = vmatpush1.bf16.msra.mxu1 %v17417_v13  ;;  %v15282_v33 = vcombine.high %v1143_v29, %v1143_v29  ;;  %v15281_v35 = vcombine.low %v1143_v29, %v1143_v29  ;;  %v1111_v36 = vld [vmem:[#allocation4] sm:$0xff]  ;;  %v1429_v59 = vld [vmem:[#allocation9 + $0x10] sm:$0xff]  ;;  %v1428_v61 = vld [vmem:[#allocation9 + $0x8] sm:$0xff] }
 0x23e   : > { %1339 = vmatprep.subr.bf16.mxu0 %v17418_v14  ;;  %1382 = vmatprep.subr.bf16.mxu1 %v17420_v15  ;;  %v1322_v38 = vsel %vm1320_vm0, %v15279_v34, 0  ;;  %v1113_v40 = vpack.c.bf16 %v1112_v37, %v1111_v36  ;;  %v1148_v43 = vsub.s32 0, %v1147_v42  ;;  %v1156_v44 = vsub.s32 2, %v1147_v42  ;;  %v1144_v45 = vld [vmem:[#allocation8] sm:$0xf]  ;;  %v1427_v55 = vld [vmem:[#allocation9] sm:$0xff] }
 0x23f   : > { %v1328_v39 = vsel %vm1320_vm0, %v15281_v35, 0  ;;  %v1152_v46 = vsub.s32 1, %v1147_v42  ;;  %v1160_v47 = vsub.s32 3, %v1147_v42  ;;  %v1430_v63 = vld [vmem:[#allocation9 + $0x18] sm:$0xff]  ;;  %v1431_v10 = vld [vmem:[#allocation9 + $0x20] sm:$0xff]  ;;  %v1433_v11 = vld [vmem:[#allocation9 + $0x30] sm:$0xff] }
 0x240   : > { %v1149_v48 = vrot.slane %v1144_v45, %v1148_v43  ;;  %v1157_v49 = vrot.slane %v1144_v45, %v1156_v44 }
 0x241   : > { %1340 = vmatpush1.bf16.msra.mxu0 %v17422_v16  ;;  %1383 = vmatpush1.bf16.msra.mxu1 %v17423_v17  ;;  %v1153_v50 = vrot.slane %v1144_v45, %v1152_v46  ;;  %v1161_v51 = vrot.slane %v1144_v45, %v1160_v47 }
 0x242   : > { %1341 = vmatprep.subr.bf16.mxu0 %v17424_v18  ;;  %1384 = vmatprep.subr.bf16.mxu1 %v17426_v19  ;;  %v1432_v18 = vld [vmem:[#allocation9 + $0x28] sm:$0xff]  ;;  %v1434_v19 = vld [vmem:[#allocation9 + $0x38] sm:$0xff] }
 0x245   : > { %1342 = vmatpush1.bf16.msra.mxu0 %v17428_v20  ;;  %1385 = vmatpush1.bf16.msra.mxu1 %v17429_v21 }
 0x246   : > { %1343 = vmatprep.subr.bf16.mxu0 %v17430_v22  ;;  %1386 = vmatprep.subr.bf16.mxu1 %v17432_v23 }
 0x249   : > { %1344 = vmatpush1.bf16.msra.mxu0 %v17434_v24  ;;  %1387 = vmatpush1.bf16.msra.mxu1 %v17435_v25 }
 0x24a   : > { %1345 = vmatprep.subr.bf16.mxu0 %v17436_v26  ;;  %1388 = vmatprep.subr.bf16.mxu1 %v17438_v27 }
 0x24d   : > { %1346 = vmatpush1.bf16.msra.mxu0 %v17440_v30  ;;  %1389 = vmatpush1.bf16.msra.mxu1 %v17441_v31 }
 0x24e   : > { %15283 = vmatprep.subr.msk.bf16.mxu0 %vm1320_vm0, %v15280_v32  ;;  %15285 = vmatprep.subr.msk.bf16.mxu1 %vm1320_vm0, %v15282_v33 }
 0x251   : > { %1348 = vmatpush1.bf16.msra.mxu0 %v1322_v38  ;;  %1391 = vmatpush1.bf16.msra.mxu1 %v1328_v39 }
 0x254   : > { %15284 = vmatmul.mubr.msk.bf16.vlgmr.msra.gmra.mrb[0].mxu0 %vm1316_vm1, %v1113_v40  ;;  %15286 = vmatmul.mubr.msk.bf16.vlgmr.msra.gmra.mrb[0].mxu1 %vm1316_vm1, %v1113_v40 }
 0x327   : > { %v1367_v52 = vpop.f32.mrb[0].mxu0  ;;  %v1410_v53 = vpop.f32.mrb[0].mxu1 }
 0x328   : > { %v1368_v54 = vadd.f32 %v1367_v52, %v1149_v48  ;;  %v1411_v56 = vadd.f32 %v1410_v53, %v1157_v49  ;;  %v1369_v57 = vpop.f32.mrb[1].mxu0  ;;  %v1412_v58 = vpop.f32.mrb[1].mxu1 }
 0x329   : > { %v1370_v60 = vadd.f32 %v1369_v57, %v1153_v50  ;;  %v1413_v62 = vadd.f32 %v1412_v58, %v1161_v51  ;;  %v1371_v0 = vpop.f32.mrb[2].mxu0  ;;  %v1414_v1 = vpop.f32.mrb[2].mxu1 }
 0x32a   : > { %v1419_v2 = vmul.f32 22.627417, %v1368_v54  ;;  %v1421_v3 = vmul.f32 22.627417, %v1411_v56  ;;  %v1372_v4 = vadd.f32 %v1371_v0, %v1149_v48  ;;  %v1415_v5 = vadd.f32 %v1414_v1, %v1157_v49  ;;  %v1373_v6 = vpop.f32.mrb[3].mxu0  ;;  %v1416_v7 = vpop.f32.mrb[3].mxu1 }
 0x32b   : > { %v1420_v8 = vmul.f32 22.627417, %v1370_v60  ;;  %v1422_v9 = vmul.f32 22.627417, %v1413_v62  ;;  %v1374_v12 = vadd.f32 %v1373_v6, %v1153_v50  ;;  %v1417_v13 = vadd.f32 %v1416_v7, %v1161_v51 }
 0x32c   : > { %v1435_v14 = vadd.f32 %v1427_v55, %v1419_v2  ;;  %v1437_v15 = vadd.f32 %v1429_v59, %v1421_v3  ;;  %v1423_v16 = vmul.f32 22.627417, %v1372_v4  ;;  %v1425_v17 = vmul.f32 22.627417, %v1415_v5 }
 0x32d   : > { %v1436_v20 = vadd.f32 %v1428_v61, %v1420_v8  ;;  %v1438_v21 = vadd.f32 %v1430_v63, %v1422_v9  ;;  %v1424_v22 = vmul.f32 22.627417, %v1374_v12  ;;  %v1426_v23 = vmul.f32 22.627417, %v1417_v13 }
 0x32e   : > { %1443 = vst [vmem:[#allocation2] sm:$0xff] %v1435_v14  ;;  %1445 = vst [vmem:[#allocation2 + $0x10] sm:$0xff] %v1437_v15  ;;  %v1439_v24 = vadd.f32 %v1431_v10, %v1423_v16  ;;  %v1441_v25 = vadd.f32 %v1433_v11, %v1425_v17 }
 0x32f   : > { %1444 = vst [vmem:[#allocation2 + $0x8] sm:$0xff] %v1436_v20  ;;  %1446 = vst [vmem:[#allocation2 + $0x18] sm:$0xff] %v1438_v21  ;;  %v1440_v26 = vadd.f32 %v1432_v18, %v1424_v22  ;;  %v1442_v27 = vadd.f32 %v1434_v19, %v1426_v23 }
 0x330   : > { %1447 = vst [vmem:[#allocation2 + $0x20] sm:$0xff] %v1439_v24  ;;  %1449 = vst [vmem:[#allocation2 + $0x30] sm:$0xff] %v1441_v25 }
 0x331   : > { %1448 = vst [vmem:[#allocation2 + $0x28] sm:$0xff] %v1440_v26  ;;  %1450 = vst [vmem:[#allocation2 + $0x38] sm:$0xff] %v1442_v27 }
 0x332 PF: > { %v17446_v28 = vld [vmem:[%s20338_s2 + $0x4] ss:$48 sps:$4 sm:$0xff]   ;;  %v17448_v29 = vld [vmem:[%s20338_s2 + $0xc] ss:$48 sps:$4 sm:$0xff]   ;;  %v17450_v30 = vld [vmem:[%s20338_s2] ss:$48 sps:$4 sm:$0xff]  }
 0x333   : > { %3831 = vmatprep.subr.bf16.mxu0 %v17446_v28  ;;  %v17451_v31 = vld [vmem:[%s20338_s2 + $0x8] ss:$48 sps:$4 sm:$0xff]   ;;  %3917 = vmatprep.subr.bf16.mxu1 %v17448_v29  ;;  %v17452_v32 = vld [vmem:[%s20338_s2 + $0x64] ss:$48 sps:$4 sm:$0xff]   ;;  %v17454_v33 = vld [vmem:[%s20338_s2 + $0x6c] ss:$48 sps:$4 sm:$0xff]  }
 0x334   : > { %3832 = vmatpush1.bf16.msra.mxu0 %v17450_v30  ;;  %3918 = vmatpush1.bf16.msra.mxu1 %v17451_v31  ;;  %v17456_v34 = vld [vmem:[%s20338_s2 + $0x60] ss:$48 sps:$4 sm:$0xff]   ;;  %v17457_v35 = vld [vmem:[%s20338_s2 + $0x68] ss:$48 sps:$4 sm:$0xff]   ;;  %v17458_v36 = vld [vmem:[%s20338_s2 + $0xc4] ss:$48 sps:$4 sm:$0xff]  }
 0x335   : > { %3833 = vmatprep.subr.bf16.mxu0 %v17452_v32  ;;  %3919 = vmatprep.subr.bf16.mxu1 %v17454_v33  ;;  %v17460_v37 = vld [vmem:[%s20338_s2 + $0xcc] ss:$48 sps:$4 sm:$0xff]   ;;  %v17462_v38 = vld [vmem:[%s20338_s2 + $0xc0] ss:$48 sps:$4 sm:$0xff]   ;;  %v17463_v39 = vld [vmem:[%s20338_s2 + $0xc8] ss:$48 sps:$4 sm:$0xff]  }
 0x336   : > { %v17464_v40 = vld [vmem:[%s20338_s2 + $0x124] ss:$48 sps:$4 sm:$0xff]   ;;  %v17466_v41 = vld [vmem:[%s20338_s2 + $0x12c] ss:$48 sps:$4 sm:$0xff]   ;;  %v17468_v42 = vld [vmem:[%s20338_s2 + $0x120] ss:$48 sps:$4 sm:$0xff]  }
 0x337   : > { %v17469_v43 = vld [vmem:[%s20338_s2 + $0x128] ss:$48 sps:$4 sm:$0xff]   ;;  %v17470_v44 = vld [vmem:[%s20338_s2 + $0x184] ss:$48 sps:$4 sm:$0xff]   ;;  %v17472_v45 = vld [vmem:[%s20338_s2 + $0x18c] ss:$48 sps:$4 sm:$0xff]  }
 0x338   : > { %3834 = vmatpush1.bf16.msra.mxu0 %v17456_v34  ;;  %3920 = vmatpush1.bf16.msra.mxu1 %v17457_v35  ;;  %v17474_v46 = vld [vmem:[%s20338_s2 + $0x180] ss:$48 sps:$4 sm:$0xff]   ;;  %v17475_v47 = vld [vmem:[%s20338_s2 + $0x188] ss:$48 sps:$4 sm:$0xff]   ;;  %v17476_v48 = vld [vmem:[%s20338_s2 + $0x1e4] ss:$48 sps:$4 sm:$0xff]  }
 0x339   : > { %3835 = vmatprep.subr.bf16.mxu0 %v17458_v36  ;;  %3921 = vmatprep.subr.bf16.mxu1 %v17460_v37  ;;  %v17478_v49 = vld [vmem:[%s20338_s2 + $0x1ec] ss:$48 sps:$4 sm:$0xff]   ;;  %v17480_v50 = vld [vmem:[%s20338_s2 + $0x1e0] ss:$48 sps:$4 sm:$0xff]   ;;  %v17481_v51 = vld [vmem:[%s20338_s2 + $0x1e8] ss:$48 sps:$4 sm:$0xff]  }
 0x33a   : > { %v17482_v52 = vld [vmem:[%s20338_s2 + $0x244] ss:$48 sps:$4 sm:$0xff]   ;;  %v17484_v53 = vld [vmem:[%s20338_s2 + $0x24c] ss:$48 sps:$4 sm:$0xff]   ;;  %v17486_v54 = vld [vmem:[%s20338_s2 + $0x240] ss:$48 sps:$4 sm:$0xff]  }
 0x33b   : > { %v17487_v55 = vld [vmem:[%s20338_s2 + $0x248] ss:$48 sps:$4 sm:$0xff]   ;;  %v17488_v56 = vld [vmem:[%s20338_s2 + $0x2a4] ss:$48 sps:$4 sm:$0xff]   ;;  %v17490_v57 = vld [vmem:[%s20338_s2 + $0x2ac] ss:$48 sps:$4 sm:$0xff]  }
 0x33c   : > { %3836 = vmatpush1.bf16.msra.mxu0 %v17462_v38  ;;  %3922 = vmatpush1.bf16.msra.mxu1 %v17463_v39  ;;  %v17492_v58 = vld [vmem:[%s20338_s2 + $0x2a0] ss:$48 sps:$4 sm:$0xff]   ;;  %v17493_v59 = vld [vmem:[%s20338_s2 + $0x2a8] ss:$48 sps:$4 sm:$0xff]   ;;  %v17494_v60 = vld [vmem:[%s20338_s2 + $0x304] ss:$48 sps:$4 sm:$0xff]  }
 0x33d   : > { %3837 = vmatprep.subr.bf16.mxu0 %v17464_v40  ;;  %3923 = vmatprep.subr.bf16.mxu1 %v17466_v41  ;;  %v17496_v61 = vld [vmem:[%s20338_s2 + $0x30c] ss:$48 sps:$4 sm:$0xff]   ;;  %v17498_v62 = vld [vmem:[%s20338_s2 + $0x300] ss:$48 sps:$4 sm:$0xff]   ;;  %v17499_v63 = vld [vmem:[%s20338_s2 + $0x308] ss:$48 sps:$4 sm:$0xff]  }
 0x33e   : > { %v17500_v0 = vld [vmem:[%s20338_s2 + $0x364] ss:$48 sps:$4 sm:$0xff]   ;;  %v17502_v1 = vld [vmem:[%s20338_s2 + $0x36c] ss:$48 sps:$4 sm:$0xff]   ;;  %v17504_v2 = vld [vmem:[%s20338_s2 + $0x360] ss:$48 sps:$4 sm:$0xff]  }
 0x33f   : > { %v17505_v3 = vld [vmem:[%s20338_s2 + $0x368] ss:$48 sps:$4 sm:$0xff]   ;;  %v17506_v4 = vld [vmem:[%s20338_s2 + $0x3c4] ss:$48 sps:$4 sm:$0xff]   ;;  %v17508_v5 = vld [vmem:[%s20338_s2 + $0x3cc] ss:$48 sps:$4 sm:$0xff]  }
 0x340   : > { %3838 = vmatpush1.bf16.msra.mxu0 %v17468_v42  ;;  %3924 = vmatpush1.bf16.msra.mxu1 %v17469_v43  ;;  %v17510_v6 = vld [vmem:[%s20338_s2 + $0x3c0] ss:$48 sps:$4 sm:$0xff]   ;;  %v17511_v7 = vld [vmem:[%s20338_s2 + $0x3c8] ss:$48 sps:$4 sm:$0xff]   ;;  %v17512_v8 = vld [vmem:[%s20338_s2 + $0x424] ss:$48 sps:$4 sm:$0xff]  }
 0x341   : > { %3839 = vmatprep.subr.bf16.mxu0 %v17470_v44  ;;  %3925 = vmatprep.subr.bf16.mxu1 %v17472_v45  ;;  %v17514_v9 = vld [vmem:[%s20338_s2 + $0x42c] ss:$48 sps:$4 sm:$0xff]   ;;  %v1452_v10 = vld [vmem:[#allocation2 + $0x8] sm:$0xff]  ;;  %vm19676_vm2 = vmmov 0   ;;  %vm4418_vm3 = vcmask 64512   ;;  %s22702_s23 = sld [smem:[#allocation33_spill]] }
 0x342   : > { %v1456_v11 = vld [vmem:[#allocation2 + $0x28] sm:$0xff]  ;;  %v17520_v16 = vld [vmem:[%s20338_s2 + $0x48c] ss:$48 sps:$4 sm:$0xff]  }
 0x343   : > { %v17516_v12 = vld [vmem:[%s20338_s2 + $0x420] ss:$48 sps:$4 sm:$0xff]   ;;  %v17517_v13 = vld [vmem:[%s20338_s2 + $0x428] ss:$48 sps:$4 sm:$0xff]   ;;  %v20420_v14 = vpack.c.bf16 %v1456_v11, %v1452_v10  ;;  %v17518_v15 = vld [vmem:[%s20338_s2 + $0x484] ss:$48 sps:$4 sm:$0xff]  }
 0x344   : > { %3840 = vmatpush1.bf16.msra.mxu0 %v17474_v46  ;;  %3926 = vmatpush1.bf16.msra.mxu1 %v17475_v47  ;;  %v17522_v17 = vld [vmem:[%s20338_s2 + $0x480] ss:$48 sps:$4 sm:$0xff]   ;;  %v17523_v18 = vld [vmem:[%s20338_s2 + $0x488] ss:$48 sps:$4 sm:$0xff]   ;;  %v17524_v19 = vld [vmem:[%s20338_s2 + $0x4e4] ss:$48 sps:$4 sm:$0xff]  }
 0x345   : > { %3841 = vmatprep.subr.bf16.mxu0 %v17476_v48  ;;  %3927 = vmatprep.subr.bf16.mxu1 %v17478_v49  ;;  %v17526_v20 = vld [vmem:[%s20338_s2 + $0x4ec] ss:$48 sps:$4 sm:$0xff]   ;;  %v17528_v21 = vld [vmem:[%s20338_s2 + $0x4e0] ss:$48 sps:$4 sm:$0xff]   ;;  %v17529_v22 = vld [vmem:[%s20338_s2 + $0x4e8] ss:$48 sps:$4 sm:$0xff]  }
 0x346   : > { %3863 = vmatprep.mubr.bf16.mxu0 %v20420_v14  ;;  %3949 = vmatprep.mubr.bf16.mxu1 %v20420_v14  ;;  %v17530_v23 = vld [vmem:[%s20338_s2 + $0x544] ss:$48 sps:$4 sm:$0xff]   ;;  %v17532_v24 = vld [vmem:[%s20338_s2 + $0x54c] ss:$48 sps:$4 sm:$0xff]   ;;  %v17534_v25 = vld [vmem:[%s20338_s2 + $0x540] ss:$48 sps:$4 sm:$0xff]  }
 0x347   : > { %v17535_v26 = vld [vmem:[%s20338_s2 + $0x548] ss:$48 sps:$4 sm:$0xff]   ;;  %v17536_v27 = vld [vmem:[%s20338_s2 + $0x5a4] ss:$48 sps:$4 sm:$0xff]   ;;  %v17538_v28 = vld [vmem:[%s20338_s2 + $0x5ac] ss:$48 sps:$4 sm:$0xff]  }
 0x348   : > { %3842 = vmatpush1.bf16.msra.mxu0 %v17480_v50  ;;  %3928 = vmatpush1.bf16.msra.mxu1 %v17481_v51  ;;  %v17540_v29 = vld [vmem:[%s20338_s2 + $0x5a0] ss:$48 sps:$4 sm:$0xff]   ;;  %v17541_v30 = vld [vmem:[%s20338_s2 + $0x5a8] ss:$48 sps:$4 sm:$0xff]   ;;  %v17544_v31 = vld [vmem:[%s20338_s2 + $0x604] ss:$48 sps:$4 sm:$0xff]  }
 0x349   : > { %3843 = vmatprep.subr.bf16.mxu0 %v17482_v52  ;;  %3929 = vmatprep.subr.bf16.mxu1 %v17484_v53  ;;  %v1451_v32 = vld [vmem:[#allocation2] sm:$0xff]  ;;  %v17550_v38 = vld [vmem:[%s20338_s2 + $0x664] ss:$48 sps:$4 sm:$0xff]   ;;  %p16831_p8 = scmp.ne.s32.totalorder %s22702_s23, 5 }
 0x34a   : > { %v1455_v33 = vld [vmem:[#allocation2 + $0x20] sm:$0xff]  ;;  %v17556_v42 = vld [vmem:[%s20338_s2 + $0x6c4] ss:$48 sps:$4 sm:$0xff]   ;;  %s22703_s4 = sld [smem:[#allocation48_spill]] (!%p16831_p8)  ;;  %vm14845_vm4 = vcmask (!%p16831_p8), 130048   ;;  %vm14864_vm5 = vcmask (!%p16831_p8), 1040384  }
 0x34b   : > { %v17547_v34 = vld [vmem:[%s20338_s2 + $0x60c] ss:$48 sps:$4 sm:$0xff]   ;;  %v17542_v35 = vld [vmem:[%s20338_s2 + $0x600] ss:$48 sps:$4 sm:$0xff]   ;;  %v17545_v36 = vld [vmem:[%s20338_s2 + $0x608] ss:$48 sps:$4 sm:$0xff]   ;;  %v20444_v37 = vpack.c.bf16 %v1455_v33, %v1451_v32 }
 0x34c   : > { %3844 = vmatpush1.bf16.msra.mxu0 %v17486_v54  ;;  %3930 = vmatpush1.bf16.msra.mxu1 %v17487_v55  ;;  %v17553_v39 = vld [vmem:[%s20338_s2 + $0x66c] ss:$48 sps:$4 sm:$0xff]   ;;  %v17548_v40 = vld [vmem:[%s20338_s2 + $0x660] ss:$48 sps:$4 sm:$0xff]   ;;  %v17551_v41 = vld [vmem:[%s20338_s2 + $0x668] ss:$48 sps:$4 sm:$0xff]  }
 0x34d   : > { %3845 = vmatprep.subr.bf16.mxu0 %v17488_v56  ;;  %3931 = vmatprep.subr.bf16.mxu1 %v17490_v57  ;;  %v17559_v43 = vld [vmem:[%s20338_s2 + $0x6cc] ss:$48 sps:$4 sm:$0xff]   ;;  %v17554_v44 = vld [vmem:[%s20338_s2 + $0x6c0] ss:$48 sps:$4 sm:$0xff]   ;;  %v17557_v45 = vld [vmem:[%s20338_s2 + $0x6c8] ss:$48 sps:$4 sm:$0xff]  }
 0x34e   : > { %v17562_v46 = vld [vmem:[%s20338_s2 + $0x724] ss:$48 sps:$4 sm:$0xff]   ;;  %v17565_v47 = vld [vmem:[%s20338_s2 + $0x72c] ss:$48 sps:$4 sm:$0xff]   ;;  %v17560_v48 = vld [vmem:[%s20338_s2 + $0x720] ss:$48 sps:$4 sm:$0xff]  }
 0x34f   : > { %v17563_v49 = vld [vmem:[%s20338_s2 + $0x728] ss:$48 sps:$4 sm:$0xff]   ;;  %v17568_v50 = vld [vmem:[%s20338_s2 + $0x784] ss:$48 sps:$4 sm:$0xff]   ;;  %v17571_v51 = vld [vmem:[%s20338_s2 + $0x78c] ss:$48 sps:$4 sm:$0xff]  }
 0x350   : > { %3846 = vmatpush1.bf16.msra.mxu0 %v17492_v58  ;;  %3932 = vmatpush1.bf16.msra.mxu1 %v17493_v59  ;;  %v17566_v52 = vld [vmem:[%s20338_s2 + $0x780] ss:$48 sps:$4 sm:$0xff]   ;;  %v17569_v53 = vld [vmem:[%s20338_s2 + $0x788] ss:$48 sps:$4 sm:$0xff]   ;;  %v17574_v54 = vld [vmem:[%s20338_s2 + $0x7e4] ss:$48 sps:$4 sm:$0xff]  }
 0x351   : > { %3847 = vmatprep.subr.bf16.mxu0 %v17494_v60  ;;  %3933 = vmatprep.subr.bf16.mxu1 %v17496_v61  ;;  %v17577_v55 = vld [vmem:[%s20338_s2 + $0x7ec] ss:$48 sps:$4 sm:$0xff]   ;;  %v17572_v56 = vld [vmem:[%s20338_s2 + $0x7e0] ss:$48 sps:$4 sm:$0xff]   ;;  %v17575_v57 = vld [vmem:[%s20338_s2 + $0x7e8] ss:$48 sps:$4 sm:$0xff]  }
 0x352   : > { %v17580_v58 = vld [vmem:[%s20338_s2 + $0x844] ss:$48 sps:$4 sm:$0xff]   ;;  %v17583_v59 = vld [vmem:[%s20338_s2 + $0x84c] ss:$48 sps:$4 sm:$0xff]   ;;  %v17578_v61 = vld [vmem:[%s20338_s2 + $0x840] ss:$48 sps:$4 sm:$0xff]  }
 0x353   : > { %v1454_v60 = vld [vmem:[#allocation2 + $0x18] sm:$0xff]  ;;  %v17601_v10 = vld [vmem:[%s20338_s2 + $0x96c] ss:$48 sps:$4 sm:$0xff]   ;;  %vm14875_vm6 = vcmask (!%p16831_p8), 1024  }
 0x354   : > { %3848 = vmatpush1.bf16.msra.mxu0 %v17498_v62  ;;  %3934 = vmatpush1.bf16.msra.mxu1 %v17499_v63  ;;  %v17581_v62 = vld [vmem:[%s20338_s2 + $0x848] ss:$48 sps:$4 sm:$0xff]   ;;  %v17596_v11 = vld [vmem:[%s20338_s2 + $0x960] ss:$48 sps:$4 sm:$0xff]  }
 0x355   : > { %3849 = vmatprep.subr.bf16.mxu0 %v17500_v0  ;;  %3935 = vmatprep.subr.bf16.mxu1 %v17502_v1  ;;  %v1458_v63 = vld [vmem:[#allocation2 + $0x38] sm:$0xff] }
 0x356   : > { %v17586_v0 = vld [vmem:[%s20338_s2 + $0x8a4] ss:$48 sps:$4 sm:$0xff]   ;;  %v20473_v1 = vpack.c.bf16 %v1458_v63, %v1454_v60  ;;  %v17626_v32 = vld [vmem:[%s20338_s2 + $0xb40] ss:$48 sps:$4 sm:$0xff]   ;;  %v17629_v33 = vld [vmem:[%s20338_s2 + $0xb48] ss:$48 sps:$4 sm:$0xff]  }
 0x357   : > { %v17662_v60 = vld [vmem:[%s20338_s2 + $0x190] ss:$48 sps:$4 sm:$0xff]   ;;  %v17673_v63 = vld [vmem:[%s20338_s2 + $0x1fc] ss:$48 sps:$4 sm:$0xff]  }
 0x358   : > { %3850 = vmatpush1.bf16.msra.mxu0 %v17504_v2  ;;  %3936 = vmatpush1.bf16.msra.mxu1 %v17505_v3  ;;  %v17589_v2 = vld [vmem:[%s20338_s2 + $0x8ac] ss:$48 sps:$4 sm:$0xff]   ;;  %v17584_v3 = vld [vmem:[%s20338_s2 + $0x8a0] ss:$48 sps:$4 sm:$0xff]  }
 0x359   : > { %3851 = vmatprep.subr.bf16.mxu0 %v17506_v4  ;;  %3937 = vmatprep.subr.bf16.mxu1 %v17508_v5  ;;  %v17587_v4 = vld [vmem:[%s20338_s2 + $0x8a8] ss:$48 sps:$4 sm:$0xff]   ;;  %v17592_v5 = vld [vmem:[%s20338_s2 + $0x904] ss:$48 sps:$4 sm:$0xff]  }
 0x35c   : > { %3852 = vmatpush1.bf16.msra.mxu0 %v17510_v6  ;;  %3938 = vmatpush1.bf16.msra.mxu1 %v17511_v7  ;;  %v17595_v6 = vld [vmem:[%s20338_s2 + $0x90c] ss:$48 sps:$4 sm:$0xff]   ;;  %v17590_v7 = vld [vmem:[%s20338_s2 + $0x900] ss:$48 sps:$4 sm:$0xff]  }
 0x35d   : > { %3853 = vmatprep.subr.bf16.mxu0 %v17512_v8  ;;  %3939 = vmatprep.subr.bf16.mxu1 %v17514_v9  ;;  %v17593_v8 = vld [vmem:[%s20338_s2 + $0x908] ss:$48 sps:$4 sm:$0xff]   ;;  %v17598_v9 = vld [vmem:[%s20338_s2 + $0x964] ss:$48 sps:$4 sm:$0xff]  }
 0x360   : > { %3854 = vmatpush1.bf16.msra.mxu0 %v17516_v12  ;;  %3940 = vmatpush1.bf16.msra.mxu1 %v17517_v13  ;;  %v17599_v12 = vld [vmem:[%s20338_s2 + $0x968] ss:$48 sps:$4 sm:$0xff]   ;;  %v17604_v13 = vld [vmem:[%s20338_s2 + $0x9c4] ss:$48 sps:$4 sm:$0xff]  }
 0x361   : > { %3855 = vmatprep.subr.bf16.mxu0 %v17518_v15  ;;  %3941 = vmatprep.subr.bf16.mxu1 %v17520_v16  ;;  %v17607_v15 = vld [vmem:[%s20338_s2 + $0x9cc] ss:$48 sps:$4 sm:$0xff]   ;;  %v17602_v16 = vld [vmem:[%s20338_s2 + $0x9c0] ss:$48 sps:$4 sm:$0xff]  }
 0x364   : > { %3856 = vmatpush1.bf16.msra.mxu0 %v17522_v17  ;;  %3942 = vmatpush1.bf16.msra.mxu1 %v17523_v18  ;;  %v17605_v17 = vld [vmem:[%s20338_s2 + $0x9c8] ss:$48 sps:$4 sm:$0xff]   ;;  %v17610_v18 = vld [vmem:[%s20338_s2 + $0xa24] ss:$48 sps:$4 sm:$0xff]  }
 0x365   : > { %3857 = vmatprep.subr.bf16.mxu0 %v17524_v19  ;;  %3943 = vmatprep.subr.bf16.mxu1 %v17526_v20  ;;  %v17613_v19 = vld [vmem:[%s20338_s2 + $0xa2c] ss:$48 sps:$4 sm:$0xff]   ;;  %v17608_v20 = vld [vmem:[%s20338_s2 + $0xa20] ss:$48 sps:$4 sm:$0xff]  }
 0x368   : > { %3858 = vmatpush1.bf16.msra.mxu0 %v17528_v21  ;;  %3944 = vmatpush1.bf16.msra.mxu1 %v17529_v22  ;;  %v17611_v21 = vld [vmem:[%s20338_s2 + $0xa28] ss:$48 sps:$4 sm:$0xff]   ;;  %v17616_v22 = vld [vmem:[%s20338_s2 + $0xa84] ss:$48 sps:$4 sm:$0xff]  }
 0x369   : > { %3859 = vmatprep.subr.bf16.mxu0 %v17530_v23  ;;  %3945 = vmatprep.subr.bf16.mxu1 %v17532_v24  ;;  %v17619_v23 = vld [vmem:[%s20338_s2 + $0xa8c] ss:$48 sps:$4 sm:$0xff]   ;;  %v17614_v24 = vld [vmem:[%s20338_s2 + $0xa80] ss:$48 sps:$4 sm:$0xff]  }
 0x36c   : > { %3860 = vmatpush1.bf16.msra.mxu0 %v17534_v25  ;;  %3946 = vmatpush1.bf16.msra.mxu1 %v17535_v26  ;;  %v17617_v25 = vld [vmem:[%s20338_s2 + $0xa88] ss:$48 sps:$4 sm:$0xff]   ;;  %v17622_v26 = vld [vmem:[%s20338_s2 + $0xae4] ss:$48 sps:$4 sm:$0xff]  }
 0x36d   : > { %3861 = vmatprep.subr.bf16.mxu0 %v17536_v27  ;;  %3947 = vmatprep.subr.bf16.mxu1 %v17538_v28  ;;  %v17625_v27 = vld [vmem:[%s20338_s2 + $0xaec] ss:$48 sps:$4 sm:$0xff]   ;;  %v17620_v28 = vld [vmem:[%s20338_s2 + $0xae0] ss:$48 sps:$4 sm:$0xff]  }
 0x370   : > { %3862 = vmatpush1.bf16.msra.mxu0 %v17540_v29  ;;  %3948 = vmatpush1.bf16.msra.mxu1 %v17541_v30  ;;  %v17623_v29 = vld [vmem:[%s20338_s2 + $0xae8] ss:$48 sps:$4 sm:$0xff]   ;;  %v17628_v30 = vld [vmem:[%s20338_s2 + $0xb44] ss:$48 sps:$4 sm:$0xff]  }
 0x371   : > { %3874 = vmatprep.subr.bf16.mxu0 %v17544_v31  ;;  %3960 = vmatprep.subr.bf16.mxu1 %v17547_v34  ;;  %v17631_v31 = vld [vmem:[%s20338_s2 + $0xb4c] ss:$48 sps:$4 sm:$0xff]   ;;  %v17634_v34 = vld [vmem:[%s20338_s2 + $0xba4] ss:$48 sps:$4 sm:$0xff]  }
 0x373   : > { %3864 = vmatmul.mubr.bf16.vlgmr.msra.gmra.mrb[0].mxu0 %v20444_v37  ;;  %3950 = vmatmul.mubr.bf16.vlgmr.msra.gmra.mrb[0].mxu1 %v20444_v37 }
 0x374   : > { %3875 = vmatpush1.bf16.msra.mxu0 %v17542_v35  ;;  %3961 = vmatpush1.bf16.msra.mxu1 %v17545_v36  ;;  %v17637_v35 = vld [vmem:[%s20338_s2 + $0xbac] ss:$48 sps:$4 sm:$0xff]   ;;  %v17632_v36 = vld [vmem:[%s20338_s2 + $0xba0] ss:$48 sps:$4 sm:$0xff]  }
 0x375   : > { %3876 = vmatprep.subr.bf16.mxu0 %v17550_v38  ;;  %3962 = vmatprep.subr.bf16.mxu1 %v17553_v39  ;;  %v17635_v38 = vld [vmem:[%s20338_s2 + $0xba8] ss:$48 sps:$4 sm:$0xff]  }
 0x376   : > { %3906 = vmatprep.mubr.bf16.mxu0 %v20473_v1  ;;  %3992 = vmatprep.mubr.bf16.mxu1 %v20473_v1  ;;  %v1453_v39 = vld [vmem:[#allocation2 + $0x10] sm:$0xff] }
 0x378   : > { %3877 = vmatpush1.bf16.msra.mxu0 %v17548_v40  ;;  %3963 = vmatpush1.bf16.msra.mxu1 %v17551_v41  ;;  %v1457_v40 = vld [vmem:[#allocation2 + $0x30] sm:$0xff]  ;;  %v17640_v41 = vld [vmem:[%s20338_s2 + $0x14] ss:$48 sps:$4 sm:$0xff]  }
 0x379   : > { %3878 = vmatprep.subr.bf16.mxu0 %v17556_v42  ;;  %3964 = vmatprep.subr.bf16.mxu1 %v17559_v43  ;;  %v17643_v42 = vld [vmem:[%s20338_s2 + $0x1c] ss:$48 sps:$4 sm:$0xff]   ;;  %v20514_v43 = vpack.c.bf16 %v1457_v40, %v1453_v39  ;;  %v17722_v39 = vld [vmem:[%s20338_s2 + $0x550] ss:$48 sps:$4 sm:$0xff]   ;;  %v17725_v40 = vld [vmem:[%s20338_s2 + $0x558] ss:$48 sps:$4 sm:$0xff]  }
 0x37c   : > { %3879 = vmatpush1.bf16.msra.mxu0 %v17554_v44  ;;  %3965 = vmatpush1.bf16.msra.mxu1 %v17557_v45  ;;  %v17638_v44 = vld [vmem:[%s20338_s2 + $0x10] ss:$48 sps:$4 sm:$0xff]   ;;  %v17641_v45 = vld [vmem:[%s20338_s2 + $0x18] ss:$48 sps:$4 sm:$0xff]  }
 0x37d   : > { %3880 = vmatprep.subr.bf16.mxu0 %v17562_v46  ;;  %3966 = vmatprep.subr.bf16.mxu1 %v17565_v47  ;;  %v17646_v46 = vld [vmem:[%s20338_s2 + $0x74] ss:$48 sps:$4 sm:$0xff]   ;;  %v17649_v47 = vld [vmem:[%s20338_s2 + $0x7c] ss:$48 sps:$4 sm:$0xff]  }
 0x380   : > { %3881 = vmatpush1.bf16.msra.mxu0 %v17560_v48  ;;  %3967 = vmatpush1.bf16.msra.mxu1 %v17563_v49  ;;  %v17644_v48 = vld [vmem:[%s20338_s2 + $0x70] ss:$48 sps:$4 sm:$0xff]   ;;  %v17647_v49 = vld [vmem:[%s20338_s2 + $0x78] ss:$48 sps:$4 sm:$0xff]  }
 0x381   : > { %3882 = vmatprep.subr.bf16.mxu0 %v17568_v50  ;;  %3968 = vmatprep.subr.bf16.mxu1 %v17571_v51  ;;  %v17652_v50 = vld [vmem:[%s20338_s2 + $0xd4] ss:$48 sps:$4 sm:$0xff]   ;;  %v17655_v51 = vld [vmem:[%s20338_s2 + $0xdc] ss:$48 sps:$4 sm:$0xff]  }
 0x384   : > { %3883 = vmatpush1.bf16.msra.mxu0 %v17566_v52  ;;  %3969 = vmatpush1.bf16.msra.mxu1 %v17569_v53  ;;  %v17650_v52 = vld [vmem:[%s20338_s2 + $0xd0] ss:$48 sps:$4 sm:$0xff]   ;;  %v17653_v53 = vld [vmem:[%s20338_s2 + $0xd8] ss:$48 sps:$4 sm:$0xff]  }
 0x385   : > { %3884 = vmatprep.subr.bf16.mxu0 %v17574_v54  ;;  %3970 = vmatprep.subr.bf16.mxu1 %v17577_v55  ;;  %v17658_v54 = vld [vmem:[%s20338_s2 + $0x134] ss:$48 sps:$4 sm:$0xff]   ;;  %v17661_v55 = vld [vmem:[%s20338_s2 + $0x13c] ss:$48 sps:$4 sm:$0xff]  }
 0x388   : > { %3885 = vmatpush1.bf16.msra.mxu0 %v17572_v56  ;;  %3971 = vmatpush1.bf16.msra.mxu1 %v17575_v57  ;;  %v17656_v56 = vld [vmem:[%s20338_s2 + $0x130] ss:$48 sps:$4 sm:$0xff]   ;;  %v17659_v57 = vld [vmem:[%s20338_s2 + $0x138] ss:$48 sps:$4 sm:$0xff]  }
 0x389   : > { %3886 = vmatprep.subr.bf16.mxu0 %v17580_v58  ;;  %3972 = vmatprep.subr.bf16.mxu1 %v17583_v59  ;;  %v17664_v58 = vld [vmem:[%s20338_s2 + $0x194] ss:$48 sps:$4 sm:$0xff]   ;;  %v17667_v59 = vld [vmem:[%s20338_s2 + $0x19c] ss:$48 sps:$4 sm:$0xff]  }
 0x38c   : > { %3887 = vmatpush1.bf16.msra.mxu0 %v17578_v61  ;;  %3973 = vmatpush1.bf16.msra.mxu1 %v17581_v62  ;;  %v17665_v61 = vld [vmem:[%s20338_s2 + $0x198] ss:$48 sps:$4 sm:$0xff]   ;;  %v17670_v62 = vld [vmem:[%s20338_s2 + $0x1f4] ss:$48 sps:$4 sm:$0xff]  }
 0x38d   : > { %3888 = vmatprep.subr.bf16.mxu0 %v17586_v0  ;;  %3974 = vmatprep.subr.bf16.mxu1 %v17589_v2  ;;  %v17668_v0 = vld [vmem:[%s20338_s2 + $0x1f0] ss:$48 sps:$4 sm:$0xff]   ;;  %v17671_v2 = vld [vmem:[%s20338_s2 + $0x1f8] ss:$48 sps:$4 sm:$0xff]  }
 0x390   : > { %3889 = vmatpush1.bf16.msra.mxu0 %v17584_v3  ;;  %3975 = vmatpush1.bf16.msra.mxu1 %v17587_v4  ;;  %v17676_v3 = vld [vmem:[%s20338_s2 + $0x254] ss:$48 sps:$4 sm:$0xff]   ;;  %v17679_v4 = vld [vmem:[%s20338_s2 + $0x25c] ss:$48 sps:$4 sm:$0xff]  }
 0x391   : > { %3890 = vmatprep.subr.bf16.mxu0 %v17592_v5  ;;  %3976 = vmatprep.subr.bf16.mxu1 %v17595_v6  ;;  %v17674_v5 = vld [vmem:[%s20338_s2 + $0x250] ss:$48 sps:$4 sm:$0xff]   ;;  %v17677_v6 = vld [vmem:[%s20338_s2 + $0x258] ss:$48 sps:$4 sm:$0xff]  }
 0x394   : > { %3891 = vmatpush1.bf16.msra.mxu0 %v17590_v7  ;;  %3977 = vmatpush1.bf16.msra.mxu1 %v17593_v8  ;;  %v17682_v7 = vld [vmem:[%s20338_s2 + $0x2b4] ss:$48 sps:$4 sm:$0xff]   ;;  %v17685_v8 = vld [vmem:[%s20338_s2 + $0x2bc] ss:$48 sps:$4 sm:$0xff]  }
 0x395   : > { %3892 = vmatprep.subr.bf16.mxu0 %v17598_v9  ;;  %3978 = vmatprep.subr.bf16.mxu1 %v17601_v10  ;;  %v17680_v9 = vld [vmem:[%s20338_s2 + $0x2b0] ss:$48 sps:$4 sm:$0xff]   ;;  %v17683_v10 = vld [vmem:[%s20338_s2 + $0x2b8] ss:$48 sps:$4 sm:$0xff]  }
 0x398   : > { %3893 = vmatpush1.bf16.msra.mxu0 %v17596_v11  ;;  %3979 = vmatpush1.bf16.msra.mxu1 %v17599_v12  ;;  %v17688_v11 = vld [vmem:[%s20338_s2 + $0x314] ss:$48 sps:$4 sm:$0xff]   ;;  %v17691_v12 = vld [vmem:[%s20338_s2 + $0x31c] ss:$48 sps:$4 sm:$0xff]  }
 0x399   : > { %3894 = vmatprep.subr.bf16.mxu0 %v17604_v13  ;;  %3980 = vmatprep.subr.bf16.mxu1 %v17607_v15  ;;  %v17686_v13 = vld [vmem:[%s20338_s2 + $0x310] ss:$48 sps:$4 sm:$0xff]   ;;  %v17689_v15 = vld [vmem:[%s20338_s2 + $0x318] ss:$48 sps:$4 sm:$0xff]  }
 0x39c   : > { %3895 = vmatpush1.bf16.msra.mxu0 %v17602_v16  ;;  %3981 = vmatpush1.bf16.msra.mxu1 %v17605_v17  ;;  %v17694_v16 = vld [vmem:[%s20338_s2 + $0x374] ss:$48 sps:$4 sm:$0xff]   ;;  %v17697_v17 = vld [vmem:[%s20338_s2 + $0x37c] ss:$48 sps:$4 sm:$0xff]  }
 0x39d   : > { %3896 = vmatprep.subr.bf16.mxu0 %v17610_v18  ;;  %3982 = vmatprep.subr.bf16.mxu1 %v17613_v19  ;;  %v17692_v18 = vld [vmem:[%s20338_s2 + $0x370] ss:$48 sps:$4 sm:$0xff]   ;;  %v17695_v19 = vld [vmem:[%s20338_s2 + $0x378] ss:$48 sps:$4 sm:$0xff]  }
 0x3a0   : > { %3897 = vmatpush1.bf16.msra.mxu0 %v17608_v20  ;;  %3983 = vmatpush1.bf16.msra.mxu1 %v17611_v21  ;;  %v17700_v20 = vld [vmem:[%s20338_s2 + $0x3d4] ss:$48 sps:$4 sm:$0xff]   ;;  %v17703_v21 = vld [vmem:[%s20338_s2 + $0x3dc] ss:$48 sps:$4 sm:$0xff]  }
 0x3a1   : > { %3898 = vmatprep.subr.bf16.mxu0 %v17616_v22  ;;  %3984 = vmatprep.subr.bf16.mxu1 %v17619_v23  ;;  %v17698_v22 = vld [vmem:[%s20338_s2 + $0x3d0] ss:$48 sps:$4 sm:$0xff]   ;;  %v17701_v23 = vld [vmem:[%s20338_s2 + $0x3d8] ss:$48 sps:$4 sm:$0xff]  }
 0x3a4   : > { %3899 = vmatpush1.bf16.msra.mxu0 %v17614_v24  ;;  %3985 = vmatpush1.bf16.msra.mxu1 %v17617_v25  ;;  %v17706_v24 = vld [vmem:[%s20338_s2 + $0x434] ss:$48 sps:$4 sm:$0xff]   ;;  %v17709_v25 = vld [vmem:[%s20338_s2 + $0x43c] ss:$48 sps:$4 sm:$0xff]  }
 0x3a5   : > { %3900 = vmatprep.subr.bf16.mxu0 %v17622_v26  ;;  %3986 = vmatprep.subr.bf16.mxu1 %v17625_v27  ;;  %v17704_v26 = vld [vmem:[%s20338_s2 + $0x430] ss:$48 sps:$4 sm:$0xff]   ;;  %v17707_v27 = vld [vmem:[%s20338_s2 + $0x438] ss:$48 sps:$4 sm:$0xff]  }
 0x3a8   : > { %3901 = vmatpush1.bf16.msra.mxu0 %v17620_v28  ;;  %3987 = vmatpush1.bf16.msra.mxu1 %v17623_v29  ;;  %v17712_v28 = vld [vmem:[%s20338_s2 + $0x494] ss:$48 sps:$4 sm:$0xff]   ;;  %v17715_v29 = vld [vmem:[%s20338_s2 + $0x49c] ss:$48 sps:$4 sm:$0xff]  }
 0x3a9   : > { %3902 = vmatprep.subr.bf16.mxu0 %v17628_v30  ;;  %3988 = vmatprep.subr.bf16.mxu1 %v17631_v31  ;;  %v17710_v30 = vld [vmem:[%s20338_s2 + $0x490] ss:$48 sps:$4 sm:$0xff]   ;;  %v17713_v31 = vld [vmem:[%s20338_s2 + $0x498] ss:$48 sps:$4 sm:$0xff]  }
 0x3ac   : > { %3903 = vmatpush1.bf16.msra.mxu0 %v17626_v32  ;;  %3989 = vmatpush1.bf16.msra.mxu1 %v17629_v33  ;;  %v17718_v32 = vld [vmem:[%s20338_s2 + $0x4f4] ss:$48 sps:$4 sm:$0xff]   ;;  %v17721_v33 = vld [vmem:[%s20338_s2 + $0x4fc] ss:$48 sps:$4 sm:$0xff]  }
 0x3ad   : > { %3904 = vmatprep.subr.bf16.mxu0 %v17634_v34  ;;  %3990 = vmatprep.subr.bf16.mxu1 %v17637_v35  ;;  %v17716_v34 = vld [vmem:[%s20338_s2 + $0x4f0] ss:$48 sps:$4 sm:$0xff]   ;;  %v17719_v35 = vld [vmem:[%s20338_s2 + $0x4f8] ss:$48 sps:$4 sm:$0xff]  }
 0x3b0   : > { %3905 = vmatpush1.bf16.msra.mxu0 %v17632_v36  ;;  %3991 = vmatpush1.bf16.msra.mxu1 %v17635_v38  ;;  %v17724_v36 = vld [vmem:[%s20338_s2 + $0x554] ss:$48 sps:$4 sm:$0xff]   ;;  %v17727_v38 = vld [vmem:[%s20338_s2 + $0x55c] ss:$48 sps:$4 sm:$0xff]  }
 0x3b1   : > { %4003 = vmatprep.subr.bf16.mxu0 %v17640_v41  ;;  %4089 = vmatprep.subr.bf16.mxu1 %v17643_v42  ;;  %v17730_v41 = vld [vmem:[%s20338_s2 + $0x5b4] ss:$48 sps:$4 sm:$0xff]   ;;  %v17733_v42 = vld [vmem:[%s20338_s2 + $0x5bc] ss:$48 sps:$4 sm:$0xff]  }
 0x3b3   : > { %3907 = vmatmul.mubr.bf16.vlgmr.msra.gmra.mrb[0].mxu0 %v20514_v43  ;;  %3993 = vmatmul.mubr.bf16.vlgmr.msra.gmra.mrb[0].mxu1 %v20514_v43 }
 0x3b4   : > { %4004 = vmatpush1.bf16.msra.mxu0 %v17638_v44  ;;  %4090 = vmatpush1.bf16.msra.mxu1 %v17641_v45  ;;  %v17728_v44 = vld [vmem:[%s20338_s2 + $0x5b0] ss:$48 sps:$4 sm:$0xff]   ;;  %v17731_v45 = vld [vmem:[%s20338_s2 + $0x5b8] ss:$48 sps:$4 sm:$0xff]  }
 0x3b5   : > { %4005 = vmatprep.subr.bf16.mxu0 %v17646_v46  ;;  %4091 = vmatprep.subr.bf16.mxu1 %v17649_v47  ;;  %v17736_v46 = vld [vmem:[%s20338_s2 + $0x614] ss:$48 sps:$4 sm:$0xff]   ;;  %v17739_v47 = vld [vmem:[%s20338_s2 + $0x61c] ss:$48 sps:$4 sm:$0xff]  }
 0x3b6   : > { %4035 = vmatprep.mubr.bf16.mxu0 %v20420_v14  ;;  %4121 = vmatprep.mubr.bf16.mxu1 %v20420_v14 }
 0x3b8   : > { %4006 = vmatpush1.bf16.msra.mxu0 %v17644_v48  ;;  %4092 = vmatpush1.bf16.msra.mxu1 %v17647_v49  ;;  %v17734_v48 = vld [vmem:[%s20338_s2 + $0x610] ss:$48 sps:$4 sm:$0xff]   ;;  %v17737_v49 = vld [vmem:[%s20338_s2 + $0x618] ss:$48 sps:$4 sm:$0xff]  }
 0x3b9   : > { %4007 = vmatprep.subr.bf16.mxu0 %v17652_v50  ;;  %4093 = vmatprep.subr.bf16.mxu1 %v17655_v51  ;;  %v17742_v50 = vld [vmem:[%s20338_s2 + $0x674] ss:$48 sps:$4 sm:$0xff]   ;;  %v17745_v51 = vld [vmem:[%s20338_s2 + $0x67c] ss:$48 sps:$4 sm:$0xff]  }
 0x3bc   : > { %4008 = vmatpush1.bf16.msra.mxu0 %v17650_v52  ;;  %4094 = vmatpush1.bf16.msra.mxu1 %v17653_v53  ;;  %v17740_v52 = vld [vmem:[%s20338_s2 + $0x670] ss:$48 sps:$4 sm:$0xff]   ;;  %v17743_v53 = vld [vmem:[%s20338_s2 + $0x678] ss:$48 sps:$4 sm:$0xff]  }
 0x3bd   : > { %4009 = vmatprep.subr.bf16.mxu0 %v17658_v54  ;;  %4095 = vmatprep.subr.bf16.mxu1 %v17661_v55  ;;  %v17748_v54 = vld [vmem:[%s20338_s2 + $0x6d4] ss:$48 sps:$4 sm:$0xff]   ;;  %v17751_v55 = vld [vmem:[%s20338_s2 + $0x6dc] ss:$48 sps:$4 sm:$0xff]  }
 0x3c0   : > { %4010 = vmatpush1.bf16.msra.mxu0 %v17656_v56  ;;  %4096 = vmatpush1.bf16.msra.mxu1 %v17659_v57  ;;  %v17746_v56 = vld [vmem:[%s20338_s2 + $0x6d0] ss:$48 sps:$4 sm:$0xff]   ;;  %v17749_v57 = vld [vmem:[%s20338_s2 + $0x6d8] ss:$48 sps:$4 sm:$0xff]  }
 0x3c1   : > { %4011 = vmatprep.subr.bf16.mxu0 %v17664_v58  ;;  %4097 = vmatprep.subr.bf16.mxu1 %v17667_v59  ;;  %v17754_v58 = vld [vmem:[%s20338_s2 + $0x734] ss:$48 sps:$4 sm:$0xff]   ;;  %v17757_v59 = vld [vmem:[%s20338_s2 + $0x73c] ss:$48 sps:$4 sm:$0xff]  }
 0x3c4   : > { %4012 = vmatpush1.bf16.msra.mxu0 %v17662_v60  ;;  %4098 = vmatpush1.bf16.msra.mxu1 %v17665_v61  ;;  %v17752_v60 = vld [vmem:[%s20338_s2 + $0x730] ss:$48 sps:$4 sm:$0xff]   ;;  %v17755_v61 = vld [vmem:[%s20338_s2 + $0x738] ss:$48 sps:$4 sm:$0xff]  }
 0x3c5   : > { %4013 = vmatprep.subr.bf16.mxu0 %v17670_v62  ;;  %4099 = vmatprep.subr.bf16.mxu1 %v17673_v63  ;;  %v17760_v62 = vld [vmem:[%s20338_s2 + $0x794] ss:$48 sps:$4 sm:$0xff]   ;;  %v17763_v63 = vld [vmem:[%s20338_s2 + $0x79c] ss:$48 sps:$4 sm:$0xff]  }
 0x3c8   : > { %4014 = vmatpush1.bf16.msra.mxu0 %v17668_v0  ;;  %4100 = vmatpush1.bf16.msra.mxu1 %v17671_v2  ;;  %v17758_v0 = vld [vmem:[%s20338_s2 + $0x790] ss:$48 sps:$4 sm:$0xff]   ;;  %v17761_v2 = vld [vmem:[%s20338_s2 + $0x798] ss:$48 sps:$4 sm:$0xff]  }
 0x3c9   : > { %4015 = vmatprep.subr.bf16.mxu0 %v17676_v3  ;;  %4101 = vmatprep.subr.bf16.mxu1 %v17679_v4  ;;  %v17766_v3 = vld [vmem:[%s20338_s2 + $0x7f4] ss:$48 sps:$4 sm:$0xff]   ;;  %v17769_v4 = vld [vmem:[%s20338_s2 + $0x7fc] ss:$48 sps:$4 sm:$0xff]  }
 0x3cc   : > { %4016 = vmatpush1.bf16.msra.mxu0 %v17674_v5  ;;  %4102 = vmatpush1.bf16.msra.mxu1 %v17677_v6  ;;  %v17764_v5 = vld [vmem:[%s20338_s2 + $0x7f0] ss:$48 sps:$4 sm:$0xff]   ;;  %v17767_v6 = vld [vmem:[%s20338_s2 + $0x7f8] ss:$48 sps:$4 sm:$0xff]  }
 0x3cd   : > { %4017 = vmatprep.subr.bf16.mxu0 %v17682_v7  ;;  %4103 = vmatprep.subr.bf16.mxu1 %v17685_v8  ;;  %v17772_v7 = vld [vmem:[%s20338_s2 + $0x854] ss:$48 sps:$4 sm:$0xff]   ;;  %v17775_v8 = vld [vmem:[%s20338_s2 + $0x85c] ss:$48 sps:$4 sm:$0xff]  }
 0x3d0   : > { %4018 = vmatpush1.bf16.msra.mxu0 %v17680_v9  ;;  %4104 = vmatpush1.bf16.msra.mxu1 %v17683_v10  ;;  %v17770_v9 = vld [vmem:[%s20338_s2 + $0x850] ss:$48 sps:$4 sm:$0xff]   ;;  %v17773_v10 = vld [vmem:[%s20338_s2 + $0x858] ss:$48 sps:$4 sm:$0xff]  }
 0x3d1   : > { %4019 = vmatprep.subr.bf16.mxu0 %v17688_v11  ;;  %4105 = vmatprep.subr.bf16.mxu1 %v17691_v12  ;;  %v17778_v11 = vld [vmem:[%s20338_s2 + $0x8b4] ss:$48 sps:$4 sm:$0xff]   ;;  %v17781_v12 = vld [vmem:[%s20338_s2 + $0x8bc] ss:$48 sps:$4 sm:$0xff]  }
 0x3d4   : > { %4020 = vmatpush1.bf16.msra.mxu0 %v17686_v13  ;;  %4106 = vmatpush1.bf16.msra.mxu1 %v17689_v15  ;;  %v17776_v13 = vld [vmem:[%s20338_s2 + $0x8b0] ss:$48 sps:$4 sm:$0xff]   ;;  %v17779_v15 = vld [vmem:[%s20338_s2 + $0x8b8] ss:$48 sps:$4 sm:$0xff]  }
 0x3d5   : > { %4021 = vmatprep.subr.bf16.mxu0 %v17694_v16  ;;  %4107 = vmatprep.subr.bf16.mxu1 %v17697_v17  ;;  %v17784_v16 = vld [vmem:[%s20338_s2 + $0x914] ss:$48 sps:$4 sm:$0xff]   ;;  %v17787_v17 = vld [vmem:[%s20338_s2 + $0x91c] ss:$48 sps:$4 sm:$0xff]  }
 0x3d8   : > { %4022 = vmatpush1.bf16.msra.mxu0 %v17692_v18  ;;  %4108 = vmatpush1.bf16.msra.mxu1 %v17695_v19  ;;  %v17782_v18 = vld [vmem:[%s20338_s2 + $0x910] ss:$48 sps:$4 sm:$0xff]   ;;  %v17785_v19 = vld [vmem:[%s20338_s2 + $0x918] ss:$48 sps:$4 sm:$0xff]  }
 0x3d9   : > { %4023 = vmatprep.subr.bf16.mxu0 %v17700_v20  ;;  %4109 = vmatprep.subr.bf16.mxu1 %v17703_v21  ;;  %v17790_v20 = vld [vmem:[%s20338_s2 + $0x974] ss:$48 sps:$4 sm:$0xff]   ;;  %v17793_v21 = vld [vmem:[%s20338_s2 + $0x97c] ss:$48 sps:$4 sm:$0xff]  }
 0x3dc   : > { %4024 = vmatpush1.bf16.msra.mxu0 %v17698_v22  ;;  %4110 = vmatpush1.bf16.msra.mxu1 %v17701_v23  ;;  %v17788_v22 = vld [vmem:[%s20338_s2 + $0x970] ss:$48 sps:$4 sm:$0xff]   ;;  %v17791_v23 = vld [vmem:[%s20338_s2 + $0x978] ss:$48 sps:$4 sm:$0xff]  }
 0x3dd   : > { %4025 = vmatprep.subr.bf16.mxu0 %v17706_v24  ;;  %4111 = vmatprep.subr.bf16.mxu1 %v17709_v25  ;;  %v17796_v24 = vld [vmem:[%s20338_s2 + $0x9d4] ss:$48 sps:$4 sm:$0xff]   ;;  %v17799_v25 = vld [vmem:[%s20338_s2 + $0x9dc] ss:$48 sps:$4 sm:$0xff]  }
 0x3e0   : > { %4026 = vmatpush1.bf16.msra.mxu0 %v17704_v26  ;;  %4112 = vmatpush1.bf16.msra.mxu1 %v17707_v27  ;;  %v17794_v26 = vld [vmem:[%s20338_s2 + $0x9d0] ss:$48 sps:$4 sm:$0xff]   ;;  %v17797_v27 = vld [vmem:[%s20338_s2 + $0x9d8] ss:$48 sps:$4 sm:$0xff]  }
 0x3e1   : > { %4027 = vmatprep.subr.bf16.mxu0 %v17712_v28  ;;  %4113 = vmatprep.subr.bf16.mxu1 %v17715_v29  ;;  %v17802_v28 = vld [vmem:[%s20338_s2 + $0xa34] ss:$48 sps:$4 sm:$0xff]   ;;  %v17805_v29 = vld [vmem:[%s20338_s2 + $0xa3c] ss:$48 sps:$4 sm:$0xff]  }
 0x3e4   : > { %4028 = vmatpush1.bf16.msra.mxu0 %v17710_v30  ;;  %4114 = vmatpush1.bf16.msra.mxu1 %v17713_v31  ;;  %v17800_v30 = vld [vmem:[%s20338_s2 + $0xa30] ss:$48 sps:$4 sm:$0xff]   ;;  %v17803_v31 = vld [vmem:[%s20338_s2 + $0xa38] ss:$48 sps:$4 sm:$0xff]  }
 0x3e5   : > { %4029 = vmatprep.subr.bf16.mxu0 %v17718_v32  ;;  %4115 = vmatprep.subr.bf16.mxu1 %v17721_v33  ;;  %v17808_v32 = vld [vmem:[%s20338_s2 + $0xa94] ss:$48 sps:$4 sm:$0xff]   ;;  %v17811_v33 = vld [vmem:[%s20338_s2 + $0xa9c] ss:$48 sps:$4 sm:$0xff]  }
 0x3e8   : > { %4030 = vmatpush1.bf16.msra.mxu0 %v17716_v34  ;;  %4116 = vmatpush1.bf16.msra.mxu1 %v17719_v35  ;;  %v17806_v34 = vld [vmem:[%s20338_s2 + $0xa90] ss:$48 sps:$4 sm:$0xff]   ;;  %v17809_v35 = vld [vmem:[%s20338_s2 + $0xa98] ss:$48 sps:$4 sm:$0xff]  }
 0x3e9   : > { %4031 = vmatprep.subr.bf16.mxu0 %v17724_v36  ;;  %4117 = vmatprep.subr.bf16.mxu1 %v17727_v38  ;;  %v17814_v36 = vld [vmem:[%s20338_s2 + $0xaf4] ss:$48 sps:$4 sm:$0xff]   ;;  %v17817_v38 = vld [vmem:[%s20338_s2 + $0xafc] ss:$48 sps:$4 sm:$0xff]  }
 0x3ec   : > { %4032 = vmatpush1.bf16.msra.mxu0 %v17722_v39  ;;  %4118 = vmatpush1.bf16.msra.mxu1 %v17725_v40  ;;  %v17812_v39 = vld [vmem:[%s20338_s2 + $0xaf0] ss:$48 sps:$4 sm:$0xff]   ;;  %v17815_v40 = vld [vmem:[%s20338_s2 + $0xaf8] ss:$48 sps:$4 sm:$0xff]  }
 0x3ed   : > { %4033 = vmatprep.subr.bf16.mxu0 %v17730_v41  ;;  %4119 = vmatprep.subr.bf16.mxu1 %v17733_v42  ;;  %v17820_v41 = vld [vmem:[%s20338_s2 + $0xb54] ss:$48 sps:$4 sm:$0xff]   ;;  %v17823_v42 = vld [vmem:[%s20338_s2 + $0xb5c] ss:$48 sps:$4 sm:$0xff]  }
 0x3f0   : > { %4034 = vmatpush1.bf16.msra.mxu0 %v17728_v44  ;;  %4120 = vmatpush1.bf16.msra.mxu1 %v17731_v45  ;;  %v17818_v44 = vld [vmem:[%s20338_s2 + $0xb50] ss:$48 sps:$4 sm:$0xff]   ;;  %v17821_v45 = vld [vmem:[%s20338_s2 + $0xb58] ss:$48 sps:$4 sm:$0xff]  }
 0x3f1   : > { %4046 = vmatprep.subr.bf16.mxu0 %v17736_v46  ;;  %4132 = vmatprep.subr.bf16.mxu1 %v17739_v47  ;;  %v17826_v46 = vld [vmem:[%s20338_s2 + $0xbb4] ss:$48 sps:$4 sm:$0xff]   ;;  %v17829_v47 = vld [vmem:[%s20338_s2 + $0xbbc] ss:$48 sps:$4 sm:$0xff]  }
 0x3f3   : > { %4036 = vmatmul.mubr.bf16.vlgmr.msra.gmra.mrb[4].mxu0 %v20444_v37  ;;  %4122 = vmatmul.mubr.bf16.vlgmr.msra.gmra.mrb[4].mxu1 %v20444_v37 }
 0x3f4   : > { %4047 = vmatpush1.bf16.msra.mxu0 %v17734_v48  ;;  %4133 = vmatpush1.bf16.msra.mxu1 %v17737_v49  ;;  %v17824_v48 = vld [vmem:[%s20338_s2 + $0xbb0] ss:$48 sps:$4 sm:$0xff]   ;;  %v17827_v49 = vld [vmem:[%s20338_s2 + $0xbb8] ss:$48 sps:$4 sm:$0xff]  }
 0x3f5   : > { %4048 = vmatprep.subr.bf16.mxu0 %v17742_v50  ;;  %4134 = vmatprep.subr.bf16.mxu1 %v17745_v51  ;;  %v17832_v50 = vld [vmem:[%s20338_s2 + $0x24] ss:$48 sps:$4 sm:$0xff]   ;;  %v17830_v51 = vld [vmem:[%s20338_s2 + $0x20] ss:$48 sps:$4 sm:$0xff]  }
 0x3f6   : > { %4078 = vmatprep.mubr.bf16.mxu0 %v20473_v1  ;;  %4164 = vmatprep.mubr.bf16.mxu1 %v20473_v1 }
 0x3f8   : > { %4049 = vmatpush1.bf16.msra.mxu0 %v17740_v52  ;;  %4135 = vmatpush1.bf16.msra.mxu1 %v17743_v53  ;;  %v17835_v52 = vld [vmem:[%s20338_s2 + $0x84] ss:$48 sps:$4 sm:$0xff]   ;;  %v17833_v53 = vld [vmem:[%s20338_s2 + $0x80] ss:$48 sps:$4 sm:$0xff]  }
 0x3f9   : > { %4050 = vmatprep.subr.bf16.mxu0 %v17748_v54  ;;  %4136 = vmatprep.subr.bf16.mxu1 %v17751_v55  ;;  %v17838_v54 = vld [vmem:[%s20338_s2 + $0xe4] ss:$48 sps:$4 sm:$0xff]   ;;  %v17836_v55 = vld [vmem:[%s20338_s2 + $0xe0] ss:$48 sps:$4 sm:$0xff]  }
 0x3fc   : > { %4051 = vmatpush1.bf16.msra.mxu0 %v17746_v56  ;;  %4137 = vmatpush1.bf16.msra.mxu1 %v17749_v57  ;;  %v17841_v56 = vld [vmem:[%s20338_s2 + $0x144] ss:$48 sps:$4 sm:$0xff]   ;;  %v17839_v57 = vld [vmem:[%s20338_s2 + $0x140] ss:$48 sps:$4 sm:$0xff]  }
 0x3fd   : > { %4052 = vmatprep.subr.bf16.mxu0 %v17754_v58  ;;  %4138 = vmatprep.subr.bf16.mxu1 %v17757_v59  ;;  %v17844_v58 = vld [vmem:[%s20338_s2 + $0x1a4] ss:$48 sps:$4 sm:$0xff]   ;;  %v17842_v59 = vld [vmem:[%s20338_s2 + $0x1a0] ss:$48 sps:$4 sm:$0xff]  }
 0x400   : > { %4053 = vmatpush1.bf16.msra.mxu0 %v17752_v60  ;;  %4139 = vmatpush1.bf16.msra.mxu1 %v17755_v61  ;;  %v17847_v60 = vld [vmem:[%s20338_s2 + $0x204] ss:$48 sps:$4 sm:$0xff]   ;;  %v17845_v61 = vld [vmem:[%s20338_s2 + $0x200] ss:$48 sps:$4 sm:$0xff]  }
 0x401   : > { %4054 = vmatprep.subr.bf16.mxu0 %v17760_v62  ;;  %4140 = vmatprep.subr.bf16.mxu1 %v17763_v63  ;;  %v17848_v62 = vld [vmem:[%s20338_s2 + $0x260] ss:$48 sps:$4 sm:$0xff]   ;;  %v17853_v63 = vld [vmem:[%s20338_s2 + $0x2c4] ss:$48 sps:$4 sm:$0xff]  }
 0x404   : > { %4055 = vmatpush1.bf16.msra.mxu0 %v17758_v0  ;;  %4141 = vmatpush1.bf16.msra.mxu1 %v17761_v2  ;;  %v17851_v0 = vld [vmem:[%s20338_s2 + $0x2c0] ss:$48 sps:$4 sm:$0xff]   ;;  %v17856_v2 = vld [vmem:[%s20338_s2 + $0x324] ss:$48 sps:$4 sm:$0xff]  }
 0x405   : > { %4056 = vmatprep.subr.bf16.mxu0 %v17766_v3  ;;  %4142 = vmatprep.subr.bf16.mxu1 %v17769_v4  ;;  %v17854_v3 = vld [vmem:[%s20338_s2 + $0x320] ss:$48 sps:$4 sm:$0xff]   ;;  %v17859_v4 = vld [vmem:[%s20338_s2 + $0x384] ss:$48 sps:$4 sm:$0xff]  }
 0x408   : > { %4057 = vmatpush1.bf16.msra.mxu0 %v17764_v5  ;;  %4143 = vmatpush1.bf16.msra.mxu1 %v17767_v6  ;;  %v17857_v5 = vld [vmem:[%s20338_s2 + $0x380] ss:$48 sps:$4 sm:$0xff]   ;;  %v17862_v6 = vld [vmem:[%s20338_s2 + $0x3e4] ss:$48 sps:$4 sm:$0xff]  }
 0x409   : > { %4058 = vmatprep.subr.bf16.mxu0 %v17772_v7  ;;  %4144 = vmatprep.subr.bf16.mxu1 %v17775_v8  ;;  %v17860_v7 = vld [vmem:[%s20338_s2 + $0x3e0] ss:$48 sps:$4 sm:$0xff]   ;;  %v17865_v8 = vld [vmem:[%s20338_s2 + $0x444] ss:$48 sps:$4 sm:$0xff]  }
 0x40c   : > { %4059 = vmatpush1.bf16.msra.mxu0 %v17770_v9  ;;  %4145 = vmatpush1.bf16.msra.mxu1 %v17773_v10  ;;  %v17863_v9 = vld [vmem:[%s20338_s2 + $0x440] ss:$48 sps:$4 sm:$0xff]   ;;  %v17868_v10 = vld [vmem:[%s20338_s2 + $0x4a4] ss:$48 sps:$4 sm:$0xff]  }
 0x40d   : > { %4060 = vmatprep.subr.bf16.mxu0 %v17778_v11  ;;  %4146 = vmatprep.subr.bf16.mxu1 %v17781_v12  ;;  %v17866_v11 = vld [vmem:[%s20338_s2 + $0x4a0] ss:$48 sps:$4 sm:$0xff]   ;;  %v17871_v12 = vld [vmem:[%s20338_s2 + $0x504] ss:$48 sps:$4 sm:$0xff]  }
 0x410   : > { %4061 = vmatpush1.bf16.msra.mxu0 %v17776_v13  ;;  %4147 = vmatpush1.bf16.msra.mxu1 %v17779_v15  ;;  %v17869_v13 = vld [vmem:[%s20338_s2 + $0x500] ss:$48 sps:$4 sm:$0xff]   ;;  %v17874_v15 = vld [vmem:[%s20338_s2 + $0x564] ss:$48 sps:$4 sm:$0xff]  }
 0x411   : > { %4062 = vmatprep.subr.bf16.mxu0 %v17784_v16  ;;  %4148 = vmatprep.subr.bf16.mxu1 %v17787_v17  ;;  %v17872_v16 = vld [vmem:[%s20338_s2 + $0x560] ss:$48 sps:$4 sm:$0xff]   ;;  %v17877_v17 = vld [vmem:[%s20338_s2 + $0x5c4] ss:$48 sps:$4 sm:$0xff]  }
 0x414   : > { %4063 = vmatpush1.bf16.msra.mxu0 %v17782_v18  ;;  %4149 = vmatpush1.bf16.msra.mxu1 %v17785_v19  ;;  %v17875_v18 = vld [vmem:[%s20338_s2 + $0x5c0] ss:$48 sps:$4 sm:$0xff]   ;;  %v17880_v19 = vld [vmem:[%s20338_s2 + $0x624] ss:$48 sps:$4 sm:$0xff]  }
 0x415   : > { %4064 = vmatprep.subr.bf16.mxu0 %v17790_v20  ;;  %4150 = vmatprep.subr.bf16.mxu1 %v17793_v21  ;;  %v17878_v20 = vld [vmem:[%s20338_s2 + $0x620] ss:$48 sps:$4 sm:$0xff]   ;;  %v17883_v21 = vld [vmem:[%s20338_s2 + $0x684] ss:$48 sps:$4 sm:$0xff]  }
 0x418   : > { %4065 = vmatpush1.bf16.msra.mxu0 %v17788_v22  ;;  %4151 = vmatpush1.bf16.msra.mxu1 %v17791_v23  ;;  %v17881_v22 = vld [vmem:[%s20338_s2 + $0x680] ss:$48 sps:$4 sm:$0xff]   ;;  %v17886_v23 = vld [vmem:[%s20338_s2 + $0x6e4] ss:$48 sps:$4 sm:$0xff]  }
 0x419   : > { %4066 = vmatprep.subr.bf16.mxu0 %v17796_v24  ;;  %4152 = vmatprep.subr.bf16.mxu1 %v17799_v25  ;;  %v17884_v24 = vld [vmem:[%s20338_s2 + $0x6e0] ss:$48 sps:$4 sm:$0xff]   ;;  %v17889_v25 = vld [vmem:[%s20338_s2 + $0x744] ss:$48 sps:$4 sm:$0xff]  }
 0x41c   : > { %4067 = vmatpush1.bf16.msra.mxu0 %v17794_v26  ;;  %4153 = vmatpush1.bf16.msra.mxu1 %v17797_v27  ;;  %v17887_v26 = vld [vmem:[%s20338_s2 + $0x740] ss:$48 sps:$4 sm:$0xff]   ;;  %v17892_v27 = vld [vmem:[%s20338_s2 + $0x7a4] ss:$48 sps:$4 sm:$0xff]  }
 0x41d   : > { %4068 = vmatprep.subr.bf16.mxu0 %v17802_v28  ;;  %4154 = vmatprep.subr.bf16.mxu1 %v17805_v29  ;;  %v17890_v28 = vld [vmem:[%s20338_s2 + $0x7a0] ss:$48 sps:$4 sm:$0xff]   ;;  %v17895_v29 = vld [vmem:[%s20338_s2 + $0x804] ss:$48 sps:$4 sm:$0xff]  }
 0x420   : > { %4069 = vmatpush1.bf16.msra.mxu0 %v17800_v30  ;;  %4155 = vmatpush1.bf16.msra.mxu1 %v17803_v31  ;;  %v17893_v30 = vld [vmem:[%s20338_s2 + $0x800] ss:$48 sps:$4 sm:$0xff]   ;;  %v17898_v31 = vld [vmem:[%s20338_s2 + $0x864] ss:$48 sps:$4 sm:$0xff]  }
 0x421   : > { %4070 = vmatprep.subr.bf16.mxu0 %v17808_v32  ;;  %4156 = vmatprep.subr.bf16.mxu1 %v17811_v33 }
 0x424   : > { %4071 = vmatpush1.bf16.msra.mxu0 %v17806_v34  ;;  %4157 = vmatpush1.bf16.msra.mxu1 %v17809_v35  ;;  %v17896_v34 = vld [vmem:[%s20338_s2 + $0x860] ss:$48 sps:$4 sm:$0xff]  }
 0x425   : > { %4072 = vmatprep.subr.bf16.mxu0 %v17814_v36  ;;  %4158 = vmatprep.subr.bf16.mxu1 %v17817_v38  ;;  %v17901_v38 = vld [vmem:[%s20338_s2 + $0x8c4] ss:$48 sps:$4 sm:$0xff]  }
 0x428   : > { %4073 = vmatpush1.bf16.msra.mxu0 %v17812_v39  ;;  %4159 = vmatpush1.bf16.msra.mxu1 %v17815_v40 }
 0x429   : > { %4074 = vmatprep.subr.bf16.mxu0 %v17820_v41  ;;  %4160 = vmatprep.subr.bf16.mxu1 %v17823_v42 }
 0x42c   : > { %4075 = vmatpush1.bf16.msra.mxu0 %v17818_v44  ;;  %4161 = vmatpush1.bf16.msra.mxu1 %v17821_v45  ;;  %v17899_v44 = vld [vmem:[%s20338_s2 + $0x8c0] ss:$48 sps:$4 sm:$0xff]   ;;  %v17904_v45 = vld [vmem:[%s20338_s2 + $0x924] ss:$48 sps:$4 sm:$0xff]  }
 0x42d   : > { %4076 = vmatprep.subr.bf16.mxu0 %v17826_v46  ;;  %4162 = vmatprep.subr.bf16.mxu1 %v17829_v47  ;;  %v17902_v46 = vld [vmem:[%s20338_s2 + $0x920] ss:$48 sps:$4 sm:$0xff]   ;;  %v17907_v47 = vld [vmem:[%s20338_s2 + $0x984] ss:$48 sps:$4 sm:$0xff]  }
 0x430   : > { %4077 = vmatpush1.bf16.msra.mxu0 %v17824_v48  ;;  %4163 = vmatpush1.bf16.msra.mxu1 %v17827_v49  ;;  %v17905_v48 = vld [vmem:[%s20338_s2 + $0x980] ss:$48 sps:$4 sm:$0xff]   ;;  %v17910_v49 = vld [vmem:[%s20338_s2 + $0x9e4] ss:$48 sps:$4 sm:$0xff]  }
 0x431   : > { %4175 = vmatprep.subr.bf16.mxu0 %v17832_v50  ;;  %v17908_v50 = vld [vmem:[%s20338_s2 + $0x9e0] ss:$48 sps:$4 sm:$0xff]  }
 0x433   : > { %4079 = vmatmul.mubr.bf16.vlgmr.msra.gmra.mrb[4].mxu0 %v20514_v43  ;;  %4165 = vmatmul.mubr.bf16.vlgmr.msra.gmra.mrb[4].mxu1 %v20514_v43 }
 0x434   : > { %4176 = vmatpush1.bf16.msra.mxu0 %v17830_v51  ;;  %4207 = vmatprep.mubr.bf16.mxu0 %v20420_v14  ;;  %v17913_v51 = vld [vmem:[%s20338_s2 + $0xa44] ss:$48 sps:$4 sm:$0xff]  }
 0x435   : > { %4177 = vmatprep.subr.bf16.mxu0 %v17835_v52  ;;  %4293 = vmatprep.mubr.bf16.mxu1 %v20420_v14  ;;  %v17850_v14 = vld [vmem:[%s20338_s2 + $0x264] ss:$48 sps:$4 sm:$0xff]   ;;  %v17928_v52 = vld [vmem:[%s20338_s2 + $0x2c] ss:$48 sps:$4 sm:$0xff]  }
 0x436   : > { %4261 = vmatprep.subr.bf16.mxu1 %v17928_v52  ;;  %v17992_v52 = vld [vmem:[%s20338_s2 + $0x868] ss:$48 sps:$4 sm:$0xff]  }
 0x438   : > { %4178 = vmatpush1.bf16.msra.mxu0 %v17833_v53  ;;  %v17926_v53 = vld [vmem:[%s20338_s2 + $0x28] ss:$48 sps:$4 sm:$0xff]  }
 0x439   : > { %4179 = vmatprep.subr.bf16.mxu0 %v17838_v54  ;;  %v17911_v54 = vld [vmem:[%s20338_s2 + $0xa40] ss:$48 sps:$4 sm:$0xff]   ;;  %4262 = vmatpush1.bf16.msra.mxu1 %v17926_v53  ;;  %v17997_v53 = vld [vmem:[%s20338_s2 + $0x8cc] ss:$48 sps:$4 sm:$0xff]  }
 0x43c   : > { %4180 = vmatpush1.bf16.msra.mxu0 %v17836_v55  ;;  %v17916_v55 = vld [vmem:[%s20338_s2 + $0xaa4] ss:$48 sps:$4 sm:$0xff]  }
 0x43d   : > { %4181 = vmatprep.subr.bf16.mxu0 %v17841_v56  ;;  %v17931_v56 = vld [vmem:[%s20338_s2 + $0x8c] ss:$48 sps:$4 sm:$0xff]  }
 0x43e   : > { %4263 = vmatprep.subr.bf16.mxu1 %v17931_v56  ;;  %v17998_v56 = vld [vmem:[%s20338_s2 + $0x928] ss:$48 sps:$4 sm:$0xff]  }
 0x440   : > { %4182 = vmatpush1.bf16.msra.mxu0 %v17839_v57  ;;  %v17929_v57 = vld [vmem:[%s20338_s2 + $0x88] ss:$48 sps:$4 sm:$0xff]  }
 0x441   : > { %4183 = vmatprep.subr.bf16.mxu0 %v17844_v58  ;;  %v17914_v58 = vld [vmem:[%s20338_s2 + $0xaa0] ss:$48 sps:$4 sm:$0xff]   ;;  %4264 = vmatpush1.bf16.msra.mxu1 %v17929_v57  ;;  %v18003_v57 = vld [vmem:[%s20338_s2 + $0x98c] ss:$48 sps:$4 sm:$0xff]  }
 0x444   : > { %4184 = vmatpush1.bf16.msra.mxu0 %v17842_v59  ;;  %v17919_v59 = vld [vmem:[%s20338_s2 + $0xb04] ss:$48 sps:$4 sm:$0xff]  }
 0x445   : > { %4185 = vmatprep.subr.bf16.mxu0 %v17847_v60  ;;  %v17934_v60 = vld [vmem:[%s20338_s2 + $0xec] ss:$48 sps:$4 sm:$0xff]  }
 0x446   : > { %4265 = vmatprep.subr.bf16.mxu1 %v17934_v60  ;;  %v18006_v60 = vld [vmem:[%s20338_s2 + $0x9ec] ss:$48 sps:$4 sm:$0xff]  }
 0x448   : > { %4186 = vmatpush1.bf16.msra.mxu0 %v17845_v61  ;;  %v17932_v61 = vld [vmem:[%s20338_s2 + $0xe8] ss:$48 sps:$4 sm:$0xff]  }
 0x449   : > { %4187 = vmatprep.subr.bf16.mxu0 %v17850_v14  ;;  %v17917_v14 = vld [vmem:[%s20338_s2 + $0xb00] ss:$48 sps:$4 sm:$0xff]   ;;  %4266 = vmatpush1.bf16.msra.mxu1 %v17932_v61  ;;  %v18004_v61 = vld [vmem:[%s20338_s2 + $0x9e8] ss:$48 sps:$4 sm:$0xff]  }
 0x44c   : > { %4188 = vmatpush1.bf16.msra.mxu0 %v17848_v62  ;;  %v17922_v62 = vld [vmem:[%s20338_s2 + $0xb64] ss:$48 sps:$4 sm:$0xff]  }
 0x44d   : > { %4189 = vmatprep.subr.bf16.mxu0 %v17853_v63  ;;  %v17937_v63 = vld [vmem:[%s20338_s2 + $0x14c] ss:$48 sps:$4 sm:$0xff]  }
 0x44e   : > { %4267 = vmatprep.subr.bf16.mxu1 %v17937_v63 }
 0x450   : > { %4190 = vmatpush1.bf16.msra.mxu0 %v17851_v0  ;;  %v17935_v0 = vld [vmem:[%s20338_s2 + $0x148] ss:$48 sps:$4 sm:$0xff]  }
 0x451   : > { %4191 = vmatprep.subr.bf16.mxu0 %v17856_v2  ;;  %4268 = vmatpush1.bf16.msra.mxu1 %v17935_v0  ;;  %v17940_v2 = vld [vmem:[%s20338_s2 + $0x1ac] ss:$48 sps:$4 sm:$0xff]  }
 0x452   : > { %4269 = vmatprep.subr.bf16.mxu1 %v17940_v2  ;;  %v1847_v0 = vld [vmem:[%s20346_s0] sm:$0xff]  ;;  %v18007_v2 = vld [vmem:[%s20338_s2 + $0xa48] ss:$48 sps:$4 sm:$0xff]  }
 0x454   : > { %4192 = vmatpush1.bf16.msra.mxu0 %v17854_v3  ;;  %v17920_v3 = vld [vmem:[%s20338_s2 + $0xb60] ss:$48 sps:$4 sm:$0xff]  }
 0x455   : > { %4193 = vmatprep.subr.bf16.mxu0 %v17859_v4  ;;  %v17938_v4 = vld [vmem:[%s20338_s2 + $0x1a8] ss:$48 sps:$4 sm:$0xff]  }
 0x456   : > { %4270 = vmatpush1.bf16.msra.mxu1 %v17938_v4 }
 0x458   : > { %4194 = vmatpush1.bf16.msra.mxu0 %v17857_v5  ;;  %v17943_v5 = vld [vmem:[%s20338_s2 + $0x20c] ss:$48 sps:$4 sm:$0xff]  }
 0x459   : > { %4195 = vmatprep.subr.bf16.mxu0 %v17862_v6  ;;  %v17925_v6 = vld [vmem:[%s20338_s2 + $0xbc4] ss:$48 sps:$4 sm:$0xff]   ;;  %4271 = vmatprep.subr.bf16.mxu1 %v17943_v5 }
 0x45c   : > { %4196 = vmatpush1.bf16.msra.mxu0 %v17860_v7  ;;  %v17941_v7 = vld [vmem:[%s20338_s2 + $0x208] ss:$48 sps:$4 sm:$0xff]  }
 0x45d   : > { %4197 = vmatprep.subr.bf16.mxu0 %v17865_v8  ;;  %v17946_v8 = vld [vmem:[%s20338_s2 + $0x26c] ss:$48 sps:$4 sm:$0xff]   ;;  %4272 = vmatpush1.bf16.msra.mxu1 %v17941_v7  ;;  %v18010_v7 = vld [vmem:[%s20338_s2 + $0xaa8] ss:$48 sps:$4 sm:$0xff]  }
 0x45e   : > { %4273 = vmatprep.subr.bf16.mxu1 %v17946_v8  ;;  %v18015_v8 = vld [vmem:[%s20338_s2 + $0xb0c] ss:$48 sps:$4 sm:$0xff]  }
 0x460   : > { %4198 = vmatpush1.bf16.msra.mxu0 %v17863_v9  ;;  %v17923_v9 = vld [vmem:[%s20338_s2 + $0xbc0] ss:$48 sps:$4 sm:$0xff]  }
 0x461   : > { %4199 = vmatprep.subr.bf16.mxu0 %v17868_v10  ;;  %v17944_v10 = vld [vmem:[%s20338_s2 + $0x268] ss:$48 sps:$4 sm:$0xff]  }
 0x462   : > { %4274 = vmatpush1.bf16.msra.mxu1 %v17944_v10 }
 0x464   : > { %4200 = vmatpush1.bf16.msra.mxu0 %v17866_v11  ;;  %v17949_v11 = vld [vmem:[%s20338_s2 + $0x2cc] ss:$48 sps:$4 sm:$0xff]  }
 0x465   : > { %4201 = vmatprep.subr.bf16.mxu0 %v17871_v12  ;;  %v19675_v12 = vmov 0.0   ;;  %4275 = vmatprep.subr.bf16.mxu1 %v17949_v11 }
 0x468   : > { %4202 = vmatpush1.bf16.msra.mxu0 %v17869_v13  ;;  %v17947_v13 = vld [vmem:[%s20338_s2 + $0x2c8] ss:$48 sps:$4 sm:$0xff]  }
 0x469   : > { %4203 = vmatprep.subr.bf16.mxu0 %v17874_v15  ;;  %v17952_v15 = vld [vmem:[%s20338_s2 + $0x32c] ss:$48 sps:$4 sm:$0xff]   ;;  %4276 = vmatpush1.bf16.msra.mxu1 %v17947_v13 }
 0x46a   : > { %4277 = vmatprep.subr.bf16.mxu1 %v17952_v15 }
 0x46c   : > { %4204 = vmatpush1.bf16.msra.mxu0 %v17872_v16  ;;  %v17950_v16 = vld [vmem:[%s20338_s2 + $0x328] ss:$48 sps:$4 sm:$0xff]  }
 0x46d   : > { %4205 = vmatprep.subr.bf16.mxu0 %v17877_v17  ;;  %v17955_v17 = vld [vmem:[%s20338_s2 + $0x38c] ss:$48 sps:$4 sm:$0xff]   ;;  %4278 = vmatpush1.bf16.msra.mxu1 %v17950_v16 }
 0x46e   : > { %4279 = vmatprep.subr.bf16.mxu1 %v17955_v17 }
 0x470   : > { %4206 = vmatpush1.bf16.msra.mxu0 %v17875_v18  ;;  %v17953_v18 = vld [vmem:[%s20338_s2 + $0x388] ss:$48 sps:$4 sm:$0xff]  }
 0x471   : > { %4218 = vmatprep.subr.bf16.mxu0 %v17880_v19  ;;  %v17958_v19 = vld [vmem:[%s20338_s2 + $0x3ec] ss:$48 sps:$4 sm:$0xff]   ;;  %4280 = vmatpush1.bf16.msra.mxu1 %v17953_v18 }
 0x472   : > { %4281 = vmatprep.subr.bf16.mxu1 %v17958_v19 }
 0x473   : > { %4208 = vmatmul.mubr.bf16.vlgmr.msra.gmra.mrb[8].mxu0 %v20444_v37 }
 0x474   : > { %4219 = vmatpush1.bf16.msra.mxu0 %v17878_v20  ;;  %4250 = vmatprep.mubr.bf16.mxu0 %v20473_v1  ;;  %v17956_v20 = vld [vmem:[%s20338_s2 + $0x3e8] ss:$48 sps:$4 sm:$0xff]  }
 0x475   : > { %4220 = vmatprep.subr.bf16.mxu0 %v17883_v21  ;;  %v17961_v21 = vld [vmem:[%s20338_s2 + $0x44c] ss:$48 sps:$4 sm:$0xff]   ;;  %4282 = vmatpush1.bf16.msra.mxu1 %v17956_v20 }
 0x476   : > { %4283 = vmatprep.subr.bf16.mxu1 %v17961_v21 }
 0x478   : > { %4221 = vmatpush1.bf16.msra.mxu0 %v17881_v22  ;;  %v17959_v22 = vld [vmem:[%s20338_s2 + $0x448] ss:$48 sps:$4 sm:$0xff]  }
 0x479   : > { %4222 = vmatprep.subr.bf16.mxu0 %v17886_v23  ;;  %v17964_v23 = vld [vmem:[%s20338_s2 + $0x4ac] ss:$48 sps:$4 sm:$0xff]   ;;  %4284 = vmatpush1.bf16.msra.mxu1 %v17959_v22 }
 0x47a   : > { %4285 = vmatprep.subr.bf16.mxu1 %v17964_v23 }
 0x47c   : > { %4223 = vmatpush1.bf16.msra.mxu0 %v17884_v24  ;;  %v17962_v24 = vld [vmem:[%s20338_s2 + $0x4a8] ss:$48 sps:$4 sm:$0xff]  }
 0x47d   : > { %4224 = vmatprep.subr.bf16.mxu0 %v17889_v25  ;;  %v17967_v25 = vld [vmem:[%s20338_s2 + $0x50c] ss:$48 sps:$4 sm:$0xff]   ;;  %4286 = vmatpush1.bf16.msra.mxu1 %v17962_v24 }
 0x47e   : > { %4287 = vmatprep.subr.bf16.mxu1 %v17967_v25 }
 0x480   : > { %4225 = vmatpush1.bf16.msra.mxu0 %v17887_v26  ;;  %v17965_v26 = vld [vmem:[%s20338_s2 + $0x508] ss:$48 sps:$4 sm:$0xff]  }
 0x481   : > { %4226 = vmatprep.subr.bf16.mxu0 %v17892_v27  ;;  %v17970_v27 = vld [vmem:[%s20338_s2 + $0x56c] ss:$48 sps:$4 sm:$0xff]   ;;  %4288 = vmatpush1.bf16.msra.mxu1 %v17965_v26 }
 0x482   : > { %4289 = vmatprep.subr.bf16.mxu1 %v17970_v27  ;;  %v18013_v27 = vld [vmem:[%s20338_s2 + $0xb08] ss:$48 sps:$4 sm:$0xff]  }
 0x484   : > { %4227 = vmatpush1.bf16.msra.mxu0 %v17890_v28  ;;  %v17968_v28 = vld [vmem:[%s20338_s2 + $0x568] ss:$48 sps:$4 sm:$0xff]  }
 0x485   : > { %4228 = vmatprep.subr.bf16.mxu0 %v17895_v29  ;;  %v17973_v29 = vld [vmem:[%s20338_s2 + $0x5cc] ss:$48 sps:$4 sm:$0xff]   ;;  %4290 = vmatpush1.bf16.msra.mxu1 %v17968_v28 }
 0x486   : > { %v20701_v32 = vpop.f32.mrb[0].mxu0  ;;  %v20703_v33 = vpop.f32.mrb[0].mxu1  ;;  %4291 = vmatprep.subr.bf16.mxu1 %v17973_v29 }
 0x487   : > { %v20706_v35 = vpop.f32.mrb[1].mxu0  ;;  %v20708_v36 = vpop.f32.mrb[1].mxu1 }
 0x488   : > { %v20711_v39 = vpop.f32.mrb[2].mxu0  ;;  %v20713_v40 = vpop.f32.mrb[2].mxu1  ;;  %4229 = vmatpush1.bf16.msra.mxu0 %v17893_v30  ;;  %v17971_v30 = vld [vmem:[%s20338_s2 + $0x5c8] ss:$48 sps:$4 sm:$0xff]  }
 0x489   : > { %v20715_v41 = vpop.f32.mrb[3].mxu0  ;;  %v20717_v42 = vpop.f32.mrb[3].mxu1  ;;  %4230 = vmatprep.subr.bf16.mxu0 %v17898_v31  ;;  %v17976_v31 = vld [vmem:[%s20338_s2 + $0x62c] ss:$48 sps:$4 sm:$0xff]   ;;  %4292 = vmatpush1.bf16.msra.mxu1 %v17971_v30 }
 0x48a   : > { %4304 = vmatprep.subr.bf16.mxu1 %v17976_v31  ;;  %v18018_v31 = vld [vmem:[%s20338_s2 + $0xb6c] ss:$48 sps:$4 sm:$0xff]  }
 0x48c   : > { %4231 = vmatpush1.bf16.msra.mxu0 %v17896_v34  ;;  %v17974_v34 = vld [vmem:[%s20338_s2 + $0x628] ss:$48 sps:$4 sm:$0xff]   ;;  %4294 = vmatmul.mubr.bf16.vlgmr.msra.gmra.mrb[8].mxu1 %v20444_v37 }
 0x48d   : > { %4232 = vmatprep.subr.bf16.mxu0 %v17901_v38  ;;  %v17979_v38 = vld [vmem:[%s20338_s2 + $0x68c] ss:$48 sps:$4 sm:$0xff]   ;;  %4305 = vmatpush1.bf16.msra.mxu1 %v17974_v34  ;;  %v17986_v37 = vld [vmem:[%s20338_s2 + $0x7a8] ss:$48 sps:$4 sm:$0xff]  }
 0x48e   : > { %4336 = vmatprep.mubr.bf16.mxu1 %v20473_v1  ;;  %4306 = vmatprep.subr.bf16.mxu1 %v17979_v38  ;;  %v17989_v1 = vld [vmem:[%s20338_s2 + $0x808] ss:$48 sps:$4 sm:$0xff]  }
 0x490   : > { %4233 = vmatpush1.bf16.msra.mxu0 %v17899_v44  ;;  %v17977_v44 = vld [vmem:[%s20338_s2 + $0x688] ss:$48 sps:$4 sm:$0xff]  }
 0x491   : > { %4234 = vmatprep.subr.bf16.mxu0 %v17904_v45  ;;  %v17982_v45 = vld [vmem:[%s20338_s2 + $0x6ec] ss:$48 sps:$4 sm:$0xff]   ;;  %4307 = vmatpush1.bf16.msra.mxu1 %v17977_v44  ;;  %v18016_v44 = vld [vmem:[%s20338_s2 + $0xb68] ss:$48 sps:$4 sm:$0xff]  }
 0x492   : > { %4308 = vmatprep.subr.bf16.mxu1 %v17982_v45 }
 0x494   : > { %4235 = vmatpush1.bf16.msra.mxu0 %v17902_v46  ;;  %v17980_v46 = vld [vmem:[%s20338_s2 + $0x6e8] ss:$48 sps:$4 sm:$0xff]  }
 0x495   : > { %4236 = vmatprep.subr.bf16.mxu0 %v17907_v47  ;;  %v17985_v47 = vld [vmem:[%s20338_s2 + $0x74c] ss:$48 sps:$4 sm:$0xff]   ;;  %4309 = vmatpush1.bf16.msra.mxu1 %v17980_v46 }
 0x496   : > { %4310 = vmatprep.subr.bf16.mxu1 %v17985_v47  ;;  %v18021_v47 = vld [vmem:[%s20338_s2 + $0xbcc] ss:$48 sps:$4 sm:$0xff]  }
 0x498   : > { %4237 = vmatpush1.bf16.msra.mxu0 %v17905_v48  ;;  %v17983_v48 = vld [vmem:[%s20338_s2 + $0x748] ss:$48 sps:$4 sm:$0xff]  }
 0x499   : > { %4238 = vmatprep.subr.bf16.mxu0 %v17910_v49  ;;  %v17988_v49 = vld [vmem:[%s20338_s2 + $0x7ac] ss:$48 sps:$4 sm:$0xff]   ;;  %4311 = vmatpush1.bf16.msra.mxu1 %v17983_v48 }
 0x49a   : > { %4312 = vmatprep.subr.bf16.mxu1 %v17988_v49  ;;  %v18019_v49 = vld [vmem:[%s20338_s2 + $0xbc8] ss:$48 sps:$4 sm:$0xff]  }
 0x49c   : > { %4239 = vmatpush1.bf16.msra.mxu0 %v17908_v50  ;;  %v17991_v50 = vld [vmem:[%s20338_s2 + $0x80c] ss:$48 sps:$4 sm:$0xff]  }
 0x49d   : > { %4240 = vmatprep.subr.bf16.mxu0 %v17913_v51  ;;  %v17994_v51 = vld [vmem:[%s20338_s2 + $0x86c] ss:$48 sps:$4 sm:$0xff]   ;;  %4313 = vmatpush1.bf16.msra.mxu1 %v17986_v37 }
 0x49e   : > { %4314 = vmatprep.subr.bf16.mxu1 %v17991_v50 }
 0x4a0   : > { %4241 = vmatpush1.bf16.msra.mxu0 %v17911_v54  ;;  %v17995_v54 = vld [vmem:[%s20338_s2 + $0x8c8] ss:$48 sps:$4 sm:$0xff]  }
 0x4a1   : > { %4242 = vmatprep.subr.bf16.mxu0 %v17916_v55  ;;  %4315 = vmatpush1.bf16.msra.mxu1 %v17989_v1  ;;  %v18000_v55 = vld [vmem:[%s20338_s2 + $0x92c] ss:$48 sps:$4 sm:$0xff]  }
 0x4a2   : > { %4316 = vmatprep.subr.bf16.mxu1 %v17994_v51 }
 0x4a4   : > { %4243 = vmatpush1.bf16.msra.mxu0 %v17914_v58  ;;  %v18001_v58 = vld [vmem:[%s20338_s2 + $0x988] ss:$48 sps:$4 sm:$0xff]  }
 0x4a5   : > { %4244 = vmatprep.subr.bf16.mxu0 %v17919_v59  ;;  %4317 = vmatpush1.bf16.msra.mxu1 %v17992_v52  ;;  %v1851_v59 = vlaneseq }
 0x4a6   : > { %4318 = vmatprep.subr.bf16.mxu1 %v17997_v53  ;;  %v20868_v53 = vld [vmem:[%s20346_s0 + $0x8] sm:$0xf] }
 0x4a8   : > { %4245 = vmatpush1.bf16.msra.mxu0 %v17917_v14  ;;  %v1852_v14 = vshrl.u32 %v1851_v59, 7 }
 0x4a9   : > { %4246 = vmatprep.subr.bf16.mxu0 %v17922_v62  ;;  %4319 = vmatpush1.bf16.msra.mxu1 %v17995_v54  ;;  %v18009_v62 = vld [vmem:[%s20338_s2 + $0xa4c] ss:$48 sps:$4 sm:$0xff]  }
 0x4aa   : > { %4320 = vmatprep.subr.bf16.mxu1 %v18000_v55  ;;  %v20797_v63 = vsub.s32 4, %v1852_v14  ;;  %v20802_v4 = vsub.s32 0, %v1852_v14  ;;  %v20810_v10 = vsub.s32 1, %v1852_v14  ;;  %v20812_v16 = vsub.s32 6, %v1852_v14 }
 0x4ab   : > { %v20818_v25 = vsub.s32 2, %v1852_v14  ;;  %v20824_v30 = vsub.s32 7, %v1852_v14  ;;  %v20831_v38 = vsub.s32 3, %v1852_v14 }
 0x4ac   : > { %4247 = vmatpush1.bf16.msra.mxu0 %v17920_v3  ;;  %v18012_v3 = vld [vmem:[%s20338_s2 + $0xaac] ss:$48 sps:$4 sm:$0xff]   ;;  %v1870_v5 = vrot.slane %v1847_v0, %v20797_v63  ;;  %v1858_v26 = vrot.slane %v1847_v0, %v20810_v10  ;;  %v1878_v28 = vrot.slane %v1847_v0, %v20812_v16  ;;  %v1886_v54 = vrot.slane %v20868_v53, %v20802_v4 }
 0x4ad   : > { %4248 = vmatprep.subr.bf16.mxu0 %v17925_v6  ;;  %4321 = vmatpush1.bf16.msra.mxu1 %v17998_v56  ;;  %v20805_v6 = vsub.s32 5, %v1852_v14  ;;  %v1882_v46 = vrot.slane %v1847_v0, %v20824_v30 }
 0x4ae   : > { %4322 = vmatprep.subr.bf16.mxu1 %v18003_v57  ;;  %v17035_v34 = vadd.f32 %v20706_v35, %v1858_v26  ;;  %v1866_v35 = vrot.slane %v1847_v0, %v20831_v38 }
 0x4af   : > { %v1874_v17 = vrot.slane %v1847_v0, %v20805_v6 }
 0x4b0   : > { %4249 = vmatpush1.bf16.msra.mxu0 %v17923_v9  ;;  %v1854_v9 = vrot.slane %v1847_v0, %v20802_v4  ;;  %v17039_v50 = vadd.f32 %v20708_v36, %v1866_v35  ;;  %v17037_v36 = vadd.f32 %v20715_v41, %v1858_v26  ;;  %v17041_v41 = vadd.f32 %v20717_v42, %v1866_v35 }
 0x4b1   : > { %16954 = vmatprep.subr.mxu0 %v19675_v12  ;;  %4323 = vmatpush1.bf16.msra.mxu1 %v18001_v58 }
 0x4b2   : > { %4324 = vmatprep.subr.bf16.mxu1 %v18006_v60  ;;  %v17034_v24 = vadd.f32 %v20701_v32, %v1854_v9  ;;  %v1862_v32 = vrot.slane %v1847_v0, %v20818_v25 }
 0x4b3   : > { %4251 = vmatmul.mubr.bf16.vlgmr.msra.gmra.mrb[8].mxu0 %v20514_v43 }
 0x4b4   : > { %16956 = vmatprep.mubr.msk.f32.mxu0 %vm19676_vm2, %v19675_v12  ;;  %v17038_v48 = vadd.f32 %v20703_v33, %v1862_v32  ;;  %v17036_v33 = vadd.f32 %v20711_v39, %v1854_v9 }
 0x4b5   : > { %4325 = vmatpush1.bf16.msra.mxu1 %v18004_v61 }
 0x4b6   : > { %4326 = vmatprep.subr.bf16.mxu1 %v18009_v62 }
 0x4b9   : > { %4327 = vmatpush1.bf16.msra.mxu1 %v18007_v2 }
 0x4ba   : > { %4328 = vmatprep.subr.bf16.mxu1 %v18012_v3 }
 0x4bd   : > { %4329 = vmatpush1.bf16.msra.mxu1 %v18010_v7 }
 0x4be   : > { %4330 = vmatprep.subr.bf16.mxu1 %v18015_v8 }
 0x4c1   : > { %4331 = vmatpush1.bf16.msra.mxu1 %v18013_v27 }
 0x4c2   : > { %4332 = vmatprep.subr.bf16.mxu1 %v18018_v31 }
 0x4c5   : > { %4333 = vmatpush1.bf16.msra.mxu1 %v18016_v44 }
 0x4c6   : > { %4334 = vmatprep.subr.bf16.mxu1 %v18021_v47 }
 0x4c9   : > { %4335 = vmatpush1.bf16.msra.mxu1 %v18019_v49 }
 0x4ca   : > { %16959 = vmatprep.subr.mxu1 %v19675_v12 }
 0x4cc   : > { %4337 = vmatmul.mubr.bf16.vlgmr.msra.gmra.mrb[8].mxu1 %v20514_v43  ;;  %v17040_v43 = vadd.f32 %v20713_v40, %v1862_v32 }
 0x4cd   : > { %16961 = vmatprep.mubr.msk.f32.mxu1 %vm19676_vm2, %v19675_v12 }
 0x506   : > { %v4080_v11 = vpop.f32.mrb[4].mxu0  ;;  %v4166_v13 = vpop.f32.mrb[4].mxu1 }
 0x507   : > { %v17042_v15 = vadd.f32 %v4080_v11, %v1870_v5  ;;  %v4082_v18 = vpop.f32.mrb[5].mxu0  ;;  %v4168_v19 = vpop.f32.mrb[5].mxu1  ;;  %v17046_v45 = vadd.f32 %v4166_v13, %v1878_v28 }
 0x508   : > { %v4084_v20 = vpop.f32.mrb[6].mxu0  ;;  %v4170_v21 = vpop.f32.mrb[6].mxu1  ;;  %v17043_v29 = vadd.f32 %v4082_v18, %v1874_v17  ;;  %v17047_v37 = vadd.f32 %v4168_v19, %v1882_v46 }
 0x509   : > { %v4086_v22 = vpop.f32.mrb[7].mxu0  ;;  %v20815_v23 = vpop.f32.mrb[7].mxu1  ;;  %16955 = vmatpush3.xpose.msra.mxu0 %v17042_v15  ;;  %v17044_v1 = vadd.f32 %v4084_v20, %v1870_v5  ;;  %v17048_v52 = vadd.f32 %v4170_v21, %v1878_v28 }
 0x50a   : > { %16964 = vmatprep.subr.mxu0 %v19675_v12  ;;  %v17045_v51 = vadd.f32 %v4086_v22, %v1874_v17  ;;  %v17049_v39 = vadd.f32 %v20815_v23, %v1882_v46 }
 0x50c   : > { %16957 = vmatmul.mubr.f32.vlgmr.msra.gmra.mrb[12].mxu0 %v17034_v24 }
 0x50d   : > { %16965 = vmatpush3.xpose.msra.mxu0 %v17043_v29  ;;  %16966 = vmatprep.mubr.msk.f32.mxu0 %vm19676_vm2, %v19675_v12 }
 0x50e   : > { %16974 = vmatprep.subr.mxu0 %v19675_v12 }
 0x510   : > { %16967 = vmatmul.mubr.f32.vlgmr.msra.gmra.mrb[14].mxu0 %v17035_v34 }
 0x511   : > { %16975 = vmatpush3.xpose.msra.mxu0 %v17046_v45  ;;  %16976 = vmatprep.mubr.msk.f32.mxu0 %vm19676_vm2, %v19675_v12 }
 0x512   : > { %16984 = vmatprep.subr.mxu0 %v19675_v12 }
 0x514   : > { %16977 = vmatmul.mubr.f32.vlgmr.msra.gmra.mrb[16].mxu0 %v17038_v48 }
 0x515   : > { %16985 = vmatpush3.xpose.msra.mxu0 %v17047_v37  ;;  %16986 = vmatprep.mubr.msk.f32.mxu0 %vm19676_vm2, %v19675_v12 }
 0x516   : > { %16994 = vmatprep.subr.mxu0 %v19675_v12 }
 0x518   : > { %16987 = vmatmul.mubr.f32.vlgmr.msra.gmra.mrb[18].mxu0 %v17039_v50 }
 0x519   : > { %16995 = vmatpush3.xpose.msra.mxu0 %v17044_v1  ;;  %16996 = vmatprep.mubr.msk.f32.mxu0 %vm19676_vm2, %v19675_v12 }
 0x51a   : > { %17004 = vmatprep.subr.mxu0 %v19675_v12 }
 0x51c   : > { %16997 = vmatmul.mubr.f32.vlgmr.msra.gmra.mrb[20].mxu0 %v17036_v33 }
 0x51d   : > { %17005 = vmatpush3.xpose.msra.mxu0 %v17045_v51  ;;  %17006 = vmatprep.mubr.msk.f32.mxu0 %vm19676_vm2, %v19675_v12 }
 0x51e   : > { %17014 = vmatprep.subr.mxu0 %v19675_v12 }
 0x520   : > { %17007 = vmatmul.mubr.f32.vlgmr.msra.gmra.mrb[22].mxu0 %v17037_v36 }
 0x521   : > { %17015 = vmatpush3.xpose.msra.mxu0 %v17048_v52  ;;  %17016 = vmatprep.mubr.msk.f32.mxu0 %vm19676_vm2, %v19675_v12 }
 0x522   : > { %17024 = vmatprep.subr.mxu0 %v19675_v12 }
 0x524   : > { %17017 = vmatmul.mubr.f32.vlgmr.msra.gmra.mrb[24].mxu0 %v17040_v43 }
 0x525   : > { %17025 = vmatpush3.xpose.msra.mxu0 %v17049_v39  ;;  %17026 = vmatprep.mubr.msk.f32.mxu0 %vm19676_vm2, %v19675_v12 }
 0x528   : > { %17027 = vmatmul.mubr.f32.vlgmr.msra.gmra.mrb[26].mxu0 %v17041_v41 }
 0x586   : > { %v4252_v55 = vpop.f32.mrb[8].mxu0 }
 0x587   : > { %v17050_v56 = vadd.f32 %v4252_v55, %v1886_v54  ;;  %v20872_v40 = vpop.f32.mrb[9].mxu0 }
 0x588   : > { %v4256_v57 = vpop.f32.mrb[10].mxu0 }
 0x589   : > { %v20874_v58 = vadd.f32 %v4256_v57, %v1886_v54  ;;  %v20876_v59 = vpop.f32.mrb[11].mxu0  ;;  %16960 = vmatpush3.msra.mxu1 %v17050_v56 }
 0x58a   : > { %16969 = vmatprep.subr.mxu1 %v19675_v12 }
 0x59f   : > { %v20887_v46 = vpop.f32.mrb[8].mxu1 }
 0x5a0   : > { %v20889_v47 = vpop.f32.mrb[9].mxu1 }
 0x5a1   : > { %v20891_v48 = vpop.f32.mrb[10].mxu1 }
 0x5a2   : > { %v20893_v35 = vpop.f32.mrb[11].mxu1 }
 0x5df   : > { %v4413_v60 = vpop.f32.mrb[12].mxu0 }
 0x5e0   : > { %v4417_v42 = vmul.f32 0.088388346, %v4413_v60  ;;  %v16958_v61 = vpop.f32.mrb[13].mxu0 }
 0x5e2   : > { %v4419_v14 = vsel %vm4418_vm3, %v4417_v42, -inf }
 0x5e3   : > { %4420 = vmax.xlane.f32.xlu0 %v4419_v14  ;;  %v4569_v62 = vpop.f32.mrb[14].mxu0 }
 0x5e4   : > { %v4573_v0 = vmul.f32 0.088388346, %v4569_v62  ;;  %v16968_v2 = vpop.f32.mrb[15].mxu0 }
 0x5e6   : > { %v4574_v3 = vsel %vm4418_vm3, %v4573_v0, -inf }
 0x5e7   : > { %4575 = vmax.xlane.f32.xlu0 %v4574_v3  ;;  %v4724_v5 = vpop.f32.mrb[16].mxu0 }
 0x5e8   : > { %v4728_v7 = vmul.f32 0.088388346, %v4724_v5  ;;  %v16978_v8 = vpop.f32.mrb[17].mxu0 }
 0x5ea   : > { %v4729_v9 = vsel %vm4418_vm3, %v4728_v7, -inf }
 0x5eb   : > { %4730 = vmax.xlane.f32.xlu1 %v4729_v9  ;;  %v4879_v11 = vpop.f32.mrb[18].mxu0 }
 0x5ec   : > { %v4883_v13 = vmul.f32 0.088388346, %v4879_v11  ;;  %v16988_v15 = vpop.f32.mrb[19].mxu0 }
 0x5ee   : > { %v4884_v17 = vsel %vm4418_vm3, %v4883_v13, -inf }
 0x5ef   : > { %4885 = vmax.xlane.f32.xlu1 %v4884_v17  ;;  %v5034_v18 = vpop.f32.mrb[20].mxu0 }
 0x5f0   : > { %v5038_v19 = vmul.f32 0.088388346, %v5034_v18  ;;  %v16998_v20 = vpop.f32.mrb[21].mxu0 }
 0x5f2   : > { %v5039_v21 = vsel %vm4418_vm3, %v5038_v19, -inf }
 0x5f3   : > { %5040 = vmax.xlane.f32.xlu0 %v5039_v21  ;;  %v5189_v22 = vpop.f32.mrb[22].mxu0 }
 0x5f4   : > { %v5193_v23 = vmul.f32 0.088388346, %v5189_v22  ;;  %v17008_v24 = vpop.f32.mrb[23].mxu0 }
 0x5f6   : > { %v5194_v26 = vsel %vm4418_vm3, %v5193_v23, -inf }
 0x5f7   : > { %5195 = vmax.xlane.f32.xlu1 %v5194_v26  ;;  %v5344_v27 = vpop.f32.mrb[24].mxu0 }
 0x5f8   : > { %v5348_v28 = vmul.f32 0.088388346, %v5344_v27  ;;  %v17018_v29 = vpop.f32.mrb[25].mxu0 }
 0x5f9   : > { %v18024_v29 = vld [vmem:[%s20348_s24 + $0x4] ss:$16 sps:$4 sm:$0xff]  }
 0x5fa   : > { %v5349_v31 = vsel %vm4418_vm3, %v5348_v28, -inf  ;;  %6382 = vmatprep.subr.bf16.mxu0 %v18024_v29 }
 0x5fb   : > { %5350 = vmax.xlane.f32.xlu0 %v5349_v31  ;;  %v5499_v32 = vpop.f32.mrb[26].mxu0  ;;  %v18030_v31 = vld [vmem:[%s20348_s24 + $0x24] ss:$16 sps:$4 sm:$0xff]  }
 0x5fc   : > { %v5503_v34 = vmul.f32 0.088388346, %v5499_v32  ;;  %v17028_v44 = vpop.f32.mrb[27].mxu0  ;;  %v18028_v32 = vld [vmem:[%s20348_s24 + $0x20] ss:$16 sps:$4 sm:$0xff]  }
 0x5fd   : > { %v18034_v44 = vld [vmem:[%s20348_s24 + $0x40] ss:$16 sps:$4 sm:$0xff]  }
 0x5fe   : > { %v5504_v45 = vsel %vm4418_vm3, %v5503_v34, -inf }
 0x5ff   : > { %5505 = vmax.xlane.f32.xlu1 %v5504_v45  ;;  %v18042_v45 = vld [vmem:[%s20348_s24 + $0x64] ss:$16 sps:$4 sm:$0xff]  }
 0x670   : > { %v4421_v49 = vpop.xlane.xlu0 %4420 }
 0x671   : > { %v4422_v37 = vsub.f32 %v4417_v42, %v4421_v49  ;;  %v18040_v49 = vld [vmem:[%s20348_s24 + $0x60] ss:$16 sps:$4 sm:$0xff]  }
 0x673   : > { %v4423_v50 = vmul.f32 1.442695, %v4422_v37  ;;  %v18048_v37 = vld [vmem:[%s20348_s24 + $0x84] ss:$16 sps:$4 sm:$0xff]  }
 0x674   : > { %v4576_v1 = vpop.xlane.xlu0 %4575 }
 0x675   : > { %18982 = vpow2.f32 %v4423_v50  ;;  %v4577_v33 = vsub.f32 %v4573_v0, %v4576_v1  ;;  %v18046_v50 = vld [vmem:[%s20348_s24 + $0x80] ss:$16 sps:$4 sm:$0xff]   ;;  %v18054_v1 = vld [vmem:[%s20348_s24 + $0xa4] ss:$16 sps:$4 sm:$0xff]  }
 0x677   : > { %v4578_v51 = vmul.f32 1.442695, %v4577_v33  ;;  %v18052_v33 = vld [vmem:[%s20348_s24 + $0xa0] ss:$16 sps:$4 sm:$0xff]  }
 0x678   : > { %v4731_v36 = vpop.xlane.xlu1 %4730 }
 0x679   : > { %18984 = vpow2.f32 %v4578_v51  ;;  %v4732_v52 = vsub.f32 %v4728_v7, %v4731_v36  ;;  %v18060_v51 = vld [vmem:[%s20348_s24 + $0xc4] ss:$16 sps:$4 sm:$0xff]   ;;  %v18058_v36 = vld [vmem:[%s20348_s24 + $0xc0] ss:$16 sps:$4 sm:$0xff]  }
 0x67b   : > { %v4733_v43 = vmul.f32 1.442695, %v4732_v52  ;;  %v18066_v52 = vld [vmem:[%s20348_s24 + $0xe4] ss:$16 sps:$4 sm:$0xff]  }
 0x67c   : > { %v4886_v39 = vpop.xlane.xlu1 %4885 }
 0x67d   : > { %18986 = vpow2.f32 %v4733_v43  ;;  %v4887_v41 = vsub.f32 %v4883_v13, %v4886_v39  ;;  %v18064_v43 = vld [vmem:[%s20348_s24 + $0xe0] ss:$16 sps:$4 sm:$0xff]   ;;  %v18072_v39 = vld [vmem:[%s20348_s24 + $0x104] ss:$16 sps:$4 sm:$0xff]  }
 0x67f   : > { %v20895_v54 = vpop.eup %18982  ;;  %v4888_v55 = vmul.f32 1.442695, %v4887_v41  ;;  %v18070_v41 = vld [vmem:[%s20348_s24 + $0x100] ss:$16 sps:$4 sm:$0xff]  }
 0x680   : > { %v5041_v56 = vpop.xlane.xlu0 %5040  ;;  %v4425_v57 = vsel %vm4418_vm3, %v20895_v54, 0.0 }
 0x681   : > { %18988 = vpow2.f32 %v4888_v55  ;;  %v5042_v60 = vsub.f32 %v5038_v19, %v5041_v56  ;;  %4426 = vadd.xlane.f32.xlu0 %v4425_v57  ;;  %v18078_v55 = vld [vmem:[%s20348_s24 + $0x124] ss:$16 sps:$4 sm:$0xff]   ;;  %v18076_v56 = vld [vmem:[%s20348_s24 + $0x120] ss:$16 sps:$4 sm:$0xff]  }
 0x682   : > { %v18084_v57 = vld [vmem:[%s20348_s24 + $0x144] ss:$16 sps:$4 sm:$0xff]  }
 0x683   : > { %v20899_v42 = vpop.eup %18984  ;;  %v5043_v61 = vmul.f32 1.442695, %v5042_v60  ;;  %v18082_v60 = vld [vmem:[%s20348_s24 + $0x140] ss:$16 sps:$4 sm:$0xff]  }
 0x684   : > { %v5196_v14 = vpop.xlane.xlu1 %5195  ;;  %v4580_v62 = vsel %vm4418_vm3, %v20899_v42, 0.0 }
 0x685   : > { %18990 = vpow2.f32 %v5043_v61  ;;  %v5197_v0 = vsub.f32 %v5193_v23, %v5196_v14  ;;  %4581 = vadd.xlane.f32.xlu1 %v4580_v62 }
 0x687   : > { %v20903_v2 = vpop.eup %18986  ;;  %v5198_v3 = vmul.f32 1.442695, %v5197_v0  ;;  %v1890_v0 = vrot.slane %v20868_v53, %v20810_v10 }
 0x688   : > { %v5351_v5 = vpop.xlane.xlu0 %5350  ;;  %v4735_v7 = vsel %vm4418_vm3, %v20903_v2, 0.0 }
 0x689   : > { %18992 = vpow2.f32 %v5198_v3  ;;  %v5352_v8 = vsub.f32 %v5348_v28, %v5351_v5  ;;  %4736 = vadd.xlane.f32.xlu0 %v4735_v7  ;;  %v18022_v28 = vld [vmem:[%s20348_s24] ss:$16 sps:$4 sm:$0xff]  }
 0x68a   : > { %6383 = vmatpush1.bf16.msra.mxu0 %v18022_v28 }
 0x68b   : > { %v20907_v9 = vpop.eup %18988  ;;  %v5353_v11 = vmul.f32 1.442695, %v5352_v8  ;;  %6384 = vmatprep.subr.bf16.mxu0 %v18030_v31  ;;  %v17051_v8 = vadd.f32 %v20872_v40, %v1890_v0  ;;  %v1898_v40 = vrot.slane %v20868_v53, %v20831_v38  ;;  %v18027_v31 = vld [vmem:[%s20348_s24 + $0xc] ss:$16 sps:$4 sm:$0xff]  }
 0x68c   : > { %v5506_v13 = vpop.xlane.xlu1 %5505  ;;  %v4890_v15 = vsel %vm4418_vm3, %v20907_v9, 0.0 }
 0x68d   : > { %18994 = vpow2.f32 %v5353_v11  ;;  %v5507_v17 = vsub.f32 %v5503_v34, %v5506_v13  ;;  %4891 = vadd.xlane.f32.xlu1 %v4890_v15  ;;  %v18036_v34 = vld [vmem:[%s20348_s24 + $0x44] ss:$16 sps:$4 sm:$0xff]   ;;  %v1894_v11 = vrot.slane %v20868_v53, %v20818_v25 }
 0x68e   : > { %6385 = vmatpush1.bf16.msra.mxu0 %v18028_v32  ;;  %v18025_v32 = vld [vmem:[%s20348_s24 + $0x8] ss:$16 sps:$4 sm:$0xff]  }
 0x68f   : > { %v20911_v18 = vpop.eup %18990  ;;  %v5508_v19 = vmul.f32 1.442695, %v5507_v17  ;;  %6386 = vmatprep.subr.bf16.mxu0 %v18036_v34  ;;  %v18033_v34 = vld [vmem:[%s20348_s24 + $0x2c] ss:$16 sps:$4 sm:$0xff]  }
 0x690   : > { %v5045_v20 = vsel %vm4418_vm3, %v20911_v18, 0.0 }
 0x691   : > { %18996 = vpow2.f32 %v5508_v19  ;;  %5046 = vadd.xlane.f32.xlu0 %v5045_v20 }
 0x692   : > { %6387 = vmatpush1.bf16.msra.mxu0 %v18034_v44  ;;  %v18039_v44 = vld [vmem:[%s20348_s24 + $0x4c] ss:$16 sps:$4 sm:$0xff]  }
 0x693   : > { %v20915_v21 = vpop.eup %18992  ;;  %6388 = vmatprep.subr.bf16.mxu0 %v18042_v45  ;;  %v18037_v45 = vld [vmem:[%s20348_s24 + $0x48] ss:$16 sps:$4 sm:$0xff]  }
 0x694   : > { %v5200_v22 = vsel %vm4418_vm3, %v20915_v21, 0.0 }
 0x695   : > { %5201 = vadd.xlane.f32.xlu1 %v5200_v22 }
 0x696   : > { %6389 = vmatpush1.bf16.msra.mxu0 %v18040_v49  ;;  %v18051_v49 = vld [vmem:[%s20348_s24 + $0x8c] ss:$16 sps:$4 sm:$0xff]  }
 0x697   : > { %v20919_v23 = vpop.eup %18994  ;;  %6390 = vmatprep.subr.bf16.mxu0 %v18048_v37  ;;  %v18049_v37 = vld [vmem:[%s20348_s24 + $0x88] ss:$16 sps:$4 sm:$0xff]  }
 0x698   : > { %v5355_v24 = vsel %vm4418_vm3, %v20919_v23, 0.0 }
 0x699   : > { %5356 = vadd.xlane.f32.xlu0 %v5355_v24 }
 0x69a   : > { %6391 = vmatpush1.bf16.msra.mxu0 %v18046_v50  ;;  %v18057_v50 = vld [vmem:[%s20348_s24 + $0xac] ss:$16 sps:$4 sm:$0xff]  }
 0x69b   : > { %v20923_v26 = vpop.eup %18996  ;;  %6392 = vmatprep.subr.bf16.mxu0 %v18054_v1  ;;  %v18055_v1 = vld [vmem:[%s20348_s24 + $0xa8] ss:$16 sps:$4 sm:$0xff]  }
 0x69c   : > { %v5510_v27 = vsel %vm4418_vm3, %v20923_v26, 0.0 }
 0x69d   : > { %5511 = vadd.xlane.f32.xlu1 %v5510_v27 }
 0x69e   : > { %6393 = vmatpush1.bf16.msra.mxu0 %v18052_v33  ;;  %v18063_v33 = vld [vmem:[%s20348_s24 + $0xcc] ss:$16 sps:$4 sm:$0xff]  }
 0x69f   : > { %6394 = vmatprep.subr.bf16.mxu0 %v18060_v51  ;;  %v18061_v51 = vld [vmem:[%s20348_s24 + $0xc8] ss:$16 sps:$4 sm:$0xff]  }
 0x6a2   : > { %6395 = vmatpush1.bf16.msra.mxu0 %v18058_v36  ;;  %v18069_v36 = vld [vmem:[%s20348_s24 + $0xec] ss:$16 sps:$4 sm:$0xff]  }
 0x6a3   : > { %6396 = vmatprep.subr.bf16.mxu0 %v18066_v52  ;;  %v18067_v52 = vld [vmem:[%s20348_s24 + $0xe8] ss:$16 sps:$4 sm:$0xff]  }
 0x6a6   : > { %6397 = vmatpush1.bf16.msra.mxu0 %v18064_v43  ;;  %v18075_v43 = vld [vmem:[%s20348_s24 + $0x10c] ss:$16 sps:$4 sm:$0xff]  }
 0x6a7   : > { %6398 = vmatprep.subr.bf16.mxu0 %v18072_v39  ;;  %v18073_v39 = vld [vmem:[%s20348_s24 + $0x108] ss:$16 sps:$4 sm:$0xff]  }
 0x6aa   : > { %6399 = vmatpush1.bf16.msra.mxu0 %v18070_v41  ;;  %v18081_v41 = vld [vmem:[%s20348_s24 + $0x12c] ss:$16 sps:$4 sm:$0xff]  }
 0x6ab   : > { %6400 = vmatprep.subr.bf16.mxu0 %v18078_v55  ;;  %v18079_v55 = vld [vmem:[%s20348_s24 + $0x128] ss:$16 sps:$4 sm:$0xff]  }
 0x6ae   : > { %6401 = vmatpush1.bf16.msra.mxu0 %v18076_v56  ;;  %v18087_v56 = vld [vmem:[%s20348_s24 + $0x14c] ss:$16 sps:$4 sm:$0xff]  }
 0x6af   : > { %6402 = vmatprep.subr.bf16.mxu0 %v18084_v57  ;;  %v18085_v57 = vld [vmem:[%s20348_s24 + $0x148] ss:$16 sps:$4 sm:$0xff]  }
 0x6b2   : > { %6403 = vmatpush1.bf16.msra.mxu0 %v18082_v60  ;;  %v18088_v60 = vld [vmem:[%s20348_s24 + $0x160] ss:$16 sps:$4 sm:$0xff]  }
 0x70e   : > { %v4427_v61 = vpop.xlane.xlu0 %4426 }
 0x70f   : > { %18998 = vrcp.f32 %v4427_v61  ;;  %v18090_v61 = vld [vmem:[%s20348_s24 + $0x164] ss:$16 sps:$4 sm:$0xff]  }
 0x710   : > { %6404 = vmatprep.subr.bf16.mxu0 %v18090_v61  ;;  %v18147_v61 = vld [vmem:[%s20348_s24 + $0x28c] ss:$16 sps:$4 sm:$0xff]  }
 0x711   : > { %6405 = vmatpush1.bf16.msra.mxu0 %v18088_v60  ;;  %v18144_v60 = vld [vmem:[%s20348_s24 + $0x284] ss:$16 sps:$4 sm:$0xff]  }
 0x712   : > { %v4582_v14 = vpop.xlane.xlu1 %4581 }
 0x713   : > { %19000 = vrcp.f32 %v4582_v14  ;;  %v18091_v14 = vld [vmem:[%s20348_s24 + $0x168] ss:$16 sps:$4 sm:$0xff]  }
 0x716   : > { %v4737_v62 = vpop.xlane.xlu0 %4736 }
 0x717   : > { %19002 = vrcp.f32 %v4737_v62  ;;  %v18093_v62 = vld [vmem:[%s20348_s24 + $0x16c] ss:$16 sps:$4 sm:$0xff]  }
 0x719   : > { %v18999_v3 = vpop.eup %18998 }
 0x71a   : > { %v4429_v5 = vmul.f32 %v18999_v3, %v20895_v54  ;;  %v4892_v7 = vpop.xlane.xlu1 %4891  ;;  %v17054_v54 = vadd.f32 %v20887_v46, %v1894_v11  ;;  %v18096_v3 = vld [vmem:[%s20348_s24 + $0x184] ss:$16 sps:$4 sm:$0xff]  }
 0x71b   : > { %19004 = vrcp.f32 %v4892_v7  ;;  %v18099_v7 = vld [vmem:[%s20348_s24 + $0x18c] ss:$16 sps:$4 sm:$0xff]   ;;  %6406 = vmatprep.subr.bf16.mxu0 %v18096_v3 }
 0x71c   : > { %16962 = vmatmul.mubr.msk.f32.vlgmr.msra.gmra.mrb[12].mxu1 %vm4418_vm3, %v4429_v5  ;;  %v18097_v5 = vld [vmem:[%s20348_s24 + $0x188] ss:$16 sps:$4 sm:$0xff]   ;;  %v18153_v3 = vld [vmem:[%s20348_s24 + $0x2ac] ss:$16 sps:$4 sm:$0xff]  }
 0x71d   : > { %v19001_v13 = vpop.eup %19000  ;;  %16970 = vmatpush3.msra.mxu1 %v17051_v8  ;;  %16971 = vmatprep.mubr.msk.f32.mxu1 %vm19676_vm2, %v19675_v12  ;;  %v18100_v8 = vld [vmem:[%s20348_s24 + $0x1a0] ss:$16 sps:$4 sm:$0xff]  }
 0x71e   : > { %v4584_v15 = vmul.f32 %v19001_v13, %v20899_v42  ;;  %v5047_v17 = vpop.xlane.xlu0 %5046  ;;  %16979 = vmatprep.subr.mxu1 %v19675_v12  ;;  %v17055_v42 = vadd.f32 %v20889_v47, %v1898_v40  ;;  %v18103_v13 = vld [vmem:[%s20348_s24 + $0x1a8] ss:$16 sps:$4 sm:$0xff]  }
 0x71f   : > { %19006 = vrcp.f32 %v5047_v17  ;;  %v18106_v17 = vld [vmem:[%s20348_s24 + $0x1c0] ss:$16 sps:$4 sm:$0xff]  }
 0x720   : > { %16972 = vmatmul.mubr.msk.f32.vlgmr.msra.gmra.mrb[14].mxu1 %vm4418_vm3, %v4584_v15  ;;  %v18105_v15 = vld [vmem:[%s20348_s24 + $0x1ac] ss:$16 sps:$4 sm:$0xff]  }
 0x721   : > { %v19003_v19 = vpop.eup %19002  ;;  %16980 = vmatpush3.msra.mxu1 %v17054_v54  ;;  %16981 = vmatprep.mubr.msk.f32.mxu1 %vm19676_vm2, %v19675_v12  ;;  %v18108_v54 = vld [vmem:[%s20348_s24 + $0x1c4] ss:$16 sps:$4 sm:$0xff]  }
 0x722   : > { %v4739_v20 = vmul.f32 %v19003_v19, %v20903_v2  ;;  %v5202_v22 = vpop.xlane.xlu1 %5201  ;;  %16989 = vmatprep.subr.mxu1 %v19675_v12  ;;  %v18111_v19 = vld [vmem:[%s20348_s24 + $0x1cc] ss:$16 sps:$4 sm:$0xff]  }
 0x723   : > { %19008 = vrcp.f32 %v5202_v22  ;;  %v18114_v22 = vld [vmem:[%s20348_s24 + $0x1e4] ss:$16 sps:$4 sm:$0xff]  }
 0x724   : > { %16982 = vmatmul.mubr.msk.f32.vlgmr.msra.gmra.mrb[16].mxu1 %vm4418_vm3, %v4739_v20  ;;  %v18112_v20 = vld [vmem:[%s20348_s24 + $0x1e0] ss:$16 sps:$4 sm:$0xff]  }
 0x725   : > { %v19005_v46 = vpop.eup %19004  ;;  %16990 = vmatpush3.msra.mxu1 %v17055_v42  ;;  %16991 = vmatprep.mubr.msk.f32.mxu1 %vm19676_vm2, %v19675_v12  ;;  %v18115_v42 = vld [vmem:[%s20348_s24 + $0x1e8] ss:$16 sps:$4 sm:$0xff]  }
 0x726   : > { %v4894_v53 = vmul.f32 %v19005_v46, %v20907_v9  ;;  %v5357_v24 = vpop.xlane.xlu0 %5356  ;;  %16999 = vmatprep.subr.mxu1 %v19675_v12  ;;  %v17053_v9 = vadd.f32 %v20876_v59, %v1890_v0  ;;  %v18094_v0 = vld [vmem:[%s20348_s24 + $0x180] ss:$16 sps:$4 sm:$0xff]   ;;  %v18117_v46 = vld [vmem:[%s20348_s24 + $0x1ec] ss:$16 sps:$4 sm:$0xff]  }
 0x727   : > { %19010 = vrcp.f32 %v5357_v24  ;;  %6407 = vmatpush1.bf16.msra.mxu0 %v18094_v0  ;;  %v18123_v24 = vld [vmem:[%s20348_s24 + $0x20c] ss:$16 sps:$4 sm:$0xff]   ;;  %v18150_v0 = vld [vmem:[%s20348_s24 + $0x2a4] ss:$16 sps:$4 sm:$0xff]  }
 0x728   : > { %16992 = vmatmul.mubr.msk.f32.vlgmr.msra.gmra.mrb[18].mxu1 %vm4418_vm3, %v4894_v53  ;;  %v18120_v53 = vld [vmem:[%s20348_s24 + $0x204] ss:$16 sps:$4 sm:$0xff]  }
 0x729   : > { %v19007_v2 = vpop.eup %19006  ;;  %17000 = vmatpush3.msra.mxu1 %v20874_v58  ;;  %17001 = vmatprep.mubr.msk.f32.mxu1 %vm19676_vm2, %v19675_v12 }
 0x72a   : > { %v5049_v47 = vmul.f32 %v19007_v2, %v20911_v18  ;;  %v5512_v27 = vpop.xlane.xlu1 %5511  ;;  %17009 = vmatprep.subr.mxu1 %v19675_v12  ;;  %v17056_v18 = vadd.f32 %v20891_v48, %v1894_v11  ;;  %v18102_v11 = vld [vmem:[%s20348_s24 + $0x1a4] ss:$16 sps:$4 sm:$0xff]  }
 0x72b   : > { %19012 = vrcp.f32 %v5512_v27  ;;  %6408 = vmatprep.subr.bf16.mxu0 %v18102_v11  ;;  %v18159_v11 = vld [vmem:[%s20348_s24 + $0x2cc] ss:$16 sps:$4 sm:$0xff]  }
 0x72c   : > { %17002 = vmatmul.mubr.msk.f32.vlgmr.msra.gmra.mrb[20].mxu1 %vm4418_vm3, %v5049_v47  ;;  %6409 = vmatpush1.bf16.msra.mxu0 %v18100_v8  ;;  %v18156_v8 = vld [vmem:[%s20348_s24 + $0x2c4] ss:$16 sps:$4 sm:$0xff]  }
 0x72d   : > { %v19009_v28 = vpop.eup %19008  ;;  %17010 = vmatpush3.msra.mxu1 %v17053_v9  ;;  %17011 = vmatprep.mubr.msk.f32.mxu1 %vm19676_vm2, %v19675_v12 }
 0x72e   : > { %v5204_v58 = vmul.f32 %v19009_v28, %v20915_v21  ;;  %17019 = vmatprep.subr.mxu1 %v19675_v12  ;;  %v17057_v21 = vadd.f32 %v20893_v35, %v1898_v40  ;;  %v18031_v35 = vld [vmem:[%s20348_s24 + $0x28] ss:$16 sps:$4 sm:$0xff]   ;;  %6410 = vmatprep.subr.bf16.mxu0 %v18108_v54  ;;  %v18165_v54 = vld [vmem:[%s20348_s24 + $0x2ec] ss:$16 sps:$4 sm:$0xff]  }
 0x72f   : > { %v18109_v40 = vld [vmem:[%s20348_s24 + $0x1c8] ss:$16 sps:$4 sm:$0xff]  }
 0x730   : > { %17012 = vmatmul.mubr.msk.f32.vlgmr.msra.gmra.mrb[22].mxu1 %vm4418_vm3, %v5204_v58  ;;  %6411 = vmatpush1.bf16.msra.mxu0 %v18106_v17  ;;  %v18162_v17 = vld [vmem:[%s20348_s24 + $0x2e4] ss:$16 sps:$4 sm:$0xff]  }
 0x731   : > { %v19011_v29 = vpop.eup %19010  ;;  %17020 = vmatpush3.msra.mxu1 %v17056_v18  ;;  %17021 = vmatprep.mubr.msk.f32.mxu1 %vm19676_vm2, %v19675_v12 }
 0x732   : > { %v5359_v59 = vmul.f32 %v19011_v29, %v20919_v23  ;;  %17029 = vmatprep.subr.mxu1 %v19675_v12  ;;  %6412 = vmatprep.subr.bf16.mxu0 %v18114_v22  ;;  %v18171_v22 = vld [vmem:[%s20348_s24 + $0x30c] ss:$16 sps:$4 sm:$0xff]  }
 0x734   : > { %17022 = vmatmul.mubr.msk.f32.vlgmr.msra.gmra.mrb[24].mxu1 %vm4418_vm3, %v5359_v59  ;;  %6413 = vmatpush1.bf16.msra.mxu0 %v18112_v20  ;;  %v18168_v20 = vld [vmem:[%s20348_s24 + $0x304] ss:$16 sps:$4 sm:$0xff]  }
 0x735   : > { %v19013_v48 = vpop.eup %19012  ;;  %17030 = vmatpush3.msra.mxu1 %v17057_v21  ;;  %17031 = vmatprep.mubr.msk.f32.mxu1 %vm19676_vm2, %v19675_v12  ;;  %v18045_v12 = vld [vmem:[%s20348_s24 + $0x6c] ss:$16 sps:$4 sm:$0xff]  }
 0x736   : > { %v5514_v23 = vmul.f32 %v19013_v48, %v20923_v26  ;;  %6468 = vmatprep.subr.bf16.mxu1 %v18027_v31  ;;  %v18043_v26 = vld [vmem:[%s20348_s24 + $0x68] ss:$16 sps:$4 sm:$0xff]   ;;  %6425 = vmatprep.subr.bf16.mxu0 %v18120_v53  ;;  %v18174_v53 = vld [vmem:[%s20348_s24 + $0x324] ss:$16 sps:$4 sm:$0xff]  }
 0x738   : > { %17032 = vmatmul.mubr.msk.f32.vlgmr.msra.gmra.mrb[26].mxu1 %vm4418_vm3, %v5514_v23 }
 0x739   : > { %6469 = vmatpush1.bf16.msra.mxu1 %v18025_v32 }
 0x73a   : > { %6470 = vmatprep.subr.bf16.mxu1 %v18033_v34  ;;  %v18118_v34 = vld [vmem:[%s20348_s24 + $0x200] ss:$16 sps:$4 sm:$0xff]  }
 0x73d   : > { %6471 = vmatpush1.bf16.msra.mxu1 %v18031_v35  ;;  %v18121_v35 = vld [vmem:[%s20348_s24 + $0x208] ss:$16 sps:$4 sm:$0xff]  }
 0x73e   : > { %6472 = vmatprep.subr.bf16.mxu1 %v18039_v44  ;;  %v18126_v44 = vld [vmem:[%s20348_s24 + $0x224] ss:$16 sps:$4 sm:$0xff]  }
 0x741   : > { %6473 = vmatpush1.bf16.msra.mxu1 %v18037_v45  ;;  %v18129_v45 = vld [vmem:[%s20348_s24 + $0x22c] ss:$16 sps:$4 sm:$0xff]  }
 0x742   : > { %6474 = vmatprep.subr.bf16.mxu1 %v18045_v12 }
 0x745   : > { %6475 = vmatpush1.bf16.msra.mxu1 %v18043_v26 }
 0x746   : > { %6476 = vmatprep.subr.bf16.mxu1 %v18051_v49 }
 0x749   : > { %6477 = vmatpush1.bf16.msra.mxu1 %v18049_v37  ;;  %v18124_v37 = vld [vmem:[%s20348_s24 + $0x220] ss:$16 sps:$4 sm:$0xff]  }
 0x74a   : > { %6478 = vmatprep.subr.bf16.mxu1 %v18057_v50  ;;  %v18127_v50 = vld [vmem:[%s20348_s24 + $0x228] ss:$16 sps:$4 sm:$0xff]  }
 0x74d   : > { %6479 = vmatpush1.bf16.msra.mxu1 %v18055_v1  ;;  %v18132_v1 = vld [vmem:[%s20348_s24 + $0x244] ss:$16 sps:$4 sm:$0xff]  }
 0x74e   : > { %6480 = vmatprep.subr.bf16.mxu1 %v18063_v33  ;;  %v18135_v33 = vld [vmem:[%s20348_s24 + $0x24c] ss:$16 sps:$4 sm:$0xff]  }
 0x751   : > { %6481 = vmatpush1.bf16.msra.mxu1 %v18061_v51 }
 0x752   : > { %6482 = vmatprep.subr.bf16.mxu1 %v18069_v36 }
 0x755   : > { %6483 = vmatpush1.bf16.msra.mxu1 %v18067_v52 }
 0x756   : > { %6484 = vmatprep.subr.bf16.mxu1 %v18075_v43  ;;  %v18130_v43 = vld [vmem:[%s20348_s24 + $0x240] ss:$16 sps:$4 sm:$0xff]  }
 0x759   : > { %6485 = vmatpush1.bf16.msra.mxu1 %v18073_v39  ;;  %v18133_v39 = vld [vmem:[%s20348_s24 + $0x248] ss:$16 sps:$4 sm:$0xff]  }
 0x75a   : > { %6486 = vmatprep.subr.bf16.mxu1 %v18081_v41  ;;  %v18138_v41 = vld [vmem:[%s20348_s24 + $0x264] ss:$16 sps:$4 sm:$0xff]  }
 0x75d   : > { %6487 = vmatpush1.bf16.msra.mxu1 %v18079_v55  ;;  %v18141_v55 = vld [vmem:[%s20348_s24 + $0x26c] ss:$16 sps:$4 sm:$0xff]  }
 0x75e   : > { %6488 = vmatprep.subr.bf16.mxu1 %v18087_v56  ;;  %v18136_v56 = vld [vmem:[%s20348_s24 + $0x260] ss:$16 sps:$4 sm:$0xff]  }
 0x761   : > { %6489 = vmatpush1.bf16.msra.mxu1 %v18085_v57  ;;  %v18139_v57 = vld [vmem:[%s20348_s24 + $0x268] ss:$16 sps:$4 sm:$0xff]  }
 0x762   : > { %6490 = vmatprep.subr.bf16.mxu1 %v18093_v62  ;;  %v18145_v62 = vld [vmem:[%s20348_s24 + $0x288] ss:$16 sps:$4 sm:$0xff]  }
 0x765   : > { %6491 = vmatpush1.bf16.msra.mxu1 %v18091_v14  ;;  %v18142_v14 = vld [vmem:[%s20348_s24 + $0x280] ss:$16 sps:$4 sm:$0xff]  }
 0x766   : > { %6492 = vmatprep.subr.bf16.mxu1 %v18099_v7  ;;  %v18151_v7 = vld [vmem:[%s20348_s24 + $0x2a8] ss:$16 sps:$4 sm:$0xff]  }
 0x769   : > { %6493 = vmatpush1.bf16.msra.mxu1 %v18097_v5  ;;  %v18148_v5 = vld [vmem:[%s20348_s24 + $0x2a0] ss:$16 sps:$4 sm:$0xff]  }
 0x76a   : > { %6494 = vmatprep.subr.bf16.mxu1 %v18105_v15  ;;  %v18157_v15 = vld [vmem:[%s20348_s24 + $0x2c8] ss:$16 sps:$4 sm:$0xff]  }
 0x76d   : > { %6495 = vmatpush1.bf16.msra.mxu1 %v18103_v13  ;;  %v18154_v13 = vld [vmem:[%s20348_s24 + $0x2c0] ss:$16 sps:$4 sm:$0xff]  }
 0x76e   : > { %6496 = vmatprep.subr.bf16.mxu1 %v18111_v19  ;;  %v18163_v19 = vld [vmem:[%s20348_s24 + $0x2e8] ss:$16 sps:$4 sm:$0xff]  }
 0x771   : > { %6497 = vmatpush1.bf16.msra.mxu1 %v18109_v40  ;;  %v18160_v40 = vld [vmem:[%s20348_s24 + $0x2e0] ss:$16 sps:$4 sm:$0xff]  }
 0x772   : > { %6498 = vmatprep.subr.bf16.mxu1 %v18117_v46  ;;  %v18169_v46 = vld [vmem:[%s20348_s24 + $0x308] ss:$16 sps:$4 sm:$0xff]  }
 0x775   : > { %6499 = vmatpush1.bf16.msra.mxu1 %v18115_v42  ;;  %v18166_v42 = vld [vmem:[%s20348_s24 + $0x300] ss:$16 sps:$4 sm:$0xff]  }
 0x776   : > { %6511 = vmatprep.subr.bf16.mxu1 %v18123_v24  ;;  %v18177_v24 = vld [vmem:[%s20348_s24 + $0x32c] ss:$16 sps:$4 sm:$0xff]  }
 0x7ef   : > { %v4499_v2 = vpop.f32.mrb[12].mxu1 }
 0x7f0   : > { %v16963_v47 = vpop.f32.mrb[13].mxu1 }
 0x7f1   : > { %v18175_v47 = vld [vmem:[%s20348_s24 + $0x328] ss:$16 sps:$4 sm:$0xff]  }
 0x7f3   : > { %v4654_v27 = vpop.f32.mrb[14].mxu1 }
 0x7f4   : > { %v16973_v9 = vpop.f32.mrb[15].mxu1 }
 0x7f5   : > { %v18183_v9 = vld [vmem:[%s20348_s24 + $0x34c] ss:$16 sps:$4 sm:$0xff]  }
 0x7f7   : > { %v4809_v28 = vpop.f32.mrb[16].mxu1 }
 0x7f8   : > { %v16983_v58 = vpop.f32.mrb[17].mxu1 }
 0x7f9   : > { %v18181_v58 = vld [vmem:[%s20348_s24 + $0x348] ss:$16 sps:$4 sm:$0xff]  }
 0x7fb   : > { %v4964_v18 = vpop.f32.mrb[18].mxu1 }
 0x7fc   : > { %v16993_v29 = vpop.f32.mrb[19].mxu1 }
 0x7fd   : > { %v18189_v29 = vld [vmem:[%s20348_s24 + $0x36c] ss:$16 sps:$4 sm:$0xff]  }
 0x7ff   : > { %v5119_v59 = vpop.f32.mrb[20].mxu1 }
 0x800   : > { %v5588_v31 = vpack.c.bf16 %v5119_v59, %v4499_v2  ;;  %v17003_v21 = vpop.f32.mrb[21].mxu1  ;;  %v18172_v2 = vld [vmem:[%s20348_s24 + $0x320] ss:$16 sps:$4 sm:$0xff]  }
 0x801   : > { %v18184_v59 = vld [vmem:[%s20348_s24 + $0x360] ss:$16 sps:$4 sm:$0xff]   ;;  %v18192_v21 = vld [vmem:[%s20348_s24 + $0x384] ss:$16 sps:$4 sm:$0xff]  }
 0x803   : > { %v5274_v48 = vpop.f32.mrb[22].mxu1 }
 0x804   : > { %v5589_v32 = vpack.c.bf16 %v5274_v48, %v4654_v27  ;;  %v17013_v23 = vpop.f32.mrb[23].mxu1  ;;  %v18180_v27 = vld [vmem:[%s20348_s24 + $0x344] ss:$16 sps:$4 sm:$0xff]   ;;  %v18195_v48 = vld [vmem:[%s20348_s24 + $0x38c] ss:$16 sps:$4 sm:$0xff]  }
 0x805   : > { %v18193_v23 = vld [vmem:[%s20348_s24 + $0x388] ss:$16 sps:$4 sm:$0xff]  }
 0x806   : > { %6414 = vmatprep.mubr.bf16.mxu0 %v5589_v32  ;;  %6500 = vmatprep.mubr.bf16.mxu1 %v5589_v32  ;;  %v18190_v32 = vld [vmem:[%s20348_s24 + $0x380] ss:$16 sps:$4 sm:$0xff]  }
 0x807   : > { %v5429_v12 = vpop.f32.mrb[24].mxu1  ;;  %6415 = vmatmul.mubr.bf16.vlgmr.msra.gmra.mrb[28].mxu0 %v5588_v31  ;;  %6501 = vmatmul.mubr.bf16.vlgmr.msra.gmra.mrb[28].mxu1 %v5588_v31  ;;  %v18187_v31 = vld [vmem:[%s20348_s24 + $0x368] ss:$16 sps:$4 sm:$0xff]  }
 0x808   : > { %v21046_v26 = vpack.c.bf16 %v5429_v12, %v4809_v28  ;;  %6426 = vmatpush1.bf16.msra.mxu0 %v18118_v34  ;;  %6512 = vmatpush1.bf16.msra.mxu1 %v18121_v35  ;;  %v17023_v49 = vpop.f32.mrb[25].mxu1  ;;  %v18178_v28 = vld [vmem:[%s20348_s24 + $0x340] ss:$16 sps:$4 sm:$0xff]   ;;  %v18198_v34 = vld [vmem:[%s20348_s24 + $0x3a4] ss:$16 sps:$4 sm:$0xff]  }
 0x809   : > { %6427 = vmatprep.subr.bf16.mxu0 %v18126_v44  ;;  %6513 = vmatprep.subr.bf16.mxu1 %v18129_v45  ;;  %v18201_v35 = vld [vmem:[%s20348_s24 + $0x3ac] ss:$16 sps:$4 sm:$0xff]   ;;  %v18196_v44 = vld [vmem:[%s20348_s24 + $0x3a0] ss:$16 sps:$4 sm:$0xff]   ;;  %v18199_v45 = vld [vmem:[%s20348_s24 + $0x3a8] ss:$16 sps:$4 sm:$0xff]  }
 0x80a   : > { %v18204_v12 = vld [vmem:[%s20348_s24 + $0x3c4] ss:$16 sps:$4 sm:$0xff]   ;;  %v18207_v49 = vld [vmem:[%s20348_s24 + $0x3cc] ss:$16 sps:$4 sm:$0xff]  }
 0x80b   : > { %v5584_v51 = vpop.f32.mrb[26].mxu1 }
 0x80c   : > { %v5591_v36 = vpack.c.bf16 %v5584_v51, %v4964_v18  ;;  %6428 = vmatpush1.bf16.msra.mxu0 %v18124_v37  ;;  %6514 = vmatpush1.bf16.msra.mxu1 %v18127_v50  ;;  %v17033_v52 = vpop.f32.mrb[27].mxu1  ;;  %v18186_v18 = vld [vmem:[%s20348_s24 + $0x364] ss:$16 sps:$4 sm:$0xff]   ;;  %v18202_v37 = vld [vmem:[%s20348_s24 + $0x3c0] ss:$16 sps:$4 sm:$0xff]  }
 0x80d   : > { %6429 = vmatprep.subr.bf16.mxu0 %v18132_v1  ;;  %6515 = vmatprep.subr.bf16.mxu1 %v18135_v33  ;;  %v18205_v50 = vld [vmem:[%s20348_s24 + $0x3c8] ss:$16 sps:$4 sm:$0xff]   ;;  %v18210_v1 = vld [vmem:[%s20348_s24 + $0x3e4] ss:$16 sps:$4 sm:$0xff]   ;;  %v18213_v33 = vld [vmem:[%s20348_s24 + $0x3ec] ss:$16 sps:$4 sm:$0xff]  }
 0x80e   : > { %6457 = vmatprep.mubr.bf16.mxu0 %v5591_v36  ;;  %6543 = vmatprep.mubr.bf16.mxu1 %v5591_v36  ;;  %v18208_v51 = vld [vmem:[%s20348_s24 + $0x3e0] ss:$16 sps:$4 sm:$0xff]   ;;  %v18211_v36 = vld [vmem:[%s20348_s24 + $0x3e8] ss:$16 sps:$4 sm:$0xff]  }
 0x80f   : > { %v5720_v52 = vld [vmem:[%s919_s28] sm:$0xf] }
 0x810   : > { %6430 = vmatpush1.bf16.msra.mxu0 %v18130_v43  ;;  %6516 = vmatpush1.bf16.msra.mxu1 %v18133_v39  ;;  %v5725_v43 = vrot.slane %v5720_v52, %v20802_v4  ;;  %v5733_v39 = vrot.slane %v5720_v52, %v20818_v25 }
 0x811   : > { %6431 = vmatprep.subr.bf16.mxu0 %v18138_v41  ;;  %6517 = vmatprep.subr.bf16.mxu1 %v18141_v55  ;;  %v5729_v41 = vrot.slane %v5720_v52, %v20810_v10 }
 0x814   : > { %6432 = vmatpush1.bf16.msra.mxu0 %v18136_v56  ;;  %6518 = vmatpush1.bf16.msra.mxu1 %v18139_v57  ;;  %v5737_v57 = vrot.slane %v5720_v52, %v20831_v38  ;;  %v6711_v52 = vld [vmem:[%s20353_s21 + $0x100] sm:$0xff] }
 0x815   : > { %6433 = vmatprep.subr.bf16.mxu0 %v18144_v60  ;;  %6519 = vmatprep.subr.bf16.mxu1 %v18147_v61 }
 0x818   : > { %6434 = vmatpush1.bf16.msra.mxu0 %v18142_v14  ;;  %6520 = vmatpush1.bf16.msra.mxu1 %v18145_v62 }
 0x819   : > { %6435 = vmatprep.subr.bf16.mxu0 %v18150_v0  ;;  %6521 = vmatprep.subr.bf16.mxu1 %v18153_v3 }
 0x81c   : > { %6436 = vmatpush1.bf16.msra.mxu0 %v18148_v5  ;;  %6522 = vmatpush1.bf16.msra.mxu1 %v18151_v7 }
 0x81d   : > { %6437 = vmatprep.subr.bf16.mxu0 %v18156_v8  ;;  %6523 = vmatprep.subr.bf16.mxu1 %v18159_v11 }
 0x820   : > { %6438 = vmatpush1.bf16.msra.mxu0 %v18154_v13  ;;  %6524 = vmatpush1.bf16.msra.mxu1 %v18157_v15  ;;  %v19023_v15 = vld [vmem:[#allocation2 + $0x8] sm:$0xff] }
 0x821   : > { %6439 = vmatprep.subr.bf16.mxu0 %v18162_v17  ;;  %6525 = vmatprep.subr.bf16.mxu1 %v18165_v54 }
 0x824   : > { %6440 = vmatpush1.bf16.msra.mxu0 %v18160_v40  ;;  %6526 = vmatpush1.bf16.msra.mxu1 %v18163_v19 }
 0x825   : > { %6441 = vmatprep.subr.bf16.mxu0 %v18168_v20  ;;  %6527 = vmatprep.subr.bf16.mxu1 %v18171_v22  ;;  %v19024_v20 = vld [vmem:[#allocation2 + $0x20] sm:$0xff] }
 0x828   : > { %6442 = vmatpush1.bf16.msra.mxu0 %v18166_v42  ;;  %6528 = vmatpush1.bf16.msra.mxu1 %v18169_v46  ;;  %v19025_v42 = vld [vmem:[#allocation2 + $0x10] sm:$0xff] }
 0x829   : > { %6443 = vmatprep.subr.bf16.mxu0 %v18174_v53  ;;  %6529 = vmatprep.subr.bf16.mxu1 %v18177_v24  ;;  %v19026_v24 = vld [vmem:[#allocation2 + $0x28] sm:$0xff] }
 0x82c   : > { %6444 = vmatpush1.bf16.msra.mxu0 %v18172_v2  ;;  %6530 = vmatpush1.bf16.msra.mxu1 %v18175_v47 }
 0x82d   : > { %6445 = vmatprep.subr.bf16.mxu0 %v18180_v27  ;;  %6531 = vmatprep.subr.bf16.mxu1 %v18183_v9  ;;  %v19027_v27 = vld [vmem:[#allocation2 + $0x18] sm:$0xff] }
 0x830   : > { %6446 = vmatpush1.bf16.msra.mxu0 %v18178_v28  ;;  %6532 = vmatpush1.bf16.msra.mxu1 %v18181_v58  ;;  %v19028_v28 = vld [vmem:[#allocation2 + $0x30] sm:$0xff] }
 0x831   : > { %6447 = vmatprep.subr.bf16.mxu0 %v18186_v18  ;;  %6533 = vmatprep.subr.bf16.mxu1 %v18189_v29 }
 0x834   : > { %6448 = vmatpush1.bf16.msra.mxu0 %v18184_v59  ;;  %6534 = vmatpush1.bf16.msra.mxu1 %v18187_v31  ;;  %v19029_v59 = vld [vmem:[#allocation2 + $0x38] sm:$0xff] }
 0x835   : > { %6449 = vmatprep.subr.bf16.mxu0 %v18192_v21  ;;  %6535 = vmatprep.subr.bf16.mxu1 %v18195_v48 }
 0x838   : > { %6450 = vmatpush1.bf16.msra.mxu0 %v18190_v32  ;;  %6536 = vmatpush1.bf16.msra.mxu1 %v18193_v23  ;;  %v6679_v23 = vld [vmem:[%s20353_s21] sm:$0xff] }
 0x839   : > { %6451 = vmatprep.subr.bf16.mxu0 %v18198_v34  ;;  %6537 = vmatprep.subr.bf16.mxu1 %v18201_v35  ;;  %v6687_v34 = vld [vmem:[%s20353_s21 + $0x40] sm:$0xff]  ;;  %v6680_v35 = vld [vmem:[%s20353_s21 + $0x8] sm:$0xff] }
 0x83c   : > { %6452 = vmatpush1.bf16.msra.mxu0 %v18196_v44  ;;  %6538 = vmatpush1.bf16.msra.mxu1 %v18199_v45  ;;  %v15807_v44 = vcombine.low %v6679_v23, %v6687_v34  ;;  %v15808_v45 = vcombine.high %v6679_v23, %v6687_v34  ;;  %v6776_v23 = vld [vmem:[%s20353_s21 + $0x308] sm:$0xff] }
 0x83d   : > { %6453 = vmatprep.subr.bf16.mxu0 %v18204_v12  ;;  %6539 = vmatprep.subr.bf16.mxu1 %v18207_v49  ;;  %v6688_v12 = vld [vmem:[%s20353_s21 + $0x48] sm:$0xff]  ;;  %v6695_v49 = vld [vmem:[%s20353_s21 + $0x80] sm:$0xff] }
 0x83e   : > { %v6784_v34 = vld [vmem:[%s20353_s21 + $0x348] sm:$0xff] }
 0x840   : > { %6454 = vmatpush1.bf16.msra.mxu0 %v18202_v37  ;;  %6540 = vmatpush1.bf16.msra.mxu1 %v18205_v50  ;;  %v6703_v37 = vld [vmem:[%s20353_s21 + $0xc0] sm:$0xff]  ;;  %v15809_v50 = vcombine.low %v6680_v35, %v6688_v12 }
 0x841   : > { %6455 = vmatprep.subr.bf16.mxu0 %v18210_v1  ;;  %6541 = vmatprep.subr.bf16.mxu1 %v18213_v33  ;;  %v15810_v1 = vcombine.high %v6680_v35, %v6688_v12  ;;  %v15824_v33 = vcombine.high %v6695_v49, %v6703_v37  ;;  %v15906_v12 = vcombine.high %v6776_v23, %v6784_v34 }
 0x844   : > { %6456 = vmatpush1.bf16.msra.mxu0 %v18208_v51  ;;  %6542 = vmatpush1.bf16.msra.mxu1 %v18211_v36  ;;  %v6696_v51 = vld [vmem:[%s20353_s21 + $0x88] sm:$0xff] }
 0x845   : > { %v6704_v36 = vld [vmem:[%s20353_s21 + $0xc8] sm:$0xff]  ;;  %9835 = vmatprep.subr.bf16.mxu0 %v15808_v45  ;;  %9921 = vmatprep.subr.bf16.mxu1 %v15810_v1 }
 0x846   : > { %v6800_v1 = vld [vmem:[%s20353_s21 + $0x3c8] sm:$0xff] }
 0x847   : > { %6458 = vmatmul.mubr.bf16.vlgmr.msra.gmra.mrb[28].mxu0 %v21046_v26  ;;  %6544 = vmatmul.mubr.bf16.vlgmr.msra.gmra.mrb[28].mxu1 %v21046_v26  ;;  %v19022_v26 = vld [vmem:[#allocation2] sm:$0xff] }
 0x848   : > { %9836 = vmatpush1.bf16.msra.mxu0 %v15807_v44  ;;  %9922 = vmatpush1.bf16.msra.mxu1 %v15809_v50  ;;  %v6792_v50 = vld [vmem:[%s20353_s21 + $0x388] sm:$0xff] }
 0x849   : > { %9837 = vmatprep.subr.bf16.mxu0 %v15824_v33 }
 0x91a   : > { %v6459_v55 = vpop.f32.mrb[28].mxu0  ;;  %v6545_v56 = vpop.f32.mrb[28].mxu1 }
 0x91b   : > { %v17058_v60 = vadd.f32 %v6459_v55, %v5725_v43  ;;  %v6461_v61 = vpop.f32.mrb[29].mxu0  ;;  %v6547_v14 = vpop.f32.mrb[29].mxu1  ;;  %v17062_v62 = vadd.f32 %v6545_v56, %v5733_v39  ;;  %v6720_v55 = vld [vmem:[%s20353_s21 + $0x148] sm:$0xff]  ;;  %v15823_v56 = vcombine.low %v6695_v49, %v6703_v37  ;;  %v6791_v49 = vld [vmem:[%s20353_s21 + $0x380] sm:$0xff] }
 0x91c   : > { %v17059_v0 = vadd.f32 %v6461_v61, %v5729_v41  ;;  %v6463_v3 = vpop.f32.mrb[30].mxu0  ;;  %v6549_v5 = vpop.f32.mrb[30].mxu1  ;;  %v17063_v54 = vadd.f32 %v6547_v14, %v5737_v57  ;;  %v6727_v14 = vld [vmem:[%s20353_s21 + $0x180] sm:$0xff] }
 0x91d   : > { %v21114_v7 = vadd.f32 %v19022_v26, %v17058_v60  ;;  %v17060_v8 = vadd.f32 %v6463_v3, %v5725_v43  ;;  %v6465_v11 = vpop.f32.mrb[31].mxu0  ;;  %v6551_v13 = vpop.f32.mrb[31].mxu1  ;;  %v17064_v40 = vadd.f32 %v6549_v5, %v5733_v39  ;;  %v21120_v46 = vadd.f32 %v19025_v42, %v17062_v62  ;;  %v6719_v39 = vld [vmem:[%s20353_s21 + $0x140] sm:$0xff]  ;;  %v6736_v3 = vld [vmem:[%s20353_s21 + $0x1c8] sm:$0xff]  ;;  %9838 = vmatpush1.bf16.msra.mxu0 %v15823_v56 }
 0x91e   : > { %v21116_v17 = vadd.f32 %v19023_v15, %v17059_v0  ;;  %v17061_v19 = vadd.f32 %v6465_v11, %v5729_v41  ;;  %v17065_v47 = vadd.f32 %v6551_v13, %v5737_v57  ;;  %v21126_v9 = vadd.f32 %v19027_v27, %v17063_v54  ;;  %v6712_v41 = vld [vmem:[%s20353_s21 + $0x108] sm:$0xff]  ;;  %v6735_v62 = vld [vmem:[%s20353_s21 + $0x1c0] sm:$0xff] }
 0x91f   : > { %v21118_v22 = vadd.f32 %v19024_v20, %v17060_v8  ;;  %v21128_v58 = vadd.f32 %v19028_v28, %v17064_v40  ;;  %v15826_v43 = vcombine.high %v6696_v51, %v6704_v36  ;;  %v15825_v57 = vcombine.low %v6696_v51, %v6704_v36  ;;  %v6728_v0 = vld [vmem:[%s20353_s21 + $0x188] sm:$0xff]  ;;  %v6743_v13 = vld [vmem:[%s20353_s21 + $0x200] sm:$0xff] }
 0x920   : > { %v6564_v53 = vadd.f32 %v21116_v17, %v21114_v7  ;;  %v21124_v2 = vadd.f32 %v19026_v24, %v17061_v19  ;;  %v21133_v31 = vadd.f32 %v19029_v59, %v17065_v47  ;;  %v15840_v60 = vcombine.high %v6711_v52, %v6719_v39  ;;  %v6751_v15 = vld [vmem:[%s20353_s21 + $0x240] sm:$0xff]  ;;  %v6744_v54 = vld [vmem:[%s20353_s21 + $0x208] sm:$0xff] }
 0x921   : > { %9923 = vmatprep.subr.bf16.mxu1 %v15826_v43  ;;  %v15842_v61 = vcombine.high %v6712_v41, %v6720_v55  ;;  %v15839_v5 = vcombine.low %v6711_v52, %v6719_v39  ;;  %v15841_v26 = vcombine.low %v6712_v41, %v6720_v55  ;;  %v15856_v8 = vcombine.high %v6727_v14, %v6735_v62  ;;  %v6752_v40 = vld [vmem:[%s20353_s21 + $0x248] sm:$0xff]  ;;  %v6759_v24 = vld [vmem:[%s20353_s21 + $0x280] sm:$0xff] }
 0x922   : > { %v6569_v18 = vadd.f32 %v21124_v2, %v21118_v22  ;;  %v6565_v29 = vadd.f32 %v6564_v53, %v21120_v46  ;;  %9924 = vmatpush1.bf16.msra.mxu1 %v15825_v57  ;;  %9839 = vmatprep.subr.bf16.mxu0 %v15840_v60  ;;  %v15858_v11 = vcombine.high %v6728_v0, %v6736_v3  ;;  %v6767_v47 = vld [vmem:[%s20353_s21 + $0x2c0] sm:$0xff]  ;;  %v6760_v27 = vld [vmem:[%s20353_s21 + $0x288] sm:$0xff] }
 0x923   : > { %9925 = vmatprep.subr.bf16.mxu1 %v15842_v61  ;;  %9840 = vmatpush1.bf16.msra.mxu0 %v15839_v5  ;;  %v15855_v19 = vcombine.low %v6727_v14, %v6735_v62  ;;  %v15857_v20 = vcombine.low %v6728_v0, %v6736_v3  ;;  %v15872_v42 = vcombine.high %v6743_v13, %v6751_v15  ;;  %v6768_v28 = vld [vmem:[%s20353_s21 + $0x2c8] sm:$0xff]  ;;  %v6799_v37 = vld [vmem:[%s20353_s21 + $0x3c0] sm:$0xff] }
 0x924   : > { %v6566_v21 = vadd.f32 %v6565_v29, %v21126_v9  ;;  %v6570_v48 = vadd.f32 %v6569_v18, %v21128_v58  ;;  %9841 = vmatprep.subr.bf16.mxu0 %v15856_v8  ;;  %v15874_v53 = vcombine.high %v6744_v54, %v6752_v40  ;;  %v15871_v18 = vcombine.low %v6743_v13, %v6751_v15  ;;  %v6807_v43 = vld [vmem:[%s20353_s21 + $0x400] sm:$0xff]  ;;  %v6808_v41 = vld [vmem:[%s20353_s21 + $0x408] sm:$0xff] }
 0x925   : > { %v15873_v29 = vcombine.low %v6744_v54, %v6752_v40  ;;  %v15888_v59 = vcombine.high %v6759_v24, %v6767_v47  ;;  %v15887_v35 = vcombine.low %v6759_v24, %v6767_v47  ;;  %v15889_v44 = vcombine.low %v6760_v27, %v6768_v28  ;;  %v6815_v39 = vld [vmem:[%s20353_s21 + $0x440] sm:$0xff]  ;;  %v6816_v55 = vld [vmem:[%s20353_s21 + $0x448] sm:$0xff] }
 0x926   : > { %6567 = vadd.xlane.f32.xlu0 %v6566_v21  ;;  %v6571_v32 = vadd.f32 %v6570_v48, %v21133_v31  ;;  %9926 = vmatpush1.bf16.msra.mxu1 %v15841_v26  ;;  %v15890_v21 = vcombine.high %v6760_v27, %v6768_v28  ;;  %v6775_v48 = vld [vmem:[%s20353_s21 + $0x300] sm:$0xff]  ;;  %v15905_v51 = vcombine.low %v6776_v23, %v6784_v34  ;;  %v6824_v0 = vld [vmem:[%s20353_s21 + $0x488] sm:$0xff] }
 0x927   : > { %9927 = vmatprep.subr.bf16.mxu1 %v15858_v11  ;;  %9842 = vmatpush1.bf16.msra.mxu0 %v15855_v19  ;;  %v15920_v36 = vcombine.high %v6791_v49, %v6799_v37  ;;  %v15922_v52 = vcombine.high %v6792_v50, %v6800_v1  ;;  %v15919_v56 = vcombine.low %v6791_v49, %v6799_v37  ;;  %v6823_v14 = vld [vmem:[%s20353_s21 + $0x480] sm:$0xff]  ;;  %v6832_v3 = vld [vmem:[%s20353_s21 + $0x4c8] sm:$0xff] }
 0x928   : > { %6572 = vadd.xlane.f32.xlu1 %v6571_v32  ;;  %9843 = vmatprep.subr.bf16.mxu0 %v15872_v42  ;;  %v6783_v32 = vld [vmem:[%s20353_s21 + $0x340] sm:$0xff]  ;;  %v15921_v57 = vcombine.low %v6792_v50, %v6800_v1  ;;  %v15936_v60 = vcombine.high %v6807_v43, %v6815_v39  ;;  %v15938_v61 = vcombine.high %v6808_v41, %v6816_v55  ;;  %v6848_v49 = vld [vmem:[%s20353_s21 + $0x548] sm:$0xff] }
 0x929   : > { %v15904_v45 = vcombine.high %v6775_v48, %v6783_v32  ;;  %v15903_v33 = vcombine.low %v6775_v48, %v6783_v32  ;;  %v6831_v62 = vld [vmem:[%s20353_s21 + $0x4c0] sm:$0xff]  ;;  %v15935_v5 = vcombine.low %v6807_v43, %v6815_v39  ;;  %v15937_v26 = vcombine.low %v6808_v41, %v6816_v55  ;;  %v6864_v43 = vld [vmem:[%s20353_s21 + $0x5c8] sm:$0xff] }
 0x92a   : > { %9928 = vmatpush1.bf16.msra.mxu1 %v15857_v20  ;;  %v15952_v8 = vcombine.high %v6823_v14, %v6831_v62  ;;  %v15954_v11 = vcombine.high %v6824_v0, %v6832_v3  ;;  %v15951_v13 = vcombine.low %v6823_v14, %v6831_v62  ;;  %v15953_v15 = vcombine.low %v6824_v0, %v6832_v3  ;;  %v6880_v62 = vld [vmem:[%s20353_s21 + $0x648] sm:$0xff]  ;;  %v6887_v0 = vld [vmem:[%s20353_s21 + $0x680] sm:$0xff] }
 0x92b   : > { %9929 = vmatprep.subr.bf16.mxu1 %v15874_v53  ;;  %9844 = vmatpush1.bf16.msra.mxu0 %v15871_v18  ;;  %v6895_v3 = vld [vmem:[%s20353_s21 + $0x6c0] sm:$0xff] }
 0x92c   : > { %9845 = vmatprep.subr.bf16.mxu0 %v15888_v59 }
 0x92e   : > { %9930 = vmatpush1.bf16.msra.mxu1 %v15873_v29 }
 0x92f   : > { %9931 = vmatprep.subr.bf16.mxu1 %v15890_v21  ;;  %9846 = vmatpush1.bf16.msra.mxu0 %v15887_v35  ;;  %v6839_v35 = vld [vmem:[%s20353_s21 + $0x500] sm:$0xff] }
 0x930   : > { %9847 = vmatprep.subr.bf16.mxu0 %v15904_v45  ;;  %v6840_v45 = vld [vmem:[%s20353_s21 + $0x508] sm:$0xff] }
 0x931   : > { %v15969_v50 = vcombine.low %v6840_v45, %v6848_v49  ;;  %v15970_v1 = vcombine.high %v6840_v45, %v6848_v49  ;;  %v21249_v45 = vld [vmem:[%s20353_s21 + $0x808] sm:$0xff] }
 0x932   : > { %9932 = vmatpush1.bf16.msra.mxu1 %v15889_v44  ;;  %v6847_v44 = vld [vmem:[%s20353_s21 + $0x540] sm:$0xff]  ;;  %v21254_v49 = vld [vmem:[%s20353_s21 + $0x848] sm:$0xff] }
 0x933   : > { %9933 = vmatprep.subr.bf16.mxu1 %v15906_v12  ;;  %9848 = vmatpush1.bf16.msra.mxu0 %v15903_v33  ;;  %v15968_v12 = vcombine.high %v6839_v35, %v6847_v44  ;;  %v15967_v37 = vcombine.low %v6839_v35, %v6847_v44  ;;  %v6855_v33 = vld [vmem:[%s20353_s21 + $0x580] sm:$0xff] }
 0x934   : > { %9849 = vmatprep.subr.bf16.mxu0 %v15920_v36  ;;  %v6856_v36 = vld [vmem:[%s20353_s21 + $0x588] sm:$0xff]  ;;  %v21243_v35 = vld [vmem:[%s20353_s21 + $0x800] sm:$0xff] }
 0x935   : > { %v15985_v41 = vcombine.low %v6856_v36, %v6864_v43  ;;  %v15986_v55 = vcombine.high %v6856_v36, %v6864_v43  ;;  %v21246_v44 = vld [vmem:[%s20353_s21 + $0x840] sm:$0xff] }
 0x936   : > { %9934 = vmatpush1.bf16.msra.mxu1 %v15905_v51  ;;  %v6863_v51 = vld [vmem:[%s20353_s21 + $0x5c0] sm:$0xff] }
 0x937   : > { %9935 = vmatprep.subr.bf16.mxu1 %v15922_v52  ;;  %9850 = vmatpush1.bf16.msra.mxu0 %v15919_v56  ;;  %v15984_v52 = vcombine.high %v6855_v33, %v6863_v51  ;;  %v15983_v39 = vcombine.low %v6855_v33, %v6863_v51  ;;  %v6871_v56 = vld [vmem:[%s20353_s21 + $0x600] sm:$0xff] }
 0x938   : > { %9851 = vmatprep.subr.bf16.mxu0 %v15936_v60  ;;  %v6872_v60 = vld [vmem:[%s20353_s21 + $0x608] sm:$0xff] }
 0x93a   : > { %9936 = vmatpush1.bf16.msra.mxu1 %v15921_v57  ;;  %v6879_v57 = vld [vmem:[%s20353_s21 + $0x640] sm:$0xff] }
 0x93b   : > { %9937 = vmatprep.subr.bf16.mxu1 %v15938_v61  ;;  %9852 = vmatpush1.bf16.msra.mxu0 %v15935_v5  ;;  %v15999_v61 = vcombine.low %v6871_v56, %v6879_v57  ;;  %v16000_v14 = vcombine.high %v6871_v56, %v6879_v57  ;;  %v16001_v5 = vcombine.low %v6872_v60, %v6880_v62 }
 0x93c   : > { %9853 = vmatprep.subr.bf16.mxu0 %v15952_v8  ;;  %v16016_v8 = vcombine.high %v6887_v0, %v6895_v3 }
 0x93e   : > { %9938 = vmatpush1.bf16.msra.mxu1 %v15937_v26  ;;  %v16002_v26 = vcombine.high %v6872_v60, %v6880_v62 }
 0x93f   : > { %9939 = vmatprep.subr.bf16.mxu1 %v15954_v11  ;;  %9854 = vmatpush1.bf16.msra.mxu0 %v15951_v13  ;;  %v6888_v11 = vld [vmem:[%s20353_s21 + $0x688] sm:$0xff] }
 0x940   : > { %9855 = vmatprep.subr.bf16.mxu0 %v15968_v12  ;;  %v6896_v13 = vld [vmem:[%s20353_s21 + $0x6c8] sm:$0xff]  ;;  %v16064_v12 = vcombine.high %v21243_v35, %v21246_v44 }
 0x942   : > { %9940 = vmatpush1.bf16.msra.mxu1 %v15953_v15  ;;  %v16018_v15 = vcombine.high %v6888_v11, %v6896_v13 }
 0x943   : > { %9941 = vmatprep.subr.bf16.mxu1 %v15970_v1  ;;  %9856 = vmatpush1.bf16.msra.mxu0 %v15967_v37  ;;  %v16063_v37 = vcombine.low %v21243_v35, %v21246_v44  ;;  %v16066_v1 = vcombine.high %v21249_v45, %v21254_v49  ;;  %v6991_v35 = vld [vmem:[%s20353_s21 + $0x9c0] sm:$0xff]  ;;  %v6984_v44 = vld [vmem:[%s20353_s21 + $0x988] sm:$0xff] }
 0x944   : > { %9857 = vmatprep.subr.bf16.mxu0 %v15984_v52 }
 0x946   : > { %9942 = vmatpush1.bf16.msra.mxu1 %v15969_v50  ;;  %v16065_v50 = vcombine.low %v21249_v45, %v21254_v49 }
 0x947   : > { %9943 = vmatprep.subr.bf16.mxu1 %v15986_v55  ;;  %9858 = vmatpush1.bf16.msra.mxu0 %v15983_v39  ;;  %v6563_v55 = vld [vmem:[%s937_s20] sm:$0xf] }
 0x948   : > { %9859 = vmatprep.subr.bf16.mxu0 %v16000_v14 }
 0x94a   : > { %9944 = vmatpush1.bf16.msra.mxu1 %v15985_v41  ;;  %v6562_v41 = vld [vmem:[%s928_s30] sm:$0xf] }
 0x94b   : > { %9945 = vmatprep.subr.bf16.mxu1 %v16002_v26  ;;  %9860 = vmatpush1.bf16.msra.mxu0 %v15999_v61  ;;  %v6625_v56 = vrot.slane %v6562_v41, %v20810_v10  ;;  %v6621_v57 = vrot.slane %v6562_v41, %v20802_v4  ;;  %v6629_v61 = vrot.slane %v6562_v41, %v20818_v25 }
 0x94c   : > { %9861 = vmatprep.subr.bf16.mxu0 %v16016_v8  ;;  %v6654_v26 = vrot.slane %v6563_v55, %v20810_v10  ;;  %v6650_v8 = vrot.slane %v6563_v55, %v20802_v4 }
 0x94e   : > { %9946 = vmatpush1.bf16.msra.mxu1 %v16001_v5 }
 0x94f   : > { %9947 = vmatprep.subr.bf16.mxu1 %v16018_v15 }
 0x9b3   : > { %v6568_v54 = vpop.xlane.xlu0 %6567 }
 0x9b4   : > { %v6575_v40 = vmul.f32 0.001953125, %v6568_v54  ;;  %v6903_v54 = vld [vmem:[%s20353_s21 + $0x700] sm:$0xff] }
 0x9b5   : > { %v6573_v19 = vpop.xlane.xlu1 %6572 }
 0x9b6   : > { %v21179_v20 = vsub.f32 %v21114_v7, %v6575_v40  ;;  %v21182_v42 = vsub.f32 %v21116_v17, %v6575_v40  ;;  %v6576_v53 = vmul.f32 0.001953125, %v6573_v19  ;;  %v21185_v24 = vsub.f32 %v21120_v46, %v6575_v40  ;;  %v6904_v19 = vld [vmem:[%s20353_s21 + $0x708] sm:$0xff] }
 0x9b7   : > { %v21188_v47 = vsub.f32 %v21126_v9, %v6575_v40  ;;  %v6911_v40 = vld [vmem:[%s20353_s21 + $0x740] sm:$0xff] }
 0x9b8   : > { %v21191_v27 = vsub.f32 %v21118_v22, %v6576_v53  ;;  %v21194_v28 = vsub.f32 %v21124_v2, %v6576_v53  ;;  %v6585_v7 = vmul.f32 %v21179_v20, %v21179_v20  ;;  %v6586_v17 = vmul.f32 %v21182_v42, %v21182_v42 }
 0x9b9   : > { %v6587_v18 = vmul.f32 %v21185_v24, %v21185_v24  ;;  %v21203_v46 = vsub.f32 %v21128_v58, %v6576_v53  ;;  %v21206_v22 = vsub.f32 %v21133_v31, %v6576_v53  ;;  %v6588_v59 = vmul.f32 %v21188_v47, %v21188_v47  ;;  %v6912_v53 = vld [vmem:[%s20353_s21 + $0x748] sm:$0xff] }
 0x9ba   : > { %v6593_v9 = vadd.f32 %v6586_v17, %v6585_v7  ;;  %v6589_v2 = vmul.f32 %v21191_v27, %v21191_v27  ;;  %v6590_v29 = vmul.f32 %v21194_v28, %v21194_v28  ;;  %v16015_v7 = vcombine.low %v6887_v0, %v6895_v3 }
 0x9bb   : > { %v6591_v58 = vmul.f32 %v21203_v46, %v21203_v46  ;;  %v6592_v31 = vmul.f32 %v21206_v22, %v21206_v22  ;;  %v16017_v17 = vcombine.low %v6888_v11, %v6896_v13  ;;  %v6633_v0 = vrot.slane %v6562_v41, %v20831_v38 }
 0x9bc   : > { %v6594_v21 = vadd.f32 %v6593_v9, %v6587_v18  ;;  %v6598_v48 = vadd.f32 %v6590_v29, %v6589_v2  ;;  %v16032_v18 = vcombine.high %v6903_v54, %v6911_v40  ;;  %v16034_v9 = vcombine.high %v6904_v19, %v6912_v53  ;;  %v6919_v2 = vld [vmem:[%s20353_s21 + $0x780] sm:$0xff]  ;;  %9862 = vmatpush1.bf16.msra.mxu0 %v16015_v7 }
 0x9bd   : > { %v6927_v29 = vld [vmem:[%s20353_s21 + $0x7c0] sm:$0xff]  ;;  %9948 = vmatpush1.bf16.msra.mxu1 %v16017_v17  ;;  %v6658_v13 = vrot.slane %v6563_v55, %v20818_v25 }
 0x9be   : > { %v6595_v32 = vadd.f32 %v6594_v21, %v6588_v59  ;;  %v6599_v23 = vadd.f32 %v6598_v48, %v6591_v58  ;;  %v6920_v59 = vld [vmem:[%s20353_s21 + $0x788] sm:$0xff]  ;;  %v16031_v58 = vcombine.low %v6903_v54, %v6911_v40  ;;  %9863 = vmatprep.subr.bf16.mxu0 %v16032_v18  ;;  %v16033_v48 = vcombine.low %v6904_v19, %v6912_v53 }
 0x9bf   : > { %v6928_v21 = vld [vmem:[%s20353_s21 + $0x7c8] sm:$0xff]  ;;  %9949 = vmatprep.subr.bf16.mxu1 %v16034_v9 }
 0x9c0   : > { %6596 = vadd.xlane.f32.xlu0 %v6595_v32  ;;  %v6600_v34 = vadd.f32 %v6599_v23, %v6592_v31  ;;  %v16048_v32 = vcombine.high %v6919_v2, %v6927_v29  ;;  %v16050_v31 = vcombine.high %v6920_v59, %v6928_v21  ;;  %9864 = vmatpush1.bf16.msra.mxu0 %v16031_v58  ;;  %v6952_v58 = vld [vmem:[%s20353_s21 + $0x888] sm:$0xff] }
 0x9c1   : > { %v16047_v23 = vcombine.low %v6919_v2, %v6927_v29  ;;  %9950 = vmatpush1.bf16.msra.mxu1 %v16033_v48  ;;  %v6951_v29 = vld [vmem:[%s20353_s21 + $0x880] sm:$0xff]  ;;  %v6960_v48 = vld [vmem:[%s20353_s21 + $0x8c8] sm:$0xff] }
 0x9c2   : > { %6601 = vadd.xlane.f32.xlu1 %v6600_v34  ;;  %9865 = vmatprep.subr.bf16.mxu0 %v16048_v32  ;;  %v16049_v34 = vcombine.low %v6920_v59, %v6928_v21  ;;  %v6959_v21 = vld [vmem:[%s20353_s21 + $0x8c0] sm:$0xff]  ;;  %v16081_v41 = vcombine.low %v6952_v58, %v6960_v48 }
 0x9c3   : > { %9951 = vmatprep.subr.bf16.mxu1 %v16050_v31 }
 0x9c4   : > { %9866 = vmatpush1.bf16.msra.mxu0 %v16047_v23 }
 0x9c5   : > { %9952 = vmatpush1.bf16.msra.mxu1 %v16049_v34  ;;  %9878 = vmatprep.subr.bf16.mxu0 %v16064_v12  ;;  %v6967_v12 = vld [vmem:[%s20353_s21 + $0x900] sm:$0xff] }
 0x9c6   : > { %9964 = vmatprep.subr.bf16.mxu1 %v16066_v1  ;;  %v16080_v1 = vcombine.high %v6951_v29, %v6959_v21 }
 0xa4d   : > { %v6597_v33 = vpop.xlane.xlu0 %6596 }
 0xa4e   : > { %v6603_v51 = vmul.f32 0.001953125, %v6597_v33  ;;  %v16082_v33 = vcombine.high %v6952_v58, %v6960_v48  ;;  %v7055_v58 = vld [vmem:[%s20353_s21 + $0xbc0] sm:$0xff]  ;;  %v7048_v48 = vld [vmem:[%s20353_s21 + $0xb88] sm:$0xff] }
 0xa4f   : > { %v6602_v36 = vpop.xlane.xlu1 %6601 }
 0xa50   : > { %v6605_v52 = vadd.f32 1e-05, %v6603_v51  ;;  %v6604_v43 = vmul.f32 0.001953125, %v6602_v36  ;;  %v6975_v51 = vld [vmem:[%s20353_s21 + $0x940] sm:$0xff]  ;;  %v6968_v36 = vld [vmem:[%s20353_s21 + $0x908] sm:$0xff] }
 0xa51   : > { %v16095_v45 = vcombine.low %v6967_v12, %v6975_v51 }
 0xa52   : > { %19014 = vrsqrt.f32 %v6605_v52  ;;  %v6606_v39 = vadd.f32 1e-05, %v6604_v43  ;;  %v6976_v52 = vld [vmem:[%s20353_s21 + $0x948] sm:$0xff] }
 0xa53   : > { %v16097_v49 = vcombine.low %v6968_v36, %v6976_v52 }
 0xa54   : > { %19016 = vrsqrt.f32 %v6606_v39  ;;  %v16079_v39 = vcombine.low %v6951_v29, %v6959_v21  ;;  %v7047_v21 = vld [vmem:[%s20353_s21 + $0xb80] sm:$0xff] }
 0xa5c   : > { %v19015_v60 = vpop.eup %19014 }
 0xa5d   : > { %v6610_v14 = vmul.f32 %v19015_v60, %v21182_v42  ;;  %v6609_v62 = vmul.f32 %v19015_v60, %v21179_v20  ;;  %v6611_v3 = vmul.f32 %v19015_v60, %v21185_v24  ;;  %v6612_v11 = vmul.f32 %v19015_v60, %v21188_v47 }
 0xa5e   : > { %v19017_v5 = vpop.eup %19016  ;;  %v6662_v47 = vrot.slane %v6563_v55, %v20831_v38  ;;  %v16096_v55 = vcombine.high %v6967_v12, %v6975_v51  ;;  %v7056_v12 = vld [vmem:[%s20353_s21 + $0xbc8] sm:$0xff]  ;;  %v16176_v51 = vcombine.high %v7047_v21, %v7055_v58 }
 0xa5f   : > { %v6614_v15 = vmul.f32 %v19017_v5, %v21194_v28  ;;  %v6639_v54 = vmul.f32 %v6625_v56, %v6610_v14  ;;  %v6613_v42 = vmul.f32 %v19017_v5, %v21191_v27  ;;  %v6638_v20 = vmul.f32 %v6621_v57, %v6609_v62  ;;  %v7007_v14 = vld [vmem:[%s20353_s21 + $0xa40] sm:$0xff]  ;;  %v7000_v62 = vld [vmem:[%s20353_s21 + $0xa08] sm:$0xff] }
 0xa60   : > { %v6616_v40 = vmul.f32 %v19017_v5, %v21206_v22  ;;  %v6615_v24 = vmul.f32 %v19017_v5, %v21203_v46  ;;  %v6640_v19 = vmul.f32 %v6629_v61, %v6611_v3  ;;  %v6641_v17 = vmul.f32 %v6633_v0, %v6612_v11  ;;  %v7015_v11 = vld [vmem:[%s20353_s21 + $0xa80] sm:$0xff] }
 0xa61   : > { %v6643_v53 = vmul.f32 %v6625_v56, %v6614_v15  ;;  %v6642_v7 = vmul.f32 %v6621_v57, %v6613_v42  ;;  %v21284_v27 = vadd.f32 %v6654_v26, %v6639_v54  ;;  %v21288_v22 = vadd.f32 %v6650_v8, %v6638_v20  ;;  %v6983_v57 = vld [vmem:[%s20353_s21 + $0x980] sm:$0xff]  ;;  %v7016_v15 = vld [vmem:[%s20353_s21 + $0xa88] sm:$0xff] }
 0xa62   : > { %v6645_v18 = vmul.f32 %v6633_v0, %v6616_v40  ;;  %v6644_v28 = vmul.f32 %v6629_v61, %v6615_v24  ;;  %v21282_v9 = vadd.f32 %v6658_v13, %v6640_v19  ;;  %v21308_v34 = vadd.f32 %v6662_v47, %v6641_v17  ;;  %v6999_v61 = vld [vmem:[%s20353_s21 + $0xa00] sm:$0xff]  ;;  %v7008_v0 = vld [vmem:[%s20353_s21 + $0xa48] sm:$0xff] }
 0xa63   : > { %v21286_v2 = vadd.f32 %v6654_v26, %v6643_v53  ;;  %v21290_v46 = vadd.f32 %v6650_v8, %v6642_v7  ;;  %v16098_v56 = vcombine.high %v6968_v36, %v6976_v52  ;;  %v16111_v3 = vcombine.low %v6983_v57, %v6991_v35  ;;  %v7024_v54 = vld [vmem:[%s20353_s21 + $0xac8] sm:$0xff]  ;;  %v7031_v19 = vld [vmem:[%s20353_s21 + $0xb00] sm:$0xff] }
 0xa64   : > { %v21293_v59 = vadd.f32 %v6662_v47, %v6645_v18  ;;  %v21298_v32 = vadd.f32 %v6658_v13, %v6644_v28  ;;  %v16128_v26 = vcombine.high %v6999_v61, %v7007_v14  ;;  %v16130_v8 = vcombine.high %v7000_v62, %v7008_v0  ;;  %v7023_v13 = vld [vmem:[%s20353_s21 + $0xac0] sm:$0xff]  ;;  %v7032_v7 = vld [vmem:[%s20353_s21 + $0xb08] sm:$0xff] }
 0xa65   : > { %v21302_v31 = vpack.c.bf16 %v21286_v2, %v21284_v27  ;;  %v21306_v23 = vpack.c.bf16 %v21290_v46, %v21288_v22  ;;  %v16127_v42 = vcombine.low %v6999_v61, %v7007_v14  ;;  %v16129_v20 = vcombine.low %v7000_v62, %v7008_v0  ;;  %v7039_v53 = vld [vmem:[%s20353_s21 + $0xb40] sm:$0xff]  ;;  %v7040_v47 = vld [vmem:[%s20353_s21 + $0xb48] sm:$0xff] }
 0xa66   : > { %v21320_v43 = vpack.c.bf16 %v21293_v59, %v21308_v34  ;;  %v16144_v40 = vcombine.high %v7015_v11, %v7023_v13  ;;  %v16146_v24 = vcombine.high %v7016_v15, %v7024_v54  ;;  %v16143_v17 = vcombine.low %v7015_v11, %v7023_v13  ;;  %v7063_v52 = vld [vmem:[%s20353_s21 + $0xc00] sm:$0xff] }
 0xa67   : > { %9867 = vmatprep.mubr.bf16.mxu0 %v21302_v31  ;;  %9953 = vmatprep.mubr.bf16.mxu1 %v21302_v31  ;;  %v16145_v18 = vcombine.low %v7016_v15, %v7024_v54  ;;  %v16160_v28 = vcombine.high %v7031_v19, %v7039_v53  ;;  %v16162_v29 = vcombine.high %v7032_v7, %v7040_v47  ;;  %v7095_v0 = vld [vmem:[%s20353_s21 + $0xd00] sm:$0xff] }
 0xa68   : > { %9868 = vmatmul.mubr.bf16.vlgmr.msra.gmra.mrb[32].mxu0 %v21306_v23  ;;  %9954 = vmatmul.mubr.bf16.vlgmr.msra.gmra.mrb[32].mxu1 %v21306_v23  ;;  %v16178_v36 = vcombine.high %v7048_v48, %v7056_v12  ;;  %v7111_v54 = vld [vmem:[%s20353_s21 + $0xd80] sm:$0xff] }
 0xa69   : > { %9879 = vmatpush1.bf16.msra.mxu0 %v16063_v37  ;;  %9965 = vmatpush1.bf16.msra.mxu1 %v16065_v50  ;;  %v6992_v37 = vld [vmem:[%s20353_s21 + $0x9c8] sm:$0xff]  ;;  %v16112_v50 = vcombine.high %v6983_v57, %v6991_v35  ;;  %v16177_v57 = vcombine.low %v7048_v48, %v7056_v12  ;;  %v7143_v12 = vld [vmem:[%s20353_s21 + $0xe80] sm:$0xff] }
 0xa6a   : > { %9910 = vmatprep.mubr.bf16.mxu0 %v21320_v43  ;;  %9996 = vmatprep.mubr.bf16.mxu1 %v21320_v43  ;;  %v16114_v60 = vcombine.high %v6984_v44, %v6992_v37  ;;  %v16113_v5 = vcombine.low %v6984_v44, %v6992_v37  ;;  %v7079_v37 = vld [vmem:[%s20353_s21 + $0xc80] sm:$0xff] }
 0xa6b   : > { %9880 = vmatprep.subr.bf16.mxu0 %v16080_v1  ;;  %9966 = vmatprep.subr.bf16.mxu1 %v16082_v33  ;;  %v16159_v1 = vcombine.low %v7031_v19, %v7039_v53  ;;  %v16161_v33 = vcombine.low %v7032_v7, %v7040_v47  ;;  %v7127_v47 = vld [vmem:[%s20353_s21 + $0xe00] sm:$0xff] }
 0xa6d   : > { %9881 = vmatpush1.bf16.msra.mxu0 %v16079_v39  ;;  %9967 = vmatpush1.bf16.msra.mxu1 %v16081_v41  ;;  %v7071_v39 = vld [vmem:[%s20353_s21 + $0xc40] sm:$0xff]  ;;  %v7064_v41 = vld [vmem:[%s20353_s21 + $0xc08] sm:$0xff] }
 0xa6e   : > { %9882 = vmatprep.subr.bf16.mxu0 %v16096_v55  ;;  %9968 = vmatprep.subr.bf16.mxu1 %v16098_v56  ;;  %v7072_v55 = vld [vmem:[%s20353_s21 + $0xc48] sm:$0xff]  ;;  %v16175_v56 = vcombine.low %v7047_v21, %v7055_v58  ;;  %v16192_v35 = vcombine.high %v7063_v52, %v7071_v39 }
 0xa6f   : > { %v16194_v44 = vcombine.high %v7064_v41, %v7072_v55  ;;  %v16193_v61 = vcombine.low %v7064_v41, %v7072_v55  ;;  %v7159_v55 = vld [vmem:[%s20353_s21 + $0xf00] sm:$0xff] }
 0xa71   : > { %9883 = vmatpush1.bf16.msra.mxu0 %v16095_v45  ;;  %9969 = vmatpush1.bf16.msra.mxu1 %v16097_v49  ;;  %v7087_v45 = vld [vmem:[%s20353_s21 + $0xcc0] sm:$0xff]  ;;  %v7080_v49 = vld [vmem:[%s20353_s21 + $0xc88] sm:$0xff] }
 0xa72   : > { %9884 = vmatprep.subr.bf16.mxu0 %v16112_v50  ;;  %9970 = vmatprep.subr.bf16.mxu1 %v16114_v60  ;;  %v7088_v50 = vld [vmem:[%s20353_s21 + $0xcc8] sm:$0xff]  ;;  %v16191_v60 = vcombine.low %v7063_v52, %v7071_v39  ;;  %v16208_v14 = vcombine.high %v7079_v37, %v7087_v45 }
 0xa73   : > { %v16210_v62 = vcombine.high %v7080_v49, %v7088_v50  ;;  %v16209_v11 = vcombine.low %v7080_v49, %v7088_v50  ;;  %v7175_v50 = vld [vmem:[%s20353_s21 + $0xf80] sm:$0xff] }
 0xa75   : > { %9885 = vmatpush1.bf16.msra.mxu0 %v16111_v3  ;;  %9971 = vmatpush1.bf16.msra.mxu1 %v16113_v5  ;;  %v7103_v3 = vld [vmem:[%s20353_s21 + $0xd40] sm:$0xff]  ;;  %v7096_v5 = vld [vmem:[%s20353_s21 + $0xd08] sm:$0xff] }
 0xa76   : > { %9886 = vmatprep.subr.bf16.mxu0 %v16128_v26  ;;  %9972 = vmatprep.subr.bf16.mxu1 %v16130_v8  ;;  %v7104_v26 = vld [vmem:[%s20353_s21 + $0xd48] sm:$0xff]  ;;  %v16207_v8 = vcombine.low %v7079_v37, %v7087_v45  ;;  %v16224_v13 = vcombine.high %v7095_v0, %v7103_v3 }
 0xa77   : > { %v16226_v15 = vcombine.high %v7096_v5, %v7104_v26  ;;  %v16225_v19 = vcombine.low %v7096_v5, %v7104_v26  ;;  %v6681_v26 = vld [vmem:[%s20353_s21 + $0x10] sm:$0xff] }
 0xa79   : > { %9887 = vmatpush1.bf16.msra.mxu0 %v16127_v42  ;;  %9973 = vmatpush1.bf16.msra.mxu1 %v16129_v20  ;;  %v7119_v42 = vld [vmem:[%s20353_s21 + $0xdc0] sm:$0xff]  ;;  %v7112_v20 = vld [vmem:[%s20353_s21 + $0xd88] sm:$0xff] }
 0xa7a   : > { %9888 = vmatprep.subr.bf16.mxu0 %v16144_v40  ;;  %9974 = vmatprep.subr.bf16.mxu1 %v16146_v24  ;;  %v7120_v40 = vld [vmem:[%s20353_s21 + $0xdc8] sm:$0xff]  ;;  %v16223_v24 = vcombine.low %v7095_v0, %v7103_v3  ;;  %v16240_v53 = vcombine.high %v7111_v54, %v7119_v42 }
 0xa7b   : > { %v16242_v7 = vcombine.high %v7112_v20, %v7120_v40  ;;  %v16241_v21 = vcombine.low %v7112_v20, %v7120_v40  ;;  %v6697_v40 = vld [vmem:[%s20353_s21 + $0x90] sm:$0xff] }
 0xa7d   : > { %9889 = vmatpush1.bf16.msra.mxu0 %v16143_v17  ;;  %9975 = vmatpush1.bf16.msra.mxu1 %v16145_v18  ;;  %v7135_v17 = vld [vmem:[%s20353_s21 + $0xe40] sm:$0xff]  ;;  %v7128_v18 = vld [vmem:[%s20353_s21 + $0xe08] sm:$0xff] }
 0xa7e   : > { %9890 = vmatprep.subr.bf16.mxu0 %v16160_v28  ;;  %9976 = vmatprep.subr.bf16.mxu1 %v16162_v29  ;;  %v7136_v28 = vld [vmem:[%s20353_s21 + $0xe48] sm:$0xff]  ;;  %v16239_v29 = vcombine.low %v7111_v54, %v7119_v42  ;;  %v16256_v58 = vcombine.high %v7127_v47, %v7135_v17 }
 0xa7f   : > { %v16258_v48 = vcombine.high %v7128_v18, %v7136_v28  ;;  %v16257_v52 = vcombine.low %v7128_v18, %v7136_v28 }
 0xa81   : > { %9891 = vmatpush1.bf16.msra.mxu0 %v16159_v1  ;;  %9977 = vmatpush1.bf16.msra.mxu1 %v16161_v33  ;;  %v7151_v1 = vld [vmem:[%s20353_s21 + $0xec0] sm:$0xff]  ;;  %v7144_v33 = vld [vmem:[%s20353_s21 + $0xe88] sm:$0xff] }
 0xa82   : > { %9892 = vmatprep.subr.bf16.mxu0 %v16176_v51  ;;  %9978 = vmatprep.subr.bf16.mxu1 %v16178_v36  ;;  %v7152_v51 = vld [vmem:[%s20353_s21 + $0xec8] sm:$0xff]  ;;  %v16255_v36 = vcombine.low %v7127_v47, %v7135_v17  ;;  %v16272_v39 = vcombine.high %v7143_v12, %v7151_v1  ;;  %v21392_v47 = vpack.c.bf16 %v21298_v32, %v21282_v9 }
 0xa83   : > { %v16274_v41 = vcombine.high %v7144_v33, %v7152_v51  ;;  %v16273_v37 = vcombine.low %v7144_v33, %v7152_v51 }
 0xa85   : > { %9893 = vmatpush1.bf16.msra.mxu0 %v16175_v56  ;;  %9979 = vmatpush1.bf16.msra.mxu1 %v16177_v57  ;;  %v7167_v56 = vld [vmem:[%s20353_s21 + $0xf40] sm:$0xff]  ;;  %v7160_v57 = vld [vmem:[%s20353_s21 + $0xf08] sm:$0xff] }
 0xa86   : > { %9894 = vmatprep.subr.bf16.mxu0 %v16192_v35  ;;  %9980 = vmatprep.subr.bf16.mxu1 %v16194_v44  ;;  %v7168_v35 = vld [vmem:[%s20353_s21 + $0xf48] sm:$0xff]  ;;  %v16271_v44 = vcombine.low %v7143_v12, %v7151_v1  ;;  %v16288_v45 = vcombine.high %v7159_v55, %v7167_v56 }
 0xa87   : > { %v16290_v49 = vcombine.high %v7160_v57, %v7168_v35  ;;  %v16289_v0 = vcombine.low %v7160_v57, %v7168_v35 }
 0xa89   : > { %9895 = vmatpush1.bf16.msra.mxu0 %v16191_v60  ;;  %9981 = vmatpush1.bf16.msra.mxu1 %v16193_v61  ;;  %v7183_v60 = vld [vmem:[%s20353_s21 + $0xfc0] sm:$0xff]  ;;  %v7176_v61 = vld [vmem:[%s20353_s21 + $0xf88] sm:$0xff] }
 0xa8a   : > { %9896 = vmatprep.subr.bf16.mxu0 %v16208_v14  ;;  %9982 = vmatprep.subr.bf16.mxu1 %v16210_v62  ;;  %v7184_v14 = vld [vmem:[%s20353_s21 + $0xfc8] sm:$0xff]  ;;  %v16287_v62 = vcombine.low %v7159_v55, %v7167_v56  ;;  %v16304_v3 = vcombine.high %v7175_v50, %v7183_v60 }
 0xa8b   : > { %v16306_v5 = vcombine.high %v7176_v61, %v7184_v14  ;;  %v16305_v54 = vcombine.low %v7176_v61, %v7184_v14 }
 0xa8d   : > { %9897 = vmatpush1.bf16.msra.mxu0 %v16207_v8  ;;  %9983 = vmatpush1.bf16.msra.mxu1 %v16209_v11  ;;  %v6689_v8 = vld [vmem:[%s20353_s21 + $0x50] sm:$0xff]  ;;  %v6682_v11 = vld [vmem:[%s20353_s21 + $0x18] sm:$0xff] }
 0xa8e   : > { %9898 = vmatprep.subr.bf16.mxu0 %v16224_v13  ;;  %9984 = vmatprep.subr.bf16.mxu1 %v16226_v15  ;;  %v6690_v13 = vld [vmem:[%s20353_s21 + $0x58] sm:$0xff]  ;;  %v16303_v15 = vcombine.low %v7175_v50, %v7183_v60  ;;  %v15812_v42 = vcombine.high %v6681_v26, %v6689_v8 }
 0xa8f   : > { %v15814_v20 = vcombine.high %v6682_v11, %v6690_v13  ;;  %v15813_v17 = vcombine.low %v6682_v11, %v6690_v13 }
 0xa91   : > { %9899 = vmatpush1.bf16.msra.mxu0 %v16223_v24  ;;  %9985 = vmatpush1.bf16.msra.mxu1 %v16225_v19  ;;  %v6705_v24 = vld [vmem:[%s20353_s21 + $0xd0] sm:$0xff]  ;;  %v6698_v19 = vld [vmem:[%s20353_s21 + $0x98] sm:$0xff] }
 0xa92   : > { %9900 = vmatprep.subr.bf16.mxu0 %v16240_v53  ;;  %9986 = vmatprep.subr.bf16.mxu1 %v16242_v7  ;;  %v6706_v53 = vld [vmem:[%s20353_s21 + $0xd8] sm:$0xff]  ;;  %v15811_v7 = vcombine.low %v6681_v26, %v6689_v8  ;;  %v15828_v18 = vcombine.high %v6697_v40, %v6705_v24  ;;  %v15827_v12 = vcombine.low %v6697_v40, %v6705_v24 }
 0xa93   : > { %v15830_v28 = vcombine.high %v6698_v19, %v6706_v53  ;;  %v15829_v1 = vcombine.low %v6698_v19, %v6706_v53 }
 0xa95   : > { %9901 = vmatpush1.bf16.msra.mxu0 %v16239_v29  ;;  %9987 = vmatpush1.bf16.msra.mxu1 %v16241_v21  ;;  %v6713_v29 = vld [vmem:[%s20353_s21 + $0x110] sm:$0xff] }
 0xa96   : > { %9902 = vmatprep.subr.bf16.mxu0 %v16256_v58  ;;  %9988 = vmatprep.subr.bf16.mxu1 %v16258_v48  ;;  %v6721_v21 = vld [vmem:[%s20353_s21 + $0x150] sm:$0xff]  ;;  %v6714_v58 = vld [vmem:[%s20353_s21 + $0x118] sm:$0xff] }
 0xa97   : > { %v6722_v48 = vld [vmem:[%s20353_s21 + $0x158] sm:$0xff]  ;;  %v15844_v33 = vcombine.high %v6713_v29, %v6721_v21  ;;  %v15843_v55 = vcombine.low %v6713_v29, %v6721_v21 }
 0xa98   : > { %v15846_v51 = vcombine.high %v6714_v58, %v6722_v48  ;;  %v15845_v56 = vcombine.low %v6714_v58, %v6722_v48 }
 0xa99   : > { %9903 = vmatpush1.bf16.msra.mxu0 %v16255_v36  ;;  %9989 = vmatpush1.bf16.msra.mxu1 %v16257_v52  ;;  %v6729_v36 = vld [vmem:[%s20353_s21 + $0x190] sm:$0xff] }
 0xa9a   : > { %9904 = vmatprep.subr.bf16.mxu0 %v16272_v39  ;;  %9990 = vmatprep.subr.bf16.mxu1 %v16274_v41  ;;  %v6737_v52 = vld [vmem:[%s20353_s21 + $0x1d0] sm:$0xff]  ;;  %v6730_v39 = vld [vmem:[%s20353_s21 + $0x198] sm:$0xff] }
 0xa9b   : > { %v6738_v41 = vld [vmem:[%s20353_s21 + $0x1d8] sm:$0xff]  ;;  %v15860_v57 = vcombine.high %v6729_v36, %v6737_v52  ;;  %v15859_v50 = vcombine.low %v6729_v36, %v6737_v52 }
 0xa9c   : > { %v15862_v35 = vcombine.high %v6730_v39, %v6738_v41  ;;  %v15861_v60 = vcombine.low %v6730_v39, %v6738_v41 }
 0xa9d   : > { %9905 = vmatpush1.bf16.msra.mxu0 %v16271_v44  ;;  %9991 = vmatpush1.bf16.msra.mxu1 %v16273_v37  ;;  %v6745_v44 = vld [vmem:[%s20353_s21 + $0x210] sm:$0xff] }
 0xa9e   : > { %9906 = vmatprep.subr.bf16.mxu0 %v16288_v45  ;;  %9992 = vmatprep.subr.bf16.mxu1 %v16290_v49  ;;  %v6753_v37 = vld [vmem:[%s20353_s21 + $0x250] sm:$0xff]  ;;  %v6746_v45 = vld [vmem:[%s20353_s21 + $0x218] sm:$0xff] }
 0xa9f   : > { %v6754_v49 = vld [vmem:[%s20353_s21 + $0x258] sm:$0xff]  ;;  %v15876_v61 = vcombine.high %v6745_v44, %v6753_v37  ;;  %v15875_v26 = vcombine.low %v6745_v44, %v6753_v37 }
 0xaa0   : > { %v15878_v14 = vcombine.high %v6746_v45, %v6754_v49  ;;  %v15877_v8 = vcombine.low %v6746_v45, %v6754_v49 }
 0xaa1   : > { %9907 = vmatpush1.bf16.msra.mxu0 %v16287_v62  ;;  %9993 = vmatpush1.bf16.msra.mxu1 %v16289_v0  ;;  %v6761_v62 = vld [vmem:[%s20353_s21 + $0x290] sm:$0xff] }
 0xaa2   : > { %9908 = vmatprep.subr.bf16.mxu0 %v16304_v3  ;;  %9994 = vmatprep.subr.bf16.mxu1 %v16306_v5  ;;  %v6769_v0 = vld [vmem:[%s20353_s21 + $0x2d0] sm:$0xff]  ;;  %v6762_v3 = vld [vmem:[%s20353_s21 + $0x298] sm:$0xff] }
 0xaa3   : > { %v6770_v5 = vld [vmem:[%s20353_s21 + $0x2d8] sm:$0xff]  ;;  %v15892_v11 = vcombine.high %v6761_v62, %v6769_v0  ;;  %v15891_v40 = vcombine.low %v6761_v62, %v6769_v0 }
 0xaa4   : > { %v15894_v13 = vcombine.high %v6762_v3, %v6770_v5  ;;  %v15893_v24 = vcombine.low %v6762_v3, %v6770_v5 }
 0xaa5   : > { %9909 = vmatpush1.bf16.msra.mxu0 %v16303_v15  ;;  %9995 = vmatpush1.bf16.msra.mxu1 %v16305_v54  ;;  %v6777_v15 = vld [vmem:[%s20353_s21 + $0x310] sm:$0xff] }
 0xaa6   : > { %10007 = vmatprep.subr.bf16.mxu0 %v15812_v42  ;;  %10093 = vmatprep.subr.bf16.mxu1 %v15814_v20  ;;  %v6785_v54 = vld [vmem:[%s20353_s21 + $0x350] sm:$0xff]  ;;  %v6778_v42 = vld [vmem:[%s20353_s21 + $0x318] sm:$0xff] }
 0xaa7   : > { %v6786_v20 = vld [vmem:[%s20353_s21 + $0x358] sm:$0xff]  ;;  %v15908_v19 = vcombine.high %v6777_v15, %v6785_v54  ;;  %v15907_v29 = vcombine.low %v6777_v15, %v6785_v54 }
 0xaa8   : > { %9911 = vmatmul.mubr.bf16.vlgmr.msra.gmra.mrb[32].mxu0 %v21392_v47  ;;  %9997 = vmatmul.mubr.bf16.vlgmr.msra.gmra.mrb[32].mxu1 %v21392_v47  ;;  %v15910_v53 = vcombine.high %v6778_v42, %v6786_v20  ;;  %v15909_v21 = vcombine.low %v6778_v42, %v6786_v20 }
 0xaa9   : > { %10008 = vmatpush1.bf16.msra.mxu0 %v15811_v7  ;;  %10039 = vmatprep.mubr.bf16.mxu0 %v21302_v31  ;;  %v6793_v7 = vld [vmem:[%s20353_s21 + $0x390] sm:$0xff] }
 0xaaa   : > { %10094 = vmatpush1.bf16.msra.mxu1 %v15813_v17  ;;  %10125 = vmatprep.mubr.bf16.mxu1 %v21302_v31  ;;  %v6801_v17 = vld [vmem:[%s20353_s21 + $0x3d0] sm:$0xff] }
 0xaab   : > { %10009 = vmatprep.subr.bf16.mxu0 %v15828_v18  ;;  %10095 = vmatprep.subr.bf16.mxu1 %v15830_v28  ;;  %v6794_v18 = vld [vmem:[%s20353_s21 + $0x398] sm:$0xff]  ;;  %v15924_v58 = vcombine.high %v6793_v7, %v6801_v17  ;;  %v15923_v36 = vcombine.low %v6793_v7, %v6801_v17 }
 0xaac   : > { %v6802_v28 = vld [vmem:[%s20353_s21 + $0x3d8] sm:$0xff] }
 0xaad   : > { %10010 = vmatpush1.bf16.msra.mxu0 %v15827_v12  ;;  %v15926_v48 = vcombine.high %v6794_v18, %v6802_v28  ;;  %v6809_v12 = vld [vmem:[%s20353_s21 + $0x410] sm:$0xff]  ;;  %v15925_v52 = vcombine.low %v6794_v18, %v6802_v28 }
 0xaae   : > { %10096 = vmatpush1.bf16.msra.mxu1 %v15829_v1  ;;  %10011 = vmatprep.subr.bf16.mxu0 %v15844_v33  ;;  %v6817_v1 = vld [vmem:[%s20353_s21 + $0x450] sm:$0xff]  ;;  %v6810_v33 = vld [vmem:[%s20353_s21 + $0x418] sm:$0xff] }
 0xaaf   : > { %10097 = vmatprep.subr.bf16.mxu1 %v15846_v51  ;;  %v6818_v51 = vld [vmem:[%s20353_s21 + $0x458] sm:$0xff]  ;;  %v15940_v39 = vcombine.high %v6809_v12, %v6817_v1  ;;  %v15939_v44 = vcombine.low %v6809_v12, %v6817_v1 }
 0xab0   : > { %v15942_v41 = vcombine.high %v6810_v33, %v6818_v51  ;;  %v15941_v37 = vcombine.low %v6810_v33, %v6818_v51 }
 0xab1   : > { %10012 = vmatpush1.bf16.msra.mxu0 %v15843_v55  ;;  %v6825_v55 = vld [vmem:[%s20353_s21 + $0x490] sm:$0xff] }
 0xab2   : > { %10098 = vmatpush1.bf16.msra.mxu1 %v15845_v56  ;;  %10013 = vmatprep.subr.bf16.mxu0 %v15860_v57  ;;  %v6833_v56 = vld [vmem:[%s20353_s21 + $0x4d0] sm:$0xff]  ;;  %v6826_v57 = vld [vmem:[%s20353_s21 + $0x498] sm:$0xff] }
 0xab3   : > { %10099 = vmatprep.subr.bf16.mxu1 %v15862_v35  ;;  %v6834_v35 = vld [vmem:[%s20353_s21 + $0x4d8] sm:$0xff]  ;;  %v15956_v45 = vcombine.high %v6825_v55, %v6833_v56  ;;  %v15955_v62 = vcombine.low %v6825_v55, %v6833_v56 }
 0xab4   : > { %v15958_v49 = vcombine.high %v6826_v57, %v6834_v35  ;;  %v15957_v0 = vcombine.low %v6826_v57, %v6834_v35 }
 0xab5   : > { %10014 = vmatpush1.bf16.msra.mxu0 %v15859_v50  ;;  %v6841_v50 = vld [vmem:[%s20353_s21 + $0x510] sm:$0xff] }
 0xab6   : > { %10100 = vmatpush1.bf16.msra.mxu1 %v15861_v60  ;;  %10015 = vmatprep.subr.bf16.mxu0 %v15876_v61  ;;  %v6849_v60 = vld [vmem:[%s20353_s21 + $0x550] sm:$0xff]  ;;  %v6842_v61 = vld [vmem:[%s20353_s21 + $0x518] sm:$0xff] }
 0xab7   : > { %10101 = vmatprep.subr.bf16.mxu1 %v15878_v14  ;;  %v6850_v14 = vld [vmem:[%s20353_s21 + $0x558] sm:$0xff]  ;;  %v15972_v3 = vcombine.high %v6841_v50, %v6849_v60  ;;  %v15971_v15 = vcombine.low %v6841_v50, %v6849_v60 }
 0xab8   : > { %v15974_v5 = vcombine.high %v6842_v61, %v6850_v14  ;;  %v15973_v54 = vcombine.low %v6842_v61, %v6850_v14 }
 0xab9   : > { %10016 = vmatpush1.bf16.msra.mxu0 %v15875_v26  ;;  %v6857_v26 = vld [vmem:[%s20353_s21 + $0x590] sm:$0xff] }
 0xaba   : > { %10102 = vmatpush1.bf16.msra.mxu1 %v15877_v8  ;;  %10017 = vmatprep.subr.bf16.mxu0 %v15892_v11  ;;  %v6865_v8 = vld [vmem:[%s20353_s21 + $0x5d0] sm:$0xff]  ;;  %v6858_v11 = vld [vmem:[%s20353_s21 + $0x598] sm:$0xff] }
 0xabb   : > { %10103 = vmatprep.subr.bf16.mxu1 %v15894_v13  ;;  %v6866_v13 = vld [vmem:[%s20353_s21 + $0x5d8] sm:$0xff]  ;;  %v15988_v42 = vcombine.high %v6857_v26, %v6865_v8  ;;  %v15987_v7 = vcombine.low %v6857_v26, %v6865_v8 }
 0xabc   : > { %v15990_v20 = vcombine.high %v6858_v11, %v6866_v13  ;;  %v15989_v17 = vcombine.low %v6858_v11, %v6866_v13 }
 0xabd   : > { %10018 = vmatpush1.bf16.msra.mxu0 %v15891_v40  ;;  %v6873_v40 = vld [vmem:[%s20353_s21 + $0x610] sm:$0xff] }
 0xabe   : > { %10104 = vmatpush1.bf16.msra.mxu1 %v15893_v24  ;;  %10019 = vmatprep.subr.bf16.mxu0 %v15908_v19  ;;  %v6881_v24 = vld [vmem:[%s20353_s21 + $0x650] sm:$0xff]  ;;  %v6874_v19 = vld [vmem:[%s20353_s21 + $0x618] sm:$0xff] }
 0xabf   : > { %10105 = vmatprep.subr.bf16.mxu1 %v15910_v53  ;;  %v6882_v53 = vld [vmem:[%s20353_s21 + $0x658] sm:$0xff]  ;;  %v16004_v18 = vcombine.high %v6873_v40, %v6881_v24  ;;  %v16003_v12 = vcombine.low %v6873_v40, %v6881_v24 }
 0xac0   : > { %v16006_v28 = vcombine.high %v6874_v19, %v6882_v53  ;;  %v16005_v1 = vcombine.low %v6874_v19, %v6882_v53  ;;  %v6962_v40 = vld [vmem:[%s20353_s21 + $0x8d8] sm:$0xff]  ;;  %v6969_v53 = vld [vmem:[%s20353_s21 + $0x910] sm:$0xff] }
 0xac1   : > { %10020 = vmatpush1.bf16.msra.mxu0 %v15907_v29  ;;  %v6889_v29 = vld [vmem:[%s20353_s21 + $0x690] sm:$0xff] }
 0xac2   : > { %10106 = vmatpush1.bf16.msra.mxu1 %v15909_v21  ;;  %10021 = vmatprep.subr.bf16.mxu0 %v15924_v58  ;;  %v6897_v21 = vld [vmem:[%s20353_s21 + $0x6d0] sm:$0xff]  ;;  %v6890_v58 = vld [vmem:[%s20353_s21 + $0x698] sm:$0xff] }
 0xac3   : > { %10107 = vmatprep.subr.bf16.mxu1 %v15926_v48  ;;  %v6898_v48 = vld [vmem:[%s20353_s21 + $0x6d8] sm:$0xff]  ;;  %v16020_v33 = vcombine.high %v6889_v29, %v6897_v21  ;;  %v16019_v55 = vcombine.low %v6889_v29, %v6897_v21 }
 0xac4   : > { %v16022_v51 = vcombine.high %v6890_v58, %v6898_v48  ;;  %v16021_v56 = vcombine.low %v6890_v58, %v6898_v48 }
 0xac5   : > { %10022 = vmatpush1.bf16.msra.mxu0 %v15923_v36  ;;  %v6905_v36 = vld [vmem:[%s20353_s21 + $0x710] sm:$0xff] }
 0xac6   : > { %10108 = vmatpush1.bf16.msra.mxu1 %v15925_v52  ;;  %10023 = vmatprep.subr.bf16.mxu0 %v15940_v39  ;;  %v6913_v52 = vld [vmem:[%s20353_s21 + $0x750] sm:$0xff]  ;;  %v6906_v39 = vld [vmem:[%s20353_s21 + $0x718] sm:$0xff] }
 0xac7   : > { %10109 = vmatprep.subr.bf16.mxu1 %v15942_v41  ;;  %v6914_v41 = vld [vmem:[%s20353_s21 + $0x758] sm:$0xff]  ;;  %v16036_v57 = vcombine.high %v6905_v36, %v6913_v52  ;;  %v16035_v50 = vcombine.low %v6905_v36, %v6913_v52 }
 0xac8   : > { %v16038_v35 = vcombine.high %v6906_v39, %v6914_v41  ;;  %v16037_v60 = vcombine.low %v6906_v39, %v6914_v41 }
 0xac9   : > { %10024 = vmatpush1.bf16.msra.mxu0 %v15939_v44  ;;  %v6921_v44 = vld [vmem:[%s20353_s21 + $0x790] sm:$0xff] }
 0xaca   : > { %10110 = vmatpush1.bf16.msra.mxu1 %v15941_v37  ;;  %10025 = vmatprep.subr.bf16.mxu0 %v15956_v45  ;;  %v6929_v37 = vld [vmem:[%s20353_s21 + $0x7d0] sm:$0xff]  ;;  %v6922_v45 = vld [vmem:[%s20353_s21 + $0x798] sm:$0xff] }
 0xacb   : > { %10111 = vmatprep.subr.bf16.mxu1 %v15958_v49  ;;  %v6930_v49 = vld [vmem:[%s20353_s21 + $0x7d8] sm:$0xff]  ;;  %v16052_v61 = vcombine.high %v6921_v44, %v6929_v37  ;;  %v16051_v26 = vcombine.low %v6921_v44, %v6929_v37 }
 0xacc   : > { %v16054_v14 = vcombine.high %v6922_v45, %v6930_v49  ;;  %v16053_v8 = vcombine.low %v6922_v45, %v6930_v49 }
 0xacd   : > { %10026 = vmatpush1.bf16.msra.mxu0 %v15955_v62  ;;  %v6937_v62 = vld [vmem:[%s20353_s21 + $0x810] sm:$0xff] }
 0xace   : > { %10112 = vmatpush1.bf16.msra.mxu1 %v15957_v0  ;;  %10027 = vmatprep.subr.bf16.mxu0 %v15972_v3  ;;  %v6945_v0 = vld [vmem:[%s20353_s21 + $0x850] sm:$0xff]  ;;  %v6938_v3 = vld [vmem:[%s20353_s21 + $0x818] sm:$0xff] }
 0xacf   : > { %10113 = vmatprep.subr.bf16.mxu1 %v15974_v5  ;;  %v6946_v5 = vld [vmem:[%s20353_s21 + $0x858] sm:$0xff]  ;;  %v16068_v11 = vcombine.high %v6937_v62, %v6945_v0 }
 0xad0   : > { %v16070_v13 = vcombine.high %v6938_v3, %v6946_v5  ;;  %v16069_v24 = vcombine.low %v6938_v3, %v6946_v5 }
 0xad1   : > { %10028 = vmatpush1.bf16.msra.mxu0 %v15971_v15  ;;  %v6953_v15 = vld [vmem:[%s20353_s21 + $0x890] sm:$0xff] }
 0xad2   : > { %10114 = vmatpush1.bf16.msra.mxu1 %v15973_v54  ;;  %10029 = vmatprep.subr.bf16.mxu0 %v15988_v42  ;;  %v6961_v54 = vld [vmem:[%s20353_s21 + $0x8d0] sm:$0xff]  ;;  %v16067_v42 = vcombine.low %v6937_v62, %v6945_v0 }
 0xad3   : > { %10115 = vmatprep.subr.bf16.mxu1 %v15990_v20  ;;  %v6954_v20 = vld [vmem:[%s20353_s21 + $0x898] sm:$0xff]  ;;  %v16084_v19 = vcombine.high %v6953_v15, %v6961_v54  ;;  %v16083_v29 = vcombine.low %v6953_v15, %v6961_v54 }
 0xad4   : > { %v16085_v21 = vcombine.low %v6954_v20, %v6962_v40 }
 0xad5   : > { %10030 = vmatpush1.bf16.msra.mxu0 %v15987_v7  ;;  %v6977_v7 = vld [vmem:[%s20353_s21 + $0x950] sm:$0xff] }
 0xad6   : > { %10116 = vmatpush1.bf16.msra.mxu1 %v15989_v17  ;;  %10031 = vmatprep.subr.bf16.mxu0 %v16004_v18  ;;  %v16086_v17 = vcombine.high %v6954_v20, %v6962_v40  ;;  %v6970_v18 = vld [vmem:[%s20353_s21 + $0x918] sm:$0xff]  ;;  %v16100_v58 = vcombine.high %v6969_v53, %v6977_v7  ;;  %v16099_v36 = vcombine.low %v6969_v53, %v6977_v7  ;;  %v7049_v40 = vld [vmem:[%s20353_s21 + $0xb90] sm:$0xff] }
 0xad7   : > { %10117 = vmatprep.subr.bf16.mxu1 %v16006_v28  ;;  %v6978_v28 = vld [vmem:[%s20353_s21 + $0x958] sm:$0xff] }
 0xad8   : > { %v16102_v48 = vcombine.high %v6970_v18, %v6978_v28  ;;  %v16101_v52 = vcombine.low %v6970_v18, %v6978_v28  ;;  %v7058_v53 = vld [vmem:[%s20353_s21 + $0xbd8] sm:$0xff] }
 0xad9   : > { %10032 = vmatpush1.bf16.msra.mxu0 %v16003_v12  ;;  %v6985_v12 = vld [vmem:[%s20353_s21 + $0x990] sm:$0xff] }
 0xada   : > { %10118 = vmatpush1.bf16.msra.mxu1 %v16005_v1  ;;  %10033 = vmatprep.subr.bf16.mxu0 %v16020_v33  ;;  %v6993_v1 = vld [vmem:[%s20353_s21 + $0x9d0] sm:$0xff]  ;;  %v6986_v33 = vld [vmem:[%s20353_s21 + $0x998] sm:$0xff] }
 0xadb   : > { %10119 = vmatprep.subr.bf16.mxu1 %v16022_v51  ;;  %v6994_v51 = vld [vmem:[%s20353_s21 + $0x9d8] sm:$0xff]  ;;  %v16116_v39 = vcombine.high %v6985_v12, %v6993_v1  ;;  %v16115_v44 = vcombine.low %v6985_v12, %v6993_v1 }
 0xadc   : > { %v16118_v41 = vcombine.high %v6986_v33, %v6994_v51  ;;  %v16117_v37 = vcombine.low %v6986_v33, %v6994_v51 }
 0xadd   : > { %10034 = vmatpush1.bf16.msra.mxu0 %v16019_v55  ;;  %v7001_v55 = vld [vmem:[%s20353_s21 + $0xa10] sm:$0xff] }
 0xade   : > { %10120 = vmatpush1.bf16.msra.mxu1 %v16021_v56  ;;  %10035 = vmatprep.subr.bf16.mxu0 %v16036_v57  ;;  %v7009_v56 = vld [vmem:[%s20353_s21 + $0xa50] sm:$0xff]  ;;  %v7002_v57 = vld [vmem:[%s20353_s21 + $0xa18] sm:$0xff] }
 0xadf   : > { %10121 = vmatprep.subr.bf16.mxu1 %v16038_v35  ;;  %v7010_v35 = vld [vmem:[%s20353_s21 + $0xa58] sm:$0xff]  ;;  %v16132_v45 = vcombine.high %v7001_v55, %v7009_v56  ;;  %v16131_v62 = vcombine.low %v7001_v55, %v7009_v56 }
 0xae0   : > { %v16134_v49 = vcombine.high %v7002_v57, %v7010_v35  ;;  %v16133_v0 = vcombine.low %v7002_v57, %v7010_v35 }
 0xae1   : > { %10036 = vmatpush1.bf16.msra.mxu0 %v16035_v50  ;;  %v7017_v50 = vld [vmem:[%s20353_s21 + $0xa90] sm:$0xff] }
 0xae2   : > { %10122 = vmatpush1.bf16.msra.mxu1 %v16037_v60  ;;  %10037 = vmatprep.subr.bf16.mxu0 %v16052_v61  ;;  %v7025_v60 = vld [vmem:[%s20353_s21 + $0xad0] sm:$0xff]  ;;  %v7018_v61 = vld [vmem:[%s20353_s21 + $0xa98] sm:$0xff] }
 0xae3   : > { %10123 = vmatprep.subr.bf16.mxu1 %v16054_v14  ;;  %v7026_v14 = vld [vmem:[%s20353_s21 + $0xad8] sm:$0xff]  ;;  %v16148_v3 = vcombine.high %v7017_v50, %v7025_v60  ;;  %v16147_v15 = vcombine.low %v7017_v50, %v7025_v60 }
 0xae4   : > { %v16150_v5 = vcombine.high %v7018_v61, %v7026_v14  ;;  %v16149_v54 = vcombine.low %v7018_v61, %v7026_v14 }
 0xae5   : > { %10038 = vmatpush1.bf16.msra.mxu0 %v16051_v26  ;;  %v7033_v26 = vld [vmem:[%s20353_s21 + $0xb10] sm:$0xff] }
 0xae6   : > { %10124 = vmatpush1.bf16.msra.mxu1 %v16053_v8  ;;  %10050 = vmatprep.subr.bf16.mxu0 %v16068_v11  ;;  %v7041_v8 = vld [vmem:[%s20353_s21 + $0xb50] sm:$0xff]  ;;  %v7034_v11 = vld [vmem:[%s20353_s21 + $0xb18] sm:$0xff] }
 0xae7   : > { %10136 = vmatprep.subr.bf16.mxu1 %v16070_v13  ;;  %v7042_v13 = vld [vmem:[%s20353_s21 + $0xb58] sm:$0xff]  ;;  %v16163_v7 = vcombine.low %v7033_v26, %v7041_v8 }
 0xae8   : > { %10040 = vmatmul.mubr.bf16.vlgmr.msra.gmra.mrb[36].mxu0 %v21306_v23  ;;  %v16166_v20 = vcombine.high %v7034_v11, %v7042_v13 }
 0xae9   : > { %10126 = vmatmul.mubr.bf16.vlgmr.msra.gmra.mrb[36].mxu1 %v21306_v23  ;;  %10051 = vmatpush1.bf16.msra.mxu0 %v16067_v42  ;;  %v16164_v42 = vcombine.high %v7033_v26, %v7041_v8 }
 0xaea   : > { %10082 = vmatprep.mubr.bf16.mxu0 %v21320_v43  ;;  %10137 = vmatpush1.bf16.msra.mxu1 %v16069_v24  ;;  %v7057_v24 = vld [vmem:[%s20353_s21 + $0xbd0] sm:$0xff] }
 0xaeb   : > { %10168 = vmatprep.mubr.bf16.mxu1 %v21320_v43  ;;  %10052 = vmatprep.subr.bf16.mxu0 %v16084_v19  ;;  %v7050_v19 = vld [vmem:[%s20353_s21 + $0xb98] sm:$0xff]  ;;  %v16180_v18 = vcombine.high %v7049_v40, %v7057_v24  ;;  %v16179_v12 = vcombine.low %v7049_v40, %v7057_v24 }
 0xaec   : > { %10138 = vmatprep.subr.bf16.mxu1 %v16086_v17  ;;  %v16165_v17 = vcombine.low %v7034_v11, %v7042_v13  ;;  %v16182_v28 = vcombine.high %v7050_v19, %v7058_v53  ;;  %v16181_v1 = vcombine.low %v7050_v19, %v7058_v53 }
 0xaed   : > { %10053 = vmatpush1.bf16.msra.mxu0 %v16083_v29  ;;  %v7065_v29 = vld [vmem:[%s20353_s21 + $0xc10] sm:$0xff] }
 0xaee   : > { %10139 = vmatpush1.bf16.msra.mxu1 %v16085_v21  ;;  %10054 = vmatprep.subr.bf16.mxu0 %v16100_v58  ;;  %v7073_v21 = vld [vmem:[%s20353_s21 + $0xc50] sm:$0xff]  ;;  %v7066_v58 = vld [vmem:[%s20353_s21 + $0xc18] sm:$0xff] }
 0xaef   : > { %10140 = vmatprep.subr.bf16.mxu1 %v16102_v48  ;;  %v7074_v48 = vld [vmem:[%s20353_s21 + $0xc58] sm:$0xff]  ;;  %v16196_v33 = vcombine.high %v7065_v29, %v7073_v21  ;;  %v16195_v55 = vcombine.low %v7065_v29, %v7073_v21 }
 0xaf0   : > { %v16198_v51 = vcombine.high %v7066_v58, %v7074_v48  ;;  %v16197_v56 = vcombine.low %v7066_v58, %v7074_v48 }
 0xaf1   : > { %10055 = vmatpush1.bf16.msra.mxu0 %v16099_v36  ;;  %v7081_v36 = vld [vmem:[%s20353_s21 + $0xc90] sm:$0xff] }
 0xaf2   : > { %10141 = vmatpush1.bf16.msra.mxu1 %v16101_v52  ;;  %10056 = vmatprep.subr.bf16.mxu0 %v16116_v39  ;;  %v7089_v52 = vld [vmem:[%s20353_s21 + $0xcd0] sm:$0xff]  ;;  %v7082_v39 = vld [vmem:[%s20353_s21 + $0xc98] sm:$0xff] }
 0xaf3   : > { %10142 = vmatprep.subr.bf16.mxu1 %v16118_v41  ;;  %v7090_v41 = vld [vmem:[%s20353_s21 + $0xcd8] sm:$0xff]  ;;  %v16212_v57 = vcombine.high %v7081_v36, %v7089_v52  ;;  %v16211_v50 = vcombine.low %v7081_v36, %v7089_v52 }
 0xaf4   : > { %v16214_v35 = vcombine.high %v7082_v39, %v7090_v41  ;;  %v16213_v60 = vcombine.low %v7082_v39, %v7090_v41 }
 0xaf5   : > { %10057 = vmatpush1.bf16.msra.mxu0 %v16115_v44  ;;  %v7097_v44 = vld [vmem:[%s20353_s21 + $0xd10] sm:$0xff] }
 0xaf6   : > { %10143 = vmatpush1.bf16.msra.mxu1 %v16117_v37  ;;  %10058 = vmatprep.subr.bf16.mxu0 %v16132_v45  ;;  %v7105_v37 = vld [vmem:[%s20353_s21 + $0xd50] sm:$0xff]  ;;  %v7098_v45 = vld [vmem:[%s20353_s21 + $0xd18] sm:$0xff] }
 0xaf7   : > { %10144 = vmatprep.subr.bf16.mxu1 %v16134_v49  ;;  %v7106_v49 = vld [vmem:[%s20353_s21 + $0xd58] sm:$0xff]  ;;  %v16228_v61 = vcombine.high %v7097_v44, %v7105_v37  ;;  %v16227_v26 = vcombine.low %v7097_v44, %v7105_v37 }
 0xaf8   : > { %v16230_v14 = vcombine.high %v7098_v45, %v7106_v49  ;;  %v16229_v8 = vcombine.low %v7098_v45, %v7106_v49 }
 0xaf9   : > { %10059 = vmatpush1.bf16.msra.mxu0 %v16131_v62  ;;  %v7113_v62 = vld [vmem:[%s20353_s21 + $0xd90] sm:$0xff] }
 0xafa   : > { %10145 = vmatpush1.bf16.msra.mxu1 %v16133_v0  ;;  %10060 = vmatprep.subr.bf16.mxu0 %v16148_v3  ;;  %v7121_v0 = vld [vmem:[%s20353_s21 + $0xdd0] sm:$0xff]  ;;  %v7114_v3 = vld [vmem:[%s20353_s21 + $0xd98] sm:$0xff] }
 0xafb   : > { %10146 = vmatprep.subr.bf16.mxu1 %v16150_v5  ;;  %v7122_v5 = vld [vmem:[%s20353_s21 + $0xdd8] sm:$0xff]  ;;  %v16244_v11 = vcombine.high %v7113_v62, %v7121_v0  ;;  %v16243_v40 = vcombine.low %v7113_v62, %v7121_v0 }
 0xafc   : > { %v16246_v13 = vcombine.high %v7114_v3, %v7122_v5  ;;  %v16245_v24 = vcombine.low %v7114_v3, %v7122_v5 }
 0xafd   : > { %10061 = vmatpush1.bf16.msra.mxu0 %v16147_v15  ;;  %v7129_v15 = vld [vmem:[%s20353_s21 + $0xe10] sm:$0xff] }
 0xafe   : > { %10147 = vmatpush1.bf16.msra.mxu1 %v16149_v54  ;;  %10062 = vmatprep.subr.bf16.mxu0 %v16164_v42  ;;  %v7137_v54 = vld [vmem:[%s20353_s21 + $0xe50] sm:$0xff]  ;;  %v7130_v42 = vld [vmem:[%s20353_s21 + $0xe18] sm:$0xff] }
 0xaff   : > { %10148 = vmatprep.subr.bf16.mxu1 %v16166_v20  ;;  %v7138_v20 = vld [vmem:[%s20353_s21 + $0xe58] sm:$0xff]  ;;  %v16260_v19 = vcombine.high %v7129_v15, %v7137_v54  ;;  %v16259_v29 = vcombine.low %v7129_v15, %v7137_v54  ;;  %v6708_v15 = vld [vmem:[%s20353_s21 + $0xe8] sm:$0xff] }
 0xb00   : > { %v16262_v53 = vcombine.high %v7130_v42, %v7138_v20  ;;  %v16261_v21 = vcombine.low %v7130_v42, %v7138_v20  ;;  %v6715_v20 = vld [vmem:[%s20353_s21 + $0x120] sm:$0xff] }
 0xb01   : > { %10063 = vmatpush1.bf16.msra.mxu0 %v16163_v7  ;;  %v7145_v7 = vld [vmem:[%s20353_s21 + $0xe90] sm:$0xff] }
 0xb02   : > { %10149 = vmatpush1.bf16.msra.mxu1 %v16165_v17  ;;  %10064 = vmatprep.subr.bf16.mxu0 %v16180_v18  ;;  %v7153_v17 = vld [vmem:[%s20353_s21 + $0xed0] sm:$0xff]  ;;  %v7146_v18 = vld [vmem:[%s20353_s21 + $0xe98] sm:$0xff] }
 0xb03   : > { %10150 = vmatprep.subr.bf16.mxu1 %v16182_v28  ;;  %v7154_v28 = vld [vmem:[%s20353_s21 + $0xed8] sm:$0xff]  ;;  %v16276_v58 = vcombine.high %v7145_v7, %v7153_v17  ;;  %v16275_v36 = vcombine.low %v7145_v7, %v7153_v17 }
 0xb04   : > { %v16278_v48 = vcombine.high %v7146_v18, %v7154_v28  ;;  %v16277_v52 = vcombine.low %v7146_v18, %v7154_v28 }
 0xb05   : > { %10065 = vmatpush1.bf16.msra.mxu0 %v16179_v12  ;;  %v7161_v12 = vld [vmem:[%s20353_s21 + $0xf10] sm:$0xff] }
 0xb06   : > { %10151 = vmatpush1.bf16.msra.mxu1 %v16181_v1  ;;  %10066 = vmatprep.subr.bf16.mxu0 %v16196_v33  ;;  %v7169_v1 = vld [vmem:[%s20353_s21 + $0xf50] sm:$0xff]  ;;  %v7162_v33 = vld [vmem:[%s20353_s21 + $0xf18] sm:$0xff] }
 0xb07   : > { %10152 = vmatprep.subr.bf16.mxu1 %v16198_v51  ;;  %v7170_v51 = vld [vmem:[%s20353_s21 + $0xf58] sm:$0xff]  ;;  %v16292_v39 = vcombine.high %v7161_v12, %v7169_v1  ;;  %v16291_v44 = vcombine.low %v7161_v12, %v7169_v1 }
 0xb08   : > { %v16294_v41 = vcombine.high %v7162_v33, %v7170_v51  ;;  %v16293_v37 = vcombine.low %v7162_v33, %v7170_v51 }
 0xb09   : > { %10067 = vmatpush1.bf16.msra.mxu0 %v16195_v55  ;;  %v7177_v55 = vld [vmem:[%s20353_s21 + $0xf90] sm:$0xff] }
 0xb0a   : > { %10153 = vmatpush1.bf16.msra.mxu1 %v16197_v56  ;;  %10068 = vmatprep.subr.bf16.mxu0 %v16212_v57  ;;  %v7185_v56 = vld [vmem:[%s20353_s21 + $0xfd0] sm:$0xff]  ;;  %v7178_v57 = vld [vmem:[%s20353_s21 + $0xf98] sm:$0xff] }
 0xb0b   : > { %10154 = vmatprep.subr.bf16.mxu1 %v16214_v35  ;;  %v7186_v35 = vld [vmem:[%s20353_s21 + $0xfd8] sm:$0xff]  ;;  %v16308_v45 = vcombine.high %v7177_v55, %v7185_v56  ;;  %v16307_v62 = vcombine.low %v7177_v55, %v7185_v56 }
 0xb0c   : > { %v16310_v49 = vcombine.high %v7178_v57, %v7186_v35  ;;  %v16309_v0 = vcombine.low %v7178_v57, %v7186_v35 }
 0xb0d   : > { %10069 = vmatpush1.bf16.msra.mxu0 %v16211_v50  ;;  %v6683_v50 = vld [vmem:[%s20353_s21 + $0x20] sm:$0xff] }
 0xb0e   : > { %10155 = vmatpush1.bf16.msra.mxu1 %v16213_v60  ;;  %10070 = vmatprep.subr.bf16.mxu0 %v16228_v61  ;;  %v6691_v60 = vld [vmem:[%s20353_s21 + $0x60] sm:$0xff]  ;;  %v6684_v61 = vld [vmem:[%s20353_s21 + $0x28] sm:$0xff] }
 0xb0f   : > { %10156 = vmatprep.subr.bf16.mxu1 %v16230_v14  ;;  %v6692_v14 = vld [vmem:[%s20353_s21 + $0x68] sm:$0xff]  ;;  %v15816_v3 = vcombine.high %v6683_v50, %v6691_v60 }
 0xb10   : > { %v15818_v5 = vcombine.high %v6684_v61, %v6692_v14  ;;  %v15817_v54 = vcombine.low %v6684_v61, %v6692_v14 }
 0xb11   : > { %10071 = vmatpush1.bf16.msra.mxu0 %v16227_v26  ;;  %v6699_v26 = vld [vmem:[%s20353_s21 + $0xa0] sm:$0xff] }
 0xb12   : > { %10157 = vmatpush1.bf16.msra.mxu1 %v16229_v8  ;;  %10072 = vmatprep.subr.bf16.mxu0 %v16244_v11  ;;  %v6707_v8 = vld [vmem:[%s20353_s21 + $0xe0] sm:$0xff]  ;;  %v15815_v11 = vcombine.low %v6683_v50, %v6691_v60 }
 0xb13   : > { %10158 = vmatprep.subr.bf16.mxu1 %v16246_v13  ;;  %v6700_v13 = vld [vmem:[%s20353_s21 + $0xa8] sm:$0xff]  ;;  %v15832_v42 = vcombine.high %v6699_v26, %v6707_v8  ;;  %v15831_v7 = vcombine.low %v6699_v26, %v6707_v8 }
 0xb14   : > { %v15833_v17 = vcombine.low %v6700_v13, %v6708_v15 }
 0xb15   : > { %10073 = vmatpush1.bf16.msra.mxu0 %v16243_v40  ;;  %v6723_v40 = vld [vmem:[%s20353_s21 + $0x160] sm:$0xff] }
 0xb16   : > { %10159 = vmatpush1.bf16.msra.mxu1 %v16245_v24  ;;  %10074 = vmatprep.subr.bf16.mxu0 %v16260_v19  ;;  %v15834_v24 = vcombine.high %v6700_v13, %v6708_v15  ;;  %v6716_v19 = vld [vmem:[%s20353_s21 + $0x128] sm:$0xff]  ;;  %v15848_v18 = vcombine.high %v6715_v20, %v6723_v40  ;;  %v15847_v12 = vcombine.low %v6715_v20, %v6723_v40  ;;  %v6795_v15 = vld [vmem:[%s20353_s21 + $0x3a0] sm:$0xff] }
 0xb17   : > { %10160 = vmatprep.subr.bf16.mxu1 %v16262_v53  ;;  %v6724_v53 = vld [vmem:[%s20353_s21 + $0x168] sm:$0xff] }
 0xb18   : > { %v15850_v28 = vcombine.high %v6716_v19, %v6724_v53  ;;  %v15849_v1 = vcombine.low %v6716_v19, %v6724_v53  ;;  %v6804_v20 = vld [vmem:[%s20353_s21 + $0x3e8] sm:$0xff] }
 0xb19   : > { %10075 = vmatpush1.bf16.msra.mxu0 %v16259_v29  ;;  %v6731_v29 = vld [vmem:[%s20353_s21 + $0x1a0] sm:$0xff] }
 0xb1a   : > { %10161 = vmatpush1.bf16.msra.mxu1 %v16261_v21  ;;  %10076 = vmatprep.subr.bf16.mxu0 %v16276_v58  ;;  %v6739_v21 = vld [vmem:[%s20353_s21 + $0x1e0] sm:$0xff]  ;;  %v6732_v58 = vld [vmem:[%s20353_s21 + $0x1a8] sm:$0xff] }
 0xb1b   : > { %10162 = vmatprep.subr.bf16.mxu1 %v16278_v48  ;;  %v6740_v48 = vld [vmem:[%s20353_s21 + $0x1e8] sm:$0xff]  ;;  %v15864_v33 = vcombine.high %v6731_v29, %v6739_v21  ;;  %v15863_v55 = vcombine.low %v6731_v29, %v6739_v21 }
 0xb1c   : > { %v15866_v51 = vcombine.high %v6732_v58, %v6740_v48  ;;  %v15865_v56 = vcombine.low %v6732_v58, %v6740_v48 }
 0xb1d   : > { %10077 = vmatpush1.bf16.msra.mxu0 %v16275_v36  ;;  %v6747_v36 = vld [vmem:[%s20353_s21 + $0x220] sm:$0xff] }
 0xb1e   : > { %10163 = vmatpush1.bf16.msra.mxu1 %v16277_v52  ;;  %10078 = vmatprep.subr.bf16.mxu0 %v16292_v39  ;;  %v6755_v52 = vld [vmem:[%s20353_s21 + $0x260] sm:$0xff]  ;;  %v6748_v39 = vld [vmem:[%s20353_s21 + $0x228] sm:$0xff] }
 0xb1f   : > { %10164 = vmatprep.subr.bf16.mxu1 %v16294_v41  ;;  %v6756_v41 = vld [vmem:[%s20353_s21 + $0x268] sm:$0xff]  ;;  %v15880_v57 = vcombine.high %v6747_v36, %v6755_v52  ;;  %v15879_v50 = vcombine.low %v6747_v36, %v6755_v52 }
 0xb20   : > { %v15882_v35 = vcombine.high %v6748_v39, %v6756_v41  ;;  %v15881_v60 = vcombine.low %v6748_v39, %v6756_v41 }
 0xb21   : > { %10079 = vmatpush1.bf16.msra.mxu0 %v16291_v44  ;;  %v6763_v44 = vld [vmem:[%s20353_s21 + $0x2a0] sm:$0xff] }
 0xb22   : > { %10165 = vmatpush1.bf16.msra.mxu1 %v16293_v37  ;;  %10080 = vmatprep.subr.bf16.mxu0 %v16308_v45  ;;  %v6771_v37 = vld [vmem:[%s20353_s21 + $0x2e0] sm:$0xff]  ;;  %v6764_v45 = vld [vmem:[%s20353_s21 + $0x2a8] sm:$0xff] }
 0xb23   : > { %10166 = vmatprep.subr.bf16.mxu1 %v16310_v49  ;;  %v6772_v49 = vld [vmem:[%s20353_s21 + $0x2e8] sm:$0xff]  ;;  %v15896_v61 = vcombine.high %v6763_v44, %v6771_v37  ;;  %v15895_v26 = vcombine.low %v6763_v44, %v6771_v37 }
 0xb24   : > { %v15898_v14 = vcombine.high %v6764_v45, %v6772_v49  ;;  %v15897_v8 = vcombine.low %v6764_v45, %v6772_v49 }
 0xb25   : > { %10081 = vmatpush1.bf16.msra.mxu0 %v16307_v62  ;;  %v6779_v62 = vld [vmem:[%s20353_s21 + $0x320] sm:$0xff] }
 0xb26   : > { %10167 = vmatpush1.bf16.msra.mxu1 %v16309_v0  ;;  %10179 = vmatprep.subr.bf16.mxu0 %v15816_v3  ;;  %v6787_v0 = vld [vmem:[%s20353_s21 + $0x360] sm:$0xff]  ;;  %v6780_v3 = vld [vmem:[%s20353_s21 + $0x328] sm:$0xff] }
 0xb27   : > { %10265 = vmatprep.subr.bf16.mxu1 %v15818_v5  ;;  %v6788_v5 = vld [vmem:[%s20353_s21 + $0x368] sm:$0xff]  ;;  %v15911_v40 = vcombine.low %v6779_v62, %v6787_v0 }
 0xb28   : > { %10083 = vmatmul.mubr.bf16.vlgmr.msra.gmra.mrb[36].mxu0 %v21392_v47  ;;  %v15914_v13 = vcombine.high %v6780_v3, %v6788_v5 }
 0xb29   : > { %10169 = vmatmul.mubr.bf16.vlgmr.msra.gmra.mrb[36].mxu1 %v21392_v47  ;;  %10180 = vmatpush1.bf16.msra.mxu0 %v15815_v11  ;;  %v15912_v11 = vcombine.high %v6779_v62, %v6787_v0 }
 0xb2a   : > { %10211 = vmatprep.mubr.bf16.mxu0 %v21302_v31  ;;  %10266 = vmatpush1.bf16.msra.mxu1 %v15817_v54  ;;  %v6803_v54 = vld [vmem:[%s20353_s21 + $0x3e0] sm:$0xff] }
 0xb2b   : > { %10297 = vmatprep.mubr.bf16.mxu1 %v21302_v31  ;;  %10181 = vmatprep.subr.bf16.mxu0 %v15832_v42  ;;  %v6796_v42 = vld [vmem:[%s20353_s21 + $0x3a8] sm:$0xff]  ;;  %v15928_v19 = vcombine.high %v6795_v15, %v6803_v54  ;;  %v15927_v29 = vcombine.low %v6795_v15, %v6803_v54 }
 0xb2c   : > { %10267 = vmatprep.subr.bf16.mxu1 %v15834_v24  ;;  %v15913_v24 = vcombine.low %v6780_v3, %v6788_v5  ;;  %v15930_v53 = vcombine.high %v6796_v42, %v6804_v20  ;;  %v15929_v21 = vcombine.low %v6796_v42, %v6804_v20 }
 0xb2d   : > { %10182 = vmatpush1.bf16.msra.mxu0 %v15831_v7  ;;  %v6811_v7 = vld [vmem:[%s20353_s21 + $0x420] sm:$0xff] }
 0xb2e   : > { %10268 = vmatpush1.bf16.msra.mxu1 %v15833_v17  ;;  %10183 = vmatprep.subr.bf16.mxu0 %v15848_v18  ;;  %v6819_v17 = vld [vmem:[%s20353_s21 + $0x460] sm:$0xff]  ;;  %v6812_v18 = vld [vmem:[%s20353_s21 + $0x428] sm:$0xff] }
 0xb2f   : > { %10269 = vmatprep.subr.bf16.mxu1 %v15850_v28  ;;  %v6820_v28 = vld [vmem:[%s20353_s21 + $0x468] sm:$0xff]  ;;  %v15944_v58 = vcombine.high %v6811_v7, %v6819_v17  ;;  %v15943_v36 = vcombine.low %v6811_v7, %v6819_v17 }
 0xb30   : > { %v15946_v48 = vcombine.high %v6812_v18, %v6820_v28  ;;  %v15945_v52 = vcombine.low %v6812_v18, %v6820_v28 }
 0xb31   : > { %10184 = vmatpush1.bf16.msra.mxu0 %v15847_v12  ;;  %v6827_v12 = vld [vmem:[%s20353_s21 + $0x4a0] sm:$0xff] }
 0xb32   : > { %10270 = vmatpush1.bf16.msra.mxu1 %v15849_v1  ;;  %10185 = vmatprep.subr.bf16.mxu0 %v15864_v33  ;;  %v6835_v1 = vld [vmem:[%s20353_s21 + $0x4e0] sm:$0xff]  ;;  %v6828_v33 = vld [vmem:[%s20353_s21 + $0x4a8] sm:$0xff] }
 0xb33   : > { %10271 = vmatprep.subr.bf16.mxu1 %v15866_v51  ;;  %v6836_v51 = vld [vmem:[%s20353_s21 + $0x4e8] sm:$0xff]  ;;  %v15960_v39 = vcombine.high %v6827_v12, %v6835_v1  ;;  %v15959_v44 = vcombine.low %v6827_v12, %v6835_v1 }
 0xb34   : > { %v15962_v41 = vcombine.high %v6828_v33, %v6836_v51  ;;  %v15961_v37 = vcombine.low %v6828_v33, %v6836_v51 }
 0xb35   : > { %10186 = vmatpush1.bf16.msra.mxu0 %v15863_v55  ;;  %v6843_v55 = vld [vmem:[%s20353_s21 + $0x520] sm:$0xff] }
 0xb36   : > { %10272 = vmatpush1.bf16.msra.mxu1 %v15865_v56  ;;  %10187 = vmatprep.subr.bf16.mxu0 %v15880_v57  ;;  %v6851_v56 = vld [vmem:[%s20353_s21 + $0x560] sm:$0xff]  ;;  %v6844_v57 = vld [vmem:[%s20353_s21 + $0x528] sm:$0xff] }
 0xb37   : > { %10273 = vmatprep.subr.bf16.mxu1 %v15882_v35  ;;  %v6852_v35 = vld [vmem:[%s20353_s21 + $0x568] sm:$0xff]  ;;  %v15976_v45 = vcombine.high %v6843_v55, %v6851_v56  ;;  %v15975_v62 = vcombine.low %v6843_v55, %v6851_v56 }
 0xb38   : > { %v15978_v49 = vcombine.high %v6844_v57, %v6852_v35  ;;  %v15977_v0 = vcombine.low %v6844_v57, %v6852_v35 }
 0xb39   : > { %10188 = vmatpush1.bf16.msra.mxu0 %v15879_v50  ;;  %v6859_v50 = vld [vmem:[%s20353_s21 + $0x5a0] sm:$0xff] }
 0xb3a   : > { %10274 = vmatpush1.bf16.msra.mxu1 %v15881_v60  ;;  %10189 = vmatprep.subr.bf16.mxu0 %v15896_v61  ;;  %v6867_v60 = vld [vmem:[%s20353_s21 + $0x5e0] sm:$0xff]  ;;  %v6860_v61 = vld [vmem:[%s20353_s21 + $0x5a8] sm:$0xff] }
 0xb3b   : > { %10275 = vmatprep.subr.bf16.mxu1 %v15898_v14  ;;  %v6868_v14 = vld [vmem:[%s20353_s21 + $0x5e8] sm:$0xff]  ;;  %v15992_v3 = vcombine.high %v6859_v50, %v6867_v60  ;;  %v15991_v15 = vcombine.low %v6859_v50, %v6867_v60 }
 0xb3c   : > { %v15994_v5 = vcombine.high %v6860_v61, %v6868_v14  ;;  %v15993_v54 = vcombine.low %v6860_v61, %v6868_v14 }
 0xb3d   : > { %10190 = vmatpush1.bf16.msra.mxu0 %v15895_v26  ;;  %v6875_v26 = vld [vmem:[%s20353_s21 + $0x620] sm:$0xff] }
 0xb3e   : > { %10276 = vmatpush1.bf16.msra.mxu1 %v15897_v8  ;;  %10191 = vmatprep.subr.bf16.mxu0 %v15912_v11  ;;  %v6883_v8 = vld [vmem:[%s20353_s21 + $0x660] sm:$0xff]  ;;  %v6876_v11 = vld [vmem:[%s20353_s21 + $0x628] sm:$0xff] }
 0xb3f   : > { %10277 = vmatprep.subr.bf16.mxu1 %v15914_v13  ;;  %v6884_v13 = vld [vmem:[%s20353_s21 + $0x668] sm:$0xff]  ;;  %v16008_v42 = vcombine.high %v6875_v26, %v6883_v8  ;;  %v16007_v7 = vcombine.low %v6875_v26, %v6883_v8 }
 0xb40   : > { %v16010_v20 = vcombine.high %v6876_v11, %v6884_v13  ;;  %v16009_v17 = vcombine.low %v6876_v11, %v6884_v13  ;;  %v6964_v26 = vld [vmem:[%s20353_s21 + $0x8e8] sm:$0xff]  ;;  %v6971_v13 = vld [vmem:[%s20353_s21 + $0x920] sm:$0xff] }
 0xb41   : > { %10192 = vmatpush1.bf16.msra.mxu0 %v15911_v40  ;;  %v6891_v40 = vld [vmem:[%s20353_s21 + $0x6a0] sm:$0xff] }
 0xb42   : > { %10278 = vmatpush1.bf16.msra.mxu1 %v15913_v24  ;;  %10193 = vmatprep.subr.bf16.mxu0 %v15928_v19  ;;  %v6899_v24 = vld [vmem:[%s20353_s21 + $0x6e0] sm:$0xff]  ;;  %v6892_v19 = vld [vmem:[%s20353_s21 + $0x6a8] sm:$0xff] }
 0xb43   : > { %10279 = vmatprep.subr.bf16.mxu1 %v15930_v53  ;;  %v6900_v53 = vld [vmem:[%s20353_s21 + $0x6e8] sm:$0xff]  ;;  %v16024_v18 = vcombine.high %v6891_v40, %v6899_v24  ;;  %v16023_v12 = vcombine.low %v6891_v40, %v6899_v24 }
 0xb44   : > { %v16026_v28 = vcombine.high %v6892_v19, %v6900_v53  ;;  %v16025_v1 = vcombine.low %v6892_v19, %v6900_v53 }
 0xb45   : > { %10194 = vmatpush1.bf16.msra.mxu0 %v15927_v29  ;;  %v6907_v29 = vld [vmem:[%s20353_s21 + $0x720] sm:$0xff] }
 0xb46   : > { %10280 = vmatpush1.bf16.msra.mxu1 %v15929_v21  ;;  %10195 = vmatprep.subr.bf16.mxu0 %v15944_v58  ;;  %v6915_v21 = vld [vmem:[%s20353_s21 + $0x760] sm:$0xff]  ;;  %v6908_v58 = vld [vmem:[%s20353_s21 + $0x728] sm:$0xff] }
 0xb47   : > { %10281 = vmatprep.subr.bf16.mxu1 %v15946_v48  ;;  %v6916_v48 = vld [vmem:[%s20353_s21 + $0x768] sm:$0xff]  ;;  %v16040_v33 = vcombine.high %v6907_v29, %v6915_v21  ;;  %v16039_v55 = vcombine.low %v6907_v29, %v6915_v21 }
 0xb48   : > { %v16042_v51 = vcombine.high %v6908_v58, %v6916_v48  ;;  %v16041_v56 = vcombine.low %v6908_v58, %v6916_v48 }
 0xb49   : > { %10196 = vmatpush1.bf16.msra.mxu0 %v15943_v36  ;;  %v6923_v36 = vld [vmem:[%s20353_s21 + $0x7a0] sm:$0xff] }
 0xb4a   : > { %10282 = vmatpush1.bf16.msra.mxu1 %v15945_v52  ;;  %10197 = vmatprep.subr.bf16.mxu0 %v15960_v39  ;;  %v6931_v52 = vld [vmem:[%s20353_s21 + $0x7e0] sm:$0xff]  ;;  %v6924_v39 = vld [vmem:[%s20353_s21 + $0x7a8] sm:$0xff] }
 0xb4b   : > { %10283 = vmatprep.subr.bf16.mxu1 %v15962_v41  ;;  %v6932_v41 = vld [vmem:[%s20353_s21 + $0x7e8] sm:$0xff]  ;;  %v16056_v57 = vcombine.high %v6923_v36, %v6931_v52  ;;  %v16055_v50 = vcombine.low %v6923_v36, %v6931_v52 }
 0xb4c   : > { %v16058_v35 = vcombine.high %v6924_v39, %v6932_v41  ;;  %v16057_v60 = vcombine.low %v6924_v39, %v6932_v41 }
 0xb4d   : > { %10198 = vmatpush1.bf16.msra.mxu0 %v15959_v44  ;;  %v6939_v44 = vld [vmem:[%s20353_s21 + $0x820] sm:$0xff] }
 0xb4e   : > { %10284 = vmatpush1.bf16.msra.mxu1 %v15961_v37  ;;  %10199 = vmatprep.subr.bf16.mxu0 %v15976_v45  ;;  %v6947_v37 = vld [vmem:[%s20353_s21 + $0x860] sm:$0xff]  ;;  %v6940_v45 = vld [vmem:[%s20353_s21 + $0x828] sm:$0xff] }
 0xb4f   : > { %10285 = vmatprep.subr.bf16.mxu1 %v15978_v49  ;;  %v6948_v49 = vld [vmem:[%s20353_s21 + $0x868] sm:$0xff]  ;;  %v16072_v61 = vcombine.high %v6939_v44, %v6947_v37 }
 0xb50   : > { %v16074_v14 = vcombine.high %v6940_v45, %v6948_v49  ;;  %v16073_v8 = vcombine.low %v6940_v45, %v6948_v49 }
 0xb51   : > { %10200 = vmatpush1.bf16.msra.mxu0 %v15975_v62  ;;  %v6955_v62 = vld [vmem:[%s20353_s21 + $0x8a0] sm:$0xff] }
 0xb52   : > { %10286 = vmatpush1.bf16.msra.mxu1 %v15977_v0  ;;  %10201 = vmatprep.subr.bf16.mxu0 %v15992_v3  ;;  %v6963_v0 = vld [vmem:[%s20353_s21 + $0x8e0] sm:$0xff]  ;;  %v16071_v3 = vcombine.low %v6939_v44, %v6947_v37 }
 0xb53   : > { %10287 = vmatprep.subr.bf16.mxu1 %v15994_v5  ;;  %v6956_v5 = vld [vmem:[%s20353_s21 + $0x8a8] sm:$0xff]  ;;  %v16088_v11 = vcombine.high %v6955_v62, %v6963_v0  ;;  %v16087_v40 = vcombine.low %v6955_v62, %v6963_v0  ;;  %v21619_v37 = vld [vmem:[%s20355_s26] sm:$0xff] }
 0xb54   : > { %v16089_v24 = vcombine.low %v6956_v5, %v6964_v26  ;;  %v7206_v62 = vrot.slane %v21619_v37, %v20818_v25  ;;  %v7036_v0 = vld [vmem:[%s20353_s21 + $0xb28] sm:$0xff] }
 0xb55   : > { %10202 = vmatpush1.bf16.msra.mxu0 %v15991_v15  ;;  %v6979_v15 = vld [vmem:[%s20353_s21 + $0x960] sm:$0xff] }
 0xb56   : > { %10288 = vmatpush1.bf16.msra.mxu1 %v15993_v54  ;;  %10203 = vmatprep.subr.bf16.mxu0 %v16008_v42  ;;  %v16090_v54 = vcombine.high %v6956_v5, %v6964_v26  ;;  %v6972_v42 = vld [vmem:[%s20353_s21 + $0x928] sm:$0xff]  ;;  %v16104_v19 = vcombine.high %v6971_v13, %v6979_v15  ;;  %v16103_v29 = vcombine.low %v6971_v13, %v6979_v15  ;;  %v7051_v15 = vld [vmem:[%s20353_s21 + $0xba0] sm:$0xff] }
 0xb57   : > { %10289 = vmatprep.subr.bf16.mxu1 %v16010_v20  ;;  %v6980_v20 = vld [vmem:[%s20353_s21 + $0x968] sm:$0xff]  ;;  %v7202_v5 = vrot.slane %v21619_v37, %v20810_v10  ;;  %v7210_v26 = vrot.slane %v21619_v37, %v20831_v38 }
 0xb58   : > { %v16106_v53 = vcombine.high %v6972_v42, %v6980_v20  ;;  %v16105_v21 = vcombine.low %v6972_v42, %v6980_v20 }
 0xb59   : > { %10204 = vmatpush1.bf16.msra.mxu0 %v16007_v7  ;;  %v6987_v7 = vld [vmem:[%s20353_s21 + $0x9a0] sm:$0xff] }
 0xb5a   : > { %10290 = vmatpush1.bf16.msra.mxu1 %v16009_v17  ;;  %10205 = vmatprep.subr.bf16.mxu0 %v16024_v18  ;;  %v6995_v17 = vld [vmem:[%s20353_s21 + $0x9e0] sm:$0xff]  ;;  %v6988_v18 = vld [vmem:[%s20353_s21 + $0x9a8] sm:$0xff] }
 0xb5b   : > { %10291 = vmatprep.subr.bf16.mxu1 %v16026_v28  ;;  %v6996_v28 = vld [vmem:[%s20353_s21 + $0x9e8] sm:$0xff]  ;;  %v16120_v58 = vcombine.high %v6987_v7, %v6995_v17  ;;  %v16119_v36 = vcombine.low %v6987_v7, %v6995_v17 }
 0xb5c   : > { %v16122_v48 = vcombine.high %v6988_v18, %v6996_v28  ;;  %v16121_v52 = vcombine.low %v6988_v18, %v6996_v28  ;;  %v7052_v18 = vld [vmem:[%s20353_s21 + $0xba8] sm:$0xff] }
 0xb5d   : > { %10206 = vmatpush1.bf16.msra.mxu0 %v16023_v12  ;;  %v7003_v12 = vld [vmem:[%s20353_s21 + $0xa20] sm:$0xff]  ;;  %v7060_v28 = vld [vmem:[%s20353_s21 + $0xbe8] sm:$0xff] }
 0xb5e   : > { %10292 = vmatpush1.bf16.msra.mxu1 %v16025_v1  ;;  %10207 = vmatprep.subr.bf16.mxu0 %v16040_v33  ;;  %v7011_v1 = vld [vmem:[%s20353_s21 + $0xa60] sm:$0xff]  ;;  %v7004_v33 = vld [vmem:[%s20353_s21 + $0xa28] sm:$0xff] }
 0xb5f   : > { %10293 = vmatprep.subr.bf16.mxu1 %v16042_v51  ;;  %v7012_v51 = vld [vmem:[%s20353_s21 + $0xa68] sm:$0xff]  ;;  %v16136_v39 = vcombine.high %v7003_v12, %v7011_v1  ;;  %v16135_v44 = vcombine.low %v7003_v12, %v7011_v1 }
 0xb60   : > { %v16138_v41 = vcombine.high %v7004_v33, %v7012_v51  ;;  %v16137_v45 = vcombine.low %v7004_v33, %v7012_v51 }
 0xb61   : > { %10208 = vmatpush1.bf16.msra.mxu0 %v16039_v55  ;;  %v7019_v55 = vld [vmem:[%s20353_s21 + $0xaa0] sm:$0xff] }
 0xb62   : > { %10294 = vmatpush1.bf16.msra.mxu1 %v16041_v56  ;;  %10209 = vmatprep.subr.bf16.mxu0 %v16056_v57  ;;  %v7027_v56 = vld [vmem:[%s20353_s21 + $0xae0] sm:$0xff]  ;;  %v7020_v57 = vld [vmem:[%s20353_s21 + $0xaa8] sm:$0xff] }
 0xb63   : > { %10295 = vmatprep.subr.bf16.mxu1 %v16058_v35  ;;  %v7028_v35 = vld [vmem:[%s20353_s21 + $0xae8] sm:$0xff]  ;;  %v16152_v49 = vcombine.high %v7019_v55, %v7027_v56 }
 0xb65   : > { %10210 = vmatpush1.bf16.msra.mxu0 %v16055_v50  ;;  %v16154_v50 = vcombine.high %v7020_v57, %v7028_v35 }
 0xb66   : > { %10296 = vmatpush1.bf16.msra.mxu1 %v16057_v60  ;;  %10222 = vmatprep.subr.bf16.mxu0 %v16072_v61  ;;  %v7035_v60 = vld [vmem:[%s20353_s21 + $0xb20] sm:$0xff] }
 0xb67   : > { %10308 = vmatprep.subr.bf16.mxu1 %v16074_v14  ;;  %v7043_v61 = vld [vmem:[%s20353_s21 + $0xb60] sm:$0xff]  ;;  %v7198_v14 = vrot.slane %v21619_v37, %v20802_v4 }
 0xb68   : > { %10212 = vmatmul.mubr.bf16.vlgmr.msra.gmra.mrb[40].mxu0 %v21306_v23  ;;  %v16168_v13 = vcombine.high %v7035_v60, %v7043_v61  ;;  %v16167_v17 = vcombine.low %v7035_v60, %v7043_v61  ;;  %v7068_v61 = vld [vmem:[%s20353_s21 + $0xc28] sm:$0xff] }
 0xb69   : > { %10298 = vmatmul.mubr.bf16.vlgmr.msra.gmra.mrb[40].mxu1 %v21306_v23  ;;  %10223 = vmatpush1.bf16.msra.mxu0 %v16071_v3  ;;  %v7044_v3 = vld [vmem:[%s20353_s21 + $0xb68] sm:$0xff] }
 0xb6a   : > { %10254 = vmatprep.mubr.bf16.mxu0 %v21320_v43  ;;  %10309 = vmatpush1.bf16.msra.mxu1 %v16073_v8  ;;  %v16151_v8 = vcombine.low %v7019_v55, %v7027_v56  ;;  %v16169_v12 = vcombine.low %v7036_v0, %v7044_v3  ;;  %v16185_v56 = vcombine.low %v7052_v18, %v7060_v28 }
 0xb6b   : > { %10340 = vmatprep.mubr.bf16.mxu1 %v21320_v43  ;;  %10224 = vmatprep.subr.bf16.mxu0 %v16088_v11  ;;  %v16153_v11 = vcombine.low %v7020_v57, %v7028_v35  ;;  %v16186_v57 = vcombine.high %v7052_v18, %v7060_v28  ;;  %v7067_v35 = vld [vmem:[%s20353_s21 + $0xc20] sm:$0xff] }
 0xb6c   : > { %10310 = vmatprep.subr.bf16.mxu1 %v16090_v54  ;;  %v7059_v54 = vld [vmem:[%s20353_s21 + $0xbe0] sm:$0xff] }
 0xb6d   : > { %10225 = vmatpush1.bf16.msra.mxu0 %v16087_v40  ;;  %v16170_v40 = vcombine.high %v7036_v0, %v7044_v3  ;;  %v16183_v1 = vcombine.low %v7051_v15, %v7059_v54  ;;  %v7099_v18 = vld [vmem:[%s20353_s21 + $0xd20] sm:$0xff] }
 0xb6e   : > { %10311 = vmatpush1.bf16.msra.mxu1 %v16089_v24  ;;  %10226 = vmatprep.subr.bf16.mxu0 %v16104_v19  ;;  %v7107_v28 = vld [vmem:[%s20353_s21 + $0xd60] sm:$0xff] }
 0xb6f   : > { %10312 = vmatprep.subr.bf16.mxu1 %v16106_v53 }
 0xb71   : > { %10227 = vmatpush1.bf16.msra.mxu0 %v16103_v29 }
 0xb72   : > { %10313 = vmatpush1.bf16.msra.mxu1 %v16105_v21  ;;  %10228 = vmatprep.subr.bf16.mxu0 %v16120_v58 }
 0xb73   : > { %10314 = vmatprep.subr.bf16.mxu1 %v16122_v48 }
 0xb75   : > { %10229 = vmatpush1.bf16.msra.mxu0 %v16119_v36 }
 0xb76   : > { %10315 = vmatpush1.bf16.msra.mxu1 %v16121_v52  ;;  %10230 = vmatprep.subr.bf16.mxu0 %v16136_v39  ;;  %v16184_v39 = vcombine.high %v7051_v15, %v7059_v54 }
 0xb77   : > { %10316 = vmatprep.subr.bf16.mxu1 %v16138_v41 }
 0xb79   : > { %10231 = vmatpush1.bf16.msra.mxu0 %v16135_v44  ;;  %v7075_v44 = vld [vmem:[%s20353_s21 + $0xc60] sm:$0xff] }
 0xb7a   : > { %10317 = vmatpush1.bf16.msra.mxu1 %v16137_v45  ;;  %10232 = vmatprep.subr.bf16.mxu0 %v16152_v49 }
 0xb7b   : > { %v9912_v42 = vpop.f32.mrb[32].mxu0  ;;  %v9998_v20 = vpop.f32.mrb[32].mxu1  ;;  %10318 = vmatprep.subr.bf16.mxu1 %v16154_v50 }
 0xb7c   : > { %v17066_v24 = vadd.f32 %v9912_v42, %v7198_v14  ;;  %v17070_v19 = vadd.f32 %v9998_v20, %v7206_v62  ;;  %v9914_v53 = vpop.f32.mrb[33].mxu0  ;;  %v10000_v7 = vpop.f32.mrb[33].mxu1  ;;  %v7083_v42 = vld [vmem:[%s20353_s21 + $0xca0] sm:$0xff] }
 0xb7d   : > { %v17067_v29 = vadd.f32 %v9914_v53, %v7202_v5  ;;  %v17071_v21 = vadd.f32 %v10000_v7, %v7210_v26  ;;  %v9916_v58 = vpop.f32.mrb[34].mxu0  ;;  %v10002_v48 = vpop.f32.mrb[34].mxu1  ;;  %10233 = vmatpush1.bf16.msra.mxu0 %v16151_v8  ;;  %v7091_v20 = vld [vmem:[%s20353_s21 + $0xce0] sm:$0xff] }
 0xb7e   : > { %v17068_v33 = vadd.f32 %v9916_v58, %v7198_v14  ;;  %v17072_v51 = vadd.f32 %v10002_v48, %v7206_v62  ;;  %10319 = vmatpush1.bf16.msra.mxu1 %v16153_v11  ;;  %v9918_v36 = vpop.f32.mrb[35].mxu0  ;;  %v10004_v52 = vpop.f32.mrb[35].mxu1  ;;  %10234 = vmatprep.subr.bf16.mxu0 %v16168_v13  ;;  %v10523_v45 = vmax.f32 %v17066_v24, 0.0  ;;  %v10525_v49 = vmax.f32 %v17070_v19, 0.0  ;;  %v7076_v14 = vld [vmem:[%s20353_s21 + $0xc68] sm:$0xff] }
 0xb7f   : > { %v17069_v41 = vadd.f32 %v9918_v36, %v7202_v5  ;;  %v17073_v55 = vadd.f32 %v10004_v52, %v7210_v26  ;;  %10320 = vmatprep.subr.bf16.mxu1 %v16170_v40  ;;  %v10524_v62 = vmax.f32 %v17067_v29, 0.0  ;;  %v10526_v0 = vmax.f32 %v17071_v21, 0.0  ;;  %v7084_v40 = vld [vmem:[%s20353_s21 + $0xca8] sm:$0xff] }
 0xb80   : > { %v10539_v50 = vmax.f32 %v17068_v33, 0.0  ;;  %v10541_v60 = vmax.f32 %v17072_v51, 0.0  ;;  %v16200_v11 = vcombine.high %v7067_v35, %v7075_v44  ;;  %v16202_v54 = vcombine.high %v7068_v61, %v7076_v14  ;;  %v7092_v24 = vld [vmem:[%s20353_s21 + $0xce8] sm:$0xff]  ;;  %v7115_v33 = vld [vmem:[%s20353_s21 + $0xda0] sm:$0xff] }
 0xb81   : > { %v10540_v3 = vmax.f32 %v17069_v41, 0.0  ;;  %v10542_v5 = vmax.f32 %v17073_v55, 0.0  ;;  %10235 = vmatpush1.bf16.msra.mxu0 %v16167_v17  ;;  %v16199_v19 = vcombine.low %v7067_v35, %v7075_v44  ;;  %v16201_v53 = vcombine.low %v7068_v61, %v7076_v14  ;;  %v7100_v29 = vld [vmem:[%s20353_s21 + $0xd28] sm:$0xff]  ;;  %v7123_v51 = vld [vmem:[%s20353_s21 + $0xde0] sm:$0xff] }
 0xb82   : > { %v21641_v26 = vpack.c.bf16 %v10539_v50, %v10523_v45  ;;  %v21643_v8 = vpack.c.bf16 %v10541_v60, %v10525_v49  ;;  %10321 = vmatpush1.bf16.msra.mxu1 %v16169_v12  ;;  %10236 = vmatprep.subr.bf16.mxu0 %v16184_v39  ;;  %v16216_v7 = vcombine.high %v7083_v42, %v7091_v20  ;;  %v7108_v21 = vld [vmem:[%s20353_s21 + $0xd68] sm:$0xff]  ;;  %v7139_v35 = vld [vmem:[%s20353_s21 + $0xe60] sm:$0xff] }
 0xb83   : > { %v21645_v13 = vpack.c.bf16 %v10540_v3, %v10524_v62  ;;  %v21647_v15 = vpack.c.bf16 %v10542_v5, %v10526_v0  ;;  %10322 = vmatprep.subr.bf16.mxu1 %v16186_v57  ;;  %v16218_v17 = vcombine.high %v7084_v40, %v7092_v24  ;;  %v16215_v58 = vcombine.low %v7083_v42, %v7091_v20  ;;  %v7116_v36 = vld [vmem:[%s20353_s21 + $0xda8] sm:$0xff]  ;;  %v7131_v57 = vld [vmem:[%s20353_s21 + $0xe20] sm:$0xff] }
 0xb84   : > { %v16217_v48 = vcombine.low %v7084_v40, %v7092_v24  ;;  %v16232_v12 = vcombine.high %v7099_v18, %v7107_v28  ;;  %v7124_v52 = vld [vmem:[%s20353_s21 + $0xde8] sm:$0xff]  ;;  %v16231_v39 = vcombine.low %v7099_v18, %v7107_v28  ;;  %v16233_v41 = vcombine.low %v7100_v29, %v7108_v21  ;;  %v7147_v14 = vld [vmem:[%s20353_s21 + $0xea0] sm:$0xff] }
 0xb85   : > { %10237 = vmatpush1.bf16.msra.mxu0 %v16183_v1  ;;  %v16234_v1 = vcombine.high %v7100_v29, %v7108_v21  ;;  %v16248_v55 = vcombine.high %v7115_v33, %v7123_v51  ;;  %v7132_v44 = vld [vmem:[%s20353_s21 + $0xe28] sm:$0xff]  ;;  %v16247_v49 = vcombine.low %v7115_v33, %v7123_v51  ;;  %v16249_v50 = vcombine.low %v7116_v36, %v7124_v52  ;;  %v7155_v62 = vld [vmem:[%s20353_s21 + $0xee0] sm:$0xff]  ;;  %v6685_v51 = vld [vmem:[%s20353_s21 + $0x30] sm:$0xff] }
 0xb86   : > { %10323 = vmatpush1.bf16.msra.mxu1 %v16185_v56  ;;  %10238 = vmatprep.subr.bf16.mxu0 %v16200_v11  ;;  %v16250_v56 = vcombine.high %v7116_v36, %v7124_v52  ;;  %v7140_v45 = vld [vmem:[%s20353_s21 + $0xe68] sm:$0xff]  ;;  %v16264_v60 = vcombine.high %v7131_v57, %v7139_v35  ;;  %v16263_v5 = vcombine.low %v7131_v57, %v7139_v35  ;;  %v7163_v20 = vld [vmem:[%s20353_s21 + $0xf20] sm:$0xff]  ;;  %v6693_v36 = vld [vmem:[%s20353_s21 + $0x70] sm:$0xff] }
 0xb87   : > { %10324 = vmatprep.subr.bf16.mxu1 %v16202_v54  ;;  %v16266_v61 = vcombine.high %v7132_v44, %v7140_v45  ;;  %v7148_v0 = vld [vmem:[%s20353_s21 + $0xea8] sm:$0xff]  ;;  %v16265_v11 = vcombine.low %v7132_v44, %v7140_v45  ;;  %v16280_v54 = vcombine.high %v7147_v14, %v7155_v62  ;;  %v7171_v40 = vld [vmem:[%s20353_s21 + $0xf60] sm:$0xff]  ;;  %v6686_v52 = vld [vmem:[%s20353_s21 + $0x38] sm:$0xff]  ;;  %v15819_v45 = vcombine.low %v6685_v51, %v6693_v36 }
 0xb88   : > { %v7156_v3 = vld [vmem:[%s20353_s21 + $0xee8] sm:$0xff]  ;;  %v7179_v28 = vld [vmem:[%s20353_s21 + $0xfa0] sm:$0xff]  ;;  %v6701_v35 = vld [vmem:[%s20353_s21 + $0xb0] sm:$0xff] }
 0xb89   : > { %10239 = vmatpush1.bf16.msra.mxu0 %v16199_v19  ;;  %v16282_v42 = vcombine.high %v7148_v0, %v7156_v3  ;;  %v7164_v24 = vld [vmem:[%s20353_s21 + $0xf28] sm:$0xff]  ;;  %v7187_v29 = vld [vmem:[%s20353_s21 + $0xfe0] sm:$0xff]  ;;  %v6709_v44 = vld [vmem:[%s20353_s21 + $0xf0] sm:$0xff] }
 0xb8a   : > { %10325 = vmatpush1.bf16.msra.mxu1 %v16201_v53  ;;  %10240 = vmatprep.subr.bf16.mxu0 %v16216_v7  ;;  %v7172_v19 = vld [vmem:[%s20353_s21 + $0xf68] sm:$0xff]  ;;  %v16279_v53 = vcombine.low %v7147_v14, %v7155_v62  ;;  %v16281_v7 = vcombine.low %v7148_v0, %v7156_v3  ;;  %v6717_v14 = vld [vmem:[%s20353_s21 + $0x130] sm:$0xff]  ;;  %v6718_v3 = vld [vmem:[%s20353_s21 + $0x138] sm:$0xff] }
 0xb8b   : > { %10326 = vmatprep.subr.bf16.mxu1 %v16218_v17  ;;  %v16296_v17 = vcombine.high %v7163_v20, %v7171_v40  ;;  %v16298_v18 = vcombine.high %v7164_v24, %v7172_v19  ;;  %v7180_v21 = vld [vmem:[%s20353_s21 + $0xfa8] sm:$0xff]  ;;  %v6725_v62 = vld [vmem:[%s20353_s21 + $0x170] sm:$0xff] }
 0xb8d   : > { %10241 = vmatpush1.bf16.msra.mxu0 %v16215_v58  ;;  %v7188_v58 = vld [vmem:[%s20353_s21 + $0xfe8] sm:$0xff] }
 0xb8e   : > { %10327 = vmatpush1.bf16.msra.mxu1 %v16217_v48  ;;  %10242 = vmatprep.subr.bf16.mxu0 %v16232_v12  ;;  %v16295_v48 = vcombine.low %v7163_v20, %v7171_v40  ;;  %v16297_v12 = vcombine.low %v7164_v24, %v7172_v19  ;;  %v16314_v33 = vcombine.high %v7180_v21, %v7188_v58  ;;  %v6733_v40 = vld [vmem:[%s20353_s21 + $0x1b0] sm:$0xff]  ;;  %v6734_v19 = vld [vmem:[%s20353_s21 + $0x1b8] sm:$0xff] }
 0xb8f   : > { %10328 = vmatprep.subr.bf16.mxu1 %v16234_v1  ;;  %v16312_v1 = vcombine.high %v7179_v28, %v7187_v29  ;;  %v6741_v24 = vld [vmem:[%s20353_s21 + $0x1f0] sm:$0xff] }
 0xb91   : > { %10243 = vmatpush1.bf16.msra.mxu0 %v16231_v39  ;;  %v6694_v39 = vld [vmem:[%s20353_s21 + $0x78] sm:$0xff] }
 0xb92   : > { %10329 = vmatpush1.bf16.msra.mxu1 %v16233_v41  ;;  %10244 = vmatprep.subr.bf16.mxu0 %v16248_v55  ;;  %v16311_v41 = vcombine.low %v7179_v28, %v7187_v29  ;;  %v16313_v55 = vcombine.low %v7180_v21, %v7188_v58  ;;  %v15822_v57 = vcombine.high %v6686_v52, %v6694_v39  ;;  %v6749_v28 = vld [vmem:[%s20353_s21 + $0x230] sm:$0xff]  ;;  %v6750_v21 = vld [vmem:[%s20353_s21 + $0x238] sm:$0xff] }
 0xb93   : > { %10330 = vmatprep.subr.bf16.mxu1 %v16250_v56  ;;  %v15820_v56 = vcombine.high %v6685_v51, %v6693_v36  ;;  %v6757_v29 = vld [vmem:[%s20353_s21 + $0x270] sm:$0xff]  ;;  %v6758_v58 = vld [vmem:[%s20353_s21 + $0x278] sm:$0xff] }
 0xb94   : > { %v6765_v51 = vld [vmem:[%s20353_s21 + $0x2b0] sm:$0xff] }
 0xb95   : > { %10245 = vmatpush1.bf16.msra.mxu0 %v16247_v49  ;;  %v6702_v49 = vld [vmem:[%s20353_s21 + $0xb8] sm:$0xff]  ;;  %v6773_v36 = vld [vmem:[%s20353_s21 + $0x2f0] sm:$0xff] }
 0xb96   : > { %10331 = vmatpush1.bf16.msra.mxu1 %v16249_v50  ;;  %10246 = vmatprep.subr.bf16.mxu0 %v16264_v60  ;;  %v6710_v50 = vld [vmem:[%s20353_s21 + $0xf8] sm:$0xff]  ;;  %v15821_v60 = vcombine.low %v6686_v52, %v6694_v39 }
 0xb97   : > { %10332 = vmatprep.subr.bf16.mxu1 %v16266_v61  ;;  %v15836_v61 = vcombine.high %v6701_v35, %v6709_v44  ;;  %v15838_v0 = vcombine.high %v6702_v49, %v6710_v50  ;;  %v6766_v52 = vld [vmem:[%s20353_s21 + $0x2b8] sm:$0xff] }
 0xb98   : > { %v6774_v39 = vld [vmem:[%s20353_s21 + $0x2f8] sm:$0xff] }
 0xb99   : > { %10247 = vmatpush1.bf16.msra.mxu0 %v16263_v5  ;;  %v6726_v5 = vld [vmem:[%s20353_s21 + $0x178] sm:$0xff] }
 0xb9a   : > { %10333 = vmatpush1.bf16.msra.mxu1 %v16265_v11  ;;  %10248 = vmatprep.subr.bf16.mxu0 %v16280_v54  ;;  %v15835_v11 = vcombine.low %v6701_v35, %v6709_v44  ;;  %v15837_v54 = vcombine.low %v6702_v49, %v6710_v50  ;;  %v15854_v20 = vcombine.high %v6718_v3, %v6726_v5  ;;  %v6781_v35 = vld [vmem:[%s20353_s21 + $0x330] sm:$0xff]  ;;  %v6790_v49 = vld [vmem:[%s20353_s21 + $0x378] sm:$0xff] }
 0xb9b   : > { %10334 = vmatprep.subr.bf16.mxu1 %v16282_v42  ;;  %v15852_v42 = vcombine.high %v6717_v14, %v6725_v62  ;;  %v6789_v44 = vld [vmem:[%s20353_s21 + $0x370] sm:$0xff]  ;;  %v15899_v50 = vcombine.low %v6765_v51, %v6773_v36 }
 0xb9d   : > { %10249 = vmatpush1.bf16.msra.mxu0 %v16279_v53  ;;  %v6742_v53 = vld [vmem:[%s20353_s21 + $0x1f8] sm:$0xff] }
 0xb9e   : > { %10335 = vmatpush1.bf16.msra.mxu1 %v16281_v7  ;;  %10250 = vmatprep.subr.bf16.mxu0 %v16296_v17  ;;  %v15851_v7 = vcombine.low %v6717_v14, %v6725_v62  ;;  %v15853_v17 = vcombine.low %v6718_v3, %v6726_v5  ;;  %v6797_v62 = vld [vmem:[%s20353_s21 + $0x3b0] sm:$0xff]  ;;  %v6798_v3 = vld [vmem:[%s20353_s21 + $0x3b8] sm:$0xff] }
 0xb9f   : > { %10336 = vmatprep.subr.bf16.mxu1 %v16298_v18  ;;  %v15868_v18 = vcombine.high %v6733_v40, %v6741_v24  ;;  %v6806_v5 = vld [vmem:[%s20353_s21 + $0x3f8] sm:$0xff] }
 0xba1   : > { %10251 = vmatpush1.bf16.msra.mxu0 %v16295_v48  ;;  %v15867_v48 = vcombine.low %v6733_v40, %v6741_v24  ;;  %v6813_v40 = vld [vmem:[%s20353_s21 + $0x430] sm:$0xff] }
 0xba2   : > { %10337 = vmatpush1.bf16.msra.mxu1 %v16297_v12  ;;  %10252 = vmatprep.subr.bf16.mxu0 %v16312_v1  ;;  %v15869_v12 = vcombine.low %v6734_v19, %v6742_v53  ;;  %v15884_v1 = vcombine.high %v6749_v28, %v6757_v29  ;;  %v6821_v24 = vld [vmem:[%s20353_s21 + $0x470] sm:$0xff] }
 0xba3   : > { %10338 = vmatprep.subr.bf16.mxu1 %v16314_v33  ;;  %v15886_v33 = vcombine.high %v6750_v21, %v6758_v58 }
 0xba5   : > { %10253 = vmatpush1.bf16.msra.mxu0 %v16311_v41  ;;  %v15883_v41 = vcombine.low %v6749_v28, %v6757_v29  ;;  %v6829_v28 = vld [vmem:[%s20353_s21 + $0x4b0] sm:$0xff] }
 0xba6   : > { %10339 = vmatpush1.bf16.msra.mxu1 %v16313_v55  ;;  %10351 = vmatprep.subr.bf16.mxu0 %v15820_v56  ;;  %v15885_v55 = vcombine.low %v6750_v21, %v6758_v58  ;;  %v15900_v56 = vcombine.high %v6765_v51, %v6773_v36  ;;  %v6837_v29 = vld [vmem:[%s20353_s21 + $0x4f0] sm:$0xff]  ;;  %v6830_v21 = vld [vmem:[%s20353_s21 + $0x4b8] sm:$0xff] }
 0xba7   : > { %10437 = vmatprep.subr.bf16.mxu1 %v15822_v57  ;;  %v15902_v57 = vcombine.high %v6766_v52, %v6774_v39  ;;  %v6838_v58 = vld [vmem:[%s20353_s21 + $0x4f8] sm:$0xff]  ;;  %v6845_v51 = vld [vmem:[%s20353_s21 + $0x530] sm:$0xff] }
 0xba8   : > { %10255 = vmatmul.mubr.bf16.vlgmr.msra.gmra.mrb[40].mxu0 %v21392_v47  ;;  %v6853_v36 = vld [vmem:[%s20353_s21 + $0x570] sm:$0xff] }
 0xba9   : > { %10341 = vmatmul.mubr.bf16.vlgmr.msra.gmra.mrb[40].mxu1 %v21392_v47  ;;  %10352 = vmatpush1.bf16.msra.mxu0 %v15819_v45  ;;  %v6782_v45 = vld [vmem:[%s20353_s21 + $0x338] sm:$0xff] }
 0xbaa   : > { %10383 = vmatprep.mubr.bf16.mxu0 %v21302_v31  ;;  %10438 = vmatpush1.bf16.msra.mxu1 %v15821_v60  ;;  %v15901_v60 = vcombine.low %v6766_v52, %v6774_v39  ;;  %v15918_v14 = vcombine.high %v6782_v45, %v6790_v49  ;;  %v6846_v52 = vld [vmem:[%s20353_s21 + $0x538] sm:$0xff] }
 0xbab   : > { %10469 = vmatprep.mubr.bf16.mxu1 %v21302_v31  ;;  %10353 = vmatprep.subr.bf16.mxu0 %v15836_v61  ;;  %v15870_v31 = vcombine.high %v6734_v19, %v6742_v53  ;;  %v15916_v61 = vcombine.high %v6781_v35, %v6789_v44  ;;  %v6814_v19 = vld [vmem:[%s20353_s21 + $0x438] sm:$0xff] }
 0xbac   : > { %10439 = vmatprep.subr.bf16.mxu1 %v15838_v0  ;;  %v6805_v0 = vld [vmem:[%s20353_s21 + $0x3f0] sm:$0xff]  ;;  %v6822_v53 = vld [vmem:[%s20353_s21 + $0x478] sm:$0xff] }
 0xbad   : > { %10354 = vmatpush1.bf16.msra.mxu0 %v15835_v11  ;;  %v15915_v11 = vcombine.low %v6781_v35, %v6789_v44  ;;  %v6854_v39 = vld [vmem:[%s20353_s21 + $0x578] sm:$0xff]  ;;  %v6861_v35 = vld [vmem:[%s20353_s21 + $0x5b0] sm:$0xff] }
 0xbae   : > { %10440 = vmatpush1.bf16.msra.mxu1 %v15837_v54  ;;  %10355 = vmatprep.subr.bf16.mxu0 %v15852_v42  ;;  %v15917_v54 = vcombine.low %v6782_v45, %v6790_v49  ;;  %v15932_v42 = vcombine.high %v6797_v62, %v6805_v0  ;;  %v6869_v44 = vld [vmem:[%s20353_s21 + $0x5f0] sm:$0xff]  ;;  %v6862_v45 = vld [vmem:[%s20353_s21 + $0x5b8] sm:$0xff] }
 0xbaf   : > { %10441 = vmatprep.subr.bf16.mxu1 %v15854_v20  ;;  %v15934_v20 = vcombine.high %v6798_v3, %v6806_v5  ;;  %v6870_v49 = vld [vmem:[%s20353_s21 + $0x5f8] sm:$0xff] }
 0xbb1   : > { %10356 = vmatpush1.bf16.msra.mxu0 %v15851_v7  ;;  %v15931_v7 = vcombine.low %v6797_v62, %v6805_v0  ;;  %v6877_v62 = vld [vmem:[%s20353_s21 + $0x630] sm:$0xff] }
 0xbb2   : > { %10442 = vmatpush1.bf16.msra.mxu1 %v15853_v17  ;;  %10357 = vmatprep.subr.bf16.mxu0 %v15868_v18  ;;  %v15933_v17 = vcombine.low %v6798_v3, %v6806_v5  ;;  %v15948_v18 = vcombine.high %v6813_v40, %v6821_v24  ;;  %v6885_v0 = vld [vmem:[%s20353_s21 + $0x670] sm:$0xff]  ;;  %v6878_v3 = vld [vmem:[%s20353_s21 + $0x638] sm:$0xff] }
 0xbb3   : > { %10443 = vmatprep.subr.bf16.mxu1 %v15870_v31  ;;  %v15950_v31 = vcombine.high %v6814_v19, %v6822_v53  ;;  %v6886_v5 = vld [vmem:[%s20353_s21 + $0x678] sm:$0xff] }
 0xbb5   : > { %10358 = vmatpush1.bf16.msra.mxu0 %v15867_v48  ;;  %v15947_v48 = vcombine.low %v6813_v40, %v6821_v24  ;;  %v6893_v40 = vld [vmem:[%s20353_s21 + $0x6b0] sm:$0xff] }
 0xbb6   : > { %10444 = vmatpush1.bf16.msra.mxu1 %v15869_v12  ;;  %10359 = vmatprep.subr.bf16.mxu0 %v15884_v1  ;;  %v15949_v12 = vcombine.low %v6814_v19, %v6822_v53  ;;  %v15964_v1 = vcombine.high %v6829_v28, %v6837_v29  ;;  %v6901_v24 = vld [vmem:[%s20353_s21 + $0x6f0] sm:$0xff]  ;;  %v6894_v19 = vld [vmem:[%s20353_s21 + $0x6b8] sm:$0xff] }
 0xbb7   : > { %10445 = vmatprep.subr.bf16.mxu1 %v15886_v33  ;;  %v15966_v33 = vcombine.high %v6830_v21, %v6838_v58  ;;  %v6902_v53 = vld [vmem:[%s20353_s21 + $0x6f8] sm:$0xff] }
 0xbb9   : > { %10360 = vmatpush1.bf16.msra.mxu0 %v15883_v41  ;;  %v15963_v41 = vcombine.low %v6829_v28, %v6837_v29  ;;  %v6909_v28 = vld [vmem:[%s20353_s21 + $0x730] sm:$0xff] }
 0xbba   : > { %10446 = vmatpush1.bf16.msra.mxu1 %v15885_v55  ;;  %10361 = vmatprep.subr.bf16.mxu0 %v15900_v56  ;;  %v15965_v55 = vcombine.low %v6830_v21, %v6838_v58  ;;  %v15980_v56 = vcombine.high %v6845_v51, %v6853_v36  ;;  %v6917_v29 = vld [vmem:[%s20353_s21 + $0x770] sm:$0xff]  ;;  %v6910_v21 = vld [vmem:[%s20353_s21 + $0x738] sm:$0xff] }
 0xbbb   : > { %10447 = vmatprep.subr.bf16.mxu1 %v15902_v57  ;;  %v15982_v57 = vcombine.high %v6846_v52, %v6854_v39  ;;  %v6918_v58 = vld [vmem:[%s20353_s21 + $0x778] sm:$0xff] }
 0xbbd   : > { %10362 = vmatpush1.bf16.msra.mxu0 %v15899_v50  ;;  %v15979_v50 = vcombine.low %v6845_v51, %v6853_v36  ;;  %v6925_v51 = vld [vmem:[%s20353_s21 + $0x7b0] sm:$0xff] }
 0xbbe   : > { %10448 = vmatpush1.bf16.msra.mxu1 %v15901_v60  ;;  %10363 = vmatprep.subr.bf16.mxu0 %v15916_v61  ;;  %v15981_v60 = vcombine.low %v6846_v52, %v6854_v39  ;;  %v15996_v61 = vcombine.high %v6861_v35, %v6869_v44  ;;  %v6933_v36 = vld [vmem:[%s20353_s21 + $0x7f0] sm:$0xff]  ;;  %v6926_v52 = vld [vmem:[%s20353_s21 + $0x7b8] sm:$0xff] }
 0xbbf   : > { %10449 = vmatprep.subr.bf16.mxu1 %v15918_v14  ;;  %v15998_v14 = vcombine.high %v6862_v45, %v6870_v49  ;;  %v6934_v39 = vld [vmem:[%s20353_s21 + $0x7f8] sm:$0xff] }
 0xbc1   : > { %10364 = vmatpush1.bf16.msra.mxu0 %v15915_v11  ;;  %v15995_v11 = vcombine.low %v6861_v35, %v6869_v44  ;;  %v6941_v35 = vld [vmem:[%s20353_s21 + $0x830] sm:$0xff] }
 0xbc2   : > { %10450 = vmatpush1.bf16.msra.mxu1 %v15917_v54  ;;  %10365 = vmatprep.subr.bf16.mxu0 %v15932_v42  ;;  %v15997_v54 = vcombine.low %v6862_v45, %v6870_v49  ;;  %v16012_v42 = vcombine.high %v6877_v62, %v6885_v0  ;;  %v6949_v44 = vld [vmem:[%s20353_s21 + $0x870] sm:$0xff]  ;;  %v6942_v45 = vld [vmem:[%s20353_s21 + $0x838] sm:$0xff] }
 0xbc3   : > { %10451 = vmatprep.subr.bf16.mxu1 %v15934_v20  ;;  %v16014_v20 = vcombine.high %v6878_v3, %v6886_v5  ;;  %v6950_v49 = vld [vmem:[%s20353_s21 + $0x878] sm:$0xff] }
 0xbc5   : > { %10366 = vmatpush1.bf16.msra.mxu0 %v15931_v7  ;;  %v16011_v7 = vcombine.low %v6877_v62, %v6885_v0  ;;  %v6957_v62 = vld [vmem:[%s20353_s21 + $0x8b0] sm:$0xff] }
 0xbc6   : > { %10452 = vmatpush1.bf16.msra.mxu1 %v15933_v17  ;;  %10367 = vmatprep.subr.bf16.mxu0 %v15948_v18  ;;  %v16013_v17 = vcombine.low %v6878_v3, %v6886_v5  ;;  %v16028_v18 = vcombine.high %v6893_v40, %v6901_v24  ;;  %v6965_v0 = vld [vmem:[%s20353_s21 + $0x8f0] sm:$0xff]  ;;  %v16075_v3 = vcombine.low %v6941_v35, %v6949_v44  ;;  %v6958_v5 = vld [vmem:[%s20353_s21 + $0x8b8] sm:$0xff] }
 0xbc7   : > { %10453 = vmatprep.subr.bf16.mxu1 %v15950_v31  ;;  %v16030_v31 = vcombine.high %v6894_v19, %v6902_v53 }
 0xbc9   : > { %10368 = vmatpush1.bf16.msra.mxu0 %v15947_v48  ;;  %v16027_v48 = vcombine.low %v6893_v40, %v6901_v24  ;;  %v6981_v40 = vld [vmem:[%s20353_s21 + $0x970] sm:$0xff] }
 0xbca   : > { %10454 = vmatpush1.bf16.msra.mxu1 %v15949_v12  ;;  %10369 = vmatprep.subr.bf16.mxu0 %v15964_v1  ;;  %v16029_v12 = vcombine.low %v6894_v19, %v6902_v53  ;;  %v16044_v1 = vcombine.high %v6909_v28, %v6917_v29  ;;  %v6974_v19 = vld [vmem:[%s20353_s21 + $0x938] sm:$0xff] }
 0xbcb   : > { %10455 = vmatprep.subr.bf16.mxu1 %v15966_v33  ;;  %v16046_v33 = vcombine.high %v6910_v21, %v6918_v58  ;;  %v6982_v53 = vld [vmem:[%s20353_s21 + $0x978] sm:$0xff] }
 0xbcd   : > { %10370 = vmatpush1.bf16.msra.mxu0 %v15963_v41  ;;  %v16043_v41 = vcombine.low %v6909_v28, %v6917_v29  ;;  %v6989_v28 = vld [vmem:[%s20353_s21 + $0x9b0] sm:$0xff] }
 0xbce   : > { %10456 = vmatpush1.bf16.msra.mxu1 %v15965_v55  ;;  %10371 = vmatprep.subr.bf16.mxu0 %v15980_v56  ;;  %v16045_v55 = vcombine.low %v6910_v21, %v6918_v58  ;;  %v16060_v56 = vcombine.high %v6925_v51, %v6933_v36  ;;  %v6997_v29 = vld [vmem:[%s20353_s21 + $0x9f0] sm:$0xff]  ;;  %v6990_v21 = vld [vmem:[%s20353_s21 + $0x9b8] sm:$0xff] }
 0xbcf   : > { %10457 = vmatprep.subr.bf16.mxu1 %v15982_v57  ;;  %v16062_v57 = vcombine.high %v6926_v52, %v6934_v39 }
 0xbd1   : > { %10372 = vmatpush1.bf16.msra.mxu0 %v15979_v50  ;;  %v16059_v50 = vcombine.low %v6925_v51, %v6933_v36  ;;  %v7006_v51 = vld [vmem:[%s20353_s21 + $0xa38] sm:$0xff] }
 0xbd2   : > { %10458 = vmatpush1.bf16.msra.mxu1 %v15981_v60  ;;  %10373 = vmatprep.subr.bf16.mxu0 %v15996_v61  ;;  %v16061_v60 = vcombine.low %v6926_v52, %v6934_v39  ;;  %v16076_v61 = vcombine.high %v6941_v35, %v6949_v44  ;;  %v7014_v36 = vld [vmem:[%s20353_s21 + $0xa78] sm:$0xff]  ;;  %v16123_v52 = vcombine.low %v6989_v28, %v6997_v29 }
 0xbd3   : > { %10459 = vmatprep.subr.bf16.mxu1 %v15998_v14  ;;  %v16078_v14 = vcombine.high %v6942_v45, %v6950_v49  ;;  %v7022_v35 = vld [vmem:[%s20353_s21 + $0xab8] sm:$0xff] }
 0xbd4   : > { %v7030_v44 = vld [vmem:[%s20353_s21 + $0xaf8] sm:$0xff] }
 0xbd5   : > { %10374 = vmatpush1.bf16.msra.mxu0 %v15995_v11  ;;  %v6966_v11 = vld [vmem:[%s20353_s21 + $0x8f8] sm:$0xff] }
 0xbd6   : > { %10460 = vmatpush1.bf16.msra.mxu1 %v15997_v54  ;;  %10375 = vmatprep.subr.bf16.mxu0 %v16012_v42  ;;  %v16077_v54 = vcombine.low %v6942_v45, %v6950_v49  ;;  %v16092_v42 = vcombine.high %v6957_v62, %v6965_v0  ;;  %v16094_v24 = vcombine.high %v6958_v5, %v6966_v11 }
 0xbd7   : > { %10461 = vmatprep.subr.bf16.mxu1 %v16014_v20  ;;  %v6973_v20 = vld [vmem:[%s20353_s21 + $0x930] sm:$0xff]  ;;  %v16141_v49 = vcombine.low %v7006_v51, %v7014_v36 }
 0xbd8   : > { %v16107_v58 = vcombine.low %v6973_v20, %v6981_v40 }
 0xbd9   : > { %10376 = vmatpush1.bf16.msra.mxu0 %v16011_v7  ;;  %v16091_v7 = vcombine.low %v6957_v62, %v6965_v0  ;;  %v7214_v62 = vrot.slane %v21619_v37, %v20797_v63  ;;  %v7038_v0 = vld [vmem:[%s20353_s21 + $0xb38] sm:$0xff] }
 0xbda   : > { %10462 = vmatpush1.bf16.msra.mxu1 %v16013_v17  ;;  %10377 = vmatprep.subr.bf16.mxu0 %v16028_v18  ;;  %v16093_v17 = vcombine.low %v6958_v5, %v6966_v11  ;;  %v16108_v18 = vcombine.high %v6973_v20, %v6981_v40  ;;  %v7222_v5 = vrot.slane %v21619_v37, %v20812_v16 }
 0xbdb   : > { %10463 = vmatprep.subr.bf16.mxu1 %v16030_v31  ;;  %v16110_v31 = vcombine.high %v6974_v19, %v6982_v53  ;;  %v7218_v11 = vrot.slane %v21619_v37, %v20805_v6  ;;  %v16157_v20 = vcombine.low %v7022_v35, %v7030_v44 }
 0xbdd   : > { %10378 = vmatpush1.bf16.msra.mxu0 %v16027_v48  ;;  %v16109_v48 = vcombine.low %v6974_v19, %v6982_v53  ;;  %v7053_v53 = vld [vmem:[%s20353_s21 + $0xbb0] sm:$0xff] }
 0xbde   : > { %10464 = vmatpush1.bf16.msra.mxu1 %v16029_v12  ;;  %10379 = vmatprep.subr.bf16.mxu0 %v16044_v1  ;;  %v16124_v12 = vcombine.high %v6989_v28, %v6997_v29  ;;  %v7005_v1 = vld [vmem:[%s20353_s21 + $0xa30] sm:$0xff]  ;;  %v7054_v28 = vld [vmem:[%s20353_s21 + $0xbb8] sm:$0xff] }
 0xbdf   : > { %10465 = vmatprep.subr.bf16.mxu1 %v16046_v33  ;;  %v7013_v33 = vld [vmem:[%s20353_s21 + $0xa70] sm:$0xff]  ;;  %v7062_v29 = vld [vmem:[%s20353_s21 + $0xbf8] sm:$0xff] }
 0xbe0   : > { %v16139_v45 = vcombine.low %v7005_v1, %v7013_v33 }
 0xbe1   : > { %10380 = vmatpush1.bf16.msra.mxu0 %v16043_v41  ;;  %v16140_v41 = vcombine.high %v7005_v1, %v7013_v33 }
 0xbe2   : > { %10466 = vmatpush1.bf16.msra.mxu1 %v16045_v55  ;;  %10381 = vmatprep.subr.bf16.mxu0 %v16060_v56  ;;  %v16142_v55 = vcombine.high %v7006_v51, %v7014_v36  ;;  %v7021_v56 = vld [vmem:[%s20353_s21 + $0xab0] sm:$0xff] }
 0xbe3   : > { %10467 = vmatprep.subr.bf16.mxu1 %v16062_v57  ;;  %v7029_v57 = vld [vmem:[%s20353_s21 + $0xaf0] sm:$0xff] }
 0xbe5   : > { %10382 = vmatpush1.bf16.msra.mxu0 %v16059_v50  ;;  %v16156_v50 = vcombine.high %v7021_v56, %v7029_v57 }
 0xbe6   : > { %10468 = vmatpush1.bf16.msra.mxu1 %v16061_v60  ;;  %10394 = vmatprep.subr.bf16.mxu0 %v16076_v61  ;;  %v16158_v60 = vcombine.high %v7022_v35, %v7030_v44  ;;  %v7037_v61 = vld [vmem:[%s20353_s21 + $0xb30] sm:$0xff] }
 0xbe7   : > { %10480 = vmatprep.subr.bf16.mxu1 %v16078_v14  ;;  %v7045_v14 = vld [vmem:[%s20353_s21 + $0xb70] sm:$0xff] }
 0xbe8   : > { %10384 = vmatmul.mubr.bf16.vlgmr.msra.gmra.mrb[44].mxu0 %v21306_v23  ;;  %v16172_v40 = vcombine.high %v7037_v61, %v7045_v14  ;;  %v7077_v35 = vld [vmem:[%s20353_s21 + $0xc70] sm:$0xff] }
 0xbe9   : > { %10470 = vmatmul.mubr.bf16.vlgmr.msra.gmra.mrb[44].mxu1 %v21306_v23  ;;  %10395 = vmatpush1.bf16.msra.mxu0 %v16075_v3  ;;  %v6998_v23 = vld [vmem:[%s20353_s21 + $0x9f8] sm:$0xff] }
 0xbea   : > { %10426 = vmatprep.mubr.bf16.mxu0 %v21320_v43  ;;  %10481 = vmatpush1.bf16.msra.mxu1 %v16077_v54  ;;  %v16125_v39 = vcombine.low %v6990_v21, %v6998_v23  ;;  %v7046_v3 = vld [vmem:[%s20353_s21 + $0xb78] sm:$0xff]  ;;  %v16155_v54 = vcombine.low %v7021_v56, %v7029_v57  ;;  %v16190_v56 = vcombine.high %v7054_v28, %v7062_v29  ;;  %v7069_v57 = vld [vmem:[%s20353_s21 + $0xc30] sm:$0xff] }
 0xbeb   : > { %10512 = vmatprep.mubr.bf16.mxu1 %v21320_v43  ;;  %10396 = vmatprep.subr.bf16.mxu0 %v16092_v42  ;;  %v16126_v43 = vcombine.high %v6990_v21, %v6998_v23  ;;  %v7226_v42 = vrot.slane %v21619_v37, %v20824_v30  ;;  %v16174_v19 = vcombine.high %v7038_v0, %v7046_v3 }
 0xbec   : > { %10482 = vmatprep.subr.bf16.mxu1 %v16094_v24  ;;  %v16171_v37 = vcombine.low %v7037_v61, %v7045_v14  ;;  %v7078_v61 = vld [vmem:[%s20353_s21 + $0xc78] sm:$0xff] }
 0xbed   : > { %10397 = vmatpush1.bf16.msra.mxu0 %v16091_v7  ;;  %v7061_v7 = vld [vmem:[%s20353_s21 + $0xbf0] sm:$0xff] }
 0xbee   : > { %10483 = vmatpush1.bf16.msra.mxu1 %v16093_v17  ;;  %10398 = vmatprep.subr.bf16.mxu0 %v16108_v18  ;;  %v16188_v36 = vcombine.high %v7053_v53, %v7061_v7 }
 0xbef   : > { %10484 = vmatprep.subr.bf16.mxu1 %v16110_v31 }
 0xbf1   : > { %10399 = vmatpush1.bf16.msra.mxu0 %v16107_v58 }
 0xbf2   : > { %10485 = vmatpush1.bf16.msra.mxu1 %v16109_v48  ;;  %10400 = vmatprep.subr.bf16.mxu0 %v16124_v12  ;;  %v16173_v12 = vcombine.low %v7038_v0, %v7046_v3 }
 0xbf3   : > { %10486 = vmatprep.subr.bf16.mxu1 %v16126_v43 }
 0xbf5   : > { %10401 = vmatpush1.bf16.msra.mxu0 %v16123_v52 }
 0xbf6   : > { %10487 = vmatpush1.bf16.msra.mxu1 %v16125_v39  ;;  %10402 = vmatprep.subr.bf16.mxu0 %v16140_v41 }
 0xbf7   : > { %10488 = vmatprep.subr.bf16.mxu1 %v16142_v55  ;;  %v16187_v55 = vcombine.low %v7053_v53, %v7061_v7  ;;  %v7093_v53 = vld [vmem:[%s20353_s21 + $0xcf0] sm:$0xff] }
 0xbf9   : > { %10403 = vmatpush1.bf16.msra.mxu0 %v16139_v45 }
 0xbfa   : > { %10489 = vmatpush1.bf16.msra.mxu1 %v16141_v49  ;;  %10404 = vmatprep.subr.bf16.mxu0 %v16156_v50  ;;  %v16189_v50 = vcombine.low %v7054_v28, %v7062_v29 }
 0xbfb   : > { %v10084_v24 = vpop.f32.mrb[36].mxu0  ;;  %10490 = vmatprep.subr.bf16.mxu1 %v16158_v60  ;;  %v7070_v60 = vld [vmem:[%s20353_s21 + $0xc38] sm:$0xff] }
 0xbfc   : > { %v17074_v17 = vadd.f32 %v10084_v24, %v7214_v62  ;;  %v10170_v18 = vpop.f32.mrb[36].mxu1  ;;  %v10086_v31 = vpop.f32.mrb[37].mxu0  ;;  %v16206_v24 = vcombine.high %v7070_v60, %v7078_v61  ;;  %v16205_v28 = vcombine.low %v7070_v60, %v7078_v61 }
 0xbfd   : > { %v17078_v21 = vadd.f32 %v10170_v18, %v7222_v5  ;;  %v17075_v23 = vadd.f32 %v10086_v31, %v7218_v11  ;;  %v10172_v58 = vpop.f32.mrb[37].mxu1  ;;  %v10088_v48 = vpop.f32.mrb[38].mxu0  ;;  %10405 = vmatpush1.bf16.msra.mxu0 %v16155_v54  ;;  %v7094_v18 = vld [vmem:[%s20353_s21 + $0xcf8] sm:$0xff]  ;;  %v16203_v31 = vcombine.low %v7069_v57, %v7077_v35 }
 0xbfe   : > { %v17079_v43 = vadd.f32 %v10172_v58, %v7226_v42  ;;  %v17076_v1 = vadd.f32 %v10088_v48, %v7214_v62  ;;  %v10174_v33 = vpop.f32.mrb[38].mxu1  ;;  %10491 = vmatpush1.bf16.msra.mxu1 %v16157_v20  ;;  %v10090_v51 = vpop.f32.mrb[39].mxu0  ;;  %10406 = vmatprep.subr.bf16.mxu0 %v16172_v40  ;;  %v10527_v44 = vmax.f32 %v17074_v17, 0.0  ;;  %v16204_v20 = vcombine.high %v7069_v57, %v7077_v35  ;;  %v7086_v17 = vld [vmem:[%s20353_s21 + $0xcb8] sm:$0xff]  ;;  %v7109_v58 = vld [vmem:[%s20353_s21 + $0xd70] sm:$0xff] }
 0xbff   : > { %v17080_v52 = vadd.f32 %v10174_v33, %v7222_v5  ;;  %v17077_v39 = vadd.f32 %v10090_v51, %v7218_v11  ;;  %v10176_v41 = vpop.f32.mrb[39].mxu1  ;;  %10492 = vmatprep.subr.bf16.mxu1 %v16174_v19  ;;  %v10529_v14 = vmax.f32 %v17078_v21, 0.0  ;;  %v10528_v62 = vmax.f32 %v17075_v23, 0.0  ;;  %v7085_v19 = vld [vmem:[%s20353_s21 + $0xcb0] sm:$0xff]  ;;  %v7102_v48 = vld [vmem:[%s20353_s21 + $0xd38] sm:$0xff] }
 0xc00   : > { %v10543_v45 = vmax.f32 %v17076_v1, 0.0  ;;  %v17081_v49 = vadd.f32 %v10176_v41, %v7226_v42  ;;  %v10530_v5 = vmax.f32 %v17079_v43, 0.0  ;;  %v16220_v29 = vcombine.high %v7085_v19, %v7093_v53  ;;  %v7101_v23 = vld [vmem:[%s20353_s21 + $0xd30] sm:$0xff] }
 0xc01   : > { %v10545_v0 = vmax.f32 %v17080_v52, 0.0  ;;  %v10544_v3 = vmax.f32 %v17077_v39, 0.0  ;;  %10407 = vmatpush1.bf16.msra.mxu0 %v16171_v37  ;;  %v16222_v21 = vcombine.high %v7086_v17, %v7094_v18  ;;  %v7110_v37 = vld [vmem:[%s20353_s21 + $0xd78] sm:$0xff]  ;;  %v16221_v43 = vcombine.low %v7086_v17, %v7094_v18  ;;  %v7117_v51 = vld [vmem:[%s20353_s21 + $0xdb0] sm:$0xff] }
 0xc02   : > { %v21793_v11 = vpack.c.bf16 %v10543_v45, %v10527_v44  ;;  %v10546_v54 = vmax.f32 %v17081_v49, 0.0  ;;  %10493 = vmatpush1.bf16.msra.mxu1 %v16173_v12  ;;  %10408 = vmatprep.subr.bf16.mxu0 %v16188_v36  ;;  %v16219_v12 = vcombine.low %v7085_v19, %v7093_v53  ;;  %v16236_v1 = vcombine.high %v7101_v23, %v7109_v58  ;;  %v7125_v36 = vld [vmem:[%s20353_s21 + $0xdf0] sm:$0xff]  ;;  %v7118_v52 = vld [vmem:[%s20353_s21 + $0xdb8] sm:$0xff] }
 0xc03   : > { %v21795_v42 = vpack.c.bf16 %v10545_v0, %v10529_v14  ;;  %v21797_v40 = vpack.c.bf16 %v10544_v3, %v10528_v62  ;;  %10494 = vmatprep.subr.bf16.mxu1 %v16190_v56  ;;  %v16238_v33 = vcombine.high %v7102_v48, %v7110_v37  ;;  %v7126_v39 = vld [vmem:[%s20353_s21 + $0xdf8] sm:$0xff]  ;;  %v16235_v41 = vcombine.low %v7101_v23, %v7109_v58  ;;  %v7133_v35 = vld [vmem:[%s20353_s21 + $0xe30] sm:$0xff] }
 0xc04   : > { %v21801_v7 = vpack.c.bf16 %v10546_v54, %v10530_v5  ;;  %v16252_v56 = vcombine.high %v7117_v51, %v7125_v36  ;;  %v16254_v57 = vcombine.high %v7118_v52, %v7126_v39  ;;  %v7141_v44 = vld [vmem:[%s20353_s21 + $0xe70] sm:$0xff]  ;;  %v7134_v45 = vld [vmem:[%s20353_s21 + $0xe38] sm:$0xff]  ;;  %v16253_v60 = vcombine.low %v7118_v52, %v7126_v39 }
 0xc05   : > { %10409 = vmatpush1.bf16.msra.mxu0 %v16187_v55  ;;  %v16237_v55 = vcombine.low %v7102_v48, %v7110_v37  ;;  %v7142_v49 = vld [vmem:[%s20353_s21 + $0xe78] sm:$0xff]  ;;  %v16268_v61 = vcombine.high %v7133_v35, %v7141_v44  ;;  %v7149_v62 = vld [vmem:[%s20353_s21 + $0xeb0] sm:$0xff]  ;;  %v16267_v54 = vcombine.low %v7133_v35, %v7141_v44 }
 0xc06   : > { %10495 = vmatpush1.bf16.msra.mxu1 %v16189_v50  ;;  %10410 = vmatprep.subr.bf16.mxu0 %v16204_v20  ;;  %v16251_v50 = vcombine.low %v7117_v51, %v7125_v36  ;;  %v16270_v14 = vcombine.high %v7134_v45, %v7142_v49  ;;  %v7157_v0 = vld [vmem:[%s20353_s21 + $0xef0] sm:$0xff]  ;;  %v7150_v3 = vld [vmem:[%s20353_s21 + $0xeb8] sm:$0xff]  ;;  %v16269_v20 = vcombine.low %v7134_v45, %v7142_v49 }
 0xc07   : > { %10496 = vmatprep.subr.bf16.mxu1 %v16206_v24  ;;  %v7158_v5 = vld [vmem:[%s20353_s21 + $0xef8] sm:$0xff]  ;;  %v16284_v24 = vcombine.high %v7149_v62, %v7157_v0  ;;  %v7165_v53 = vld [vmem:[%s20353_s21 + $0xf30] sm:$0xff] }
 0xc08   : > { %v16286_v19 = vcombine.high %v7150_v3, %v7158_v5  ;;  %v7173_v17 = vld [vmem:[%s20353_s21 + $0xf70] sm:$0xff]  ;;  %v7166_v18 = vld [vmem:[%s20353_s21 + $0xf38] sm:$0xff] }
 0xc09   : > { %10411 = vmatpush1.bf16.msra.mxu0 %v16203_v31  ;;  %v7174_v31 = vld [vmem:[%s20353_s21 + $0xf78] sm:$0xff]  ;;  %v7181_v58 = vld [vmem:[%s20353_s21 + $0xfb0] sm:$0xff] }
 0xc0a   : > { %10497 = vmatpush1.bf16.msra.mxu1 %v16205_v28  ;;  %10412 = vmatprep.subr.bf16.mxu0 %v16220_v29  ;;  %v16283_v28 = vcombine.low %v7149_v62, %v7157_v0  ;;  %v16285_v29 = vcombine.low %v7150_v3, %v7158_v5  ;;  %v16302_v23 = vcombine.high %v7166_v18, %v7174_v31  ;;  %v7189_v48 = vld [vmem:[%s20353_s21 + $0xff0] sm:$0xff]  ;;  %v7182_v37 = vld [vmem:[%s20353_s21 + $0xfb8] sm:$0xff] }
 0xc0b   : > { %10498 = vmatprep.subr.bf16.mxu1 %v16222_v21  ;;  %v16300_v21 = vcombine.high %v7165_v53, %v7173_v17  ;;  %v16315_v36 = vcombine.low %v7181_v58, %v7189_v48  ;;  %v18216_v39 = vld [vmem:[%s20357_s1 + $0x4] ss:$16 sps:$4 sm:$0xff]   ;;  %v18225_v35 = vld [vmem:[%s20357_s1 + $0x2c] ss:$16 sps:$4 sm:$0xff]   ;;  %v18220_v44 = vld [vmem:[%s20357_s1 + $0x20] ss:$16 sps:$4 sm:$0xff]  }
 0xc0c   : > { %v18223_v45 = vld [vmem:[%s20357_s1 + $0x28] ss:$16 sps:$4 sm:$0xff]   ;;  %v18228_v49 = vld [vmem:[%s20357_s1 + $0x44] ss:$16 sps:$4 sm:$0xff]   ;;  %v18243_v3 = vld [vmem:[%s20357_s1 + $0x8c] ss:$16 sps:$4 sm:$0xff]  }
 0xc0d   : > { %10413 = vmatpush1.bf16.msra.mxu0 %v16219_v12  ;;  %v7190_v12 = vld [vmem:[%s20353_s21 + $0xff8] sm:$0xff]  ;;  %v18240_v0 = vld [vmem:[%s20357_s1 + $0x84] ss:$16 sps:$4 sm:$0xff]   ;;  %v18238_v5 = vld [vmem:[%s20357_s1 + $0x80] ss:$16 sps:$4 sm:$0xff]  }
 0xc0e   : > { %10499 = vmatpush1.bf16.msra.mxu1 %v16221_v43  ;;  %10414 = vmatprep.subr.bf16.mxu0 %v16236_v1  ;;  %v16299_v43 = vcombine.low %v7165_v53, %v7173_v17  ;;  %v16301_v1 = vcombine.low %v7166_v18, %v7174_v31  ;;  %v16318_v51 = vcombine.high %v7182_v37, %v7190_v12  ;;  %v18235_v62 = vld [vmem:[%s20357_s1 + $0x68] ss:$16 sps:$4 sm:$0xff]   ;;  %v18252_v17 = vld [vmem:[%s20357_s1 + $0xc4] ss:$16 sps:$4 sm:$0xff]   ;;  %v18255_v18 = vld [vmem:[%s20357_s1 + $0xcc] ss:$16 sps:$4 sm:$0xff]  }
 0xc0f   : > { %10500 = vmatprep.subr.bf16.mxu1 %v16238_v33  ;;  %v16316_v33 = vcombine.high %v7181_v58, %v7189_v48  ;;  %v16317_v52 = vcombine.low %v7182_v37, %v7190_v12  ;;  %v18247_v53 = vld [vmem:[%s20357_s1 + $0xa8] ss:$16 sps:$4 sm:$0xff]   ;;  %v18250_v31 = vld [vmem:[%s20357_s1 + $0xc0] ss:$16 sps:$4 sm:$0xff]   ;;  %v18264_v48 = vld [vmem:[%s20357_s1 + $0x104] ss:$16 sps:$4 sm:$0xff]  }
 0xc10   : > { %v18259_v58 = vld [vmem:[%s20357_s1 + $0xe8] ss:$16 sps:$4 sm:$0xff]   ;;  %v18267_v37 = vld [vmem:[%s20357_s1 + $0x10c] ss:$16 sps:$4 sm:$0xff]   ;;  %v18262_v12 = vld [vmem:[%s20357_s1 + $0x100] ss:$16 sps:$4 sm:$0xff]  }
 0xc11   : > { %10415 = vmatpush1.bf16.msra.mxu0 %v16235_v41  ;;  %v18219_v41 = vld [vmem:[%s20357_s1 + $0xc] ss:$16 sps:$4 sm:$0xff]  }
 0xc12   : > { %10501 = vmatpush1.bf16.msra.mxu1 %v16237_v55  ;;  %10416 = vmatprep.subr.bf16.mxu0 %v16252_v56  ;;  %v18214_v55 = vld [vmem:[%s20357_s1] ss:$16 sps:$4 sm:$0xff]   ;;  %v18217_v56 = vld [vmem:[%s20357_s1 + $0x8] ss:$16 sps:$4 sm:$0xff]  }
 0xc13   : > { %10502 = vmatprep.subr.bf16.mxu1 %v16254_v57  ;;  %v18222_v57 = vld [vmem:[%s20357_s1 + $0x24] ss:$16 sps:$4 sm:$0xff]  }
 0xc15   : > { %10417 = vmatpush1.bf16.msra.mxu0 %v16251_v50  ;;  %v18231_v50 = vld [vmem:[%s20357_s1 + $0x4c] ss:$16 sps:$4 sm:$0xff]  }
 0xc16   : > { %10503 = vmatpush1.bf16.msra.mxu1 %v16253_v60  ;;  %10418 = vmatprep.subr.bf16.mxu0 %v16268_v61  ;;  %v18229_v60 = vld [vmem:[%s20357_s1 + $0x48] ss:$16 sps:$4 sm:$0xff]   ;;  %v18234_v61 = vld [vmem:[%s20357_s1 + $0x64] ss:$16 sps:$4 sm:$0xff]  }
 0xc17   : > { %10504 = vmatprep.subr.bf16.mxu1 %v16270_v14  ;;  %v18237_v14 = vld [vmem:[%s20357_s1 + $0x6c] ss:$16 sps:$4 sm:$0xff]  }
 0xc19   : > { %10419 = vmatpush1.bf16.msra.mxu0 %v16267_v54  ;;  %v18241_v54 = vld [vmem:[%s20357_s1 + $0x88] ss:$16 sps:$4 sm:$0xff]  }
 0xc1a   : > { %10505 = vmatpush1.bf16.msra.mxu1 %v16269_v20  ;;  %10420 = vmatprep.subr.bf16.mxu0 %v16284_v24  ;;  %v18246_v20 = vld [vmem:[%s20357_s1 + $0xa4] ss:$16 sps:$4 sm:$0xff]   ;;  %v18249_v24 = vld [vmem:[%s20357_s1 + $0xac] ss:$16 sps:$4 sm:$0xff]  }
 0xc1b   : > { %10506 = vmatprep.subr.bf16.mxu1 %v16286_v19  ;;  %v18244_v19 = vld [vmem:[%s20357_s1 + $0xa0] ss:$16 sps:$4 sm:$0xff]  }
 0xc1d   : > { %10421 = vmatpush1.bf16.msra.mxu0 %v16283_v28  ;;  %v18253_v28 = vld [vmem:[%s20357_s1 + $0xc8] ss:$16 sps:$4 sm:$0xff]  }
 0xc1e   : > { %10507 = vmatpush1.bf16.msra.mxu1 %v16285_v29  ;;  %10422 = vmatprep.subr.bf16.mxu0 %v16300_v21  ;;  %v18258_v29 = vld [vmem:[%s20357_s1 + $0xe4] ss:$16 sps:$4 sm:$0xff]   ;;  %v18261_v21 = vld [vmem:[%s20357_s1 + $0xec] ss:$16 sps:$4 sm:$0xff]  }
 0xc1f   : > { %10508 = vmatprep.subr.bf16.mxu1 %v16302_v23  ;;  %v18256_v23 = vld [vmem:[%s20357_s1 + $0xe0] ss:$16 sps:$4 sm:$0xff]  }
 0xc21   : > { %10423 = vmatpush1.bf16.msra.mxu0 %v16299_v43  ;;  %v18265_v43 = vld [vmem:[%s20357_s1 + $0x108] ss:$16 sps:$4 sm:$0xff]  }
 0xc22   : > { %10509 = vmatpush1.bf16.msra.mxu1 %v16301_v1  ;;  %10424 = vmatprep.subr.bf16.mxu0 %v16316_v33  ;;  %v18270_v1 = vld [vmem:[%s20357_s1 + $0x124] ss:$16 sps:$4 sm:$0xff]   ;;  %v18273_v33 = vld [vmem:[%s20357_s1 + $0x12c] ss:$16 sps:$4 sm:$0xff]  }
 0xc23   : > { %10510 = vmatprep.subr.bf16.mxu1 %v16318_v51  ;;  %v18268_v51 = vld [vmem:[%s20357_s1 + $0x120] ss:$16 sps:$4 sm:$0xff]  }
 0xc25   : > { %10425 = vmatpush1.bf16.msra.mxu0 %v16315_v36  ;;  %v18271_v36 = vld [vmem:[%s20357_s1 + $0x128] ss:$16 sps:$4 sm:$0xff]  }
 0xc26   : > { %10511 = vmatpush1.bf16.msra.mxu1 %v16317_v52  ;;  %13665 = vmatprep.subr.bf16.mxu0 %v18216_v39  ;;  %v18276_v52 = vld [vmem:[%s20357_s1 + $0x144] ss:$16 sps:$4 sm:$0xff]   ;;  %v18279_v39 = vld [vmem:[%s20357_s1 + $0x14c] ss:$16 sps:$4 sm:$0xff]  }
 0xc27   : > { %14009 = vmatprep.subr.bf16.mxu1 %v18219_v41  ;;  %v18274_v41 = vld [vmem:[%s20357_s1 + $0x140] ss:$16 sps:$4 sm:$0xff]  }
 0xc28   : > { %10427 = vmatmul.mubr.bf16.vlgmr.msra.gmra.mrb[44].mxu0 %v21392_v47 }
 0xc29   : > { %10513 = vmatmul.mubr.bf16.vlgmr.msra.gmra.mrb[44].mxu1 %v21392_v47  ;;  %13666 = vmatpush1.bf16.msra.mxu0 %v18214_v55  ;;  %v18226_v47 = vld [vmem:[%s20357_s1 + $0x40] ss:$16 sps:$4 sm:$0xff]   ;;  %v18277_v55 = vld [vmem:[%s20357_s1 + $0x148] ss:$16 sps:$4 sm:$0xff]  }
 0xc2a   : > { %13697 = vmatprep.mubr.bf16.mxu0 %v21645_v13  ;;  %14010 = vmatpush1.bf16.msra.mxu1 %v18217_v56  ;;  %v18282_v56 = vld [vmem:[%s20357_s1 + $0x164] ss:$16 sps:$4 sm:$0xff]  }
 0xc2b   : > { %14041 = vmatprep.mubr.bf16.mxu1 %v21645_v13  ;;  %13667 = vmatprep.subr.bf16.mxu0 %v18222_v57  ;;  %v18232_v13 = vld [vmem:[%s20357_s1 + $0x60] ss:$16 sps:$4 sm:$0xff]   ;;  %v18285_v57 = vld [vmem:[%s20357_s1 + $0x16c] ss:$16 sps:$4 sm:$0xff]  }
 0xc2c   : > { %14011 = vmatprep.subr.bf16.mxu1 %v18225_v35  ;;  %v18280_v35 = vld [vmem:[%s20357_s1 + $0x160] ss:$16 sps:$4 sm:$0xff]  }
 0xc2d   : > { %13668 = vmatpush1.bf16.msra.mxu0 %v18220_v44  ;;  %v18283_v44 = vld [vmem:[%s20357_s1 + $0x168] ss:$16 sps:$4 sm:$0xff]  }
 0xc2e   : > { %14012 = vmatpush1.bf16.msra.mxu1 %v18223_v45  ;;  %13669 = vmatprep.subr.bf16.mxu0 %v18228_v49  ;;  %v18288_v45 = vld [vmem:[%s20357_s1 + $0x184] ss:$16 sps:$4 sm:$0xff]   ;;  %v18291_v49 = vld [vmem:[%s20357_s1 + $0x18c] ss:$16 sps:$4 sm:$0xff]  }
 0xc2f   : > { %14013 = vmatprep.subr.bf16.mxu1 %v18231_v50  ;;  %v18286_v50 = vld [vmem:[%s20357_s1 + $0x180] ss:$16 sps:$4 sm:$0xff]  }
 0xc31   : > { %13670 = vmatpush1.bf16.msra.mxu0 %v18226_v47  ;;  %v18289_v47 = vld [vmem:[%s20357_s1 + $0x188] ss:$16 sps:$4 sm:$0xff]  }
 0xc32   : > { %14014 = vmatpush1.bf16.msra.mxu1 %v18229_v60  ;;  %13671 = vmatprep.subr.bf16.mxu0 %v18234_v61  ;;  %v18294_v60 = vld [vmem:[%s20357_s1 + $0x1a4] ss:$16 sps:$4 sm:$0xff]   ;;  %v18297_v61 = vld [vmem:[%s20357_s1 + $0x1ac] ss:$16 sps:$4 sm:$0xff]  }
 0xc33   : > { %14015 = vmatprep.subr.bf16.mxu1 %v18237_v14  ;;  %v18292_v14 = vld [vmem:[%s20357_s1 + $0x1a0] ss:$16 sps:$4 sm:$0xff]  }
 0xc35   : > { %13672 = vmatpush1.bf16.msra.mxu0 %v18232_v13  ;;  %v18295_v13 = vld [vmem:[%s20357_s1 + $0x1a8] ss:$16 sps:$4 sm:$0xff]  }
 0xc36   : > { %14016 = vmatpush1.bf16.msra.mxu1 %v18235_v62  ;;  %13673 = vmatprep.subr.bf16.mxu0 %v18240_v0  ;;  %v18300_v62 = vld [vmem:[%s20357_s1 + $0x1c4] ss:$16 sps:$4 sm:$0xff]   ;;  %v18303_v0 = vld [vmem:[%s20357_s1 + $0x1cc] ss:$16 sps:$4 sm:$0xff]  }
 0xc37   : > { %14017 = vmatprep.subr.bf16.mxu1 %v18243_v3  ;;  %v18298_v3 = vld [vmem:[%s20357_s1 + $0x1c0] ss:$16 sps:$4 sm:$0xff]  }
 0xc39   : > { %13674 = vmatpush1.bf16.msra.mxu0 %v18238_v5  ;;  %v18301_v5 = vld [vmem:[%s20357_s1 + $0x1c8] ss:$16 sps:$4 sm:$0xff]  }
 0xc3a   : > { %14018 = vmatpush1.bf16.msra.mxu1 %v18241_v54  ;;  %13675 = vmatprep.subr.bf16.mxu0 %v18246_v20  ;;  %v18306_v54 = vld [vmem:[%s20357_s1 + $0x1e4] ss:$16 sps:$4 sm:$0xff]   ;;  %v18309_v20 = vld [vmem:[%s20357_s1 + $0x1ec] ss:$16 sps:$4 sm:$0xff]  }
 0xc3b   : > { %14019 = vmatprep.subr.bf16.mxu1 %v18249_v24  ;;  %v18304_v24 = vld [vmem:[%s20357_s1 + $0x1e0] ss:$16 sps:$4 sm:$0xff]  }
 0xc3d   : > { %13676 = vmatpush1.bf16.msra.mxu0 %v18244_v19  ;;  %v18307_v19 = vld [vmem:[%s20357_s1 + $0x1e8] ss:$16 sps:$4 sm:$0xff]  }
 0xc3e   : > { %14020 = vmatpush1.bf16.msra.mxu1 %v18247_v53  ;;  %13677 = vmatprep.subr.bf16.mxu0 %v18252_v17  ;;  %v18312_v53 = vld [vmem:[%s20357_s1 + $0x204] ss:$16 sps:$4 sm:$0xff]   ;;  %v18315_v17 = vld [vmem:[%s20357_s1 + $0x20c] ss:$16 sps:$4 sm:$0xff]  }
 0xc3f   : > { %14021 = vmatprep.subr.bf16.mxu1 %v18255_v18  ;;  %v18310_v18 = vld [vmem:[%s20357_s1 + $0x200] ss:$16 sps:$4 sm:$0xff]  }
 0xc41   : > { %13678 = vmatpush1.bf16.msra.mxu0 %v18250_v31  ;;  %v18313_v31 = vld [vmem:[%s20357_s1 + $0x208] ss:$16 sps:$4 sm:$0xff]  }
 0xc42   : > { %14022 = vmatpush1.bf16.msra.mxu1 %v18253_v28  ;;  %13679 = vmatprep.subr.bf16.mxu0 %v18258_v29  ;;  %v18318_v28 = vld [vmem:[%s20357_s1 + $0x224] ss:$16 sps:$4 sm:$0xff]   ;;  %v18321_v29 = vld [vmem:[%s20357_s1 + $0x22c] ss:$16 sps:$4 sm:$0xff]  }
 0xc43   : > { %14023 = vmatprep.subr.bf16.mxu1 %v18261_v21  ;;  %v18316_v21 = vld [vmem:[%s20357_s1 + $0x220] ss:$16 sps:$4 sm:$0xff]  }
 0xc45   : > { %13680 = vmatpush1.bf16.msra.mxu0 %v18256_v23  ;;  %v18319_v23 = vld [vmem:[%s20357_s1 + $0x228] ss:$16 sps:$4 sm:$0xff]  }
 0xc46   : > { %14024 = vmatpush1.bf16.msra.mxu1 %v18259_v58  ;;  %13681 = vmatprep.subr.bf16.mxu0 %v18264_v48  ;;  %v18324_v58 = vld [vmem:[%s20357_s1 + $0x244] ss:$16 sps:$4 sm:$0xff]   ;;  %v18327_v48 = vld [vmem:[%s20357_s1 + $0x24c] ss:$16 sps:$4 sm:$0xff]  }
 0xc47   : > { %14025 = vmatprep.subr.bf16.mxu1 %v18267_v37  ;;  %v18325_v37 = vld [vmem:[%s20357_s1 + $0x248] ss:$16 sps:$4 sm:$0xff]  }
 0xc49   : > { %13682 = vmatpush1.bf16.msra.mxu0 %v18262_v12  ;;  %v18330_v12 = vld [vmem:[%s20357_s1 + $0x264] ss:$16 sps:$4 sm:$0xff]  }
 0xc4a   : > { %14026 = vmatpush1.bf16.msra.mxu1 %v18265_v43  ;;  %13683 = vmatprep.subr.bf16.mxu0 %v18270_v1  ;;  %v18333_v43 = vld [vmem:[%s20357_s1 + $0x26c] ss:$16 sps:$4 sm:$0xff]   ;;  %v18331_v1 = vld [vmem:[%s20357_s1 + $0x268] ss:$16 sps:$4 sm:$0xff]  }
 0xc4b   : > { %14027 = vmatprep.subr.bf16.mxu1 %v18273_v33  ;;  %v18336_v33 = vld [vmem:[%s20357_s1 + $0x284] ss:$16 sps:$4 sm:$0xff]  }
 0xc4d   : > { %13684 = vmatpush1.bf16.msra.mxu0 %v18268_v51  ;;  %v18339_v51 = vld [vmem:[%s20357_s1 + $0x28c] ss:$16 sps:$4 sm:$0xff]  }
 0xc4e   : > { %14028 = vmatpush1.bf16.msra.mxu1 %v18271_v36  ;;  %13685 = vmatprep.subr.bf16.mxu0 %v18276_v52  ;;  %v18334_v36 = vld [vmem:[%s20357_s1 + $0x280] ss:$16 sps:$4 sm:$0xff]   ;;  %v21921_v52 = vld [vmem:[%s20355_s26 + $0x8] sm:$0xff]  ;;  %s22704_s26 = sld [smem:[#allocation50_spill]] (!%p16831_p8) }
 0xc4f   : > { %14029 = vmatprep.subr.bf16.mxu1 %v18279_v39  ;;  %v18337_v39 = vld [vmem:[%s20357_s1 + $0x288] ss:$16 sps:$4 sm:$0xff]  }
 0xc51   : > { %13686 = vmatpush1.bf16.msra.mxu0 %v18274_v41  ;;  %v18342_v41 = vld [vmem:[%s20357_s1 + $0x2a4] ss:$16 sps:$4 sm:$0xff]  }
 0xc52   : > { %14030 = vmatpush1.bf16.msra.mxu1 %v18277_v55  ;;  %13687 = vmatprep.subr.bf16.mxu0 %v18282_v56  ;;  %v18345_v55 = vld [vmem:[%s20357_s1 + $0x2ac] ss:$16 sps:$4 sm:$0xff]   ;;  %v7230_v56 = vrot.slane %v21921_v52, %v20802_v4 }
 0xc53   : > { %14031 = vmatprep.subr.bf16.mxu1 %v18285_v57  ;;  %v7238_v57 = vrot.slane %v21921_v52, %v20818_v25 }
 0xc55   : > { %13688 = vmatpush1.bf16.msra.mxu0 %v18280_v35  ;;  %v7234_v35 = vrot.slane %v21921_v52, %v20810_v10 }
 0xc56   : > { %14032 = vmatpush1.bf16.msra.mxu1 %v18283_v44  ;;  %13689 = vmatprep.subr.bf16.mxu0 %v18288_v45  ;;  %v18340_v44 = vld [vmem:[%s20357_s1 + $0x2a0] ss:$16 sps:$4 sm:$0xff]   ;;  %v7242_v45 = vrot.slane %v21921_v52, %v20831_v38 }
 0xc57   : > { %14033 = vmatprep.subr.bf16.mxu1 %v18291_v49  ;;  %v18343_v49 = vld [vmem:[%s20357_s1 + $0x2a8] ss:$16 sps:$4 sm:$0xff]  }
 0xc59   : > { %13690 = vmatpush1.bf16.msra.mxu0 %v18286_v50  ;;  %v18348_v50 = vld [vmem:[%s20357_s1 + $0x2c4] ss:$16 sps:$4 sm:$0xff]  }
 0xc5a   : > { %14034 = vmatpush1.bf16.msra.mxu1 %v18289_v47  ;;  %13691 = vmatprep.subr.bf16.mxu0 %v18294_v60  ;;  %v18351_v60 = vld [vmem:[%s20357_s1 + $0x2cc] ss:$16 sps:$4 sm:$0xff]  }
 0xc5b   : > { %14035 = vmatprep.subr.bf16.mxu1 %v18297_v61 }
 0xc5d   : > { %13692 = vmatpush1.bf16.msra.mxu0 %v18292_v14 }
 0xc5e   : > { %14036 = vmatpush1.bf16.msra.mxu1 %v18295_v13  ;;  %13693 = vmatprep.subr.bf16.mxu0 %v18300_v62 }
 0xc5f   : > { %14037 = vmatprep.subr.bf16.mxu1 %v18303_v0 }
 0xc61   : > { %13694 = vmatpush1.bf16.msra.mxu0 %v18298_v3 }
 0xc62   : > { %14038 = vmatpush1.bf16.msra.mxu1 %v18301_v5  ;;  %13695 = vmatprep.subr.bf16.mxu0 %v18306_v54  ;;  %v18346_v54 = vld [vmem:[%s20357_s1 + $0x2c0] ss:$16 sps:$4 sm:$0xff]  }
 0xc63   : > { %14039 = vmatprep.subr.bf16.mxu1 %v18309_v20 }
 0xc65   : > { %13696 = vmatpush1.bf16.msra.mxu0 %v18304_v24 }
 0xc66   : > { %14040 = vmatpush1.bf16.msra.mxu1 %v18307_v19  ;;  %13708 = vmatprep.subr.bf16.mxu0 %v18312_v53 }
 0xc67   : > { %14052 = vmatprep.subr.bf16.mxu1 %v18315_v17  ;;  %v18349_v17 = vld [vmem:[%s20357_s1 + $0x2c8] ss:$16 sps:$4 sm:$0xff]  }
 0xc68   : > { %13698 = vmatmul.mubr.bf16.vlgmr.msra.gmra.mrb[48].mxu0 %v21641_v26 }
 0xc69   : > { %14042 = vmatmul.mubr.bf16.vlgmr.msra.gmra.mrb[48].mxu1 %v21641_v26  ;;  %13709 = vmatpush1.bf16.msra.mxu0 %v18310_v18  ;;  %v18322_v26 = vld [vmem:[%s20357_s1 + $0x240] ss:$16 sps:$4 sm:$0xff]   ;;  %v18354_v18 = vld [vmem:[%s20357_s1 + $0x2e4] ss:$16 sps:$4 sm:$0xff]  }
 0xc6a   : > { %13740 = vmatprep.mubr.bf16.mxu0 %v21647_v15  ;;  %14053 = vmatpush1.bf16.msra.mxu1 %v18313_v31 }
 0xc6b   : > { %14084 = vmatprep.mubr.bf16.mxu1 %v21647_v15  ;;  %13710 = vmatprep.subr.bf16.mxu0 %v18318_v28  ;;  %v18328_v15 = vld [vmem:[%s20357_s1 + $0x260] ss:$16 sps:$4 sm:$0xff]  }
 0xc6c   : > { %14054 = vmatprep.subr.bf16.mxu1 %v18321_v29 }
 0xc6d   : > { %13711 = vmatpush1.bf16.msra.mxu0 %v18316_v21  ;;  %v18357_v21 = vld [vmem:[%s20357_s1 + $0x2ec] ss:$16 sps:$4 sm:$0xff]  }
 0xc6e   : > { %14055 = vmatpush1.bf16.msra.mxu1 %v18319_v23  ;;  %13712 = vmatprep.subr.bf16.mxu0 %v18324_v58 }
 0xc6f   : > { %14056 = vmatprep.subr.bf16.mxu1 %v18327_v48 }
 0xc71   : > { %13713 = vmatpush1.bf16.msra.mxu0 %v18322_v26 }
 0xc72   : > { %14057 = vmatpush1.bf16.msra.mxu1 %v18325_v37  ;;  %13714 = vmatprep.subr.bf16.mxu0 %v18330_v12 }
 0xc73   : > { %14058 = vmatprep.subr.bf16.mxu1 %v18333_v43 }
 0xc75   : > { %13715 = vmatpush1.bf16.msra.mxu0 %v18328_v15  ;;  %v18352_v15 = vld [vmem:[%s20357_s1 + $0x2e0] ss:$16 sps:$4 sm:$0xff]  }
 0xc76   : > { %14059 = vmatpush1.bf16.msra.mxu1 %v18331_v1  ;;  %13716 = vmatprep.subr.bf16.mxu0 %v18336_v33 }
 0xc77   : > { %14060 = vmatprep.subr.bf16.mxu1 %v18339_v51 }
 0xc79   : > { %13717 = vmatpush1.bf16.msra.mxu0 %v18334_v36  ;;  %v18355_v36 = vld [vmem:[%s20357_s1 + $0x2e8] ss:$16 sps:$4 sm:$0xff]  }
 0xc7a   : > { %14061 = vmatpush1.bf16.msra.mxu1 %v18337_v39  ;;  %13718 = vmatprep.subr.bf16.mxu0 %v18342_v41  ;;  %v18360_v39 = vld [vmem:[%s20357_s1 + $0x304] ss:$16 sps:$4 sm:$0xff]  }
 0xc7b   : > { %v10256_v47 = vpop.f32.mrb[40].mxu0  ;;  %14062 = vmatprep.subr.bf16.mxu1 %v18345_v55 }
 0xc7c   : > { %v17082_v61 = vadd.f32 %v10256_v47, %v7230_v56  ;;  %v10342_v14 = vpop.f32.mrb[40].mxu1  ;;  %v10258_v13 = vpop.f32.mrb[41].mxu0  ;;  %v18367_v47 = vld [vmem:[%s20357_s1 + $0x328] ss:$16 sps:$4 sm:$0xff]  }
 0xc7d   : > { %v17086_v62 = vadd.f32 %v10342_v14, %v7238_v57  ;;  %v17083_v0 = vadd.f32 %v10258_v13, %v7234_v35  ;;  %v10344_v3 = vpop.f32.mrb[41].mxu1  ;;  %v10260_v5 = vpop.f32.mrb[42].mxu0  ;;  %13719 = vmatpush1.bf16.msra.mxu0 %v18340_v44  ;;  %v18361_v44 = vld [vmem:[%s20357_s1 + $0x308] ss:$16 sps:$4 sm:$0xff]   ;;  %v18370_v14 = vld [vmem:[%s20357_s1 + $0x340] ss:$16 sps:$4 sm:$0xff]  }
 0xc7e   : > { %v17087_v20 = vadd.f32 %v10344_v3, %v7242_v45  ;;  %v17084_v24 = vadd.f32 %v10260_v5, %v7230_v56  ;;  %v10346_v19 = vpop.f32.mrb[42].mxu1  ;;  %14063 = vmatpush1.bf16.msra.mxu1 %v18343_v49  ;;  %v10262_v53 = vpop.f32.mrb[43].mxu0  ;;  %13720 = vmatprep.subr.bf16.mxu0 %v18348_v50  ;;  %v10531_v23 = vmax.f32 %v17082_v61, 0.0  ;;  %v18363_v56 = vld [vmem:[%s20357_s1 + $0x30c] ss:$16 sps:$4 sm:$0xff]  }
 0xc7f   : > { %v17088_v31 = vadd.f32 %v10346_v19, %v7238_v57  ;;  %v17085_v28 = vadd.f32 %v10262_v53, %v7234_v35  ;;  %v10348_v29 = vpop.f32.mrb[43].mxu1  ;;  %14064 = vmatprep.subr.bf16.mxu1 %v18351_v60  ;;  %v10533_v26 = vmax.f32 %v17086_v62, 0.0  ;;  %v10532_v37 = vmax.f32 %v17083_v0, 0.0  ;;  %v18358_v35 = vld [vmem:[%s20357_s1 + $0x300] ss:$16 sps:$4 sm:$0xff]  }
 0xc80   : > { %v10547_v58 = vmax.f32 %v17084_v24, 0.0  ;;  %v17089_v48 = vadd.f32 %v10348_v29, %v7242_v45  ;;  %v10534_v1 = vmax.f32 %v17087_v20, 0.0  ;;  %v18366_v45 = vld [vmem:[%s20357_s1 + $0x324] ss:$16 sps:$4 sm:$0xff]   ;;  %v18369_v49 = vld [vmem:[%s20357_s1 + $0x32c] ss:$16 sps:$4 sm:$0xff]  }
 0xc81   : > { %v10549_v12 = vmax.f32 %v17088_v31, 0.0  ;;  %v10548_v43 = vmax.f32 %v17085_v28, 0.0  ;;  %13721 = vmatpush1.bf16.msra.mxu0 %v18346_v54  ;;  %v18364_v50 = vld [vmem:[%s20357_s1 + $0x320] ss:$16 sps:$4 sm:$0xff]   ;;  %v18372_v60 = vld [vmem:[%s20357_s1 + $0x344] ss:$16 sps:$4 sm:$0xff]  }
 0xc82   : > { %v21943_v33 = vpack.c.bf16 %v10547_v58, %v10531_v23  ;;  %v10550_v51 = vmax.f32 %v17089_v48, 0.0  ;;  %14065 = vmatpush1.bf16.msra.mxu1 %v18349_v17  ;;  %13722 = vmatprep.subr.bf16.mxu0 %v18354_v18  ;;  %v18375_v61 = vld [vmem:[%s20357_s1 + $0x34c] ss:$16 sps:$4 sm:$0xff]   ;;  %v18373_v13 = vld [vmem:[%s20357_s1 + $0x348] ss:$16 sps:$4 sm:$0xff]  }
 0xc83   : > { %v21947_v41 = vpack.c.bf16 %v10549_v12, %v10533_v26  ;;  %v21949_v55 = vpack.c.bf16 %v10548_v43, %v10532_v37  ;;  %14066 = vmatprep.subr.bf16.mxu1 %v18357_v21  ;;  %v18378_v62 = vld [vmem:[%s20357_s1 + $0x364] ss:$16 sps:$4 sm:$0xff]   ;;  %v18381_v0 = vld [vmem:[%s20357_s1 + $0x36c] ss:$16 sps:$4 sm:$0xff]   ;;  %v18376_v3 = vld [vmem:[%s20357_s1 + $0x360] ss:$16 sps:$4 sm:$0xff]  }
 0xc84   : > { %v21952_v57 = vpack.c.bf16 %v10550_v51, %v10534_v1  ;;  %v18379_v5 = vld [vmem:[%s20357_s1 + $0x368] ss:$16 sps:$4 sm:$0xff]   ;;  %v18384_v54 = vld [vmem:[%s20357_s1 + $0x384] ss:$16 sps:$4 sm:$0xff]   ;;  %v18387_v20 = vld [vmem:[%s20357_s1 + $0x38c] ss:$16 sps:$4 sm:$0xff]  }
 0xc85   : > { %13723 = vmatpush1.bf16.msra.mxu0 %v18352_v15  ;;  %v18382_v24 = vld [vmem:[%s20357_s1 + $0x380] ss:$16 sps:$4 sm:$0xff]   ;;  %v18385_v19 = vld [vmem:[%s20357_s1 + $0x388] ss:$16 sps:$4 sm:$0xff]   ;;  %v18390_v53 = vld [vmem:[%s20357_s1 + $0x3a4] ss:$16 sps:$4 sm:$0xff]  }
 0xc86   : > { %14067 = vmatpush1.bf16.msra.mxu1 %v18355_v36  ;;  %13724 = vmatprep.subr.bf16.mxu0 %v18360_v39  ;;  %v18393_v17 = vld [vmem:[%s20357_s1 + $0x3ac] ss:$16 sps:$4 sm:$0xff]   ;;  %v18388_v18 = vld [vmem:[%s20357_s1 + $0x3a0] ss:$16 sps:$4 sm:$0xff]   ;;  %v18391_v31 = vld [vmem:[%s20357_s1 + $0x3a8] ss:$16 sps:$4 sm:$0xff]  }
 0xc87   : > { %14068 = vmatprep.subr.bf16.mxu1 %v18363_v56  ;;  %v18396_v28 = vld [vmem:[%s20357_s1 + $0x3c4] ss:$16 sps:$4 sm:$0xff]   ;;  %v18399_v29 = vld [vmem:[%s20357_s1 + $0x3cc] ss:$16 sps:$4 sm:$0xff]   ;;  %v18394_v21 = vld [vmem:[%s20357_s1 + $0x3c0] ss:$16 sps:$4 sm:$0xff]  }
 0xc88   : > { %v18397_v23 = vld [vmem:[%s20357_s1 + $0x3c8] ss:$16 sps:$4 sm:$0xff]   ;;  %v18402_v58 = vld [vmem:[%s20357_s1 + $0x3e4] ss:$16 sps:$4 sm:$0xff]   ;;  %v18405_v48 = vld [vmem:[%s20357_s1 + $0x3ec] ss:$16 sps:$4 sm:$0xff]  }
 0xc89   : > { %13725 = vmatpush1.bf16.msra.mxu0 %v18358_v35  ;;  %v18400_v26 = vld [vmem:[%s20357_s1 + $0x3e0] ss:$16 sps:$4 sm:$0xff]   ;;  %v18403_v37 = vld [vmem:[%s20357_s1 + $0x3e8] ss:$16 sps:$4 sm:$0xff]   ;;  %v18408_v12 = vld [vmem:[%s20357_s1 + $0x404] ss:$16 sps:$4 sm:$0xff]  }
 0xc8a   : > { %14069 = vmatpush1.bf16.msra.mxu1 %v18361_v44  ;;  %13726 = vmatprep.subr.bf16.mxu0 %v18366_v45  ;;  %v18411_v43 = vld [vmem:[%s20357_s1 + $0x40c] ss:$16 sps:$4 sm:$0xff]   ;;  %v18406_v15 = vld [vmem:[%s20357_s1 + $0x400] ss:$16 sps:$4 sm:$0xff]   ;;  %v18409_v1 = vld [vmem:[%s20357_s1 + $0x408] ss:$16 sps:$4 sm:$0xff]  }
 0xc8b   : > { %14070 = vmatprep.subr.bf16.mxu1 %v18369_v49  ;;  %v18414_v51 = vld [vmem:[%s20357_s1 + $0x424] ss:$16 sps:$4 sm:$0xff]   ;;  %v18417_v36 = vld [vmem:[%s20357_s1 + $0x42c] ss:$16 sps:$4 sm:$0xff]   ;;  %v18412_v39 = vld [vmem:[%s20357_s1 + $0x420] ss:$16 sps:$4 sm:$0xff]  }
 0xc8c   : > { %v18415_v56 = vld [vmem:[%s20357_s1 + $0x428] ss:$16 sps:$4 sm:$0xff]   ;;  %v18420_v35 = vld [vmem:[%s20357_s1 + $0x444] ss:$16 sps:$4 sm:$0xff]   ;;  %v18423_v44 = vld [vmem:[%s20357_s1 + $0x44c] ss:$16 sps:$4 sm:$0xff]  }
 0xc8d   : > { %13727 = vmatpush1.bf16.msra.mxu0 %v18364_v50  ;;  %v18421_v45 = vld [vmem:[%s20357_s1 + $0x448] ss:$16 sps:$4 sm:$0xff]   ;;  %v18426_v49 = vld [vmem:[%s20357_s1 + $0x464] ss:$16 sps:$4 sm:$0xff]   ;;  %v18429_v50 = vld [vmem:[%s20357_s1 + $0x46c] ss:$16 sps:$4 sm:$0xff]  }
 0xc8e   : > { %14071 = vmatpush1.bf16.msra.mxu1 %v18367_v47  ;;  %13728 = vmatprep.subr.bf16.mxu0 %v18372_v60  ;;  %v18427_v47 = vld [vmem:[%s20357_s1 + $0x468] ss:$16 sps:$4 sm:$0xff]   ;;  %v18432_v60 = vld [vmem:[%s20357_s1 + $0x484] ss:$16 sps:$4 sm:$0xff]  }
 0xc8f   : > { %14072 = vmatprep.subr.bf16.mxu1 %v18375_v61  ;;  %v18435_v61 = vld [vmem:[%s20357_s1 + $0x48c] ss:$16 sps:$4 sm:$0xff]  }
 0xc91   : > { %13729 = vmatpush1.bf16.msra.mxu0 %v18370_v14  ;;  %v18430_v14 = vld [vmem:[%s20357_s1 + $0x480] ss:$16 sps:$4 sm:$0xff]  }
 0xc92   : > { %14073 = vmatpush1.bf16.msra.mxu1 %v18373_v13  ;;  %13730 = vmatprep.subr.bf16.mxu0 %v18378_v62  ;;  %v18433_v13 = vld [vmem:[%s20357_s1 + $0x488] ss:$16 sps:$4 sm:$0xff]   ;;  %v18438_v62 = vld [vmem:[%s20357_s1 + $0x4a4] ss:$16 sps:$4 sm:$0xff]  }
 0xc93   : > { %14074 = vmatprep.subr.bf16.mxu1 %v18381_v0  ;;  %v18441_v0 = vld [vmem:[%s20357_s1 + $0x4ac] ss:$16 sps:$4 sm:$0xff]  }
 0xc95   : > { %13731 = vmatpush1.bf16.msra.mxu0 %v18376_v3  ;;  %v18436_v3 = vld [vmem:[%s20357_s1 + $0x4a0] ss:$16 sps:$4 sm:$0xff]  }
 0xc96   : > { %14075 = vmatpush1.bf16.msra.mxu1 %v18379_v5  ;;  %13732 = vmatprep.subr.bf16.mxu0 %v18384_v54  ;;  %v18439_v5 = vld [vmem:[%s20357_s1 + $0x4a8] ss:$16 sps:$4 sm:$0xff]   ;;  %v18444_v54 = vld [vmem:[%s20357_s1 + $0x4c4] ss:$16 sps:$4 sm:$0xff]  }
 0xc97   : > { %14076 = vmatprep.subr.bf16.mxu1 %v18387_v20  ;;  %v18447_v20 = vld [vmem:[%s20357_s1 + $0x4cc] ss:$16 sps:$4 sm:$0xff]  }
 0xc99   : > { %13733 = vmatpush1.bf16.msra.mxu0 %v18382_v24  ;;  %v18442_v24 = vld [vmem:[%s20357_s1 + $0x4c0] ss:$16 sps:$4 sm:$0xff]  }
 0xc9a   : > { %14077 = vmatpush1.bf16.msra.mxu1 %v18385_v19  ;;  %13734 = vmatprep.subr.bf16.mxu0 %v18390_v53  ;;  %v18445_v19 = vld [vmem:[%s20357_s1 + $0x4c8] ss:$16 sps:$4 sm:$0xff]   ;;  %v18450_v53 = vld [vmem:[%s20357_s1 + $0x4e4] ss:$16 sps:$4 sm:$0xff]  }
 0xc9b   : > { %14078 = vmatprep.subr.bf16.mxu1 %v18393_v17  ;;  %v18453_v17 = vld [vmem:[%s20357_s1 + $0x4ec] ss:$16 sps:$4 sm:$0xff]  }
 0xc9d   : > { %13735 = vmatpush1.bf16.msra.mxu0 %v18388_v18  ;;  %v18448_v18 = vld [vmem:[%s20357_s1 + $0x4e0] ss:$16 sps:$4 sm:$0xff]  }
 0xc9e   : > { %14079 = vmatpush1.bf16.msra.mxu1 %v18391_v31  ;;  %13736 = vmatprep.subr.bf16.mxu0 %v18396_v28  ;;  %v18451_v31 = vld [vmem:[%s20357_s1 + $0x4e8] ss:$16 sps:$4 sm:$0xff]   ;;  %v18456_v28 = vld [vmem:[%s20357_s1 + $0x504] ss:$16 sps:$4 sm:$0xff]  }
 0xc9f   : > { %14080 = vmatprep.subr.bf16.mxu1 %v18399_v29  ;;  %v18459_v29 = vld [vmem:[%s20357_s1 + $0x50c] ss:$16 sps:$4 sm:$0xff]  }
 0xca1   : > { %13737 = vmatpush1.bf16.msra.mxu0 %v18394_v21  ;;  %v18454_v21 = vld [vmem:[%s20357_s1 + $0x500] ss:$16 sps:$4 sm:$0xff]  }
 0xca2   : > { %14081 = vmatpush1.bf16.msra.mxu1 %v18397_v23  ;;  %13738 = vmatprep.subr.bf16.mxu0 %v18402_v58  ;;  %v18457_v23 = vld [vmem:[%s20357_s1 + $0x508] ss:$16 sps:$4 sm:$0xff]   ;;  %v18462_v58 = vld [vmem:[%s20357_s1 + $0x524] ss:$16 sps:$4 sm:$0xff]  }
 0xca3   : > { %14082 = vmatprep.subr.bf16.mxu1 %v18405_v48  ;;  %v18465_v48 = vld [vmem:[%s20357_s1 + $0x52c] ss:$16 sps:$4 sm:$0xff]  }
 0xca5   : > { %13739 = vmatpush1.bf16.msra.mxu0 %v18400_v26  ;;  %v18460_v26 = vld [vmem:[%s20357_s1 + $0x520] ss:$16 sps:$4 sm:$0xff]  }
 0xca6   : > { %14083 = vmatpush1.bf16.msra.mxu1 %v18403_v37  ;;  %13751 = vmatprep.subr.bf16.mxu0 %v18408_v12  ;;  %v18463_v37 = vld [vmem:[%s20357_s1 + $0x528] ss:$16 sps:$4 sm:$0xff]   ;;  %v18468_v12 = vld [vmem:[%s20357_s1 + $0x544] ss:$16 sps:$4 sm:$0xff]  }
 0xca7   : > { %14095 = vmatprep.subr.bf16.mxu1 %v18411_v43  ;;  %v18471_v43 = vld [vmem:[%s20357_s1 + $0x54c] ss:$16 sps:$4 sm:$0xff]  }
 0xca8   : > { %13741 = vmatmul.mubr.bf16.vlgmr.msra.gmra.mrb[48].mxu0 %v21643_v8 }
 0xca9   : > { %14085 = vmatmul.mubr.bf16.vlgmr.msra.gmra.mrb[48].mxu1 %v21643_v8  ;;  %13752 = vmatpush1.bf16.msra.mxu0 %v18406_v15  ;;  %v18418_v8 = vld [vmem:[%s20357_s1 + $0x440] ss:$16 sps:$4 sm:$0xff]  }
 0xcaa   : > { %13783 = vmatprep.mubr.bf16.mxu0 %v21797_v40  ;;  %14096 = vmatpush1.bf16.msra.mxu1 %v18409_v1  ;;  %v18466_v15 = vld [vmem:[%s20357_s1 + $0x540] ss:$16 sps:$4 sm:$0xff]   ;;  %v18469_v1 = vld [vmem:[%s20357_s1 + $0x548] ss:$16 sps:$4 sm:$0xff]  }
 0xcab   : > { %14127 = vmatprep.mubr.bf16.mxu1 %v21797_v40  ;;  %13753 = vmatprep.subr.bf16.mxu0 %v18414_v51  ;;  %v18424_v40 = vld [vmem:[%s20357_s1 + $0x460] ss:$16 sps:$4 sm:$0xff]   ;;  %v18474_v51 = vld [vmem:[%s20357_s1 + $0x564] ss:$16 sps:$4 sm:$0xff]  }
 0xcac   : > { %14097 = vmatprep.subr.bf16.mxu1 %v18417_v36  ;;  %v18477_v36 = vld [vmem:[%s20357_s1 + $0x56c] ss:$16 sps:$4 sm:$0xff]  }
 0xcad   : > { %13754 = vmatpush1.bf16.msra.mxu0 %v18412_v39  ;;  %v18472_v39 = vld [vmem:[%s20357_s1 + $0x560] ss:$16 sps:$4 sm:$0xff]  }
 0xcae   : > { %14098 = vmatpush1.bf16.msra.mxu1 %v18415_v56  ;;  %13755 = vmatprep.subr.bf16.mxu0 %v18420_v35  ;;  %v18475_v56 = vld [vmem:[%s20357_s1 + $0x568] ss:$16 sps:$4 sm:$0xff]   ;;  %v18480_v35 = vld [vmem:[%s20357_s1 + $0x584] ss:$16 sps:$4 sm:$0xff]  }
 0xcaf   : > { %14099 = vmatprep.subr.bf16.mxu1 %v18423_v44  ;;  %v18483_v44 = vld [vmem:[%s20357_s1 + $0x58c] ss:$16 sps:$4 sm:$0xff]  }
 0xcb1   : > { %13756 = vmatpush1.bf16.msra.mxu0 %v18418_v8  ;;  %v18478_v8 = vld [vmem:[%s20357_s1 + $0x580] ss:$16 sps:$4 sm:$0xff]  }
 0xcb2   : > { %14100 = vmatpush1.bf16.msra.mxu1 %v18421_v45  ;;  %13757 = vmatprep.subr.bf16.mxu0 %v18426_v49  ;;  %v18481_v45 = vld [vmem:[%s20357_s1 + $0x588] ss:$16 sps:$4 sm:$0xff]   ;;  %v18486_v49 = vld [vmem:[%s20357_s1 + $0x5a4] ss:$16 sps:$4 sm:$0xff]  }
 0xcb3   : > { %14101 = vmatprep.subr.bf16.mxu1 %v18429_v50  ;;  %v18489_v50 = vld [vmem:[%s20357_s1 + $0x5ac] ss:$16 sps:$4 sm:$0xff]  }
 0xcb5   : > { %13758 = vmatpush1.bf16.msra.mxu0 %v18424_v40  ;;  %v18484_v40 = vld [vmem:[%s20357_s1 + $0x5a0] ss:$16 sps:$4 sm:$0xff]  }
 0xcb6   : > { %14102 = vmatpush1.bf16.msra.mxu1 %v18427_v47  ;;  %13759 = vmatprep.subr.bf16.mxu0 %v18432_v60  ;;  %v18487_v47 = vld [vmem:[%s20357_s1 + $0x5a8] ss:$16 sps:$4 sm:$0xff]   ;;  %v18492_v60 = vld [vmem:[%s20357_s1 + $0x5c4] ss:$16 sps:$4 sm:$0xff]  }
 0xcb7   : > { %14103 = vmatprep.subr.bf16.mxu1 %v18435_v61  ;;  %v18495_v61 = vld [vmem:[%s20357_s1 + $0x5cc] ss:$16 sps:$4 sm:$0xff]  }
 0xcb9   : > { %13760 = vmatpush1.bf16.msra.mxu0 %v18430_v14  ;;  %v18490_v14 = vld [vmem:[%s20357_s1 + $0x5c0] ss:$16 sps:$4 sm:$0xff]  }
 0xcba   : > { %14104 = vmatpush1.bf16.msra.mxu1 %v18433_v13  ;;  %13761 = vmatprep.subr.bf16.mxu0 %v18438_v62  ;;  %v18493_v13 = vld [vmem:[%s20357_s1 + $0x5c8] ss:$16 sps:$4 sm:$0xff]   ;;  %v18498_v62 = vld [vmem:[%s20357_s1 + $0x5e4] ss:$16 sps:$4 sm:$0xff]  }
 0xcbb   : > { %14105 = vmatprep.subr.bf16.mxu1 %v18441_v0  ;;  %v18501_v0 = vld [vmem:[%s20357_s1 + $0x5ec] ss:$16 sps:$4 sm:$0xff]  }
 0xcbd   : > { %13762 = vmatpush1.bf16.msra.mxu0 %v18436_v3  ;;  %v18496_v3 = vld [vmem:[%s20357_s1 + $0x5e0] ss:$16 sps:$4 sm:$0xff]  }
 0xcbe   : > { %14106 = vmatpush1.bf16.msra.mxu1 %v18439_v5  ;;  %13763 = vmatprep.subr.bf16.mxu0 %v18444_v54  ;;  %v18499_v5 = vld [vmem:[%s20357_s1 + $0x5e8] ss:$16 sps:$4 sm:$0xff]   ;;  %v18504_v54 = vld [vmem:[%s20357_s1 + $0x604] ss:$16 sps:$4 sm:$0xff]  }
 0xcbf   : > { %14107 = vmatprep.subr.bf16.mxu1 %v18447_v20  ;;  %v18507_v20 = vld [vmem:[%s20357_s1 + $0x60c] ss:$16 sps:$4 sm:$0xff]  }
 0xcc1   : > { %13764 = vmatpush1.bf16.msra.mxu0 %v18442_v24  ;;  %v18502_v24 = vld [vmem:[%s20357_s1 + $0x600] ss:$16 sps:$4 sm:$0xff]  }
 0xcc2   : > { %14108 = vmatpush1.bf16.msra.mxu1 %v18445_v19  ;;  %13765 = vmatprep.subr.bf16.mxu0 %v18450_v53  ;;  %v18505_v19 = vld [vmem:[%s20357_s1 + $0x608] ss:$16 sps:$4 sm:$0xff]   ;;  %v18510_v53 = vld [vmem:[%s20357_s1 + $0x624] ss:$16 sps:$4 sm:$0xff]  }
 0xcc3   : > { %14109 = vmatprep.subr.bf16.mxu1 %v18453_v17  ;;  %v18513_v17 = vld [vmem:[%s20357_s1 + $0x62c] ss:$16 sps:$4 sm:$0xff]  }
 0xcc5   : > { %13766 = vmatpush1.bf16.msra.mxu0 %v18448_v18  ;;  %v18508_v18 = vld [vmem:[%s20357_s1 + $0x620] ss:$16 sps:$4 sm:$0xff]  }
 0xcc6   : > { %14110 = vmatpush1.bf16.msra.mxu1 %v18451_v31  ;;  %13767 = vmatprep.subr.bf16.mxu0 %v18456_v28  ;;  %v18511_v31 = vld [vmem:[%s20357_s1 + $0x628] ss:$16 sps:$4 sm:$0xff]   ;;  %v18516_v28 = vld [vmem:[%s20357_s1 + $0x644] ss:$16 sps:$4 sm:$0xff]  }
 0xcc7   : > { %14111 = vmatprep.subr.bf16.mxu1 %v18459_v29  ;;  %v18519_v29 = vld [vmem:[%s20357_s1 + $0x64c] ss:$16 sps:$4 sm:$0xff]  }
 0xcc9   : > { %13768 = vmatpush1.bf16.msra.mxu0 %v18454_v21  ;;  %v18517_v21 = vld [vmem:[%s20357_s1 + $0x648] ss:$16 sps:$4 sm:$0xff]  }
 0xcca   : > { %14112 = vmatpush1.bf16.msra.mxu1 %v18457_v23  ;;  %13769 = vmatprep.subr.bf16.mxu0 %v18462_v58  ;;  %v18522_v23 = vld [vmem:[%s20357_s1 + $0x664] ss:$16 sps:$4 sm:$0xff]   ;;  %v18525_v58 = vld [vmem:[%s20357_s1 + $0x66c] ss:$16 sps:$4 sm:$0xff]  }
 0xccb   : > { %14113 = vmatprep.subr.bf16.mxu1 %v18465_v48  ;;  %v18523_v48 = vld [vmem:[%s20357_s1 + $0x668] ss:$16 sps:$4 sm:$0xff]  }
 0xccd   : > { %13770 = vmatpush1.bf16.msra.mxu0 %v18460_v26  ;;  %v18528_v26 = vld [vmem:[%s20357_s1 + $0x684] ss:$16 sps:$4 sm:$0xff]  }
 0xcce   : > { %14114 = vmatpush1.bf16.msra.mxu1 %v18463_v37  ;;  %13771 = vmatprep.subr.bf16.mxu0 %v18468_v12  ;;  %v18531_v37 = vld [vmem:[%s20357_s1 + $0x68c] ss:$16 sps:$4 sm:$0xff]   ;;  %v18526_v12 = vld [vmem:[%s20357_s1 + $0x680] ss:$16 sps:$4 sm:$0xff]  }
 0xccf   : > { %14115 = vmatprep.subr.bf16.mxu1 %v18471_v43  ;;  %v18529_v43 = vld [vmem:[%s20357_s1 + $0x688] ss:$16 sps:$4 sm:$0xff]  }
 0xcd1   : > { %13772 = vmatpush1.bf16.msra.mxu0 %v18466_v15  ;;  %v18534_v15 = vld [vmem:[%s20357_s1 + $0x6a4] ss:$16 sps:$4 sm:$0xff]  }
 0xcd2   : > { %14116 = vmatpush1.bf16.msra.mxu1 %v18469_v1  ;;  %13773 = vmatprep.subr.bf16.mxu0 %v18474_v51  ;;  %v18537_v1 = vld [vmem:[%s20357_s1 + $0x6ac] ss:$16 sps:$4 sm:$0xff]   ;;  %v7246_v51 = vrot.slane %v21921_v52, %v20797_v63 }
 0xcd3   : > { %14117 = vmatprep.subr.bf16.mxu1 %v18477_v36  ;;  %v7254_v36 = vrot.slane %v21921_v52, %v20812_v16 }
 0xcd5   : > { %13774 = vmatpush1.bf16.msra.mxu0 %v18472_v39  ;;  %v7250_v39 = vrot.slane %v21921_v52, %v20805_v6 }
 0xcd6   : > { %14118 = vmatpush1.bf16.msra.mxu1 %v18475_v56  ;;  %13775 = vmatprep.subr.bf16.mxu0 %v18480_v35  ;;  %v18532_v56 = vld [vmem:[%s20357_s1 + $0x6a0] ss:$16 sps:$4 sm:$0xff]   ;;  %v7258_v35 = vrot.slane %v21921_v52, %v20824_v30 }
 0xcd7   : > { %14119 = vmatprep.subr.bf16.mxu1 %v18483_v44  ;;  %v18535_v44 = vld [vmem:[%s20357_s1 + $0x6a8] ss:$16 sps:$4 sm:$0xff]  }
 0xcd9   : > { %13776 = vmatpush1.bf16.msra.mxu0 %v18478_v8  ;;  %v18540_v8 = vld [vmem:[%s20357_s1 + $0x6c4] ss:$16 sps:$4 sm:$0xff]  }
 0xcda   : > { %14120 = vmatpush1.bf16.msra.mxu1 %v18481_v45  ;;  %13777 = vmatprep.subr.bf16.mxu0 %v18486_v49  ;;  %v18543_v49 = vld [vmem:[%s20357_s1 + $0x6cc] ss:$16 sps:$4 sm:$0xff]  }
 0xcdb   : > { %14121 = vmatprep.subr.bf16.mxu1 %v18489_v50 }
 0xcdd   : > { %13778 = vmatpush1.bf16.msra.mxu0 %v18484_v40 }
 0xcde   : > { %14122 = vmatpush1.bf16.msra.mxu1 %v18487_v47  ;;  %13779 = vmatprep.subr.bf16.mxu0 %v18492_v60 }
 0xcdf   : > { %14123 = vmatprep.subr.bf16.mxu1 %v18495_v61  ;;  %v18538_v61 = vld [vmem:[%s20357_s1 + $0x6c0] ss:$16 sps:$4 sm:$0xff]  }
 0xce1   : > { %13780 = vmatpush1.bf16.msra.mxu0 %v18490_v14 }
 0xce2   : > { %14124 = vmatpush1.bf16.msra.mxu1 %v18493_v13  ;;  %13781 = vmatprep.subr.bf16.mxu0 %v18498_v62  ;;  %v18541_v62 = vld [vmem:[%s20357_s1 + $0x6c8] ss:$16 sps:$4 sm:$0xff]  }
 0xce3   : > { %14125 = vmatprep.subr.bf16.mxu1 %v18501_v0  ;;  %v18546_v0 = vld [vmem:[%s20357_s1 + $0x6e4] ss:$16 sps:$4 sm:$0xff]  }
 0xce5   : > { %13782 = vmatpush1.bf16.msra.mxu0 %v18496_v3 }
 0xce6   : > { %14126 = vmatpush1.bf16.msra.mxu1 %v18499_v5  ;;  %13794 = vmatprep.subr.bf16.mxu0 %v18504_v54 }
 0xce7   : > { %14138 = vmatprep.subr.bf16.mxu1 %v18507_v20  ;;  %v18549_v20 = vld [vmem:[%s20357_s1 + $0x6ec] ss:$16 sps:$4 sm:$0xff]  }
 0xce8   : > { %13784 = vmatmul.mubr.bf16.vlgmr.msra.gmra.mrb[48].mxu0 %v21793_v11 }
 0xce9   : > { %14128 = vmatmul.mubr.bf16.vlgmr.msra.gmra.mrb[48].mxu1 %v21793_v11  ;;  %13795 = vmatpush1.bf16.msra.mxu0 %v18502_v24  ;;  %v18514_v11 = vld [vmem:[%s20357_s1 + $0x640] ss:$16 sps:$4 sm:$0xff]  }
 0xcea   : > { %13826 = vmatprep.mubr.bf16.mxu0 %v21801_v7  ;;  %14139 = vmatpush1.bf16.msra.mxu1 %v18505_v19 }
 0xceb   : > { %14170 = vmatprep.mubr.bf16.mxu1 %v21801_v7  ;;  %13796 = vmatprep.subr.bf16.mxu0 %v18510_v53  ;;  %v18520_v7 = vld [vmem:[%s20357_s1 + $0x660] ss:$16 sps:$4 sm:$0xff]  }
 0xcec   : > { %14140 = vmatprep.subr.bf16.mxu1 %v18513_v17 }
 0xced   : > { %13797 = vmatpush1.bf16.msra.mxu0 %v18508_v18 }
 0xcee   : > { %14141 = vmatpush1.bf16.msra.mxu1 %v18511_v31  ;;  %13798 = vmatprep.subr.bf16.mxu0 %v18516_v28 }
 0xcef   : > { %14142 = vmatprep.subr.bf16.mxu1 %v18519_v29  ;;  %v18544_v29 = vld [vmem:[%s20357_s1 + $0x6e0] ss:$16 sps:$4 sm:$0xff]  }
 0xcf1   : > { %13799 = vmatpush1.bf16.msra.mxu0 %v18514_v11 }
 0xcf2   : > { %14143 = vmatpush1.bf16.msra.mxu1 %v18517_v21  ;;  %13800 = vmatprep.subr.bf16.mxu0 %v18522_v23 }
 0xcf3   : > { %14144 = vmatprep.subr.bf16.mxu1 %v18525_v58  ;;  %v18547_v58 = vld [vmem:[%s20357_s1 + $0x6e8] ss:$16 sps:$4 sm:$0xff]  }
 0xcf5   : > { %13801 = vmatpush1.bf16.msra.mxu0 %v18520_v7  ;;  %v18552_v7 = vld [vmem:[%s20357_s1 + $0x704] ss:$16 sps:$4 sm:$0xff]  }
 0xcf6   : > { %14145 = vmatpush1.bf16.msra.mxu1 %v18523_v48  ;;  %13802 = vmatprep.subr.bf16.mxu0 %v18528_v26 }
 0xcf7   : > { %14146 = vmatprep.subr.bf16.mxu1 %v18531_v37  ;;  %v18555_v37 = vld [vmem:[%s20357_s1 + $0x70c] ss:$16 sps:$4 sm:$0xff]  }
 0xcf9   : > { %13803 = vmatpush1.bf16.msra.mxu0 %v18526_v12 }
 0xcfa   : > { %14147 = vmatpush1.bf16.msra.mxu1 %v18529_v43  ;;  %13804 = vmatprep.subr.bf16.mxu0 %v18534_v15  ;;  %v18550_v43 = vld [vmem:[%s20357_s1 + $0x700] ss:$16 sps:$4 sm:$0xff]   ;;  %v18553_v15 = vld [vmem:[%s20357_s1 + $0x708] ss:$16 sps:$4 sm:$0xff]  }
 0xcfb   : > { %v10428_v45 = vpop.f32.mrb[44].mxu0  ;;  %14148 = vmatprep.subr.bf16.mxu1 %v18537_v1  ;;  %v18558_v1 = vld [vmem:[%s20357_s1 + $0x724] ss:$16 sps:$4 sm:$0xff]  }
 0xcfc   : > { %v17090_v63 = vadd.f32 %v10428_v45, %v7246_v51  ;;  %v10514_v50 = vpop.f32.mrb[44].mxu1  ;;  %v10430_v16 = vpop.f32.mrb[45].mxu0  ;;  %v18570_v45 = vld [vmem:[%s20357_s1 + $0x764] ss:$16 sps:$4 sm:$0xff]  }
 0xcfd   : > { %v17094_v40 = vadd.f32 %v10514_v50, %v7254_v36  ;;  %v17091_v47 = vadd.f32 %v10430_v16, %v7250_v39  ;;  %v10516_v6 = vpop.f32.mrb[45].mxu1  ;;  %v10432_v60 = vpop.f32.mrb[46].mxu0  ;;  %13805 = vmatpush1.bf16.msra.mxu0 %v18532_v56  ;;  %v18564_v56 = vld [vmem:[%s20357_s1 + $0x744] ss:$16 sps:$4 sm:$0xff]   ;;  %v18571_v50 = vld [vmem:[%s20357_s1 + $0x768] ss:$16 sps:$4 sm:$0xff]  }
 0xcfe   : > { %v17095_v14 = vadd.f32 %v10516_v6, %v7258_v35  ;;  %v17092_v30 = vadd.f32 %v10432_v60, %v7246_v51  ;;  %v10518_v52 = vpop.f32.mrb[46].mxu1  ;;  %14149 = vmatpush1.bf16.msra.mxu1 %v18535_v44  ;;  %v10434_v13 = vpop.f32.mrb[47].mxu0  ;;  %13806 = vmatprep.subr.bf16.mxu0 %v18540_v8  ;;  %v10535_v24 = vmax.f32 %v17090_v63, 0.0  ;;  %v18561_v51 = vld [vmem:[%s20357_s1 + $0x72c] ss:$16 sps:$4 sm:$0xff]  }
 0xcff   : > { %v17096_v3 = vadd.f32 %v10518_v52, %v7254_v36  ;;  %v17093_v5 = vadd.f32 %v10434_v13, %v7250_v39  ;;  %v10520_v54 = vpop.f32.mrb[47].mxu1  ;;  %14150 = vmatprep.subr.bf16.mxu1 %v18543_v49  ;;  %v10537_v17 = vmax.f32 %v17094_v40, 0.0  ;;  %v10536_v18 = vmax.f32 %v17091_v47, 0.0  ;;  %v18556_v36 = vld [vmem:[%s20357_s1 + $0x720] ss:$16 sps:$4 sm:$0xff]  }
 0xd00   : > { %v10551_v19 = vmax.f32 %v17092_v30, 0.0  ;;  %v17097_v53 = vadd.f32 %v10520_v54, %v7258_v35  ;;  %v10538_v11 = vmax.f32 %v17095_v14, 0.0  ;;  %v18559_v39 = vld [vmem:[%s20357_s1 + $0x728] ss:$16 sps:$4 sm:$0xff]   ;;  %v18567_v35 = vld [vmem:[%s20357_s1 + $0x74c] ss:$16 sps:$4 sm:$0xff]  }
 0xd01   : > { %v10553_v31 = vmax.f32 %v17096_v3, 0.0  ;;  %v10552_v28 = vmax.f32 %v17093_v5, 0.0  ;;  %13807 = vmatpush1.bf16.msra.mxu0 %v18538_v61  ;;  %v18562_v44 = vld [vmem:[%s20357_s1 + $0x740] ss:$16 sps:$4 sm:$0xff]   ;;  %v18565_v8 = vld [vmem:[%s20357_s1 + $0x748] ss:$16 sps:$4 sm:$0xff]  }
 0xd02   : > { %v22095_v21 = vpack.c.bf16 %v10551_v19, %v10535_v24  ;;  %v10554_v23 = vmax.f32 %v17097_v53, 0.0  ;;  %14151 = vmatpush1.bf16.msra.mxu1 %v18541_v62  ;;  %13808 = vmatprep.subr.bf16.mxu0 %v18546_v0  ;;  %v18573_v49 = vld [vmem:[%s20357_s1 + $0x76c] ss:$16 sps:$4 sm:$0xff]   ;;  %v18568_v63 = vld [vmem:[%s20357_s1 + $0x760] ss:$16 sps:$4 sm:$0xff]  }
 0xd03   : > { %v22099_v48 = vpack.c.bf16 %v10553_v31, %v10537_v17  ;;  %v22101_v26 = vpack.c.bf16 %v10552_v28, %v10536_v18  ;;  %14152 = vmatprep.subr.bf16.mxu1 %v18549_v20  ;;  %v18576_v16 = vld [vmem:[%s20357_s1 + $0x784] ss:$16 sps:$4 sm:$0xff]   ;;  %v18579_v40 = vld [vmem:[%s20357_s1 + $0x78c] ss:$16 sps:$4 sm:$0xff]   ;;  %v18574_v47 = vld [vmem:[%s20357_s1 + $0x780] ss:$16 sps:$4 sm:$0xff]  }
 0xd04   : > { %v22104_v12 = vpack.c.bf16 %v10554_v23, %v10538_v11  ;;  %v18577_v6 = vld [vmem:[%s20357_s1 + $0x788] ss:$16 sps:$4 sm:$0xff]   ;;  %v18582_v60 = vld [vmem:[%s20357_s1 + $0x7a4] ss:$16 sps:$4 sm:$0xff]   ;;  %v18585_v61 = vld [vmem:[%s20357_s1 + $0x7ac] ss:$16 sps:$4 sm:$0xff]  }
 0xd05   : > { %13809 = vmatpush1.bf16.msra.mxu0 %v18544_v29  ;;  %v18580_v14 = vld [vmem:[%s20357_s1 + $0x7a0] ss:$16 sps:$4 sm:$0xff]   ;;  %v18583_v30 = vld [vmem:[%s20357_s1 + $0x7a8] ss:$16 sps:$4 sm:$0xff]   ;;  %v18588_v52 = vld [vmem:[%s20357_s1 + $0x7c4] ss:$16 sps:$4 sm:$0xff]  }
 0xd06   : > { %14153 = vmatpush1.bf16.msra.mxu1 %v18547_v58  ;;  %13810 = vmatprep.subr.bf16.mxu0 %v18552_v7  ;;  %v18591_v13 = vld [vmem:[%s20357_s1 + $0x7cc] ss:$16 sps:$4 sm:$0xff]   ;;  %v18586_v62 = vld [vmem:[%s20357_s1 + $0x7c0] ss:$16 sps:$4 sm:$0xff]   ;;  %v18589_v0 = vld [vmem:[%s20357_s1 + $0x7c8] ss:$16 sps:$4 sm:$0xff]  }
 0xd07   : > { %14154 = vmatprep.subr.bf16.mxu1 %v18555_v37  ;;  %v18594_v3 = vld [vmem:[%s20357_s1 + $0x7e4] ss:$16 sps:$4 sm:$0xff]   ;;  %v18597_v5 = vld [vmem:[%s20357_s1 + $0x7ec] ss:$16 sps:$4 sm:$0xff]   ;;  %v18592_v54 = vld [vmem:[%s20357_s1 + $0x7e0] ss:$16 sps:$4 sm:$0xff]  }
 0xd08   : > { %v18595_v20 = vld [vmem:[%s20357_s1 + $0x7e8] ss:$16 sps:$4 sm:$0xff]   ;;  %v18600_v24 = vld [vmem:[%s20357_s1 + $0x804] ss:$16 sps:$4 sm:$0xff]   ;;  %v18603_v19 = vld [vmem:[%s20357_s1 + $0x80c] ss:$16 sps:$4 sm:$0xff]  }
 0xd09   : > { %13811 = vmatpush1.bf16.msra.mxu0 %v18550_v43  ;;  %v18598_v53 = vld [vmem:[%s20357_s1 + $0x800] ss:$16 sps:$4 sm:$0xff]   ;;  %v18601_v17 = vld [vmem:[%s20357_s1 + $0x808] ss:$16 sps:$4 sm:$0xff]   ;;  %v18606_v18 = vld [vmem:[%s20357_s1 + $0x824] ss:$16 sps:$4 sm:$0xff]  }
 0xd0a   : > { %14155 = vmatpush1.bf16.msra.mxu1 %v18553_v15  ;;  %13812 = vmatprep.subr.bf16.mxu0 %v18558_v1  ;;  %v18609_v31 = vld [vmem:[%s20357_s1 + $0x82c] ss:$16 sps:$4 sm:$0xff]   ;;  %v18604_v28 = vld [vmem:[%s20357_s1 + $0x820] ss:$16 sps:$4 sm:$0xff]   ;;  %v18607_v29 = vld [vmem:[%s20357_s1 + $0x828] ss:$16 sps:$4 sm:$0xff]  }
 0xd0b   : > { %14156 = vmatprep.subr.bf16.mxu1 %v18561_v51  ;;  %v18612_v11 = vld [vmem:[%s20357_s1 + $0x844] ss:$16 sps:$4 sm:$0xff]   ;;  %v18615_v23 = vld [vmem:[%s20357_s1 + $0x84c] ss:$16 sps:$4 sm:$0xff]   ;;  %v18613_v58 = vld [vmem:[%s20357_s1 + $0x848] ss:$16 sps:$4 sm:$0xff]  }
 0xd0c   : > { %v18618_v7 = vld [vmem:[%s20357_s1 + $0x864] ss:$16 sps:$4 sm:$0xff]   ;;  %v18621_v37 = vld [vmem:[%s20357_s1 + $0x86c] ss:$16 sps:$4 sm:$0xff]   ;;  %v18619_v43 = vld [vmem:[%s20357_s1 + $0x868] ss:$16 sps:$4 sm:$0xff]  }
 0xd0d   : > { %13813 = vmatpush1.bf16.msra.mxu0 %v18556_v36  ;;  %v18624_v15 = vld [vmem:[%s20357_s1 + $0x884] ss:$16 sps:$4 sm:$0xff]   ;;  %v18627_v1 = vld [vmem:[%s20357_s1 + $0x88c] ss:$16 sps:$4 sm:$0xff]   ;;  %v18622_v51 = vld [vmem:[%s20357_s1 + $0x880] ss:$16 sps:$4 sm:$0xff]  }
 0xd0e   : > { %14157 = vmatpush1.bf16.msra.mxu1 %v18559_v39  ;;  %13814 = vmatprep.subr.bf16.mxu0 %v18564_v56  ;;  %v18625_v36 = vld [vmem:[%s20357_s1 + $0x888] ss:$16 sps:$4 sm:$0xff]   ;;  %v18630_v39 = vld [vmem:[%s20357_s1 + $0x8a4] ss:$16 sps:$4 sm:$0xff]   ;;  %v18633_v56 = vld [vmem:[%s20357_s1 + $0x8ac] ss:$16 sps:$4 sm:$0xff]  }
 0xd0f   : > { %14158 = vmatprep.subr.bf16.mxu1 %v18567_v35  ;;  %v18628_v35 = vld [vmem:[%s20357_s1 + $0x8a0] ss:$16 sps:$4 sm:$0xff]  }
 0xd11   : > { %13815 = vmatpush1.bf16.msra.mxu0 %v18562_v44  ;;  %v18631_v44 = vld [vmem:[%s20357_s1 + $0x8a8] ss:$16 sps:$4 sm:$0xff]  }
 0xd12   : > { %14159 = vmatpush1.bf16.msra.mxu1 %v18565_v8  ;;  %13816 = vmatprep.subr.bf16.mxu0 %v18570_v45  ;;  %v18636_v8 = vld [vmem:[%s20357_s1 + $0x8c4] ss:$16 sps:$4 sm:$0xff]   ;;  %v18639_v45 = vld [vmem:[%s20357_s1 + $0x8cc] ss:$16 sps:$4 sm:$0xff]  }
 0xd13   : > { %14160 = vmatprep.subr.bf16.mxu1 %v18573_v49  ;;  %v18634_v49 = vld [vmem:[%s20357_s1 + $0x8c0] ss:$16 sps:$4 sm:$0xff]  }
 0xd15   : > { %13817 = vmatpush1.bf16.msra.mxu0 %v18568_v63  ;;  %v18637_v63 = vld [vmem:[%s20357_s1 + $0x8c8] ss:$16 sps:$4 sm:$0xff]  }
 0xd16   : > { %14161 = vmatpush1.bf16.msra.mxu1 %v18571_v50  ;;  %13818 = vmatprep.subr.bf16.mxu0 %v18576_v16  ;;  %v18642_v50 = vld [vmem:[%s20357_s1 + $0x8e4] ss:$16 sps:$4 sm:$0xff]   ;;  %v18645_v16 = vld [vmem:[%s20357_s1 + $0x8ec] ss:$16 sps:$4 sm:$0xff]  }
 0xd17   : > { %14162 = vmatprep.subr.bf16.mxu1 %v18579_v40  ;;  %v18640_v40 = vld [vmem:[%s20357_s1 + $0x8e0] ss:$16 sps:$4 sm:$0xff]  }
 0xd19   : > { %13819 = vmatpush1.bf16.msra.mxu0 %v18574_v47  ;;  %v18643_v47 = vld [vmem:[%s20357_s1 + $0x8e8] ss:$16 sps:$4 sm:$0xff]  }
 0xd1a   : > { %14163 = vmatpush1.bf16.msra.mxu1 %v18577_v6  ;;  %13820 = vmatprep.subr.bf16.mxu0 %v18582_v60  ;;  %v18648_v6 = vld [vmem:[%s20357_s1 + $0x904] ss:$16 sps:$4 sm:$0xff]   ;;  %v18651_v60 = vld [vmem:[%s20357_s1 + $0x90c] ss:$16 sps:$4 sm:$0xff]  }
 0xd1b   : > { %14164 = vmatprep.subr.bf16.mxu1 %v18585_v61  ;;  %v18646_v61 = vld [vmem:[%s20357_s1 + $0x900] ss:$16 sps:$4 sm:$0xff]  }
 0xd1d   : > { %13821 = vmatpush1.bf16.msra.mxu0 %v18580_v14  ;;  %v18649_v14 = vld [vmem:[%s20357_s1 + $0x908] ss:$16 sps:$4 sm:$0xff]  }
 0xd1e   : > { %14165 = vmatpush1.bf16.msra.mxu1 %v18583_v30  ;;  %13822 = vmatprep.subr.bf16.mxu0 %v18588_v52  ;;  %v18654_v30 = vld [vmem:[%s20357_s1 + $0x924] ss:$16 sps:$4 sm:$0xff]   ;;  %v18657_v52 = vld [vmem:[%s20357_s1 + $0x92c] ss:$16 sps:$4 sm:$0xff]  }
 0xd1f   : > { %14166 = vmatprep.subr.bf16.mxu1 %v18591_v13  ;;  %v18652_v13 = vld [vmem:[%s20357_s1 + $0x920] ss:$16 sps:$4 sm:$0xff]  }
 0xd21   : > { %13823 = vmatpush1.bf16.msra.mxu0 %v18586_v62  ;;  %v18655_v62 = vld [vmem:[%s20357_s1 + $0x928] ss:$16 sps:$4 sm:$0xff]  }
 0xd22   : > { %14167 = vmatpush1.bf16.msra.mxu1 %v18589_v0  ;;  %13824 = vmatprep.subr.bf16.mxu0 %v18594_v3  ;;  %v18660_v0 = vld [vmem:[%s20357_s1 + $0x944] ss:$16 sps:$4 sm:$0xff]   ;;  %v18663_v3 = vld [vmem:[%s20357_s1 + $0x94c] ss:$16 sps:$4 sm:$0xff]  }
 0xd23   : > { %14168 = vmatprep.subr.bf16.mxu1 %v18597_v5  ;;  %v18658_v5 = vld [vmem:[%s20357_s1 + $0x940] ss:$16 sps:$4 sm:$0xff]  }
 0xd25   : > { %13825 = vmatpush1.bf16.msra.mxu0 %v18592_v54  ;;  %v18661_v54 = vld [vmem:[%s20357_s1 + $0x948] ss:$16 sps:$4 sm:$0xff]  }
 0xd26   : > { %14169 = vmatpush1.bf16.msra.mxu1 %v18595_v20  ;;  %13837 = vmatprep.subr.bf16.mxu0 %v18600_v24  ;;  %v18666_v20 = vld [vmem:[%s20357_s1 + $0x964] ss:$16 sps:$4 sm:$0xff]   ;;  %v18669_v24 = vld [vmem:[%s20357_s1 + $0x96c] ss:$16 sps:$4 sm:$0xff]  }
 0xd27   : > { %14181 = vmatprep.subr.bf16.mxu1 %v18603_v19  ;;  %v18664_v19 = vld [vmem:[%s20357_s1 + $0x960] ss:$16 sps:$4 sm:$0xff]  }
 0xd28   : > { %13827 = vmatmul.mubr.bf16.vlgmr.msra.gmra.mrb[48].mxu0 %v21795_v42 }
 0xd29   : > { %14171 = vmatmul.mubr.bf16.vlgmr.msra.gmra.mrb[48].mxu1 %v21795_v42  ;;  %13838 = vmatpush1.bf16.msra.mxu0 %v18598_v53  ;;  %v18610_v42 = vld [vmem:[%s20357_s1 + $0x840] ss:$16 sps:$4 sm:$0xff]   ;;  %v18667_v53 = vld [vmem:[%s20357_s1 + $0x968] ss:$16 sps:$4 sm:$0xff]  }
 0xd2a   : > { %13869 = vmatprep.mubr.bf16.mxu0 %v21949_v55  ;;  %14182 = vmatpush1.bf16.msra.mxu1 %v18601_v17  ;;  %v18672_v17 = vld [vmem:[%s20357_s1 + $0x984] ss:$16 sps:$4 sm:$0xff]  }
 0xd2b   : > { %14213 = vmatprep.mubr.bf16.mxu1 %v21949_v55  ;;  %13839 = vmatprep.subr.bf16.mxu0 %v18606_v18  ;;  %v18616_v55 = vld [vmem:[%s20357_s1 + $0x860] ss:$16 sps:$4 sm:$0xff]   ;;  %v18675_v18 = vld [vmem:[%s20357_s1 + $0x98c] ss:$16 sps:$4 sm:$0xff]  }
 0xd2c   : > { %14183 = vmatprep.subr.bf16.mxu1 %v18609_v31  ;;  %v18670_v31 = vld [vmem:[%s20357_s1 + $0x980] ss:$16 sps:$4 sm:$0xff]  }
 0xd2d   : > { %13840 = vmatpush1.bf16.msra.mxu0 %v18604_v28  ;;  %v18673_v28 = vld [vmem:[%s20357_s1 + $0x988] ss:$16 sps:$4 sm:$0xff]  }
 0xd2e   : > { %14184 = vmatpush1.bf16.msra.mxu1 %v18607_v29  ;;  %13841 = vmatprep.subr.bf16.mxu0 %v18612_v11  ;;  %v18678_v29 = vld [vmem:[%s20357_s1 + $0x9a4] ss:$16 sps:$4 sm:$0xff]   ;;  %v18681_v11 = vld [vmem:[%s20357_s1 + $0x9ac] ss:$16 sps:$4 sm:$0xff]  }
 0xd2f   : > { %14185 = vmatprep.subr.bf16.mxu1 %v18615_v23  ;;  %v18676_v23 = vld [vmem:[%s20357_s1 + $0x9a0] ss:$16 sps:$4 sm:$0xff]  }
 0xd31   : > { %13842 = vmatpush1.bf16.msra.mxu0 %v18610_v42  ;;  %v18679_v42 = vld [vmem:[%s20357_s1 + $0x9a8] ss:$16 sps:$4 sm:$0xff]  }
 0xd32   : > { %14186 = vmatpush1.bf16.msra.mxu1 %v18613_v58  ;;  %13843 = vmatprep.subr.bf16.mxu0 %v18618_v7  ;;  %v18684_v58 = vld [vmem:[%s20357_s1 + $0x9c4] ss:$16 sps:$4 sm:$0xff]   ;;  %v18687_v7 = vld [vmem:[%s20357_s1 + $0x9cc] ss:$16 sps:$4 sm:$0xff]  }
 0xd33   : > { %14187 = vmatprep.subr.bf16.mxu1 %v18621_v37  ;;  %v18682_v37 = vld [vmem:[%s20357_s1 + $0x9c0] ss:$16 sps:$4 sm:$0xff]  }
 0xd35   : > { %13844 = vmatpush1.bf16.msra.mxu0 %v18616_v55  ;;  %v18685_v55 = vld [vmem:[%s20357_s1 + $0x9c8] ss:$16 sps:$4 sm:$0xff]  }
 0xd36   : > { %14188 = vmatpush1.bf16.msra.mxu1 %v18619_v43  ;;  %13845 = vmatprep.subr.bf16.mxu0 %v18624_v15  ;;  %v18690_v43 = vld [vmem:[%s20357_s1 + $0x9e4] ss:$16 sps:$4 sm:$0xff]   ;;  %v18693_v15 = vld [vmem:[%s20357_s1 + $0x9ec] ss:$16 sps:$4 sm:$0xff]  }
 0xd37   : > { %14189 = vmatprep.subr.bf16.mxu1 %v18627_v1  ;;  %v18688_v1 = vld [vmem:[%s20357_s1 + $0x9e0] ss:$16 sps:$4 sm:$0xff]  }
 0xd39   : > { %13846 = vmatpush1.bf16.msra.mxu0 %v18622_v51  ;;  %v18691_v51 = vld [vmem:[%s20357_s1 + $0x9e8] ss:$16 sps:$4 sm:$0xff]  }
 0xd3a   : > { %14190 = vmatpush1.bf16.msra.mxu1 %v18625_v36  ;;  %13847 = vmatprep.subr.bf16.mxu0 %v18630_v39  ;;  %v18696_v36 = vld [vmem:[%s20357_s1 + $0xa04] ss:$16 sps:$4 sm:$0xff]   ;;  %v18699_v39 = vld [vmem:[%s20357_s1 + $0xa0c] ss:$16 sps:$4 sm:$0xff]  }
 0xd3b   : > { %14191 = vmatprep.subr.bf16.mxu1 %v18633_v56  ;;  %v18694_v56 = vld [vmem:[%s20357_s1 + $0xa00] ss:$16 sps:$4 sm:$0xff]  }
 0xd3d   : > { %13848 = vmatpush1.bf16.msra.mxu0 %v18628_v35  ;;  %v18697_v35 = vld [vmem:[%s20357_s1 + $0xa08] ss:$16 sps:$4 sm:$0xff]  }
 0xd3e   : > { %14192 = vmatpush1.bf16.msra.mxu1 %v18631_v44  ;;  %13849 = vmatprep.subr.bf16.mxu0 %v18636_v8  ;;  %v18702_v44 = vld [vmem:[%s20357_s1 + $0xa24] ss:$16 sps:$4 sm:$0xff]   ;;  %v18705_v8 = vld [vmem:[%s20357_s1 + $0xa2c] ss:$16 sps:$4 sm:$0xff]  }
 0xd3f   : > { %14193 = vmatprep.subr.bf16.mxu1 %v18639_v45  ;;  %v18700_v45 = vld [vmem:[%s20357_s1 + $0xa20] ss:$16 sps:$4 sm:$0xff]  }
 0xd41   : > { %13850 = vmatpush1.bf16.msra.mxu0 %v18634_v49  ;;  %v18703_v49 = vld [vmem:[%s20357_s1 + $0xa28] ss:$16 sps:$4 sm:$0xff]  }
 0xd42   : > { %14194 = vmatpush1.bf16.msra.mxu1 %v18637_v63  ;;  %13851 = vmatprep.subr.bf16.mxu0 %v18642_v50  ;;  %v18708_v63 = vld [vmem:[%s20357_s1 + $0xa44] ss:$16 sps:$4 sm:$0xff]   ;;  %v18711_v50 = vld [vmem:[%s20357_s1 + $0xa4c] ss:$16 sps:$4 sm:$0xff]  }
 0xd43   : > { %14195 = vmatprep.subr.bf16.mxu1 %v18645_v16  ;;  %v18709_v16 = vld [vmem:[%s20357_s1 + $0xa48] ss:$16 sps:$4 sm:$0xff]  }
 0xd45   : > { %13852 = vmatpush1.bf16.msra.mxu0 %v18640_v40  ;;  %v18714_v40 = vld [vmem:[%s20357_s1 + $0xa64] ss:$16 sps:$4 sm:$0xff]  }
 0xd46   : > { %14196 = vmatpush1.bf16.msra.mxu1 %v18643_v47  ;;  %13853 = vmatprep.subr.bf16.mxu0 %v18648_v6  ;;  %v18717_v47 = vld [vmem:[%s20357_s1 + $0xa6c] ss:$16 sps:$4 sm:$0xff]   ;;  %v18715_v6 = vld [vmem:[%s20357_s1 + $0xa68] ss:$16 sps:$4 sm:$0xff]  }
 0xd47   : > { %14197 = vmatprep.subr.bf16.mxu1 %v18651_v60  ;;  %v18720_v60 = vld [vmem:[%s20357_s1 + $0xa84] ss:$16 sps:$4 sm:$0xff]  }
 0xd49   : > { %13854 = vmatpush1.bf16.msra.mxu0 %v18646_v61  ;;  %v18723_v61 = vld [vmem:[%s20357_s1 + $0xa8c] ss:$16 sps:$4 sm:$0xff]  }
 0xd4a   : > { %14198 = vmatpush1.bf16.msra.mxu1 %v18649_v14  ;;  %13855 = vmatprep.subr.bf16.mxu0 %v18654_v30  ;;  %v18718_v14 = vld [vmem:[%s20357_s1 + $0xa80] ss:$16 sps:$4 sm:$0xff]   ;;  %v18721_v30 = vld [vmem:[%s20357_s1 + $0xa88] ss:$16 sps:$4 sm:$0xff]  }
 0xd4b   : > { %14199 = vmatprep.subr.bf16.mxu1 %v18657_v52  ;;  %v18726_v52 = vld [vmem:[%s20357_s1 + $0xaa4] ss:$16 sps:$4 sm:$0xff]  }
 0xd4d   : > { %13856 = vmatpush1.bf16.msra.mxu0 %v18652_v13  ;;  %v18729_v13 = vld [vmem:[%s20357_s1 + $0xaac] ss:$16 sps:$4 sm:$0xff]  }
 0xd4e   : > { %14200 = vmatpush1.bf16.msra.mxu1 %v18655_v62  ;;  %13857 = vmatprep.subr.bf16.mxu0 %v18660_v0  ;;  %v18724_v62 = vld [vmem:[%s20357_s1 + $0xaa0] ss:$16 sps:$4 sm:$0xff]   ;;  %v18727_v0 = vld [vmem:[%s20357_s1 + $0xaa8] ss:$16 sps:$4 sm:$0xff]  }
 0xd4f   : > { %14201 = vmatprep.subr.bf16.mxu1 %v18663_v3  ;;  %v18732_v3 = vld [vmem:[%s20357_s1 + $0xac4] ss:$16 sps:$4 sm:$0xff]  }
 0xd51   : > { %13858 = vmatpush1.bf16.msra.mxu0 %v18658_v5  ;;  %v18735_v5 = vld [vmem:[%s20357_s1 + $0xacc] ss:$16 sps:$4 sm:$0xff]  }
 0xd52   : > { %14202 = vmatpush1.bf16.msra.mxu1 %v18661_v54  ;;  %13859 = vmatprep.subr.bf16.mxu0 %v18666_v20  ;;  %v18730_v54 = vld [vmem:[%s20357_s1 + $0xac0] ss:$16 sps:$4 sm:$0xff]   ;;  %v18733_v20 = vld [vmem:[%s20357_s1 + $0xac8] ss:$16 sps:$4 sm:$0xff]  }
 0xd53   : > { %14203 = vmatprep.subr.bf16.mxu1 %v18669_v24  ;;  %v18738_v24 = vld [vmem:[%s20357_s1 + $0xae4] ss:$16 sps:$4 sm:$0xff]  }
 0xd55   : > { %13860 = vmatpush1.bf16.msra.mxu0 %v18664_v19  ;;  %v18741_v19 = vld [vmem:[%s20357_s1 + $0xaec] ss:$16 sps:$4 sm:$0xff]  }
 0xd56   : > { %14204 = vmatpush1.bf16.msra.mxu1 %v18667_v53  ;;  %13861 = vmatprep.subr.bf16.mxu0 %v18672_v17  ;;  %v18736_v53 = vld [vmem:[%s20357_s1 + $0xae0] ss:$16 sps:$4 sm:$0xff]   ;;  %v18739_v17 = vld [vmem:[%s20357_s1 + $0xae8] ss:$16 sps:$4 sm:$0xff]  }
 0xd57   : > { %14205 = vmatprep.subr.bf16.mxu1 %v18675_v18  ;;  %v18744_v18 = vld [vmem:[%s20357_s1 + $0xb04] ss:$16 sps:$4 sm:$0xff]  }
 0xd59   : > { %13862 = vmatpush1.bf16.msra.mxu0 %v18670_v31  ;;  %v18747_v31 = vld [vmem:[%s20357_s1 + $0xb0c] ss:$16 sps:$4 sm:$0xff]  }
 0xd5a   : > { %14206 = vmatpush1.bf16.msra.mxu1 %v18673_v28  ;;  %13863 = vmatprep.subr.bf16.mxu0 %v18678_v29  ;;  %v18742_v28 = vld [vmem:[%s20357_s1 + $0xb00] ss:$16 sps:$4 sm:$0xff]   ;;  %v18745_v29 = vld [vmem:[%s20357_s1 + $0xb08] ss:$16 sps:$4 sm:$0xff]  }
 0xd5b   : > { %14207 = vmatprep.subr.bf16.mxu1 %v18681_v11  ;;  %v18750_v11 = vld [vmem:[%s20357_s1 + $0xb24] ss:$16 sps:$4 sm:$0xff]  }
 0xd5d   : > { %13864 = vmatpush1.bf16.msra.mxu0 %v18676_v23  ;;  %v18753_v23 = vld [vmem:[%s20357_s1 + $0xb2c] ss:$16 sps:$4 sm:$0xff]  }
 0xd5e   : > { %14208 = vmatpush1.bf16.msra.mxu1 %v18679_v42  ;;  %13865 = vmatprep.subr.bf16.mxu0 %v18684_v58  ;;  %v18748_v42 = vld [vmem:[%s20357_s1 + $0xb20] ss:$16 sps:$4 sm:$0xff]   ;;  %v18751_v58 = vld [vmem:[%s20357_s1 + $0xb28] ss:$16 sps:$4 sm:$0xff]  }
 0xd5f   : > { %14209 = vmatprep.subr.bf16.mxu1 %v18687_v7  ;;  %v18756_v7 = vld [vmem:[%s20357_s1 + $0xb44] ss:$16 sps:$4 sm:$0xff]  }
 0xd61   : > { %13866 = vmatpush1.bf16.msra.mxu0 %v18682_v37  ;;  %v18759_v37 = vld [vmem:[%s20357_s1 + $0xb4c] ss:$16 sps:$4 sm:$0xff]  }
 0xd62   : > { %14210 = vmatpush1.bf16.msra.mxu1 %v18685_v55  ;;  %13867 = vmatprep.subr.bf16.mxu0 %v18690_v43  ;;  %v18754_v55 = vld [vmem:[%s20357_s1 + $0xb40] ss:$16 sps:$4 sm:$0xff]   ;;  %v18757_v43 = vld [vmem:[%s20357_s1 + $0xb48] ss:$16 sps:$4 sm:$0xff]  }
 0xd63   : > { %14211 = vmatprep.subr.bf16.mxu1 %v18693_v15  ;;  %v18762_v15 = vld [vmem:[%s20357_s1 + $0xb64] ss:$16 sps:$4 sm:$0xff]  }
 0xd65   : > { %13868 = vmatpush1.bf16.msra.mxu0 %v18688_v1  ;;  %v18765_v1 = vld [vmem:[%s20357_s1 + $0xb6c] ss:$16 sps:$4 sm:$0xff]  }
 0xd66   : > { %14212 = vmatpush1.bf16.msra.mxu1 %v18691_v51  ;;  %13880 = vmatprep.subr.bf16.mxu0 %v18696_v36  ;;  %v18760_v51 = vld [vmem:[%s20357_s1 + $0xb60] ss:$16 sps:$4 sm:$0xff]   ;;  %v18763_v36 = vld [vmem:[%s20357_s1 + $0xb68] ss:$16 sps:$4 sm:$0xff]  }
 0xd67   : > { %14224 = vmatprep.subr.bf16.mxu1 %v18699_v39  ;;  %v18768_v39 = vld [vmem:[%s20357_s1 + $0xb84] ss:$16 sps:$4 sm:$0xff]  }
 0xd68   : > { %13870 = vmatmul.mubr.bf16.vlgmr.msra.gmra.mrb[48].mxu0 %v21943_v33 }
 0xd69   : > { %14214 = vmatmul.mubr.bf16.vlgmr.msra.gmra.mrb[48].mxu1 %v21943_v33  ;;  %13881 = vmatpush1.bf16.msra.mxu0 %v18694_v56  ;;  %v18706_v33 = vld [vmem:[%s20357_s1 + $0xa40] ss:$16 sps:$4 sm:$0xff]   ;;  %v18771_v56 = vld [vmem:[%s20357_s1 + $0xb8c] ss:$16 sps:$4 sm:$0xff]  }
 0xd6a   : > { %13912 = vmatprep.mubr.bf16.mxu0 %v21952_v57  ;;  %14225 = vmatpush1.bf16.msra.mxu1 %v18697_v35  ;;  %v18766_v35 = vld [vmem:[%s20357_s1 + $0xb80] ss:$16 sps:$4 sm:$0xff]  }
 0xd6b   : > { %14256 = vmatprep.mubr.bf16.mxu1 %v21952_v57  ;;  %13882 = vmatprep.subr.bf16.mxu0 %v18702_v44  ;;  %v18712_v57 = vld [vmem:[%s20357_s1 + $0xa60] ss:$16 sps:$4 sm:$0xff]   ;;  %v18769_v44 = vld [vmem:[%s20357_s1 + $0xb88] ss:$16 sps:$4 sm:$0xff]  }
 0xd6c   : > { %14226 = vmatprep.subr.bf16.mxu1 %v18705_v8  ;;  %v18774_v8 = vld [vmem:[%s20357_s1 + $0xba4] ss:$16 sps:$4 sm:$0xff]  }
 0xd6d   : > { %13883 = vmatpush1.bf16.msra.mxu0 %v18700_v45  ;;  %v18777_v45 = vld [vmem:[%s20357_s1 + $0xbac] ss:$16 sps:$4 sm:$0xff]  }
 0xd6e   : > { %14227 = vmatpush1.bf16.msra.mxu1 %v18703_v49  ;;  %13884 = vmatprep.subr.bf16.mxu0 %v18708_v63  ;;  %v18772_v49 = vld [vmem:[%s20357_s1 + $0xba0] ss:$16 sps:$4 sm:$0xff]   ;;  %v18775_v63 = vld [vmem:[%s20357_s1 + $0xba8] ss:$16 sps:$4 sm:$0xff]  }
 0xd6f   : > { %14228 = vmatprep.subr.bf16.mxu1 %v18711_v50  ;;  %v18780_v50 = vld [vmem:[%s20357_s1 + $0xbc4] ss:$16 sps:$4 sm:$0xff]  }
 0xd71   : > { %13885 = vmatpush1.bf16.msra.mxu0 %v18706_v33  ;;  %v18783_v33 = vld [vmem:[%s20357_s1 + $0xbcc] ss:$16 sps:$4 sm:$0xff]  }
 0xd72   : > { %14229 = vmatpush1.bf16.msra.mxu1 %v18709_v16  ;;  %13886 = vmatprep.subr.bf16.mxu0 %v18714_v40  ;;  %v18778_v16 = vld [vmem:[%s20357_s1 + $0xbc0] ss:$16 sps:$4 sm:$0xff]   ;;  %v18781_v40 = vld [vmem:[%s20357_s1 + $0xbc8] ss:$16 sps:$4 sm:$0xff]  }
 0xd73   : > { %14230 = vmatprep.subr.bf16.mxu1 %v18717_v47  ;;  %v18786_v47 = vld [vmem:[%s20357_s1 + $0xbe4] ss:$16 sps:$4 sm:$0xff]  }
 0xd75   : > { %13887 = vmatpush1.bf16.msra.mxu0 %v18712_v57  ;;  %v18789_v57 = vld [vmem:[%s20357_s1 + $0xbec] ss:$16 sps:$4 sm:$0xff]  }
 0xd76   : > { %14231 = vmatpush1.bf16.msra.mxu1 %v18715_v6  ;;  %13888 = vmatprep.subr.bf16.mxu0 %v18720_v60  ;;  %v18784_v6 = vld [vmem:[%s20357_s1 + $0xbe0] ss:$16 sps:$4 sm:$0xff]   ;;  %v18787_v60 = vld [vmem:[%s20357_s1 + $0xbe8] ss:$16 sps:$4 sm:$0xff]  }
 0xd77   : > { %14232 = vmatprep.subr.bf16.mxu1 %v18723_v61  ;;  %v18792_v61 = vld [vmem:[%s20357_s1 + $0xc04] ss:$16 sps:$4 sm:$0xff]  }
 0xd79   : > { %13889 = vmatpush1.bf16.msra.mxu0 %v18718_v14  ;;  %v18795_v14 = vld [vmem:[%s20357_s1 + $0xc0c] ss:$16 sps:$4 sm:$0xff]  }
 0xd7a   : > { %14233 = vmatpush1.bf16.msra.mxu1 %v18721_v30  ;;  %13890 = vmatprep.subr.bf16.mxu0 %v18726_v52  ;;  %v18790_v30 = vld [vmem:[%s20357_s1 + $0xc00] ss:$16 sps:$4 sm:$0xff]   ;;  %v18793_v52 = vld [vmem:[%s20357_s1 + $0xc08] ss:$16 sps:$4 sm:$0xff]  }
 0xd7b   : > { %14234 = vmatprep.subr.bf16.mxu1 %v18729_v13  ;;  %v18798_v13 = vld [vmem:[%s20357_s1 + $0xc24] ss:$16 sps:$4 sm:$0xff]  }
 0xd7d   : > { %13891 = vmatpush1.bf16.msra.mxu0 %v18724_v62  ;;  %v18801_v62 = vld [vmem:[%s20357_s1 + $0xc2c] ss:$16 sps:$4 sm:$0xff]  }
 0xd7e   : > { %14235 = vmatpush1.bf16.msra.mxu1 %v18727_v0  ;;  %13892 = vmatprep.subr.bf16.mxu0 %v18732_v3  ;;  %v18796_v0 = vld [vmem:[%s20357_s1 + $0xc20] ss:$16 sps:$4 sm:$0xff]   ;;  %v18799_v3 = vld [vmem:[%s20357_s1 + $0xc28] ss:$16 sps:$4 sm:$0xff]  }
 0xd7f   : > { %14236 = vmatprep.subr.bf16.mxu1 %v18735_v5  ;;  %v18804_v5 = vld [vmem:[%s20357_s1 + $0xc44] ss:$16 sps:$4 sm:$0xff]  }
 0xd81   : > { %13893 = vmatpush1.bf16.msra.mxu0 %v18730_v54  ;;  %v18807_v54 = vld [vmem:[%s20357_s1 + $0xc4c] ss:$16 sps:$4 sm:$0xff]  }
 0xd82   : > { %14237 = vmatpush1.bf16.msra.mxu1 %v18733_v20  ;;  %13894 = vmatprep.subr.bf16.mxu0 %v18738_v24  ;;  %v18805_v20 = vld [vmem:[%s20357_s1 + $0xc48] ss:$16 sps:$4 sm:$0xff]   ;;  %v18810_v24 = vld [vmem:[%s20357_s1 + $0xc64] ss:$16 sps:$4 sm:$0xff]  }
 0xd83   : > { %14238 = vmatprep.subr.bf16.mxu1 %v18741_v19  ;;  %v18813_v19 = vld [vmem:[%s20357_s1 + $0xc6c] ss:$16 sps:$4 sm:$0xff]  }
 0xd85   : > { %13895 = vmatpush1.bf16.msra.mxu0 %v18736_v53  ;;  %v18811_v53 = vld [vmem:[%s20357_s1 + $0xc68] ss:$16 sps:$4 sm:$0xff]  }
 0xd86   : > { %14239 = vmatpush1.bf16.msra.mxu1 %v18739_v17  ;;  %13896 = vmatprep.subr.bf16.mxu0 %v18744_v18  ;;  %v18816_v17 = vld [vmem:[%s20357_s1 + $0xc84] ss:$16 sps:$4 sm:$0xff]   ;;  %v18819_v18 = vld [vmem:[%s20357_s1 + $0xc8c] ss:$16 sps:$4 sm:$0xff]  }
 0xd87   : > { %14240 = vmatprep.subr.bf16.mxu1 %v18747_v31  ;;  %v18814_v31 = vld [vmem:[%s20357_s1 + $0xc80] ss:$16 sps:$4 sm:$0xff]  }
 0xd89   : > { %13897 = vmatpush1.bf16.msra.mxu0 %v18742_v28  ;;  %v18817_v28 = vld [vmem:[%s20357_s1 + $0xc88] ss:$16 sps:$4 sm:$0xff]  }
 0xd8a   : > { %14241 = vmatpush1.bf16.msra.mxu1 %v18745_v29  ;;  %13898 = vmatprep.subr.bf16.mxu0 %v18750_v11  ;;  %v18822_v29 = vld [vmem:[%s20357_s1 + $0xca4] ss:$16 sps:$4 sm:$0xff]   ;;  %v18825_v11 = vld [vmem:[%s20357_s1 + $0xcac] ss:$16 sps:$4 sm:$0xff]  }
 0xd8b   : > { %14242 = vmatprep.subr.bf16.mxu1 %v18753_v23  ;;  %v18820_v23 = vld [vmem:[%s20357_s1 + $0xca0] ss:$16 sps:$4 sm:$0xff]  }
 0xd8d   : > { %13899 = vmatpush1.bf16.msra.mxu0 %v18748_v42  ;;  %v18823_v42 = vld [vmem:[%s20357_s1 + $0xca8] ss:$16 sps:$4 sm:$0xff]  }
 0xd8e   : > { %14243 = vmatpush1.bf16.msra.mxu1 %v18751_v58  ;;  %13900 = vmatprep.subr.bf16.mxu0 %v18756_v7  ;;  %v18828_v58 = vld [vmem:[%s20357_s1 + $0xcc4] ss:$16 sps:$4 sm:$0xff]   ;;  %v18831_v7 = vld [vmem:[%s20357_s1 + $0xccc] ss:$16 sps:$4 sm:$0xff]  }
 0xd8f   : > { %14244 = vmatprep.subr.bf16.mxu1 %v18759_v37  ;;  %v18826_v37 = vld [vmem:[%s20357_s1 + $0xcc0] ss:$16 sps:$4 sm:$0xff]  }
 0xd91   : > { %13901 = vmatpush1.bf16.msra.mxu0 %v18754_v55  ;;  %v18829_v55 = vld [vmem:[%s20357_s1 + $0xcc8] ss:$16 sps:$4 sm:$0xff]  }
 0xd92   : > { %14245 = vmatpush1.bf16.msra.mxu1 %v18757_v43  ;;  %13902 = vmatprep.subr.bf16.mxu0 %v18762_v15  ;;  %v18834_v43 = vld [vmem:[%s20357_s1 + $0xce4] ss:$16 sps:$4 sm:$0xff]   ;;  %v18837_v15 = vld [vmem:[%s20357_s1 + $0xcec] ss:$16 sps:$4 sm:$0xff]  }
 0xd93   : > { %14246 = vmatprep.subr.bf16.mxu1 %v18765_v1  ;;  %v18832_v1 = vld [vmem:[%s20357_s1 + $0xce0] ss:$16 sps:$4 sm:$0xff]  }
 0xd95   : > { %13903 = vmatpush1.bf16.msra.mxu0 %v18760_v51  ;;  %v18835_v51 = vld [vmem:[%s20357_s1 + $0xce8] ss:$16 sps:$4 sm:$0xff]  }
 0xd96   : > { %14247 = vmatpush1.bf16.msra.mxu1 %v18763_v36  ;;  %13904 = vmatprep.subr.bf16.mxu0 %v18768_v39  ;;  %v18840_v36 = vld [vmem:[%s20357_s1 + $0xd04] ss:$16 sps:$4 sm:$0xff]   ;;  %v18843_v39 = vld [vmem:[%s20357_s1 + $0xd0c] ss:$16 sps:$4 sm:$0xff]  }
 0xd97   : > { %14248 = vmatprep.subr.bf16.mxu1 %v18771_v56  ;;  %v18838_v56 = vld [vmem:[%s20357_s1 + $0xd00] ss:$16 sps:$4 sm:$0xff]  }
 0xd99   : > { %13905 = vmatpush1.bf16.msra.mxu0 %v18766_v35  ;;  %v18841_v35 = vld [vmem:[%s20357_s1 + $0xd08] ss:$16 sps:$4 sm:$0xff]  }
 0xd9a   : > { %14249 = vmatpush1.bf16.msra.mxu1 %v18769_v44  ;;  %13906 = vmatprep.subr.bf16.mxu0 %v18774_v8  ;;  %v18846_v44 = vld [vmem:[%s20357_s1 + $0xd24] ss:$16 sps:$4 sm:$0xff]   ;;  %v18849_v8 = vld [vmem:[%s20357_s1 + $0xd2c] ss:$16 sps:$4 sm:$0xff]  }
 0xd9b   : > { %14250 = vmatprep.subr.bf16.mxu1 %v18777_v45  ;;  %v18844_v45 = vld [vmem:[%s20357_s1 + $0xd20] ss:$16 sps:$4 sm:$0xff]  }
 0xd9d   : > { %13907 = vmatpush1.bf16.msra.mxu0 %v18772_v49  ;;  %v18847_v49 = vld [vmem:[%s20357_s1 + $0xd28] ss:$16 sps:$4 sm:$0xff]  }
 0xd9e   : > { %14251 = vmatpush1.bf16.msra.mxu1 %v18775_v63  ;;  %13908 = vmatprep.subr.bf16.mxu0 %v18780_v50  ;;  %v18852_v63 = vld [vmem:[%s20357_s1 + $0xd44] ss:$16 sps:$4 sm:$0xff]   ;;  %v18855_v50 = vld [vmem:[%s20357_s1 + $0xd4c] ss:$16 sps:$4 sm:$0xff]  }
 0xd9f   : > { %14252 = vmatprep.subr.bf16.mxu1 %v18783_v33  ;;  %v18850_v33 = vld [vmem:[%s20357_s1 + $0xd40] ss:$16 sps:$4 sm:$0xff]  }
 0xda1   : > { %13909 = vmatpush1.bf16.msra.mxu0 %v18778_v16  ;;  %v18853_v16 = vld [vmem:[%s20357_s1 + $0xd48] ss:$16 sps:$4 sm:$0xff]  }
 0xda2   : > { %14253 = vmatpush1.bf16.msra.mxu1 %v18781_v40  ;;  %13910 = vmatprep.subr.bf16.mxu0 %v18786_v47  ;;  %v18858_v40 = vld [vmem:[%s20357_s1 + $0xd64] ss:$16 sps:$4 sm:$0xff]   ;;  %v18861_v47 = vld [vmem:[%s20357_s1 + $0xd6c] ss:$16 sps:$4 sm:$0xff]  }
 0xda3   : > { %14254 = vmatprep.subr.bf16.mxu1 %v18789_v57  ;;  %v18856_v57 = vld [vmem:[%s20357_s1 + $0xd60] ss:$16 sps:$4 sm:$0xff]  }
 0xda5   : > { %13911 = vmatpush1.bf16.msra.mxu0 %v18784_v6  ;;  %v18859_v6 = vld [vmem:[%s20357_s1 + $0xd68] ss:$16 sps:$4 sm:$0xff]  }
 0xda6   : > { %14255 = vmatpush1.bf16.msra.mxu1 %v18787_v60  ;;  %13923 = vmatprep.subr.bf16.mxu0 %v18792_v61  ;;  %v18864_v60 = vld [vmem:[%s20357_s1 + $0xd84] ss:$16 sps:$4 sm:$0xff]   ;;  %v18867_v61 = vld [vmem:[%s20357_s1 + $0xd8c] ss:$16 sps:$4 sm:$0xff]  }
 0xda7   : > { %14267 = vmatprep.subr.bf16.mxu1 %v18795_v14  ;;  %v18862_v14 = vld [vmem:[%s20357_s1 + $0xd80] ss:$16 sps:$4 sm:$0xff]  }
 0xda8   : > { %13913 = vmatmul.mubr.bf16.vlgmr.msra.gmra.mrb[48].mxu0 %v21947_v41 }
 0xda9   : > { %14257 = vmatmul.mubr.bf16.vlgmr.msra.gmra.mrb[48].mxu1 %v21947_v41  ;;  %13924 = vmatpush1.bf16.msra.mxu0 %v18790_v30  ;;  %v18802_v41 = vld [vmem:[%s20357_s1 + $0xc40] ss:$16 sps:$4 sm:$0xff]   ;;  %v18865_v30 = vld [vmem:[%s20357_s1 + $0xd88] ss:$16 sps:$4 sm:$0xff]  }
 0xdaa   : > { %13955 = vmatprep.mubr.bf16.mxu0 %v22101_v26  ;;  %14268 = vmatpush1.bf16.msra.mxu1 %v18793_v52  ;;  %v18870_v52 = vld [vmem:[%s20357_s1 + $0xda4] ss:$16 sps:$4 sm:$0xff]  }
 0xdab   : > { %14299 = vmatprep.mubr.bf16.mxu1 %v22101_v26  ;;  %13925 = vmatprep.subr.bf16.mxu0 %v18798_v13  ;;  %v18808_v26 = vld [vmem:[%s20357_s1 + $0xc60] ss:$16 sps:$4 sm:$0xff]   ;;  %v18873_v13 = vld [vmem:[%s20357_s1 + $0xdac] ss:$16 sps:$4 sm:$0xff]  }
 0xdac   : > { %14269 = vmatprep.subr.bf16.mxu1 %v18801_v62  ;;  %v18868_v62 = vld [vmem:[%s20357_s1 + $0xda0] ss:$16 sps:$4 sm:$0xff]  }
 0xdad   : > { %13926 = vmatpush1.bf16.msra.mxu0 %v18796_v0  ;;  %v18871_v0 = vld [vmem:[%s20357_s1 + $0xda8] ss:$16 sps:$4 sm:$0xff]  }
 0xdae   : > { %14270 = vmatpush1.bf16.msra.mxu1 %v18799_v3  ;;  %13927 = vmatprep.subr.bf16.mxu0 %v18804_v5  ;;  %v18876_v3 = vld [vmem:[%s20357_s1 + $0xdc4] ss:$16 sps:$4 sm:$0xff]   ;;  %v18879_v5 = vld [vmem:[%s20357_s1 + $0xdcc] ss:$16 sps:$4 sm:$0xff]  }
 0xdaf   : > { %14271 = vmatprep.subr.bf16.mxu1 %v18807_v54  ;;  %v18874_v54 = vld [vmem:[%s20357_s1 + $0xdc0] ss:$16 sps:$4 sm:$0xff]  }
 0xdb1   : > { %13928 = vmatpush1.bf16.msra.mxu0 %v18802_v41  ;;  %v18877_v41 = vld [vmem:[%s20357_s1 + $0xdc8] ss:$16 sps:$4 sm:$0xff]  }
 0xdb2   : > { %14272 = vmatpush1.bf16.msra.mxu1 %v18805_v20  ;;  %13929 = vmatprep.subr.bf16.mxu0 %v18810_v24  ;;  %v18882_v20 = vld [vmem:[%s20357_s1 + $0xde4] ss:$16 sps:$4 sm:$0xff]   ;;  %v18885_v24 = vld [vmem:[%s20357_s1 + $0xdec] ss:$16 sps:$4 sm:$0xff]  }
 0xdb3   : > { %14273 = vmatprep.subr.bf16.mxu1 %v18813_v19  ;;  %v18880_v19 = vld [vmem:[%s20357_s1 + $0xde0] ss:$16 sps:$4 sm:$0xff]  }
 0xdb5   : > { %13930 = vmatpush1.bf16.msra.mxu0 %v18808_v26  ;;  %v18883_v26 = vld [vmem:[%s20357_s1 + $0xde8] ss:$16 sps:$4 sm:$0xff]  }
 0xdb6   : > { %14274 = vmatpush1.bf16.msra.mxu1 %v18811_v53  ;;  %13931 = vmatprep.subr.bf16.mxu0 %v18816_v17  ;;  %v18888_v53 = vld [vmem:[%s20357_s1 + $0xe04] ss:$16 sps:$4 sm:$0xff]   ;;  %v18891_v17 = vld [vmem:[%s20357_s1 + $0xe0c] ss:$16 sps:$4 sm:$0xff]  }
 0xdb7   : > { %14275 = vmatprep.subr.bf16.mxu1 %v18819_v18  ;;  %v18886_v18 = vld [vmem:[%s20357_s1 + $0xe00] ss:$16 sps:$4 sm:$0xff]  }
 0xdb9   : > { %13932 = vmatpush1.bf16.msra.mxu0 %v18814_v31  ;;  %v18889_v31 = vld [vmem:[%s20357_s1 + $0xe08] ss:$16 sps:$4 sm:$0xff]  }
 0xdba   : > { %14276 = vmatpush1.bf16.msra.mxu1 %v18817_v28  ;;  %13933 = vmatprep.subr.bf16.mxu0 %v18822_v29  ;;  %v18894_v28 = vld [vmem:[%s20357_s1 + $0xe24] ss:$16 sps:$4 sm:$0xff]   ;;  %v18897_v29 = vld [vmem:[%s20357_s1 + $0xe2c] ss:$16 sps:$4 sm:$0xff]  }
 0xdbb   : > { %14277 = vmatprep.subr.bf16.mxu1 %v18825_v11  ;;  %v18892_v11 = vld [vmem:[%s20357_s1 + $0xe20] ss:$16 sps:$4 sm:$0xff]  }
 0xdbd   : > { %13934 = vmatpush1.bf16.msra.mxu0 %v18820_v23  ;;  %v18895_v23 = vld [vmem:[%s20357_s1 + $0xe28] ss:$16 sps:$4 sm:$0xff]  }
 0xdbe   : > { %14278 = vmatpush1.bf16.msra.mxu1 %v18823_v42  ;;  %13935 = vmatprep.subr.bf16.mxu0 %v18828_v58  ;;  %v18900_v42 = vld [vmem:[%s20357_s1 + $0xe44] ss:$16 sps:$4 sm:$0xff]   ;;  %v18903_v58 = vld [vmem:[%s20357_s1 + $0xe4c] ss:$16 sps:$4 sm:$0xff]  }
 0xdbf   : > { %14279 = vmatprep.subr.bf16.mxu1 %v18831_v7  ;;  %v18901_v7 = vld [vmem:[%s20357_s1 + $0xe48] ss:$16 sps:$4 sm:$0xff]  }
 0xdc1   : > { %13936 = vmatpush1.bf16.msra.mxu0 %v18826_v37  ;;  %v18906_v37 = vld [vmem:[%s20357_s1 + $0xe64] ss:$16 sps:$4 sm:$0xff]  }
 0xdc2   : > { %14280 = vmatpush1.bf16.msra.mxu1 %v18829_v55  ;;  %13937 = vmatprep.subr.bf16.mxu0 %v18834_v43  ;;  %v18909_v55 = vld [vmem:[%s20357_s1 + $0xe6c] ss:$16 sps:$4 sm:$0xff]   ;;  %v18907_v43 = vld [vmem:[%s20357_s1 + $0xe68] ss:$16 sps:$4 sm:$0xff]  }
 0xdc3   : > { %14281 = vmatprep.subr.bf16.mxu1 %v18837_v15  ;;  %v18912_v15 = vld [vmem:[%s20357_s1 + $0xe84] ss:$16 sps:$4 sm:$0xff]  }
 0xdc5   : > { %13938 = vmatpush1.bf16.msra.mxu0 %v18832_v1  ;;  %v18915_v1 = vld [vmem:[%s20357_s1 + $0xe8c] ss:$16 sps:$4 sm:$0xff]  }
 0xdc6   : > { %14282 = vmatpush1.bf16.msra.mxu1 %v18835_v51  ;;  %13939 = vmatprep.subr.bf16.mxu0 %v18840_v36  ;;  %v18910_v51 = vld [vmem:[%s20357_s1 + $0xe80] ss:$16 sps:$4 sm:$0xff]   ;;  %v18913_v36 = vld [vmem:[%s20357_s1 + $0xe88] ss:$16 sps:$4 sm:$0xff]  }
 0xdc7   : > { %14283 = vmatprep.subr.bf16.mxu1 %v18843_v39  ;;  %v18918_v39 = vld [vmem:[%s20357_s1 + $0xea4] ss:$16 sps:$4 sm:$0xff]  }
 0xdc9   : > { %13940 = vmatpush1.bf16.msra.mxu0 %v18838_v56  ;;  %v18921_v56 = vld [vmem:[%s20357_s1 + $0xeac] ss:$16 sps:$4 sm:$0xff]  }
 0xdca   : > { %14284 = vmatpush1.bf16.msra.mxu1 %v18841_v35  ;;  %13941 = vmatprep.subr.bf16.mxu0 %v18846_v44  ;;  %v18916_v35 = vld [vmem:[%s20357_s1 + $0xea0] ss:$16 sps:$4 sm:$0xff]   ;;  %v18919_v44 = vld [vmem:[%s20357_s1 + $0xea8] ss:$16 sps:$4 sm:$0xff]  }
 0xdcb   : > { %14285 = vmatprep.subr.bf16.mxu1 %v18849_v8  ;;  %v18924_v8 = vld [vmem:[%s20357_s1 + $0xec4] ss:$16 sps:$4 sm:$0xff]  }
 0xdcd   : > { %13942 = vmatpush1.bf16.msra.mxu0 %v18844_v45  ;;  %v18927_v45 = vld [vmem:[%s20357_s1 + $0xecc] ss:$16 sps:$4 sm:$0xff]  }
 0xdce   : > { %14286 = vmatpush1.bf16.msra.mxu1 %v18847_v49  ;;  %13943 = vmatprep.subr.bf16.mxu0 %v18852_v63  ;;  %v18922_v49 = vld [vmem:[%s20357_s1 + $0xec0] ss:$16 sps:$4 sm:$0xff]   ;;  %v18925_v63 = vld [vmem:[%s20357_s1 + $0xec8] ss:$16 sps:$4 sm:$0xff]  }
 0xdcf   : > { %14287 = vmatprep.subr.bf16.mxu1 %v18855_v50  ;;  %v18930_v50 = vld [vmem:[%s20357_s1 + $0xee4] ss:$16 sps:$4 sm:$0xff]  }
 0xdd1   : > { %13944 = vmatpush1.bf16.msra.mxu0 %v18850_v33  ;;  %v18933_v33 = vld [vmem:[%s20357_s1 + $0xeec] ss:$16 sps:$4 sm:$0xff]  }
 0xdd2   : > { %14288 = vmatpush1.bf16.msra.mxu1 %v18853_v16  ;;  %13945 = vmatprep.subr.bf16.mxu0 %v18858_v40  ;;  %v18928_v16 = vld [vmem:[%s20357_s1 + $0xee0] ss:$16 sps:$4 sm:$0xff]   ;;  %v18931_v40 = vld [vmem:[%s20357_s1 + $0xee8] ss:$16 sps:$4 sm:$0xff]  }
 0xdd3   : > { %14289 = vmatprep.subr.bf16.mxu1 %v18861_v47  ;;  %v18936_v47 = vld [vmem:[%s20357_s1 + $0xf04] ss:$16 sps:$4 sm:$0xff]  }
 0xdd5   : > { %13946 = vmatpush1.bf16.msra.mxu0 %v18856_v57  ;;  %v18939_v57 = vld [vmem:[%s20357_s1 + $0xf0c] ss:$16 sps:$4 sm:$0xff]  }
 0xdd6   : > { %14290 = vmatpush1.bf16.msra.mxu1 %v18859_v6  ;;  %13947 = vmatprep.subr.bf16.mxu0 %v18864_v60  ;;  %v18934_v6 = vld [vmem:[%s20357_s1 + $0xf00] ss:$16 sps:$4 sm:$0xff]   ;;  %v18937_v60 = vld [vmem:[%s20357_s1 + $0xf08] ss:$16 sps:$4 sm:$0xff]  }
 0xdd7   : > { %14291 = vmatprep.subr.bf16.mxu1 %v18867_v61  ;;  %v18942_v61 = vld [vmem:[%s20357_s1 + $0xf24] ss:$16 sps:$4 sm:$0xff]  }
 0xdd9   : > { %13948 = vmatpush1.bf16.msra.mxu0 %v18862_v14  ;;  %v18945_v14 = vld [vmem:[%s20357_s1 + $0xf2c] ss:$16 sps:$4 sm:$0xff]  }
 0xdda   : > { %14292 = vmatpush1.bf16.msra.mxu1 %v18865_v30  ;;  %13949 = vmatprep.subr.bf16.mxu0 %v18870_v52  ;;  %v18940_v30 = vld [vmem:[%s20357_s1 + $0xf20] ss:$16 sps:$4 sm:$0xff]   ;;  %v18943_v52 = vld [vmem:[%s20357_s1 + $0xf28] ss:$16 sps:$4 sm:$0xff]  }
 0xddb   : > { %14293 = vmatprep.subr.bf16.mxu1 %v18873_v13  ;;  %v18948_v13 = vld [vmem:[%s20357_s1 + $0xf44] ss:$16 sps:$4 sm:$0xff]  }
 0xddd   : > { %13950 = vmatpush1.bf16.msra.mxu0 %v18868_v62  ;;  %v18951_v62 = vld [vmem:[%s20357_s1 + $0xf4c] ss:$16 sps:$4 sm:$0xff]  }
 0xdde   : > { %14294 = vmatpush1.bf16.msra.mxu1 %v18871_v0  ;;  %13951 = vmatprep.subr.bf16.mxu0 %v18876_v3  ;;  %v18946_v0 = vld [vmem:[%s20357_s1 + $0xf40] ss:$16 sps:$4 sm:$0xff]   ;;  %v18949_v3 = vld [vmem:[%s20357_s1 + $0xf48] ss:$16 sps:$4 sm:$0xff]  }
 0xddf   : > { %14295 = vmatprep.subr.bf16.mxu1 %v18879_v5  ;;  %v18954_v5 = vld [vmem:[%s20357_s1 + $0xf64] ss:$16 sps:$4 sm:$0xff]  }
 0xde1   : > { %13952 = vmatpush1.bf16.msra.mxu0 %v18874_v54  ;;  %v18957_v54 = vld [vmem:[%s20357_s1 + $0xf6c] ss:$16 sps:$4 sm:$0xff]  }
 0xde2   : > { %14296 = vmatpush1.bf16.msra.mxu1 %v18877_v41  ;;  %13953 = vmatprep.subr.bf16.mxu0 %v18882_v20  ;;  %v18952_v41 = vld [vmem:[%s20357_s1 + $0xf60] ss:$16 sps:$4 sm:$0xff]   ;;  %v18955_v20 = vld [vmem:[%s20357_s1 + $0xf68] ss:$16 sps:$4 sm:$0xff]  }
 0xde3   : > { %14297 = vmatprep.subr.bf16.mxu1 %v18885_v24  ;;  %v18960_v24 = vld [vmem:[%s20357_s1 + $0xf84] ss:$16 sps:$4 sm:$0xff]  }
 0xde5   : > { %13954 = vmatpush1.bf16.msra.mxu0 %v18880_v19  ;;  %v18963_v19 = vld [vmem:[%s20357_s1 + $0xf8c] ss:$16 sps:$4 sm:$0xff]  }
 0xde6   : > { %14298 = vmatpush1.bf16.msra.mxu1 %v18883_v26  ;;  %13966 = vmatprep.subr.bf16.mxu0 %v18888_v53  ;;  %v18958_v26 = vld [vmem:[%s20357_s1 + $0xf80] ss:$16 sps:$4 sm:$0xff]   ;;  %v18961_v53 = vld [vmem:[%s20357_s1 + $0xf88] ss:$16 sps:$4 sm:$0xff]  }
 0xde7   : > { %14310 = vmatprep.subr.bf16.mxu1 %v18891_v17  ;;  %v18966_v17 = vld [vmem:[%s20357_s1 + $0xfa4] ss:$16 sps:$4 sm:$0xff]  }
 0xde8   : > { %13956 = vmatmul.mubr.bf16.vlgmr.msra.gmra.mrb[48].mxu0 %v22095_v21 }
 0xde9   : > { %14300 = vmatmul.mubr.bf16.vlgmr.msra.gmra.mrb[48].mxu1 %v22095_v21  ;;  %13967 = vmatpush1.bf16.msra.mxu0 %v18886_v18  ;;  %v18898_v21 = vld [vmem:[%s20357_s1 + $0xe40] ss:$16 sps:$4 sm:$0xff]   ;;  %v18969_v18 = vld [vmem:[%s20357_s1 + $0xfac] ss:$16 sps:$4 sm:$0xff]  }
 0xdea   : > { %13998 = vmatprep.mubr.bf16.mxu0 %v22104_v12  ;;  %14311 = vmatpush1.bf16.msra.mxu1 %v18889_v31  ;;  %v18964_v31 = vld [vmem:[%s20357_s1 + $0xfa0] ss:$16 sps:$4 sm:$0xff]  }
 0xdeb   : > { %14342 = vmatprep.mubr.bf16.mxu1 %v22104_v12  ;;  %13968 = vmatprep.subr.bf16.mxu0 %v18894_v28  ;;  %v18904_v12 = vld [vmem:[%s20357_s1 + $0xe60] ss:$16 sps:$4 sm:$0xff]   ;;  %v18967_v28 = vld [vmem:[%s20357_s1 + $0xfa8] ss:$16 sps:$4 sm:$0xff]  }
 0xdec   : > { %14312 = vmatprep.subr.bf16.mxu1 %v18897_v29  ;;  %v18972_v29 = vld [vmem:[%s20357_s1 + $0xfc4] ss:$16 sps:$4 sm:$0xff]  }
 0xded   : > { %13969 = vmatpush1.bf16.msra.mxu0 %v18892_v11  ;;  %v18975_v11 = vld [vmem:[%s20357_s1 + $0xfcc] ss:$16 sps:$4 sm:$0xff]  }
 0xdee   : > { %14313 = vmatpush1.bf16.msra.mxu1 %v18895_v23  ;;  %13970 = vmatprep.subr.bf16.mxu0 %v18900_v42  ;;  %v18970_v23 = vld [vmem:[%s20357_s1 + $0xfc0] ss:$16 sps:$4 sm:$0xff]   ;;  %v18973_v42 = vld [vmem:[%s20357_s1 + $0xfc8] ss:$16 sps:$4 sm:$0xff]  }
 0xdef   : > { %14314 = vmatprep.subr.bf16.mxu1 %v18903_v58  ;;  %v18978_v58 = vld [vmem:[%s20357_s1 + $0xfe4] ss:$16 sps:$4 sm:$0xff]  }
 0xdf1   : > { %13971 = vmatpush1.bf16.msra.mxu0 %v18898_v21  ;;  %v18981_v21 = vld [vmem:[%s20357_s1 + $0xfec] ss:$16 sps:$4 sm:$0xff]  }
 0xdf2   : > { %14315 = vmatpush1.bf16.msra.mxu1 %v18901_v7  ;;  %13972 = vmatprep.subr.bf16.mxu0 %v18906_v37  ;;  %v18976_v7 = vld [vmem:[%s20357_s1 + $0xfe0] ss:$16 sps:$4 sm:$0xff]   ;;  %v18979_v37 = vld [vmem:[%s20357_s1 + $0xfe8] ss:$16 sps:$4 sm:$0xff]  }
 0xdf3   : > { %14316 = vmatprep.subr.bf16.mxu1 %v18909_v55  ;;  %v11083_v55 = vld [vmem:[%s973_s8] sm:$0xf] }
 0xdf5   : > { %13973 = vmatpush1.bf16.msra.mxu0 %v18904_v12  ;;  %v11088_v12 = vrot.slane %v11083_v55, %v20802_v4 }
 0xdf6   : > { %14317 = vmatpush1.bf16.msra.mxu1 %v18907_v43  ;;  %13974 = vmatprep.subr.bf16.mxu0 %v18912_v15  ;;  %v11096_v43 = vrot.slane %v11083_v55, %v20818_v25  ;;  %v11092_v15 = vrot.slane %v11083_v55, %v20810_v10 }
 0xdf7   : > { %14318 = vmatprep.subr.bf16.mxu1 %v18915_v1 }
 0xdf9   : > { %13975 = vmatpush1.bf16.msra.mxu0 %v18910_v51  ;;  %v11100_v51 = vrot.slane %v11083_v55, %v20831_v38 }
 0xdfa   : > { %14319 = vmatpush1.bf16.msra.mxu1 %v18913_v36  ;;  %13976 = vmatprep.subr.bf16.mxu0 %v18918_v39 }
 0xdfb   : > { %14320 = vmatprep.subr.bf16.mxu1 %v18921_v56 }
 0xdfd   : > { %13977 = vmatpush1.bf16.msra.mxu0 %v18916_v35 }
 0xdfe   : > { %14321 = vmatpush1.bf16.msra.mxu1 %v18919_v44  ;;  %13978 = vmatprep.subr.bf16.mxu0 %v18924_v8 }
 0xdff   : > { %14322 = vmatprep.subr.bf16.mxu1 %v18927_v45 }
 0xe01   : > { %13979 = vmatpush1.bf16.msra.mxu0 %v18922_v49 }
 0xe02   : > { %14323 = vmatpush1.bf16.msra.mxu1 %v18925_v63  ;;  %13980 = vmatprep.subr.bf16.mxu0 %v18930_v50 }
 0xe03   : > { %14324 = vmatprep.subr.bf16.mxu1 %v18933_v33 }
 0xe05   : > { %13981 = vmatpush1.bf16.msra.mxu0 %v18928_v16 }
 0xe06   : > { %14325 = vmatpush1.bf16.msra.mxu1 %v18931_v40  ;;  %13982 = vmatprep.subr.bf16.mxu0 %v18936_v47 }
 0xe07   : > { %14326 = vmatprep.subr.bf16.mxu1 %v18939_v57 }
 0xe09   : > { %13983 = vmatpush1.bf16.msra.mxu0 %v18934_v6 }
 0xe0a   : > { %14327 = vmatpush1.bf16.msra.mxu1 %v18937_v60  ;;  %13984 = vmatprep.subr.bf16.mxu0 %v18942_v61 }
 0xe0b   : > { %14328 = vmatprep.subr.bf16.mxu1 %v18945_v14 }
 0xe0d   : > { %13985 = vmatpush1.bf16.msra.mxu0 %v18940_v30 }
 0xe0e   : > { %14329 = vmatpush1.bf16.msra.mxu1 %v18943_v52  ;;  %13986 = vmatprep.subr.bf16.mxu0 %v18948_v13 }
 0xe0f   : > { %14330 = vmatprep.subr.bf16.mxu1 %v18951_v62 }
 0xe11   : > { %13987 = vmatpush1.bf16.msra.mxu0 %v18946_v0 }
 0xe12   : > { %14331 = vmatpush1.bf16.msra.mxu1 %v18949_v3  ;;  %13988 = vmatprep.subr.bf16.mxu0 %v18954_v5 }
 0xe13   : > { %14332 = vmatprep.subr.bf16.mxu1 %v18957_v54 }
 0xe15   : > { %13989 = vmatpush1.bf16.msra.mxu0 %v18952_v41 }
 0xe16   : > { %14333 = vmatpush1.bf16.msra.mxu1 %v18955_v20  ;;  %13990 = vmatprep.subr.bf16.mxu0 %v18960_v24 }
 0xe17   : > { %14334 = vmatprep.subr.bf16.mxu1 %v18963_v19 }
 0xe19   : > { %13991 = vmatpush1.bf16.msra.mxu0 %v18958_v26 }
 0xe1a   : > { %14335 = vmatpush1.bf16.msra.mxu1 %v18961_v53  ;;  %13992 = vmatprep.subr.bf16.mxu0 %v18966_v17 }
 0xe1b   : > { %14336 = vmatprep.subr.bf16.mxu1 %v18969_v18 }
 0xe1d   : > { %13993 = vmatpush1.bf16.msra.mxu0 %v18964_v31 }
 0xe1e   : > { %14337 = vmatpush1.bf16.msra.mxu1 %v18967_v28  ;;  %13994 = vmatprep.subr.bf16.mxu0 %v18972_v29 }
 0xe1f   : > { %14338 = vmatprep.subr.bf16.mxu1 %v18975_v11 }
 0xe21   : > { %13995 = vmatpush1.bf16.msra.mxu0 %v18970_v23 }
 0xe22   : > { %14339 = vmatpush1.bf16.msra.mxu1 %v18973_v42  ;;  %13996 = vmatprep.subr.bf16.mxu0 %v18978_v58 }
 0xe23   : > { %14340 = vmatprep.subr.bf16.mxu1 %v18981_v21 }
 0xe25   : > { %13997 = vmatpush1.bf16.msra.mxu0 %v18976_v7 }
 0xe26   : > { %14341 = vmatpush1.bf16.msra.mxu1 %v18979_v37 }
 0xe28   : > { %13999 = vmatmul.mubr.bf16.vlgmr.msra.gmra.mrb[48].mxu0 %v22099_v48 }
 0xe29   : > { %14343 = vmatmul.mubr.bf16.vlgmr.msra.gmra.mrb[48].mxu1 %v22099_v48 }
 0xefb   : > { %v14000_v1 = vpop.f32.mrb[48].mxu0 }
 0xefc   : > { %v17098_v36 = vadd.f32 %v14000_v1, %v11088_v12  ;;  %v14344_v39 = vpop.f32.mrb[48].mxu1  ;;  %v14002_v56 = vpop.f32.mrb[49].mxu0 }
 0xefd   : > { %v17102_v35 = vadd.f32 %v14344_v39, %v11096_v43  ;;  %v17099_v44 = vadd.f32 %v14002_v56, %v11092_v15  ;;  %v14346_v8 = vpop.f32.mrb[49].mxu1  ;;  %v14004_v45 = vpop.f32.mrb[50].mxu0  ;;  %v14361_v39 = vld [vmem:[%s982_s5] sm:$0xf]  ;;  %v14362_v56 = vld [vmem:[%s991_s25] sm:$0xf] }
 0xefe   : > { %v14353_v48 = vadd.f32 %v17098_v36, %v21288_v22  ;;  %v17100_v49 = vadd.f32 %v14004_v45, %v11088_v12  ;;  %v14348_v63 = vpop.f32.mrb[50].mxu1  ;;  %v14006_v50 = vpop.f32.mrb[51].mxu0  ;;  %v17103_v16 = vadd.f32 %v14346_v8, %v11100_v51  ;;  %v14427_v8 = vrot.slane %v14361_v39, %v20818_v25 }
 0xeff   : > { %v14354_v33 = vadd.f32 %v17099_v44, %v21284_v27  ;;  %v17104_v40 = vadd.f32 %v14348_v63, %v11096_v43  ;;  %v17101_v47 = vadd.f32 %v14006_v50, %v11092_v15  ;;  %v14350_v57 = vpop.f32.mrb[51].mxu1  ;;  %v14355_v60 = vadd.f32 %v17102_v35, %v21282_v9 }
 0xf00   : > { %v14357_v6 = vadd.f32 %v17100_v49, %v21290_v46  ;;  %v17105_v30 = vadd.f32 %v14350_v57, %v11100_v51  ;;  %v14356_v52 = vadd.f32 %v17103_v16, %v21308_v34  ;;  %v14419_v35 = vrot.slane %v14361_v39, %v20802_v4 }
 0xf01   : > { %v14363_v61 = vadd.f32 %v14354_v33, %v14353_v48  ;;  %v14358_v14 = vadd.f32 %v17101_v47, %v21286_v2  ;;  %v14359_v22 = vadd.f32 %v17104_v40, %v21298_v32  ;;  %v14423_v44 = vrot.slane %v14361_v39, %v20810_v10 }
 0xf02   : > { %v14360_v27 = vadd.f32 %v17105_v30, %v21293_v59  ;;  %v14431_v45 = vrot.slane %v14361_v39, %v20831_v38  ;;  %v14448_v49 = vrot.slane %v14362_v56, %v20802_v4  ;;  %v14452_v63 = vrot.slane %v14362_v56, %v20810_v10  ;;  %v19055_v39 = vld [vmem:[%s22703_s4 + $0xf0] sm:$0xff] (!%p16831_p8)  }
 0xf03   : > { %v14368_v13 = vadd.f32 %v14358_v14, %v14357_v6  ;;  %v14364_v62 = vadd.f32 %v14363_v61, %v14355_v60  ;;  %v14456_v50 = vrot.slane %v14362_v56, %v20818_v25 }
 0xf05   : > { %v14365_v0 = vadd.f32 %v14364_v62, %v14356_v52  ;;  %v14369_v3 = vadd.f32 %v14368_v13, %v14359_v22 }
 0xf07   : > { %14366 = vadd.xlane.f32.xlu0 %v14365_v0  ;;  %v14370_v5 = vadd.f32 %v14369_v3, %v14360_v27 }
 0xf09   : > { %14371 = vadd.xlane.f32.xlu1 %v14370_v5 }
 0xf94   : > { %v14367_v46 = vpop.xlane.xlu0 %14366 }
 0xf95   : > { %v14373_v54 = vmul.f32 0.001953125, %v14367_v46 }
 0xf96   : > { %v14372_v9 = vpop.xlane.xlu1 %14371 }
 0xf97   : > { %v14375_v41 = vsub.f32 %v14353_v48, %v14373_v54  ;;  %v14376_v20 = vsub.f32 %v14354_v33, %v14373_v54  ;;  %v14374_v2 = vmul.f32 0.001953125, %v14372_v9  ;;  %v14377_v24 = vsub.f32 %v14355_v60, %v14373_v54 }
 0xf98   : > { %v14378_v19 = vsub.f32 %v14356_v52, %v14373_v54  ;;  %v14460_v33 = vrot.slane %v14362_v56, %v20831_v38  ;;  %v19056_v56 = vld [vmem:[%s22703_s4 + $0x30] sm:$0xff] (!%p16831_p8)  }
 0xf99   : > { %v14379_v34 = vsub.f32 %v14357_v6, %v14374_v2  ;;  %v14380_v26 = vsub.f32 %v14358_v14, %v14374_v2  ;;  %v14383_v32 = vmul.f32 %v14375_v41, %v14375_v41  ;;  %v14384_v53 = vmul.f32 %v14376_v20, %v14376_v20 }
 0xf9a   : > { %v14385_v17 = vmul.f32 %v14377_v24, %v14377_v24  ;;  %v14381_v18 = vsub.f32 %v14359_v22, %v14374_v2  ;;  %v14382_v31 = vsub.f32 %v14360_v27, %v14374_v2  ;;  %v14386_v11 = vmul.f32 %v14378_v19, %v14378_v19  ;;  %v19030_v2 = vld [vmem:[%s22703_s4 + $0x40] sm:$0xff] (!%p16831_p8)  }
 0xf9b   : > { %v14391_v59 = vadd.f32 %v14384_v53, %v14383_v32  ;;  %v14387_v28 = vmul.f32 %v14379_v34, %v14379_v34  ;;  %v14388_v29 = vmul.f32 %v14380_v26, %v14380_v26  ;;  %16910 = vmatprep.subr.bf16.mxu0 (!%p16831_p8), %v19030_v2  ;;  %v19033_v32 = vld [vmem:[%s22703_s4 + $0x80] sm:$0xff] (!%p16831_p8)   ;;  %v19034_v53 = vld [vmem:[%s22703_s4 + $0x48] sm:$0xff] (!%p16831_p8)  }
 0xf9c   : > { %v14389_v42 = vmul.f32 %v14381_v18, %v14381_v18  ;;  %v14390_v7 = vmul.f32 %v14382_v31, %v14382_v31 }
 0xf9d   : > { %v14392_v23 = vadd.f32 %v14391_v59, %v14385_v17  ;;  %v14396_v58 = vadd.f32 %v14388_v29, %v14387_v28  ;;  %v19035_v17 = vld [vmem:[%s22703_s4 + $0xc8] sm:$0xff] (!%p16831_p8)   ;;  %v19039_v28 = vld [vmem:[%s22703_s4 + $0xd0] sm:$0xff] (!%p16831_p8)  }
 0xf9e   : > { %v19037_v59 = vld [vmem:[%s22703_s4 + $0x88] sm:$0xff] (!%p16831_p8)   ;;  %v19040_v29 = vld [vmem:[%s22703_s4 + $0x10] sm:$0xff] (!%p16831_p8)  }
 0xf9f   : > { %v14393_v21 = vadd.f32 %v14392_v23, %v14386_v11  ;;  %v14397_v37 = vadd.f32 %v14396_v58, %v14389_v42  ;;  %v19041_v11 = vld [vmem:[%s22703_s4 + $0x90] sm:$0xff] (!%p16831_p8)   ;;  %v19042_v23 = vld [vmem:[%s22703_s4 + $0x58] sm:$0xff] (!%p16831_p8)  }
 0xfa0   : > { %v19043_v42 = vld [vmem:[%s22703_s4 + $0xd8] sm:$0xff] (!%p16831_p8)  }
 0xfa1   : > { %14394 = vadd.xlane.f32.xlu0 %v14393_v21  ;;  %v14398_v55 = vadd.f32 %v14397_v37, %v14390_v7  ;;  %v19044_v58 = vld [vmem:[%s22703_s4 + $0x18] sm:$0xff] (!%p16831_p8)   ;;  %v19046_v7 = vld [vmem:[%s22703_s4 + $0x60] sm:$0xff] (!%p16831_p8)  }
 0xfa2   : > { %v19045_v21 = vld [vmem:[%s22703_s4 + $0x98] sm:$0xff] (!%p16831_p8)   ;;  %v19047_v37 = vld [vmem:[%s22703_s4 + $0xe0] sm:$0xff] (!%p16831_p8)  }
 0xfa3   : > { %14399 = vadd.xlane.f32.xlu1 %v14398_v55  ;;  %v19048_v55 = vld [vmem:[%s22703_s4 + $0x20] sm:$0xff] (!%p16831_p8)  }
0x102e   : > { %v14395_v12 = vpop.xlane.xlu0 %14394 }
0x102f   : > { %v14401_v43 = vmul.f32 0.001953125, %v14395_v12  ;;  %v19049_v12 = vld [vmem:[%s22703_s4 + $0xa0] sm:$0xff] (!%p16831_p8)  }
0x1030   : > { %v14400_v15 = vpop.xlane.xlu1 %14399 }
0x1031   : > { %v14403_v1 = vadd.f32 1e-05, %v14401_v43  ;;  %v14402_v51 = vmul.f32 0.001953125, %v14400_v15  ;;  %v19050_v43 = vld [vmem:[%s22703_s4 + $0x68] sm:$0xff] (!%p16831_p8)  }
0x1032   : > { %v19051_v15 = vld [vmem:[%s22703_s4 + $0xe8] sm:$0xff] (!%p16831_p8)  }
0x1033   : > { %19018 = vrsqrt.f32 %v14403_v1  ;;  %v14404_v36 = vadd.f32 1e-05, %v14402_v51  ;;  %v19052_v1 = vld [vmem:[%s22703_s4 + $0x28] sm:$0xff] (!%p16831_p8)  }
0x1034   : > { %v19053_v51 = vld [vmem:[%s22703_s4 + $0xa8] sm:$0xff] (!%p16831_p8)  }
0x1035   : > { %19020 = vrsqrt.f32 %v14404_v36  ;;  %v19054_v36 = vld [vmem:[%s22703_s4 + $0x70] sm:$0xff] (!%p16831_p8)  }
0x103d   : > { %v19019_v48 = vpop.eup %19018 }
0x103e   : > { %v14407_v16 = vmul.f32 %v19019_v48, %v14375_v41  ;;  %v14408_v40 = vmul.f32 %v19019_v48, %v14376_v20  ;;  %v14409_v47 = vmul.f32 %v19019_v48, %v14377_v24  ;;  %v14410_v57 = vmul.f32 %v19019_v48, %v14378_v19  ;;  %v19061_v48 = vld [vmem:[%s22703_s4 + $0xb8] sm:$0xff] (!%p16831_p8)  }
0x103f   : > { %v19021_v6 = vpop.eup %19020 }
0x1040   : > { %v14436_v60 = vmul.f32 %v14419_v35, %v14407_v16  ;;  %v14437_v61 = vmul.f32 %v14423_v44, %v14408_v40  ;;  %v14438_v14 = vmul.f32 %v14427_v8, %v14409_v47  ;;  %v14439_v30 = vmul.f32 %v14431_v45, %v14410_v57  ;;  %v16832_v16 = vld [vmem:[#allocation23] ss:$0 sm:$0xff] (!%p16831_p8) }
0x1041   : > { %v14411_v52 = vmul.f32 %v19021_v6, %v14379_v34  ;;  %v14412_v22 = vmul.f32 %v19021_v6, %v14380_v26  ;;  %v14413_v13 = vmul.f32 %v19021_v6, %v14381_v18  ;;  %v14414_v62 = vmul.f32 %v19021_v6, %v14382_v31  ;;  %v19031_v34 = vld [vmem:[%s22703_s4 + $0xc0] sm:$0xff] (!%p16831_p8)   ;;  %v19036_v18 = vld [vmem:[%s22703_s4 + $0x8] sm:$0xff] (!%p16831_p8)   ;;  %v19038_v31 = vld [vmem:[%s22703_s4 + $0x50] sm:$0xff] (!%p16831_p8)  }
0x1042   : > { %v22436_v27 = vadd.f32 %v14448_v49, %v14436_v60  ;;  %v14466_v10 = vadd.f32 %v14452_v63, %v14437_v61  ;;  %v22438_v0 = vadd.f32 %v14456_v50, %v14438_v14  ;;  %v14468_v25 = vadd.f32 %v14460_v33, %v14439_v30  ;;  %14484 = sbr.rel (%p16831_p8) target bundleno = 4580 (0x11e4), region = 180  ;;  %v19032_v26 = vld [vmem:[%s22703_s4] sm:$0xff] (!%p16831_p8)   ;;  %16932 = vmatprep.subr.bf16.mxu1 (!%p16831_p8), %v19031_v34 }
0x1043   : > { %v14440_v38 = vmul.f32 %v14419_v35, %v14411_v52  ;;  %v14441_v3 = vmul.f32 %v14423_v44, %v14412_v22  ;;  %v14442_v5 = vmul.f32 %v14427_v8, %v14413_v13  ;;  %v14443_v46 = vmul.f32 %v14431_v45, %v14414_v62  ;;  %16911 = vmatpush3.bf16.msra.mxu0 (!%p16831_p8), %v19032_v26  ;;  %v19057_v35 = vld [vmem:[%s22703_s4 + $0xb0] sm:$0xff] (!%p16831_p8)   ;;  %v19058_v44 = vld [vmem:[%s22703_s4 + $0x78] sm:$0xff] (!%p16831_p8)   ;;  %v14866_v26 = vld [vmem:[#allocation3] sm:$0x1] (!%p16831_p8) }
0x1044   : > { %14473 = vst [vmem:[#allocation2] sm:$0xff] %v22436_v27  ;;  %14474 = vst [vmem:[#allocation2 + $0x8] sm:$0xff] %v14466_v10  ;;  %16933 = vmatpush3.bf16.msra.mxu1 (!%p16831_p8), %v19033_v32  ;;  %16912 = vmatprep.subr.bf16.mxu0 (!%p16831_p8), %v19034_v53  ;;  %v19059_v8 = vld [vmem:[%s22703_s4 + $0xf8] sm:$0xff] (!%p16831_p8)  }
0x1045   : > { %14475 = vst [vmem:[#allocation2 + $0x10] sm:$0xff] %v22438_v0  ;;  %14476 = vst [vmem:[#allocation2 + $0x18] sm:$0xff] %v14468_v25  ;;  %v22442_v54 = vadd.f32 %v14448_v49, %v14440_v38  ;;  %v14470_v9 = vadd.f32 %v14452_v63, %v14441_v3  ;;  %v22444_v41 = vadd.f32 %v14456_v50, %v14442_v5  ;;  %16934 = vmatprep.subr.bf16.mxu1 (!%p16831_p8), %v19035_v17  ;;  %v19060_v45 = vld [vmem:[%s22703_s4 + $0x38] sm:$0xff] (!%p16831_p8)  }
0x1046   : > { %v14472_v20 = vadd.f32 %v14460_v33, %v14443_v46  ;;  %v14867_v17 = vmul.f32 (!%p16831_p8), 8.0, %v14866_v26 }
0x1047   : > { %14477 = vst [vmem:[#allocation2 + $0x20] sm:$0xff] %v22442_v54  ;;  %14478 = vst [vmem:[#allocation2 + $0x28] sm:$0xff] %v14470_v9  ;;  %v14486_v24 = vpack.c.bf16 (!%p16831_p8), %v14470_v9, %v14466_v10  ;;  %16913 = vmatpush3.bf16.msra.mxu0 (!%p16831_p8), %v19036_v18  ;;  %v14485_v49 = vpack.c.bf16 (!%p16831_p8), %v22442_v54, %v22436_v27  ;;  %v14487_v63 = vpack.c.bf16 (!%p16831_p8), %v22444_v41, %v22438_v0  ;;  %v16865_v10 = vld [vmem:[#allocation24] ss:$0 sm:$0xff] (!%p16831_p8) }
0x1048   : > { %14479 = vst [vmem:[#allocation2 + $0x30] sm:$0xff] %v22444_v41  ;;  %14480 = vst [vmem:[#allocation2 + $0x38] sm:$0xff] %v14472_v20  ;;  %v14488_v19 = vpack.c.bf16 (!%p16831_p8), %v14472_v20, %v14468_v25  ;;  %16935 = vmatpush3.bf16.msra.mxu1 (!%p16831_p8), %v19037_v59  ;;  %16914 = vmatprep.subr.bf16.mxu0 (!%p16831_p8), %v19038_v31 }
0x1049   : > { %14784 = vmatprep.mubr.bf16.mxu0 %v14486_v24  ;;  %16936 = vmatprep.subr.bf16.mxu1 %v19039_v28  ;;  %v14872_v28 = vrot.slane %v14867_v17, %v20802_v4 }
0x104a   : > { %14825 = vmatprep.mubr.bf16.mxu1 %v14488_v19 }
0x104b   : > { %16915 = vmatpush3.bf16.msra.mxu0 %v19040_v29 }
0x104c   : > { %16937 = vmatpush3.bf16.msra.mxu1 %v19041_v11  ;;  %16916 = vmatprep.subr.bf16.mxu0 %v19042_v23 }
0x104d   : > { %16938 = vmatprep.subr.bf16.mxu1 %v19043_v42 }
0x104f   : > { %16917 = vmatpush3.bf16.msra.mxu0 %v19044_v58 }
0x1050   : > { %16939 = vmatpush3.bf16.msra.mxu1 %v19045_v21  ;;  %16918 = vmatprep.subr.bf16.mxu0 %v19046_v7 }
0x1051   : > { %16940 = vmatprep.subr.bf16.mxu1 %v19047_v37 }
0x1053   : > { %16919 = vmatpush3.bf16.msra.mxu0 %v19048_v55 }
0x1054   : > { %16941 = vmatpush3.bf16.msra.mxu1 %v19049_v12  ;;  %16920 = vmatprep.subr.bf16.mxu0 %v19050_v43 }
0x1055   : > { %16942 = vmatprep.subr.bf16.mxu1 %v19051_v15 }
0x1057   : > { %16921 = vmatpush3.bf16.msra.mxu0 %v19052_v1 }
0x1058   : > { %16943 = vmatpush3.bf16.msra.mxu1 %v19053_v51  ;;  %16922 = vmatprep.subr.bf16.mxu0 %v19054_v36 }
0x1059   : > { %16944 = vmatprep.subr.bf16.mxu1 %v19055_v39 }
0x105b   : > { %16923 = vmatpush3.bf16.msra.mxu0 %v19056_v56 }
0x105c   : > { %16945 = vmatpush3.bf16.msra.mxu1 %v19057_v35  ;;  %16924 = vmatprep.subr.bf16.mxu0 %v19058_v44 }
0x105d   : > { %16946 = vmatprep.subr.bf16.mxu1 %v19059_v8 }
0x105f   : > { %16925 = vmatpush3.bf16.msra.mxu0 %v19060_v45 }
0x1060   : > { %16947 = vmatpush3.bf16.msra.mxu1 %v19061_v48 }
0x1062   : > { %14785 = vmatmul.mubr.bf16.vlgmr.msra.gmra.mrb[0].mxu0 %v14485_v49 }
0x1063   : > { %14826 = vmatmul.mubr.bf16.vlgmr.msra.gmra.mrb[0].mxu1 %v14487_v63 }
0x1135   : > { %v16926_v50 = vpop.f32.mrb[0].mxu0 }
0x1136   : > { %v16948_v33 = vpop.f32.mrb[0].mxu1  ;;  %v16927_v40 = vpop.f32.mrb[1].mxu0 }
0x1137   : > { %v16928_v47 = vadd.f32 %v16927_v40, %v16926_v50  ;;  %v16949_v57 = vpop.f32.mrb[1].mxu1  ;;  %v16929_v6 = vpop.f32.mrb[2].mxu0 }
0x1138   : > { %v16950_v60 = vadd.f32 %v16949_v57, %v16948_v33  ;;  %v16951_v61 = vpop.f32.mrb[2].mxu1  ;;  %v16930_v14 = vpop.f32.mrb[3].mxu0 }
0x1139   : > { %v14787_v30 = vadd.f32 %v16928_v47, %v16832_v16  ;;  %v16931_v52 = vadd.f32 %v16930_v14, %v16929_v6  ;;  %v16952_v22 = vpop.f32.mrb[3].mxu1 }
0x113a   : > { %v16953_v13 = vadd.f32 %v16952_v22, %v16951_v61 }
0x113b   : > { %v14828_v62 = vadd.f32 %v16950_v60, %v14787_v30  ;;  %v14790_v27 = vadd.f32 %v16931_v52, %v16832_v16 }
0x113d   : > { %v14834_v0 = vmax.f32 %v14828_v62, 0.0  ;;  %v14831_v25 = vadd.f32 %v16953_v13, %v14790_v27 }
0x113f   : > { %v14835_v38 = vmax.f32 %v14831_v25, 0.0  ;;  %v14843_v3 = vmul.f32 %v16865_v10, %v14834_v0 }
0x1141   : > { %v14846_v5 = vsel %vm14845_vm4, %v14843_v3, 0.0  ;;  %v14844_v46 = vmul.f32 %v16865_v10, %v14835_v38 }
0x1142   : > { %14847 = vadd.xlane.f32.xlu0 %v14846_v5 }
0x1143   : > { %v14849_v54 = vsel %vm14845_vm4, %v14844_v46, 0.0 }
0x1146   : > { %14850 = vadd.xlane.f32.xlu0 %v14849_v54 }
0x11cf   : > { %v14848_v9 = vpop.xlane.xlu0 %14847 }
0x11d0   : > { %v14852_v41 = vrot.slane %v14848_v9, 4 }
0x11d2   : > { %v14853_v20 = vadd.f32 %v14852_v41, %v14848_v9 }
0x11d3   : > { %v14851_v2 = vpop.xlane.xlu0 %14850 }
0x11d4   : > { %v14854_v24 = vrot.slane %v14853_v20, 2  ;;  %v14858_v19 = vrot.slane %v14851_v2, 4 }
0x11d6   : > { %v14855_v34 = vadd.f32 %v14854_v24, %v14853_v20  ;;  %v14859_v32 = vadd.f32 %v14858_v19, %v14851_v2 }
0x11d8   : > { %v14860_v53 = vrot.slane %v14859_v32, 2  ;;  %v14856_v18 = vrot.slane %v14855_v34, 1 }
0x11da   : > { %v14861_v59 = vadd.f32 %v14860_v53, %v14859_v32  ;;  %v14857_v29 = vadd.f32 %v14856_v18, %v14855_v34 }
0x11dc   : > { %v14862_v31 = vrot.slane %v14861_v59, 1 }
0x11de   : > { %v14863_v11 = vadd.f32 %v14862_v31, %v14861_v59 }
0x11e0   : > { %v14865_v23 = vsel %vm14864_vm5, %v14857_v29, %v14863_v11 }
0x11e1   : > { %v14874_v42 = vadd.f32 %v14872_v28, %v14865_v23 }
0x11e3   : > { %14876 = vst.msk [vmem:[%s22704_s26] sm:$0x3] %vm14875_vm6, %v14874_v42 }
0x11e4 PF: > { %s22705_s25 = sld [smem:[#allocation36_spill]]  ;;  %s22706_s23 = sld [smem:[#allocation31_spill]] }
0x11e5   : > { %s22707_s24 = sld [smem:[#allocation32_spill]]  ;;  %s22708_s2 = sld [smem:[#allocation37_spill]] }
0x11ea   : > { %p32_p9 = scmp.ge.s32.totalorder %s22705_s25, 8  }
0x11ec   :  { %34 = sbr.rel (!%p32_p9) target bundleno = 18 (0x12), region = 288 }
0x11f3   :  { %14888 = vsyncpa [#allocation5], 1 }
0x11f4   :  { %14890 = vsyncpa [#allocation5 + $0x1], 1 }
0x11f5   :  { %14891 = vsyncpa [#allocation7], 1 }
0x11f6   :  { %14892 = vsyncpa [#allocation10], 1 }

</bundles_post_ra>
